<compile_context>
chip_gen: v5e
topology: v5e:2x2
jax: 0.10.0
libtpu: 0.0.40
codegen_flags: <defaults>
</compile_context>

<pallas_src>
import jax
import jax.numpy as jnp
from jax.experimental import pallas as pl


# ----------------------------------------------------------------------------
# Fused kernel: 2-layer LSTM over time + last-valid-step select + head
# ----------------------------------------------------------------------------
def gp_fused_kernel(xg0_ref, whh0_ref, wih1_ref, whh1_ref, b1_ref, lens_ref,
                    bn_g_ref, bn_b_ref, bn_m_ref, bn_v_ref,
                    wd_ref, bd_ref, wf_ref, bf_ref, o_ref):
    """Single invocation (no grid).

    xg0_ref : [T, B, 4H]  precomputed layer-1 input gates (emb @ W_ih0 + b0),
                          time-major
    whh0_ref: [H, 4H]     layer-1 recurrent weights
    wih1_ref: [H, 4H]     layer-2 input weights
    whh1_ref: [H, 4H]     layer-2 recurrent weights
    b1_ref  : [1, 4H]     layer-2 bias (b_ih + b_hh)
    lens_ref: [B, 1]      int32 sequence lengths
    bn_*    : [1, H]      BatchNorm1d eval-mode params / running stats
    wd/bd   : [H, D], [1, D]   out_dense
    wf/bf   : [D, 2], [1, 2]   final_dense
    o_ref   : [B, 2]      log-probabilities
    """
    T, B, _ = xg0_ref.shape
    H = whh0_ref.shape[0]

    # Weights loaded once; they stay resident for the whole unrolled loop.
    whh0 = whh0_ref[...]
    wih1 = wih1_ref[...]
    whh1 = whh1_ref[...]
    b1 = b1_ref[...]
    lens = lens_ref[...]                       # [B, 1] int32

    def lstm_cell(gates, c_prev):
        # PyTorch gate order (i, f, g, o); H % 128 == 0 keeps slices aligned.
        i_g = jax.nn.sigmoid(gates[:, 0 * H:1 * H])
        f_g = jax.nn.sigmoid(gates[:, 1 * H:2 * H])
        g_g = jnp.tanh(gates[:, 2 * H:3 * H])
        o_g = jax.nn.sigmoid(gates[:, 3 * H:4 * H])
        c_new = f_g * c_prev + i_g * g_g
        h_new = o_g * jnp.tanh(c_new)
        return h_new, c_new

    def step(t, carry):
        h1, c1, h2, c2, sel = carry
        # Layer 1: input projection precomputed (bias folded in) -> only the
        # recurrent matmul remains per timestep.
        gates1 = xg0_ref[t] + jnp.dot(h1, whh0,
                                      preferred_element_type=jnp.float32)
        h1, c1 = lstm_cell(gates1, c1)
        # Layer 2 fed directly from layer-1's fresh hidden state (no HBM trip).
        # TODO(synk): inter-layer dropout (p=0.2, train mode) omitted (eval).
        gates2 = (jnp.dot(h1, wih1, preferred_element_type=jnp.float32)
                  + jnp.dot(h2, whh1, preferred_element_type=jnp.float32)
                  + b1)
        h2, c2 = lstm_cell(gates2, c2)
        # Keep only the hidden state at the last valid step (t == len - 1).
        # (If lens == 0 ever occurred, sel would stay zero rather than wrap.)
        sel = jnp.where(lens == t + 1, h2, sel)
        return h1, c1, h2, c2, sel

    z0 = jnp.zeros((B, H), jnp.float32)        # zero initial h/c (_init_hidden)
    _, _, _, _, sel = jax.lax.fori_loop(0, T, step, (z0, z0, z0, z0, z0),
                                        unroll=True)

    # Head: BatchNorm1d (eval) -> ReLU -> Linear -> Linear -> log_softmax.
    inv_std = jax.lax.rsqrt(bn_v_ref[...] + 1e-5)
    xn = (sel - bn_m_ref[...]) * inv_std * bn_g_ref[...] + bn_b_ref[...]
    relu = jnp.maximum(xn, 0.0)
    dense = jnp.dot(relu, wd_ref[...],
                    preferred_element_type=jnp.float32) + bd_ref[...]
    logits = jnp.dot(dense, wf_ref[...],
                     preferred_element_type=jnp.float32) + bf_ref[...]
    m = jnp.max(logits, axis=1, keepdims=True)
    zc = logits - m
    lse = jnp.log(jnp.sum(jnp.exp(zc), axis=1, keepdims=True))
    o_ref[...] = zc - lse


def gp_fused(xg0, lens2d, p):
    """xg0: [T, B, 4H] f32, lens2d: [B, 1] int32 -> [B, 2] log-probs."""
    _, B, _ = xg0.shape
    # No grid: every operand fits comfortably in VMEM at these sizes
    # (~1.5 MiB total), so full-array default BlockSpecs are used.
    return pl.pallas_call(
        gp_fused_kernel,
        out_shape=jax.ShapeDtypeStruct((B, 2), jnp.float32),
    )(xg0, p["w_hh0"], p["w_ih1"], p["w_hh1"], p["b1"], lens2d,
      p["bn_gamma"], p["bn_beta"], p["bn_mean"], p["bn_var"],
      p["w_dense"], p["b_dense"], p["w_final"], p["b_final"])


# ----------------------------------------------------------------------------
# Parameters (deterministic synthetic init mirroring the PyTorch module)
# ----------------------------------------------------------------------------
def init_params(key, vocab_size, emb_out_size, hidden, lstm_out_size):
    keys = jax.random.split(key, 12)
    k = 1.0 / jnp.sqrt(hidden)

    # Embedding: normal, padding row 0 zeroed, max_norm=1 applied eagerly.
    emb = jax.random.normal(keys[0], (vocab_size, emb_out_size), jnp.float32)
    emb = emb.at[0].set(0.0)
    norms = jnp.linalg.norm(emb, axis=1, keepdims=True)
    emb = emb * jnp.minimum(1.0, 1.0 / jnp.maximum(norms, 1e-12))

    def lstm_w(kk, din):
        w_ih = jax.random.uniform(kk[0], (din, 4 * hidden), jnp.float32, -k, k)
        w_hh = jax.random.uniform(kk[1], (hidden, 4 * hidden), jnp.float32, -k, k)
        b_ih = jax.random.uniform(kk[2], (1, 4 * hidden), jnp.float32, -k, k)
        b_hh = jax.random.uniform(kk[3], (1, 4 * hidden), jnp.float32, -k, k)
        return w_ih, w_hh, b_ih + b_hh

    w_ih0, w_hh0, b0 = lstm_w(keys[1:5], emb_out_size)
    w_ih1, w_hh1, b1 = lstm_w(keys[5:9], hidden)

    # out_dense / final_dense: kaiming_normal_ weights, normal_ biases.
    w_dense = jax.random.normal(keys[9], (hidden, lstm_out_size), jnp.float32) \
        * jnp.sqrt(2.0 / hidden)
    b_dense = jax.random.normal(keys[10], (1, lstm_out_size), jnp.float32)
    w_final = jax.random.normal(keys[11], (lstm_out_size, 2), jnp.float32) \
        * jnp.sqrt(2.0 / lstm_out_size)
    b_final = jax.random.normal(jax.random.fold_in(key, 99), (1, 2), jnp.float32)

    return dict(
        emb=emb,
        w_ih0=w_ih0, w_hh0=w_hh0, b0=b0,
        w_ih1=w_ih1, w_hh1=w_hh1, b1=b1,
        bn_gamma=jnp.ones((1, hidden), jnp.float32),
        bn_beta=jnp.zeros((1, hidden), jnp.float32),
        bn_mean=jnp.zeros((1, hidden), jnp.float32),
        bn_var=jnp.ones((1, hidden), jnp.float32),
        w_dense=w_dense, b_dense=b_dense,
        w_final=w_final, b_final=b_final,
    )


# ----------------------------------------------------------------------------
# Full forward pass
# ----------------------------------------------------------------------------
@jax.jit
def genderperformr_forward(params, username, lens):
    B, T = username.shape
    # Embedding lookup (plain-JAX glue; XLA gather).
    emb = jnp.take(params["emb"], username, axis=0)              # [B, T, E]
    # Hoisted layer-1 input->gates projection for ALL timesteps: one big
    # [B*T,E]x[E,4H] matmul that also yields the time-major layout (absorbs
    # the transpose); layer-1 bias folded in here.
    xg0 = jnp.einsum("bte,eg->tbg",
                     emb.astype(jnp.float32), params["w_ih0"]) + params["b0"]
    lens2d = lens.reshape(B, 1).astype(jnp.int32)
    return gp_fused(xg0, lens2d, params)                          # [B, 2]


# ----------------------------------------------------------------------------
if __name__ == "__main__":
    B, T = 8, 8
    EMB_SIZE = 64                 # stands in for len(EMB)
    VOCAB = EMB_SIZE + 1
    E = 32                        # emb_out_size (module default)
    H = 128                       # small stand-in for lstm_hidden_size=512;
                                  # multiple of 128 keeps gate slices lane-aligned
    LSTM_OUT = 128                # lstm_out_size (module default)

    key = jax.random.PRNGKey(0)
    pkey, dkey, lkey = jax.random.split(key, 3)

    params = init_params(pkey, VOCAB, E, H, LSTM_OUT)

    # Synthetic username batch: ids in [1, VOCAB-1], zero-padded beyond lens.
    lens = jax.random.randint(lkey, (B,), 1, T + 1, dtype=jnp.int32)
    username = jax.random.randint(dkey, (B, T), 1, VOCAB, dtype=jnp.int32)
    mask = jnp.arange(T)[None, :] < lens[:, None]
    username = jnp.where(mask, username, 0)

    logp = genderperformr_forward(params, username, lens)
    jax.block_until_ready(logp)

    assert logp.shape == (B, 2)
    # log_softmax rows must (approximately) exponentiate-sum to 1.
    assert jnp.allclose(jnp.sum(jnp.exp(logp), axis=1), 1.0, atol=1e-4)
    print("KERNEL_OK")
</pallas_src>

<mosaic_0001>
module attributes {stable_mosaic.version = 11 : i64} {
  func.func @gp_fused_kernel(%arg0: memref<8x8x512xf32, #tpu.memory_space<vmem>>, %arg1: memref<128x512xf32, #tpu.memory_space<vmem>>, %arg2: memref<128x512xf32, #tpu.memory_space<vmem>>, %arg3: memref<128x512xf32, #tpu.memory_space<vmem>>, %arg4: memref<1x512xf32, #tpu.memory_space<vmem>>, %arg5: memref<8x1xi32, #tpu.memory_space<vmem>>, %arg6: memref<1x128xf32, #tpu.memory_space<vmem>>, %arg7: memref<1x128xf32, #tpu.memory_space<vmem>>, %arg8: memref<1x128xf32, #tpu.memory_space<vmem>>, %arg9: memref<1x128xf32, #tpu.memory_space<vmem>>, %arg10: memref<128x128xf32, #tpu.memory_space<vmem>>, %arg11: memref<1x128xf32, #tpu.memory_space<vmem>>, %arg12: memref<128x2xf32, #tpu.memory_space<vmem>>, %arg13: memref<1x2xf32, #tpu.memory_space<vmem>>, %arg14: memref<8x2xf32, #tpu.memory_space<vmem>>) attributes {dimension_semantics = [], scalar_prefetch = 0 : i64, scratch_operands = 0 : i64, tpu.core_type = #tpu.core_type<tc>} {
    %c0 = arith.constant 0 : index
    %c0_0 = arith.constant 0 : index
    %0 = vector.load %arg1[%c0, %c0_0] : memref<128x512xf32, #tpu.memory_space<vmem>>, vector<128x512xf32>
    %c0_1 = arith.constant 0 : index
    %c0_2 = arith.constant 0 : index
    %1 = vector.load %arg2[%c0_1, %c0_2] : memref<128x512xf32, #tpu.memory_space<vmem>>, vector<128x512xf32>
    %c0_3 = arith.constant 0 : index
    %c0_4 = arith.constant 0 : index
    %2 = vector.load %arg3[%c0_3, %c0_4] : memref<128x512xf32, #tpu.memory_space<vmem>>, vector<128x512xf32>
    %c0_5 = arith.constant 0 : index
    %c0_6 = arith.constant 0 : index
    %3 = vector.load %arg4[%c0_5, %c0_6] : memref<1x512xf32, #tpu.memory_space<vmem>>, vector<1x512xf32>
    %c0_7 = arith.constant 0 : index
    %c0_8 = arith.constant 0 : index
    %4 = vector.load %arg5[%c0_7, %c0_8] : memref<8x1xi32, #tpu.memory_space<vmem>>, vector<8x1xi32>
    %cst = arith.constant 0.000000e+00 : f32
    %5 = vector.broadcast %cst : f32 to vector<8x128xf32>
    %c0_i32 = arith.constant 0 : i32
    %6 = arith.index_cast %c0_i32 : i32 to index
    %c0_9 = arith.constant 0 : index
    %c0_10 = arith.constant 0 : index
    %7 = vector.load %arg0[%6, %c0_9, %c0_10] : memref<8x8x512xf32, #tpu.memory_space<vmem>>, vector<1x8x512xf32>
    %8 = vector.shape_cast %7 : vector<1x8x512xf32> to vector<8x512xf32>
    %cst_11 = arith.constant dense<0.000000e+00> : vector<8x512xf32>
    %9 = tpu.matmul %5, %0, %cst_11 {dimension_numbers = #tpu.dot_dimension_numbers<[1], [0], [0], [1], [0, 0, 1, 1], [], []>} : vector<8x128xf32>, vector<128x512xf32>, vector<8x512xf32> -> vector<8x512xf32>
    %10 = arith.addf %8, %9 : vector<8x512xf32>
    %11 = vector.extract_strided_slice %10 {offsets = [0, 0], sizes = [8, 128], strides = [1, 1]} : vector<8x512xf32> to vector<8x128xf32>
    %12 = arith.negf %11 : vector<8x128xf32>
    %13 = math.exp %12 : vector<8x128xf32>
    %cst_12 = arith.constant 1.000000e+00 : f32
    %14 = vector.broadcast %cst_12 : f32 to vector<8x128xf32>
    %15 = arith.addf %14, %13 : vector<8x128xf32>
    %16 = arith.divf %14, %15 : vector<8x128xf32>
    %17 = vector.extract_strided_slice %10 {offsets = [0, 128], sizes = [8, 128], strides = [1, 1]} : vector<8x512xf32> to vector<8x128xf32>
    %18 = arith.negf %17 : vector<8x128xf32>
    %19 = math.exp %18 : vector<8x128xf32>
    %cst_13 = arith.constant 1.000000e+00 : f32
    %20 = vector.broadcast %cst_13 : f32 to vector<8x128xf32>
    %21 = arith.addf %20, %19 : vector<8x128xf32>
    %22 = arith.divf %20, %21 : vector<8x128xf32>
    %23 = vector.extract_strided_slice %10 {offsets = [0, 256], sizes = [8, 128], strides = [1, 1]} : vector<8x512xf32> to vector<8x128xf32>
    %24 = math.tanh %23 : vector<8x128xf32>
    %25 = vector.extract_strided_slice %10 {offsets = [0, 384], sizes = [8, 128], strides = [1, 1]} : vector<8x512xf32> to vector<8x128xf32>
    %26 = arith.negf %25 : vector<8x128xf32>
    %27 = math.exp %26 : vector<8x128xf32>
    %cst_14 = arith.constant 1.000000e+00 : f32
    %28 = vector.broadcast %cst_14 : f32 to vector<8x128xf32>
    %29 = arith.addf %28, %27 : vector<8x128xf32>
    %30 = arith.divf %28, %29 : vector<8x128xf32>
    %31 = arith.mulf %22, %5 : vector<8x128xf32>
    %32 = arith.mulf %16, %24 : vector<8x128xf32>
    %33 = arith.addf %31, %32 : vector<8x128xf32>
    %34 = math.tanh %33 : vector<8x128xf32>
    %35 = arith.mulf %30, %34 : vector<8x128xf32>
    %cst_15 = arith.constant dense<0.000000e+00> : vector<8x512xf32>
    %36 = tpu.matmul %35, %1, %cst_15 {dimension_numbers = #tpu.dot_dimension_numbers<[1], [0], [0], [1], [0, 0, 1, 1], [], []>} : vector<8x128xf32>, vector<128x512xf32>, vector<8x512xf32> -> vector<8x512xf32>
    %cst_16 = arith.constant dense<0.000000e+00> : vector<8x512xf32>
    %37 = tpu.matmul %5, %2, %cst_16 {dimension_numbers = #tpu.dot_dimension_numbers<[1], [0], [0], [1], [0, 0, 1, 1], [], []>} : vector<8x128xf32>, vector<128x512xf32>, vector<8x512xf32> -> vector<8x512xf32>
    %38 = arith.addf %36, %37 : vector<8x512xf32>
    %39 = vector.broadcast %3 : vector<1x512xf32> to vector<8x512xf32>
    %40 = arith.addf %38, %39 : vector<8x512xf32>
    %41 = vector.extract_strided_slice %40 {offsets = [0, 0], sizes = [8, 128], strides = [1, 1]} : vector<8x512xf32> to vector<8x128xf32>
    %42 = arith.negf %41 : vector<8x128xf32>
    %43 = math.exp %42 : vector<8x128xf32>
    %cst_17 = arith.constant 1.000000e+00 : f32
    %44 = vector.broadcast %cst_17 : f32 to vector<8x128xf32>
    %45 = arith.addf %44, %43 : vector<8x128xf32>
    %46 = arith.divf %44, %45 : vector<8x128xf32>
    %47 = vector.extract_strided_slice %40 {offsets = [0, 128], sizes = [8, 128], strides = [1, 1]} : vector<8x512xf32> to vector<8x128xf32>
    %48 = arith.negf %47 : vector<8x128xf32>
    %49 = math.exp %48 : vector<8x128xf32>
    %cst_18 = arith.constant 1.000000e+00 : f32
    %50 = vector.broadcast %cst_18 : f32 to vector<8x128xf32>
    %51 = arith.addf %50, %49 : vector<8x128xf32>
    %52 = arith.divf %50, %51 : vector<8x128xf32>
    %53 = vector.extract_strided_slice %40 {offsets = [0, 256], sizes = [8, 128], strides = [1, 1]} : vector<8x512xf32> to vector<8x128xf32>
    %54 = math.tanh %53 : vector<8x128xf32>
    %55 = vector.extract_strided_slice %40 {offsets = [0, 384], sizes = [8, 128], strides = [1, 1]} : vector<8x512xf32> to vector<8x128xf32>
    %56 = arith.negf %55 : vector<8x128xf32>
    %57 = math.exp %56 : vector<8x128xf32>
    %cst_19 = arith.constant 1.000000e+00 : f32
    %58 = vector.broadcast %cst_19 : f32 to vector<8x128xf32>
    %59 = arith.addf %58, %57 : vector<8x128xf32>
    %60 = arith.divf %58, %59 : vector<8x128xf32>
    %61 = arith.mulf %52, %5 : vector<8x128xf32>
    %62 = arith.mulf %46, %54 : vector<8x128xf32>
    %63 = arith.addf %61, %62 : vector<8x128xf32>
    %64 = math.tanh %63 : vector<8x128xf32>
    %65 = arith.mulf %60, %64 : vector<8x128xf32>
    %c1_i32 = arith.constant 1 : i32
    %66 = arith.addi %c0_i32, %c1_i32 : i32
    %67 = vector.broadcast %66 : i32 to vector<8x1xi32>
    %68 = arith.cmpi eq, %4, %67 : vector<8x1xi32>
    %69 = vector.shape_cast %68 : vector<8x1xi1> to vector<8x1xi1>
    %70 = vector.broadcast %69 : vector<8x1xi1> to vector<8x128xi1>
    %71 = arith.select %70, %65, %5 : vector<8x128xi1>, vector<8x128xf32>
    %c1_i32_20 = arith.constant 1 : i32
    %72 = arith.index_cast %c1_i32_20 : i32 to index
    %c0_21 = arith.constant 0 : index
    %c0_22 = arith.constant 0 : index
    %73 = vector.load %arg0[%72, %c0_21, %c0_22] : memref<8x8x512xf32, #tpu.memory_space<vmem>>, vector<1x8x512xf32>
    %74 = vector.shape_cast %73 : vector<1x8x512xf32> to vector<8x512xf32>
    %cst_23 = arith.constant dense<0.000000e+00> : vector<8x512xf32>
    %75 = tpu.matmul %35, %0, %cst_23 {dimension_numbers = #tpu.dot_dimension_numbers<[1], [0], [0], [1], [0, 0, 1, 1], [], []>} : vector<8x128xf32>, vector<128x512xf32>, vector<8x512xf32> -> vector<8x512xf32>
    %76 = arith.addf %74, %75 : vector<8x512xf32>
    %77 = vector.extract_strided_slice %76 {offsets = [0, 0], sizes = [8, 128], strides = [1, 1]} : vector<8x512xf32> to vector<8x128xf32>
    %78 = arith.negf %77 : vector<8x128xf32>
    %79 = math.exp %78 : vector<8x128xf32>
    %cst_24 = arith.constant 1.000000e+00 : f32
    %80 = vector.broadcast %cst_24 : f32 to vector<8x128xf32>
    %81 = arith.addf %80, %79 : vector<8x128xf32>
    %82 = arith.divf %80, %81 : vector<8x128xf32>
    %83 = vector.extract_strided_slice %76 {offsets = [0, 128], sizes = [8, 128], strides = [1, 1]} : vector<8x512xf32> to vector<8x128xf32>
    %84 = arith.negf %83 : vector<8x128xf32>
    %85 = math.exp %84 : vector<8x128xf32>
    %cst_25 = arith.constant 1.000000e+00 : f32
    %86 = vector.broadcast %cst_25 : f32 to vector<8x128xf32>
    %87 = arith.addf %86, %85 : vector<8x128xf32>
    %88 = arith.divf %86, %87 : vector<8x128xf32>
    %89 = vector.extract_strided_slice %76 {offsets = [0, 256], sizes = [8, 128], strides = [1, 1]} : vector<8x512xf32> to vector<8x128xf32>
    %90 = math.tanh %89 : vector<8x128xf32>
    %91 = vector.extract_strided_slice %76 {offsets = [0, 384], sizes = [8, 128], strides = [1, 1]} : vector<8x512xf32> to vector<8x128xf32>
    %92 = arith.negf %91 : vector<8x128xf32>
    %93 = math.exp %92 : vector<8x128xf32>
    %cst_26 = arith.constant 1.000000e+00 : f32
    %94 = vector.broadcast %cst_26 : f32 to vector<8x128xf32>
    %95 = arith.addf %94, %93 : vector<8x128xf32>
    %96 = arith.divf %94, %95 : vector<8x128xf32>
    %97 = arith.mulf %88, %33 : vector<8x128xf32>
    %98 = arith.mulf %82, %90 : vector<8x128xf32>
    %99 = arith.addf %97, %98 : vector<8x128xf32>
    %100 = math.tanh %99 : vector<8x128xf32>
    %101 = arith.mulf %96, %100 : vector<8x128xf32>
    %cst_27 = arith.constant dense<0.000000e+00> : vector<8x512xf32>
    %102 = tpu.matmul %101, %1, %cst_27 {dimension_numbers = #tpu.dot_dimension_numbers<[1], [0], [0], [1], [0, 0, 1, 1], [], []>} : vector<8x128xf32>, vector<128x512xf32>, vector<8x512xf32> -> vector<8x512xf32>
    %cst_28 = arith.constant dense<0.000000e+00> : vector<8x512xf32>
    %103 = tpu.matmul %65, %2, %cst_28 {dimension_numbers = #tpu.dot_dimension_numbers<[1], [0], [0], [1], [0, 0, 1, 1], [], []>} : vector<8x128xf32>, vector<128x512xf32>, vector<8x512xf32> -> vector<8x512xf32>
    %104 = arith.addf %102, %103 : vector<8x512xf32>
    %105 = vector.broadcast %3 : vector<1x512xf32> to vector<8x512xf32>
    %106 = arith.addf %104, %105 : vector<8x512xf32>
    %107 = vector.extract_strided_slice %106 {offsets = [0, 0], sizes = [8, 128], strides = [1, 1]} : vector<8x512xf32> to vector<8x128xf32>
    %108 = arith.negf %107 : vector<8x128xf32>
    %109 = math.exp %108 : vector<8x128xf32>
    %cst_29 = arith.constant 1.000000e+00 : f32
    %110 = vector.broadcast %cst_29 : f32 to vector<8x128xf32>
    %111 = arith.addf %110, %109 : vector<8x128xf32>
    %112 = arith.divf %110, %111 : vector<8x128xf32>
    %113 = vector.extract_strided_slice %106 {offsets = [0, 128], sizes = [8, 128], strides = [1, 1]} : vector<8x512xf32> to vector<8x128xf32>
    %114 = arith.negf %113 : vector<8x128xf32>
    %115 = math.exp %114 : vector<8x128xf32>
    %cst_30 = arith.constant 1.000000e+00 : f32
    %116 = vector.broadcast %cst_30 : f32 to vector<8x128xf32>
    %117 = arith.addf %116, %115 : vector<8x128xf32>
    %118 = arith.divf %116, %117 : vector<8x128xf32>
    %119 = vector.extract_strided_slice %106 {offsets = [0, 256], sizes = [8, 128], strides = [1, 1]} : vector<8x512xf32> to vector<8x128xf32>
    %120 = math.tanh %119 : vector<8x128xf32>
    %121 = vector.extract_strided_slice %106 {offsets = [0, 384], sizes = [8, 128], strides = [1, 1]} : vector<8x512xf32> to vector<8x128xf32>
    %122 = arith.negf %121 : vector<8x128xf32>
    %123 = math.exp %122 : vector<8x128xf32>
    %cst_31 = arith.constant 1.000000e+00 : f32
    %124 = vector.broadcast %cst_31 : f32 to vector<8x128xf32>
    %125 = arith.addf %124, %123 : vector<8x128xf32>
    %126 = arith.divf %124, %125 : vector<8x128xf32>
    %127 = arith.mulf %118, %63 : vector<8x128xf32>
    %128 = arith.mulf %112, %120 : vector<8x128xf32>
    %129 = arith.addf %127, %128 : vector<8x128xf32>
    %130 = math.tanh %129 : vector<8x128xf32>
    %131 = arith.mulf %126, %130 : vector<8x128xf32>
    %c1_i32_32 = arith.constant 1 : i32
    %132 = arith.addi %c1_i32_20, %c1_i32_32 : i32
    %133 = vector.broadcast %132 : i32 to vector<8x1xi32>
    %134 = arith.cmpi eq, %4, %133 : vector<8x1xi32>
    %135 = vector.shape_cast %134 : vector<8x1xi1> to vector<8x1xi1>
    %136 = vector.broadcast %135 : vector<8x1xi1> to vector<8x128xi1>
    %137 = arith.select %136, %131, %71 : vector<8x128xi1>, vector<8x128xf32>
    %c2_i32 = arith.constant 2 : i32
    %138 = arith.index_cast %c2_i32 : i32 to index
    %c0_33 = arith.constant 0 : index
    %c0_34 = arith.constant 0 : index
    %139 = vector.load %arg0[%138, %c0_33, %c0_34] : memref<8x8x512xf32, #tpu.memory_space<vmem>>, vector<1x8x512xf32>
    %140 = vector.shape_cast %139 : vector<1x8x512xf32> to vector<8x512xf32>
    %cst_35 = arith.constant dense<0.000000e+00> : vector<8x512xf32>
    %141 = tpu.matmul %101, %0, %cst_35 {dimension_numbers = #tpu.dot_dimension_numbers<[1], [0], [0], [1], [0, 0, 1, 1], [], []>} : vector<8x128xf32>, vector<128x512xf32>, vector<8x512xf32> -> vector<8x512xf32>
    %142 = arith.addf %140, %141 : vector<8x512xf32>
    %143 = vector.extract_strided_slice %142 {offsets = [0, 0], sizes = [8, 128], strides = [1, 1]} : vector<8x512xf32> to vector<8x128xf32>
    %144 = arith.negf %143 : vector<8x128xf32>
    %145 = math.exp %144 : vector<8x128xf32>
    %cst_36 = arith.constant 1.000000e+00 : f32
    %146 = vector.broadcast %cst_36 : f32 to vector<8x128xf32>
    %147 = arith.addf %146, %145 : vector<8x128xf32>
    %148 = arith.divf %146, %147 : vector<8x128xf32>
    %149 = vector.extract_strided_slice %142 {offsets = [0, 128], sizes = [8, 128], strides = [1, 1]} : vector<8x512xf32> to vector<8x128xf32>
    %150 = arith.negf %149 : vector<8x128xf32>
    %151 = math.exp %150 : vector<8x128xf32>
    %cst_37 = arith.constant 1.000000e+00 : f32
    %152 = vector.broadcast %cst_37 : f32 to vector<8x128xf32>
    %153 = arith.addf %152, %151 : vector<8x128xf32>
    %154 = arith.divf %152, %153 : vector<8x128xf32>
    %155 = vector.extract_strided_slice %142 {offsets = [0, 256], sizes = [8, 128], strides = [1, 1]} : vector<8x512xf32> to vector<8x128xf32>
    %156 = math.tanh %155 : vector<8x128xf32>
    %157 = vector.extract_strided_slice %142 {offsets = [0, 384], sizes = [8, 128], strides = [1, 1]} : vector<8x512xf32> to vector<8x128xf32>
    %158 = arith.negf %157 : vector<8x128xf32>
    %159 = math.exp %158 : vector<8x128xf32>
    %cst_38 = arith.constant 1.000000e+00 : f32
    %160 = vector.broadcast %cst_38 : f32 to vector<8x128xf32>
    %161 = arith.addf %160, %159 : vector<8x128xf32>
    %162 = arith.divf %160, %161 : vector<8x128xf32>
    %163 = arith.mulf %154, %99 : vector<8x128xf32>
    %164 = arith.mulf %148, %156 : vector<8x128xf32>
    %165 = arith.addf %163, %164 : vector<8x128xf32>
    %166 = math.tanh %165 : vector<8x128xf32>
    %167 = arith.mulf %162, %166 : vector<8x128xf32>
    %cst_39 = arith.constant dense<0.000000e+00> : vector<8x512xf32>
    %168 = tpu.matmul %167, %1, %cst_39 {dimension_numbers = #tpu.dot_dimension_numbers<[1], [0], [0], [1], [0, 0, 1, 1], [], []>} : vector<8x128xf32>, vector<128x512xf32>, vector<8x512xf32> -> vector<8x512xf32>
    %cst_40 = arith.constant dense<0.000000e+00> : vector<8x512xf32>
    %169 = tpu.matmul %131, %2, %cst_40 {dimension_numbers = #tpu.dot_dimension_numbers<[1], [0], [0], [1], [0, 0, 1, 1], [], []>} : vector<8x128xf32>, vector<128x512xf32>, vector<8x512xf32> -> vector<8x512xf32>
    %170 = arith.addf %168, %169 : vector<8x512xf32>
    %171 = vector.broadcast %3 : vector<1x512xf32> to vector<8x512xf32>
    %172 = arith.addf %170, %171 : vector<8x512xf32>
    %173 = vector.extract_strided_slice %172 {offsets = [0, 0], sizes = [8, 128], strides = [1, 1]} : vector<8x512xf32> to vector<8x128xf32>
    %174 = arith.negf %173 : vector<8x128xf32>
    %175 = math.exp %174 : vector<8x128xf32>
    %cst_41 = arith.constant 1.000000e+00 : f32
    %176 = vector.broadcast %cst_41 : f32 to vector<8x128xf32>
    %177 = arith.addf %176, %175 : vector<8x128xf32>
    %178 = arith.divf %176, %177 : vector<8x128xf32>
    %179 = vector.extract_strided_slice %172 {offsets = [0, 128], sizes = [8, 128], strides = [1, 1]} : vector<8x512xf32> to vector<8x128xf32>
    %180 = arith.negf %179 : vector<8x128xf32>
    %181 = math.exp %180 : vector<8x128xf32>
    %cst_42 = arith.constant 1.000000e+00 : f32
    %182 = vector.broadcast %cst_42 : f32 to vector<8x128xf32>
    %183 = arith.addf %182, %181 : vector<8x128xf32>
    %184 = arith.divf %182, %183 : vector<8x128xf32>
    %185 = vector.extract_strided_slice %172 {offsets = [0, 256], sizes = [8, 128], strides = [1, 1]} : vector<8x512xf32> to vector<8x128xf32>
    %186 = math.tanh %185 : vector<8x128xf32>
    %187 = vector.extract_strided_slice %172 {offsets = [0, 384], sizes = [8, 128], strides = [1, 1]} : vector<8x512xf32> to vector<8x128xf32>
    %188 = arith.negf %187 : vector<8x128xf32>
    %189 = math.exp %188 : vector<8x128xf32>
    %cst_43 = arith.constant 1.000000e+00 : f32
    %190 = vector.broadcast %cst_43 : f32 to vector<8x128xf32>
    %191 = arith.addf %190, %189 : vector<8x128xf32>
    %192 = arith.divf %190, %191 : vector<8x128xf32>
    %193 = arith.mulf %184, %129 : vector<8x128xf32>
    %194 = arith.mulf %178, %186 : vector<8x128xf32>
    %195 = arith.addf %193, %194 : vector<8x128xf32>
    %196 = math.tanh %195 : vector<8x128xf32>
    %197 = arith.mulf %192, %196 : vector<8x128xf32>
    %c1_i32_44 = arith.constant 1 : i32
    %198 = arith.addi %c2_i32, %c1_i32_44 : i32
    %199 = vector.broadcast %198 : i32 to vector<8x1xi32>
    %200 = arith.cmpi eq, %4, %199 : vector<8x1xi32>
    %201 = vector.shape_cast %200 : vector<8x1xi1> to vector<8x1xi1>
    %202 = vector.broadcast %201 : vector<8x1xi1> to vector<8x128xi1>
    %203 = arith.select %202, %197, %137 : vector<8x128xi1>, vector<8x128xf32>
    %c3_i32 = arith.constant 3 : i32
    %204 = arith.index_cast %c3_i32 : i32 to index
    %c0_45 = arith.constant 0 : index
    %c0_46 = arith.constant 0 : index
    %205 = vector.load %arg0[%204, %c0_45, %c0_46] : memref<8x8x512xf32, #tpu.memory_space<vmem>>, vector<1x8x512xf32>
    %206 = vector.shape_cast %205 : vector<1x8x512xf32> to vector<8x512xf32>
    %cst_47 = arith.constant dense<0.000000e+00> : vector<8x512xf32>
    %207 = tpu.matmul %167, %0, %cst_47 {dimension_numbers = #tpu.dot_dimension_numbers<[1], [0], [0], [1], [0, 0, 1, 1], [], []>} : vector<8x128xf32>, vector<128x512xf32>, vector<8x512xf32> -> vector<8x512xf32>
    %208 = arith.addf %206, %207 : vector<8x512xf32>
    %209 = vector.extract_strided_slice %208 {offsets = [0, 0], sizes = [8, 128], strides = [1, 1]} : vector<8x512xf32> to vector<8x128xf32>
    %210 = arith.negf %209 : vector<8x128xf32>
    %211 = math.exp %210 : vector<8x128xf32>
    %cst_48 = arith.constant 1.000000e+00 : f32
    %212 = vector.broadcast %cst_48 : f32 to vector<8x128xf32>
    %213 = arith.addf %212, %211 : vector<8x128xf32>
    %214 = arith.divf %212, %213 : vector<8x128xf32>
    %215 = vector.extract_strided_slice %208 {offsets = [0, 128], sizes = [8, 128], strides = [1, 1]} : vector<8x512xf32> to vector<8x128xf32>
    %216 = arith.negf %215 : vector<8x128xf32>
    %217 = math.exp %216 : vector<8x128xf32>
    %cst_49 = arith.constant 1.000000e+00 : f32
    %218 = vector.broadcast %cst_49 : f32 to vector<8x128xf32>
    %219 = arith.addf %218, %217 : vector<8x128xf32>
    %220 = arith.divf %218, %219 : vector<8x128xf32>
    %221 = vector.extract_strided_slice %208 {offsets = [0, 256], sizes = [8, 128], strides = [1, 1]} : vector<8x512xf32> to vector<8x128xf32>
    %222 = math.tanh %221 : vector<8x128xf32>
    %223 = vector.extract_strided_slice %208 {offsets = [0, 384], sizes = [8, 128], strides = [1, 1]} : vector<8x512xf32> to vector<8x128xf32>
    %224 = arith.negf %223 : vector<8x128xf32>
    %225 = math.exp %224 : vector<8x128xf32>
    %cst_50 = arith.constant 1.000000e+00 : f32
    %226 = vector.broadcast %cst_50 : f32 to vector<8x128xf32>
    %227 = arith.addf %226, %225 : vector<8x128xf32>
    %228 = arith.divf %226, %227 : vector<8x128xf32>
    %229 = arith.mulf %220, %165 : vector<8x128xf32>
    %230 = arith.mulf %214, %222 : vector<8x128xf32>
    %231 = arith.addf %229, %230 : vector<8x128xf32>
    %232 = math.tanh %231 : vector<8x128xf32>
    %233 = arith.mulf %228, %232 : vector<8x128xf32>
    %cst_51 = arith.constant dense<0.000000e+00> : vector<8x512xf32>
    %234 = tpu.matmul %233, %1, %cst_51 {dimension_numbers = #tpu.dot_dimension_numbers<[1], [0], [0], [1], [0, 0, 1, 1], [], []>} : vector<8x128xf32>, vector<128x512xf32>, vector<8x512xf32> -> vector<8x512xf32>
    %cst_52 = arith.constant dense<0.000000e+00> : vector<8x512xf32>
    %235 = tpu.matmul %197, %2, %cst_52 {dimension_numbers = #tpu.dot_dimension_numbers<[1], [0], [0], [1], [0, 0, 1, 1], [], []>} : vector<8x128xf32>, vector<128x512xf32>, vector<8x512xf32> -> vector<8x512xf32>
    %236 = arith.addf %234, %235 : vector<8x512xf32>
    %237 = vector.broadcast %3 : vector<1x512xf32> to vector<8x512xf32>
    %238 = arith.addf %236, %237 : vector<8x512xf32>
    %239 = vector.extract_strided_slice %238 {offsets = [0, 0], sizes = [8, 128], strides = [1, 1]} : vector<8x512xf32> to vector<8x128xf32>
    %240 = arith.negf %239 : vector<8x128xf32>
    %241 = math.exp %240 : vector<8x128xf32>
    %cst_53 = arith.constant 1.000000e+00 : f32
    %242 = vector.broadcast %cst_53 : f32 to vector<8x128xf32>
    %243 = arith.addf %242, %241 : vector<8x128xf32>
    %244 = arith.divf %242, %243 : vector<8x128xf32>
    %245 = vector.extract_strided_slice %238 {offsets = [0, 128], sizes = [8, 128], strides = [1, 1]} : vector<8x512xf32> to vector<8x128xf32>
    %246 = arith.negf %245 : vector<8x128xf32>
    %247 = math.exp %246 : vector<8x128xf32>
    %cst_54 = arith.constant 1.000000e+00 : f32
    %248 = vector.broadcast %cst_54 : f32 to vector<8x128xf32>
    %249 = arith.addf %248, %247 : vector<8x128xf32>
    %250 = arith.divf %248, %249 : vector<8x128xf32>
    %251 = vector.extract_strided_slice %238 {offsets = [0, 256], sizes = [8, 128], strides = [1, 1]} : vector<8x512xf32> to vector<8x128xf32>
    %252 = math.tanh %251 : vector<8x128xf32>
    %253 = vector.extract_strided_slice %238 {offsets = [0, 384], sizes = [8, 128], strides = [1, 1]} : vector<8x512xf32> to vector<8x128xf32>
    %254 = arith.negf %253 : vector<8x128xf32>
    %255 = math.exp %254 : vector<8x128xf32>
    %cst_55 = arith.constant 1.000000e+00 : f32
    %256 = vector.broadcast %cst_55 : f32 to vector<8x128xf32>
    %257 = arith.addf %256, %255 : vector<8x128xf32>
    %258 = arith.divf %256, %257 : vector<8x128xf32>
    %259 = arith.mulf %250, %195 : vector<8x128xf32>
    %260 = arith.mulf %244, %252 : vector<8x128xf32>
    %261 = arith.addf %259, %260 : vector<8x128xf32>
    %262 = math.tanh %261 : vector<8x128xf32>
    %263 = arith.mulf %258, %262 : vector<8x128xf32>
    %c1_i32_56 = arith.constant 1 : i32
    %264 = arith.addi %c3_i32, %c1_i32_56 : i32
    %265 = vector.broadcast %264 : i32 to vector<8x1xi32>
    %266 = arith.cmpi eq, %4, %265 : vector<8x1xi32>
    %267 = vector.shape_cast %266 : vector<8x1xi1> to vector<8x1xi1>
    %268 = vector.broadcast %267 : vector<8x1xi1> to vector<8x128xi1>
    %269 = arith.select %268, %263, %203 : vector<8x128xi1>, vector<8x128xf32>
    %c4_i32 = arith.constant 4 : i32
    %270 = arith.index_cast %c4_i32 : i32 to index
    %c0_57 = arith.constant 0 : index
    %c0_58 = arith.constant 0 : index
    %271 = vector.load %arg0[%270, %c0_57, %c0_58] : memref<8x8x512xf32, #tpu.memory_space<vmem>>, vector<1x8x512xf32>
    %272 = vector.shape_cast %271 : vector<1x8x512xf32> to vector<8x512xf32>
    %cst_59 = arith.constant dense<0.000000e+00> : vector<8x512xf32>
    %273 = tpu.matmul %233, %0, %cst_59 {dimension_numbers = #tpu.dot_dimension_numbers<[1], [0], [0], [1], [0, 0, 1, 1], [], []>} : vector<8x128xf32>, vector<128x512xf32>, vector<8x512xf32> -> vector<8x512xf32>
    %274 = arith.addf %272, %273 : vector<8x512xf32>
    %275 = vector.extract_strided_slice %274 {offsets = [0, 0], sizes = [8, 128], strides = [1, 1]} : vector<8x512xf32> to vector<8x128xf32>
    %276 = arith.negf %275 : vector<8x128xf32>
    %277 = math.exp %276 : vector<8x128xf32>
    %cst_60 = arith.constant 1.000000e+00 : f32
    %278 = vector.broadcast %cst_60 : f32 to vector<8x128xf32>
    %279 = arith.addf %278, %277 : vector<8x128xf32>
    %280 = arith.divf %278, %279 : vector<8x128xf32>
    %281 = vector.extract_strided_slice %274 {offsets = [0, 128], sizes = [8, 128], strides = [1, 1]} : vector<8x512xf32> to vector<8x128xf32>
    %282 = arith.negf %281 : vector<8x128xf32>
    %283 = math.exp %282 : vector<8x128xf32>
    %cst_61 = arith.constant 1.000000e+00 : f32
    %284 = vector.broadcast %cst_61 : f32 to vector<8x128xf32>
    %285 = arith.addf %284, %283 : vector<8x128xf32>
    %286 = arith.divf %284, %285 : vector<8x128xf32>
    %287 = vector.extract_strided_slice %274 {offsets = [0, 256], sizes = [8, 128], strides = [1, 1]} : vector<8x512xf32> to vector<8x128xf32>
    %288 = math.tanh %287 : vector<8x128xf32>
    %289 = vector.extract_strided_slice %274 {offsets = [0, 384], sizes = [8, 128], strides = [1, 1]} : vector<8x512xf32> to vector<8x128xf32>
    %290 = arith.negf %289 : vector<8x128xf32>
    %291 = math.exp %290 : vector<8x128xf32>
    %cst_62 = arith.constant 1.000000e+00 : f32
    %292 = vector.broadcast %cst_62 : f32 to vector<8x128xf32>
    %293 = arith.addf %292, %291 : vector<8x128xf32>
    %294 = arith.divf %292, %293 : vector<8x128xf32>
    %295 = arith.mulf %286, %231 : vector<8x128xf32>
    %296 = arith.mulf %280, %288 : vector<8x128xf32>
    %297 = arith.addf %295, %296 : vector<8x128xf32>
    %298 = math.tanh %297 : vector<8x128xf32>
    %299 = arith.mulf %294, %298 : vector<8x128xf32>
    %cst_63 = arith.constant dense<0.000000e+00> : vector<8x512xf32>
    %300 = tpu.matmul %299, %1, %cst_63 {dimension_numbers = #tpu.dot_dimension_numbers<[1], [0], [0], [1], [0, 0, 1, 1], [], []>} : vector<8x128xf32>, vector<128x512xf32>, vector<8x512xf32> -> vector<8x512xf32>
    %cst_64 = arith.constant dense<0.000000e+00> : vector<8x512xf32>
    %301 = tpu.matmul %263, %2, %cst_64 {dimension_numbers = #tpu.dot_dimension_numbers<[1], [0], [0], [1], [0, 0, 1, 1], [], []>} : vector<8x128xf32>, vector<128x512xf32>, vector<8x512xf32> -> vector<8x512xf32>
    %302 = arith.addf %300, %301 : vector<8x512xf32>
    %303 = vector.broadcast %3 : vector<1x512xf32> to vector<8x512xf32>
    %304 = arith.addf %302, %303 : vector<8x512xf32>
    %305 = vector.extract_strided_slice %304 {offsets = [0, 0], sizes = [8, 128], strides = [1, 1]} : vector<8x512xf32> to vector<8x128xf32>
    %306 = arith.negf %305 : vector<8x128xf32>
    %307 = math.exp %306 : vector<8x128xf32>
    %cst_65 = arith.constant 1.000000e+00 : f32
    %308 = vector.broadcast %cst_65 : f32 to vector<8x128xf32>
    %309 = arith.addf %308, %307 : vector<8x128xf32>
    %310 = arith.divf %308, %309 : vector<8x128xf32>
    %311 = vector.extract_strided_slice %304 {offsets = [0, 128], sizes = [8, 128], strides = [1, 1]} : vector<8x512xf32> to vector<8x128xf32>
    %312 = arith.negf %311 : vector<8x128xf32>
    %313 = math.exp %312 : vector<8x128xf32>
    %cst_66 = arith.constant 1.000000e+00 : f32
    %314 = vector.broadcast %cst_66 : f32 to vector<8x128xf32>
    %315 = arith.addf %314, %313 : vector<8x128xf32>
    %316 = arith.divf %314, %315 : vector<8x128xf32>
    %317 = vector.extract_strided_slice %304 {offsets = [0, 256], sizes = [8, 128], strides = [1, 1]} : vector<8x512xf32> to vector<8x128xf32>
    %318 = math.tanh %317 : vector<8x128xf32>
    %319 = vector.extract_strided_slice %304 {offsets = [0, 384], sizes = [8, 128], strides = [1, 1]} : vector<8x512xf32> to vector<8x128xf32>
    %320 = arith.negf %319 : vector<8x128xf32>
    %321 = math.exp %320 : vector<8x128xf32>
    %cst_67 = arith.constant 1.000000e+00 : f32
    %322 = vector.broadcast %cst_67 : f32 to vector<8x128xf32>
    %323 = arith.addf %322, %321 : vector<8x128xf32>
    %324 = arith.divf %322, %323 : vector<8x128xf32>
    %325 = arith.mulf %316, %261 : vector<8x128xf32>
    %326 = arith.mulf %310, %318 : vector<8x128xf32>
    %327 = arith.addf %325, %326 : vector<8x128xf32>
    %328 = math.tanh %327 : vector<8x128xf32>
    %329 = arith.mulf %324, %328 : vector<8x128xf32>
    %c1_i32_68 = arith.constant 1 : i32
    %330 = arith.addi %c4_i32, %c1_i32_68 : i32
    %331 = vector.broadcast %330 : i32 to vector<8x1xi32>
    %332 = arith.cmpi eq, %4, %331 : vector<8x1xi32>
    %333 = vector.shape_cast %332 : vector<8x1xi1> to vector<8x1xi1>
    %334 = vector.broadcast %333 : vector<8x1xi1> to vector<8x128xi1>
    %335 = arith.select %334, %329, %269 : vector<8x128xi1>, vector<8x128xf32>
    %c5_i32 = arith.constant 5 : i32
    %336 = arith.index_cast %c5_i32 : i32 to index
    %c0_69 = arith.constant 0 : index
    %c0_70 = arith.constant 0 : index
    %337 = vector.load %arg0[%336, %c0_69, %c0_70] : memref<8x8x512xf32, #tpu.memory_space<vmem>>, vector<1x8x512xf32>
    %338 = vector.shape_cast %337 : vector<1x8x512xf32> to vector<8x512xf32>
    %cst_71 = arith.constant dense<0.000000e+00> : vector<8x512xf32>
    %339 = tpu.matmul %299, %0, %cst_71 {dimension_numbers = #tpu.dot_dimension_numbers<[1], [0], [0], [1], [0, 0, 1, 1], [], []>} : vector<8x128xf32>, vector<128x512xf32>, vector<8x512xf32> -> vector<8x512xf32>
    %340 = arith.addf %338, %339 : vector<8x512xf32>
    %341 = vector.extract_strided_slice %340 {offsets = [0, 0], sizes = [8, 128], strides = [1, 1]} : vector<8x512xf32> to vector<8x128xf32>
    %342 = arith.negf %341 : vector<8x128xf32>
    %343 = math.exp %342 : vector<8x128xf32>
    %cst_72 = arith.constant 1.000000e+00 : f32
    %344 = vector.broadcast %cst_72 : f32 to vector<8x128xf32>
    %345 = arith.addf %344, %343 : vector<8x128xf32>
    %346 = arith.divf %344, %345 : vector<8x128xf32>
    %347 = vector.extract_strided_slice %340 {offsets = [0, 128], sizes = [8, 128], strides = [1, 1]} : vector<8x512xf32> to vector<8x128xf32>
    %348 = arith.negf %347 : vector<8x128xf32>
    %349 = math.exp %348 : vector<8x128xf32>
    %cst_73 = arith.constant 1.000000e+00 : f32
    %350 = vector.broadcast %cst_73 : f32 to vector<8x128xf32>
    %351 = arith.addf %350, %349 : vector<8x128xf32>
    %352 = arith.divf %350, %351 : vector<8x128xf32>
    %353 = vector.extract_strided_slice %340 {offsets = [0, 256], sizes = [8, 128], strides = [1, 1]} : vector<8x512xf32> to vector<8x128xf32>
    %354 = math.tanh %353 : vector<8x128xf32>
    %355 = vector.extract_strided_slice %340 {offsets = [0, 384], sizes = [8, 128], strides = [1, 1]} : vector<8x512xf32> to vector<8x128xf32>
    %356 = arith.negf %355 : vector<8x128xf32>
    %357 = math.exp %356 : vector<8x128xf32>
    %cst_74 = arith.constant 1.000000e+00 : f32
    %358 = vector.broadcast %cst_74 : f32 to vector<8x128xf32>
    %359 = arith.addf %358, %357 : vector<8x128xf32>
    %360 = arith.divf %358, %359 : vector<8x128xf32>
    %361 = arith.mulf %352, %297 : vector<8x128xf32>
    %362 = arith.mulf %346, %354 : vector<8x128xf32>
    %363 = arith.addf %361, %362 : vector<8x128xf32>
    %364 = math.tanh %363 : vector<8x128xf32>
    %365 = arith.mulf %360, %364 : vector<8x128xf32>
    %cst_75 = arith.constant dense<0.000000e+00> : vector<8x512xf32>
    %366 = tpu.matmul %365, %1, %cst_75 {dimension_numbers = #tpu.dot_dimension_numbers<[1], [0], [0], [1], [0, 0, 1, 1], [], []>} : vector<8x128xf32>, vector<128x512xf32>, vector<8x512xf32> -> vector<8x512xf32>
    %cst_76 = arith.constant dense<0.000000e+00> : vector<8x512xf32>
    %367 = tpu.matmul %329, %2, %cst_76 {dimension_numbers = #tpu.dot_dimension_numbers<[1], [0], [0], [1], [0, 0, 1, 1], [], []>} : vector<8x128xf32>, vector<128x512xf32>, vector<8x512xf32> -> vector<8x512xf32>
    %368 = arith.addf %366, %367 : vector<8x512xf32>
    %369 = vector.broadcast %3 : vector<1x512xf32> to vector<8x512xf32>
    %370 = arith.addf %368, %369 : vector<8x512xf32>
    %371 = vector.extract_strided_slice %370 {offsets = [0, 0], sizes = [8, 128], strides = [1, 1]} : vector<8x512xf32> to vector<8x128xf32>
    %372 = arith.negf %371 : vector<8x128xf32>
    %373 = math.exp %372 : vector<8x128xf32>
    %cst_77 = arith.constant 1.000000e+00 : f32
    %374 = vector.broadcast %cst_77 : f32 to vector<8x128xf32>
    %375 = arith.addf %374, %373 : vector<8x128xf32>
    %376 = arith.divf %374, %375 : vector<8x128xf32>
    %377 = vector.extract_strided_slice %370 {offsets = [0, 128], sizes = [8, 128], strides = [1, 1]} : vector<8x512xf32> to vector<8x128xf32>
    %378 = arith.negf %377 : vector<8x128xf32>
    %379 = math.exp %378 : vector<8x128xf32>
    %cst_78 = arith.constant 1.000000e+00 : f32
    %380 = vector.broadcast %cst_78 : f32 to vector<8x128xf32>
    %381 = arith.addf %380, %379 : vector<8x128xf32>
    %382 = arith.divf %380, %381 : vector<8x128xf32>
    %383 = vector.extract_strided_slice %370 {offsets = [0, 256], sizes = [8, 128], strides = [1, 1]} : vector<8x512xf32> to vector<8x128xf32>
    %384 = math.tanh %383 : vector<8x128xf32>
    %385 = vector.extract_strided_slice %370 {offsets = [0, 384], sizes = [8, 128], strides = [1, 1]} : vector<8x512xf32> to vector<8x128xf32>
    %386 = arith.negf %385 : vector<8x128xf32>
    %387 = math.exp %386 : vector<8x128xf32>
    %cst_79 = arith.constant 1.000000e+00 : f32
    %388 = vector.broadcast %cst_79 : f32 to vector<8x128xf32>
    %389 = arith.addf %388, %387 : vector<8x128xf32>
    %390 = arith.divf %388, %389 : vector<8x128xf32>
    %391 = arith.mulf %382, %327 : vector<8x128xf32>
    %392 = arith.mulf %376, %384 : vector<8x128xf32>
    %393 = arith.addf %391, %392 : vector<8x128xf32>
    %394 = math.tanh %393 : vector<8x128xf32>
    %395 = arith.mulf %390, %394 : vector<8x128xf32>
    %c1_i32_80 = arith.constant 1 : i32
    %396 = arith.addi %c5_i32, %c1_i32_80 : i32
    %397 = vector.broadcast %396 : i32 to vector<8x1xi32>
    %398 = arith.cmpi eq, %4, %397 : vector<8x1xi32>
    %399 = vector.shape_cast %398 : vector<8x1xi1> to vector<8x1xi1>
    %400 = vector.broadcast %399 : vector<8x1xi1> to vector<8x128xi1>
    %401 = arith.select %400, %395, %335 : vector<8x128xi1>, vector<8x128xf32>
    %c6_i32 = arith.constant 6 : i32
    %402 = arith.index_cast %c6_i32 : i32 to index
    %c0_81 = arith.constant 0 : index
    %c0_82 = arith.constant 0 : index
    %403 = vector.load %arg0[%402, %c0_81, %c0_82] : memref<8x8x512xf32, #tpu.memory_space<vmem>>, vector<1x8x512xf32>
    %404 = vector.shape_cast %403 : vector<1x8x512xf32> to vector<8x512xf32>
    %cst_83 = arith.constant dense<0.000000e+00> : vector<8x512xf32>
    %405 = tpu.matmul %365, %0, %cst_83 {dimension_numbers = #tpu.dot_dimension_numbers<[1], [0], [0], [1], [0, 0, 1, 1], [], []>} : vector<8x128xf32>, vector<128x512xf32>, vector<8x512xf32> -> vector<8x512xf32>
    %406 = arith.addf %404, %405 : vector<8x512xf32>
    %407 = vector.extract_strided_slice %406 {offsets = [0, 0], sizes = [8, 128], strides = [1, 1]} : vector<8x512xf32> to vector<8x128xf32>
    %408 = arith.negf %407 : vector<8x128xf32>
    %409 = math.exp %408 : vector<8x128xf32>
    %cst_84 = arith.constant 1.000000e+00 : f32
    %410 = vector.broadcast %cst_84 : f32 to vector<8x128xf32>
    %411 = arith.addf %410, %409 : vector<8x128xf32>
    %412 = arith.divf %410, %411 : vector<8x128xf32>
    %413 = vector.extract_strided_slice %406 {offsets = [0, 128], sizes = [8, 128], strides = [1, 1]} : vector<8x512xf32> to vector<8x128xf32>
    %414 = arith.negf %413 : vector<8x128xf32>
    %415 = math.exp %414 : vector<8x128xf32>
    %cst_85 = arith.constant 1.000000e+00 : f32
    %416 = vector.broadcast %cst_85 : f32 to vector<8x128xf32>
    %417 = arith.addf %416, %415 : vector<8x128xf32>
    %418 = arith.divf %416, %417 : vector<8x128xf32>
    %419 = vector.extract_strided_slice %406 {offsets = [0, 256], sizes = [8, 128], strides = [1, 1]} : vector<8x512xf32> to vector<8x128xf32>
    %420 = math.tanh %419 : vector<8x128xf32>
    %421 = vector.extract_strided_slice %406 {offsets = [0, 384], sizes = [8, 128], strides = [1, 1]} : vector<8x512xf32> to vector<8x128xf32>
    %422 = arith.negf %421 : vector<8x128xf32>
    %423 = math.exp %422 : vector<8x128xf32>
    %cst_86 = arith.constant 1.000000e+00 : f32
    %424 = vector.broadcast %cst_86 : f32 to vector<8x128xf32>
    %425 = arith.addf %424, %423 : vector<8x128xf32>
    %426 = arith.divf %424, %425 : vector<8x128xf32>
    %427 = arith.mulf %418, %363 : vector<8x128xf32>
    %428 = arith.mulf %412, %420 : vector<8x128xf32>
    %429 = arith.addf %427, %428 : vector<8x128xf32>
    %430 = math.tanh %429 : vector<8x128xf32>
    %431 = arith.mulf %426, %430 : vector<8x128xf32>
    %cst_87 = arith.constant dense<0.000000e+00> : vector<8x512xf32>
    %432 = tpu.matmul %431, %1, %cst_87 {dimension_numbers = #tpu.dot_dimension_numbers<[1], [0], [0], [1], [0, 0, 1, 1], [], []>} : vector<8x128xf32>, vector<128x512xf32>, vector<8x512xf32> -> vector<8x512xf32>
    %cst_88 = arith.constant dense<0.000000e+00> : vector<8x512xf32>
    %433 = tpu.matmul %395, %2, %cst_88 {dimension_numbers = #tpu.dot_dimension_numbers<[1], [0], [0], [1], [0, 0, 1, 1], [], []>} : vector<8x128xf32>, vector<128x512xf32>, vector<8x512xf32> -> vector<8x512xf32>
    %434 = arith.addf %432, %433 : vector<8x512xf32>
    %435 = vector.broadcast %3 : vector<1x512xf32> to vector<8x512xf32>
    %436 = arith.addf %434, %435 : vector<8x512xf32>
    %437 = vector.extract_strided_slice %436 {offsets = [0, 0], sizes = [8, 128], strides = [1, 1]} : vector<8x512xf32> to vector<8x128xf32>
    %438 = arith.negf %437 : vector<8x128xf32>
    %439 = math.exp %438 : vector<8x128xf32>
    %cst_89 = arith.constant 1.000000e+00 : f32
    %440 = vector.broadcast %cst_89 : f32 to vector<8x128xf32>
    %441 = arith.addf %440, %439 : vector<8x128xf32>
    %442 = arith.divf %440, %441 : vector<8x128xf32>
    %443 = vector.extract_strided_slice %436 {offsets = [0, 128], sizes = [8, 128], strides = [1, 1]} : vector<8x512xf32> to vector<8x128xf32>
    %444 = arith.negf %443 : vector<8x128xf32>
    %445 = math.exp %444 : vector<8x128xf32>
    %cst_90 = arith.constant 1.000000e+00 : f32
    %446 = vector.broadcast %cst_90 : f32 to vector<8x128xf32>
    %447 = arith.addf %446, %445 : vector<8x128xf32>
    %448 = arith.divf %446, %447 : vector<8x128xf32>
    %449 = vector.extract_strided_slice %436 {offsets = [0, 256], sizes = [8, 128], strides = [1, 1]} : vector<8x512xf32> to vector<8x128xf32>
    %450 = math.tanh %449 : vector<8x128xf32>
    %451 = vector.extract_strided_slice %436 {offsets = [0, 384], sizes = [8, 128], strides = [1, 1]} : vector<8x512xf32> to vector<8x128xf32>
    %452 = arith.negf %451 : vector<8x128xf32>
    %453 = math.exp %452 : vector<8x128xf32>
    %cst_91 = arith.constant 1.000000e+00 : f32
    %454 = vector.broadcast %cst_91 : f32 to vector<8x128xf32>
    %455 = arith.addf %454, %453 : vector<8x128xf32>
    %456 = arith.divf %454, %455 : vector<8x128xf32>
    %457 = arith.mulf %448, %393 : vector<8x128xf32>
    %458 = arith.mulf %442, %450 : vector<8x128xf32>
    %459 = arith.addf %457, %458 : vector<8x128xf32>
    %460 = math.tanh %459 : vector<8x128xf32>
    %461 = arith.mulf %456, %460 : vector<8x128xf32>
    %c1_i32_92 = arith.constant 1 : i32
    %462 = arith.addi %c6_i32, %c1_i32_92 : i32
    %463 = vector.broadcast %462 : i32 to vector<8x1xi32>
    %464 = arith.cmpi eq, %4, %463 : vector<8x1xi32>
    %465 = vector.shape_cast %464 : vector<8x1xi1> to vector<8x1xi1>
    %466 = vector.broadcast %465 : vector<8x1xi1> to vector<8x128xi1>
    %467 = arith.select %466, %461, %401 : vector<8x128xi1>, vector<8x128xf32>
    %c7_i32 = arith.constant 7 : i32
    %468 = arith.index_cast %c7_i32 : i32 to index
    %c0_93 = arith.constant 0 : index
    %c0_94 = arith.constant 0 : index
    %469 = vector.load %arg0[%468, %c0_93, %c0_94] : memref<8x8x512xf32, #tpu.memory_space<vmem>>, vector<1x8x512xf32>
    %470 = vector.shape_cast %469 : vector<1x8x512xf32> to vector<8x512xf32>
    %cst_95 = arith.constant dense<0.000000e+00> : vector<8x512xf32>
    %471 = tpu.matmul %431, %0, %cst_95 {dimension_numbers = #tpu.dot_dimension_numbers<[1], [0], [0], [1], [0, 0, 1, 1], [], []>} : vector<8x128xf32>, vector<128x512xf32>, vector<8x512xf32> -> vector<8x512xf32>
    %472 = arith.addf %470, %471 : vector<8x512xf32>
    %473 = vector.extract_strided_slice %472 {offsets = [0, 0], sizes = [8, 128], strides = [1, 1]} : vector<8x512xf32> to vector<8x128xf32>
    %474 = arith.negf %473 : vector<8x128xf32>
    %475 = math.exp %474 : vector<8x128xf32>
    %cst_96 = arith.constant 1.000000e+00 : f32
    %476 = vector.broadcast %cst_96 : f32 to vector<8x128xf32>
    %477 = arith.addf %476, %475 : vector<8x128xf32>
    %478 = arith.divf %476, %477 : vector<8x128xf32>
    %479 = vector.extract_strided_slice %472 {offsets = [0, 128], sizes = [8, 128], strides = [1, 1]} : vector<8x512xf32> to vector<8x128xf32>
    %480 = arith.negf %479 : vector<8x128xf32>
    %481 = math.exp %480 : vector<8x128xf32>
    %cst_97 = arith.constant 1.000000e+00 : f32
    %482 = vector.broadcast %cst_97 : f32 to vector<8x128xf32>
    %483 = arith.addf %482, %481 : vector<8x128xf32>
    %484 = arith.divf %482, %483 : vector<8x128xf32>
    %485 = vector.extract_strided_slice %472 {offsets = [0, 256], sizes = [8, 128], strides = [1, 1]} : vector<8x512xf32> to vector<8x128xf32>
    %486 = math.tanh %485 : vector<8x128xf32>
    %487 = vector.extract_strided_slice %472 {offsets = [0, 384], sizes = [8, 128], strides = [1, 1]} : vector<8x512xf32> to vector<8x128xf32>
    %488 = arith.negf %487 : vector<8x128xf32>
    %489 = math.exp %488 : vector<8x128xf32>
    %cst_98 = arith.constant 1.000000e+00 : f32
    %490 = vector.broadcast %cst_98 : f32 to vector<8x128xf32>
    %491 = arith.addf %490, %489 : vector<8x128xf32>
    %492 = arith.divf %490, %491 : vector<8x128xf32>
    %493 = arith.mulf %484, %429 : vector<8x128xf32>
    %494 = arith.mulf %478, %486 : vector<8x128xf32>
    %495 = arith.addf %493, %494 : vector<8x128xf32>
    %496 = math.tanh %495 : vector<8x128xf32>
    %497 = arith.mulf %492, %496 : vector<8x128xf32>
    %cst_99 = arith.constant dense<0.000000e+00> : vector<8x512xf32>
    %498 = tpu.matmul %497, %1, %cst_99 {dimension_numbers = #tpu.dot_dimension_numbers<[1], [0], [0], [1], [0, 0, 1, 1], [], []>} : vector<8x128xf32>, vector<128x512xf32>, vector<8x512xf32> -> vector<8x512xf32>
    %cst_100 = arith.constant dense<0.000000e+00> : vector<8x512xf32>
    %499 = tpu.matmul %461, %2, %cst_100 {dimension_numbers = #tpu.dot_dimension_numbers<[1], [0], [0], [1], [0, 0, 1, 1], [], []>} : vector<8x128xf32>, vector<128x512xf32>, vector<8x512xf32> -> vector<8x512xf32>
    %500 = arith.addf %498, %499 : vector<8x512xf32>
    %501 = vector.broadcast %3 : vector<1x512xf32> to vector<8x512xf32>
    %502 = arith.addf %500, %501 : vector<8x512xf32>
    %503 = vector.extract_strided_slice %502 {offsets = [0, 0], sizes = [8, 128], strides = [1, 1]} : vector<8x512xf32> to vector<8x128xf32>
    %504 = arith.negf %503 : vector<8x128xf32>
    %505 = math.exp %504 : vector<8x128xf32>
    %cst_101 = arith.constant 1.000000e+00 : f32
    %506 = vector.broadcast %cst_101 : f32 to vector<8x128xf32>
    %507 = arith.addf %506, %505 : vector<8x128xf32>
    %508 = arith.divf %506, %507 : vector<8x128xf32>
    %509 = vector.extract_strided_slice %502 {offsets = [0, 128], sizes = [8, 128], strides = [1, 1]} : vector<8x512xf32> to vector<8x128xf32>
    %510 = arith.negf %509 : vector<8x128xf32>
    %511 = math.exp %510 : vector<8x128xf32>
    %cst_102 = arith.constant 1.000000e+00 : f32
    %512 = vector.broadcast %cst_102 : f32 to vector<8x128xf32>
    %513 = arith.addf %512, %511 : vector<8x128xf32>
    %514 = arith.divf %512, %513 : vector<8x128xf32>
    %515 = vector.extract_strided_slice %502 {offsets = [0, 256], sizes = [8, 128], strides = [1, 1]} : vector<8x512xf32> to vector<8x128xf32>
    %516 = math.tanh %515 : vector<8x128xf32>
    %517 = vector.extract_strided_slice %502 {offsets = [0, 384], sizes = [8, 128], strides = [1, 1]} : vector<8x512xf32> to vector<8x128xf32>
    %518 = arith.negf %517 : vector<8x128xf32>
    %519 = math.exp %518 : vector<8x128xf32>
    %cst_103 = arith.constant 1.000000e+00 : f32
    %520 = vector.broadcast %cst_103 : f32 to vector<8x128xf32>
    %521 = arith.addf %520, %519 : vector<8x128xf32>
    %522 = arith.divf %520, %521 : vector<8x128xf32>
    %523 = arith.mulf %514, %459 : vector<8x128xf32>
    %524 = arith.mulf %508, %516 : vector<8x128xf32>
    %525 = arith.addf %523, %524 : vector<8x128xf32>
    %526 = math.tanh %525 : vector<8x128xf32>
    %527 = arith.mulf %522, %526 : vector<8x128xf32>
    %c1_i32_104 = arith.constant 1 : i32
    %528 = arith.addi %c7_i32, %c1_i32_104 : i32
    %529 = vector.broadcast %528 : i32 to vector<8x1xi32>
    %530 = arith.cmpi eq, %4, %529 : vector<8x1xi32>
    %531 = vector.shape_cast %530 : vector<8x1xi1> to vector<8x1xi1>
    %532 = vector.broadcast %531 : vector<8x1xi1> to vector<8x128xi1>
    %533 = arith.select %532, %527, %467 : vector<8x128xi1>, vector<8x128xf32>
    %c8_i32 = arith.constant 8 : i32
    %c0_105 = arith.constant 0 : index
    %c0_106 = arith.constant 0 : index
    %534 = vector.load %arg9[%c0_105, %c0_106] : memref<1x128xf32, #tpu.memory_space<vmem>>, vector<1x128xf32>
    %cst_107 = arith.constant 9.99999974E-6 : f32
    %535 = vector.broadcast %cst_107 : f32 to vector<1x128xf32>
    %536 = arith.addf %534, %535 : vector<1x128xf32>
    %537 = math.rsqrt %536 : vector<1x128xf32>
    %c0_108 = arith.constant 0 : index
    %c0_109 = arith.constant 0 : index
    %538 = vector.load %arg8[%c0_108, %c0_109] : memref<1x128xf32, #tpu.memory_space<vmem>>, vector<1x128xf32>
    %539 = vector.broadcast %538 : vector<1x128xf32> to vector<8x128xf32>
    %540 = arith.subf %533, %539 : vector<8x128xf32>
    %541 = vector.broadcast %537 : vector<1x128xf32> to vector<8x128xf32>
    %542 = arith.mulf %540, %541 : vector<8x128xf32>
    %c0_110 = arith.constant 0 : index
    %c0_111 = arith.constant 0 : index
    %543 = vector.load %arg6[%c0_110, %c0_111] : memref<1x128xf32, #tpu.memory_space<vmem>>, vector<1x128xf32>
    %544 = vector.broadcast %543 : vector<1x128xf32> to vector<8x128xf32>
    %545 = arith.mulf %542, %544 : vector<8x128xf32>
    %c0_112 = arith.constant 0 : index
    %c0_113 = arith.constant 0 : index
    %546 = vector.load %arg7[%c0_112, %c0_113] : memref<1x128xf32, #tpu.memory_space<vmem>>, vector<1x128xf32>
    %547 = vector.broadcast %546 : vector<1x128xf32> to vector<8x128xf32>
    %548 = arith.addf %545, %547 : vector<8x128xf32>
    %cst_114 = arith.constant 0.000000e+00 : f32
    %549 = vector.broadcast %cst_114 : f32 to vector<8x128xf32>
    %550 = arith.maximumf %548, %549 : vector<8x128xf32>
    %c0_115 = arith.constant 0 : index
    %c0_116 = arith.constant 0 : index
    %551 = vector.load %arg10[%c0_115, %c0_116] : memref<128x128xf32, #tpu.memory_space<vmem>>, vector<128x128xf32>
    %cst_117 = arith.constant dense<0.000000e+00> : vector<8x128xf32>
    %552 = tpu.matmul %550, %551, %cst_117 {dimension_numbers = #tpu.dot_dimension_numbers<[1], [0], [0], [1], [0, 0, 1, 1], [], []>} : vector<8x128xf32>, vector<128x128xf32>, vector<8x128xf32> -> vector<8x128xf32>
    %c0_118 = arith.constant 0 : index
    %c0_119 = arith.constant 0 : index
    %553 = vector.load %arg11[%c0_118, %c0_119] : memref<1x128xf32, #tpu.memory_space<vmem>>, vector<1x128xf32>
    %554 = vector.broadcast %553 : vector<1x128xf32> to vector<8x128xf32>
    %555 = arith.addf %552, %554 : vector<8x128xf32>
    %c0_120 = arith.constant 0 : index
    %c0_121 = arith.constant 0 : index
    %556 = vector.load %arg12[%c0_120, %c0_121] : memref<128x2xf32, #tpu.memory_space<vmem>>, vector<128x2xf32>
    %cst_122 = arith.constant dense<0.000000e+00> : vector<8x2xf32>
    %557 = tpu.matmul %555, %556, %cst_122 {dimension_numbers = #tpu.dot_dimension_numbers<[1], [0], [0], [1], [0, 0, 1, 1], [], []>} : vector<8x128xf32>, vector<128x2xf32>, vector<8x2xf32> -> vector<8x2xf32>
    %c0_123 = arith.constant 0 : index
    %c0_124 = arith.constant 0 : index
    %558 = vector.load %arg13[%c0_123, %c0_124] : memref<1x2xf32, #tpu.memory_space<vmem>>, vector<1x2xf32>
    %559 = vector.broadcast %558 : vector<1x2xf32> to vector<8x2xf32>
    %560 = arith.addf %557, %559 : vector<8x2xf32>
    %cst_125 = arith.constant dense<0xFF800000> : vector<8xf32>
    %561 = vector.multi_reduction <maximumf>, %560, %cst_125 [1] : vector<8x2xf32> to vector<8xf32>
    %562 = vector.shape_cast %561 : vector<8xf32> to vector<8x1xf32>
    %563 = vector.broadcast %562 : vector<8x1xf32> to vector<8x2xf32>
    %564 = arith.subf %560, %563 : vector<8x2xf32>
    %565 = math.exp %564 : vector<8x2xf32>
    %cst_126 = arith.constant dense<0.000000e+00> : vector<8xf32>
    %566 = vector.multi_reduction <add>, %565, %cst_126 [1] : vector<8x2xf32> to vector<8xf32>
    %567 = vector.shape_cast %566 : vector<8xf32> to vector<8x1xf32>
    %568 = math.log %567 : vector<8x1xf32>
    %569 = vector.broadcast %568 : vector<8x1xf32> to vector<8x2xf32>
    %570 = arith.subf %564, %569 : vector<8x2xf32>
    %c0_127 = arith.constant 0 : index
    %c0_128 = arith.constant 0 : index
    %571 = vector.load %arg14[%c0_127, %c0_128] : memref<8x2xf32, #tpu.memory_space<vmem>>, vector<8x2xf32>
    tpu.vector_store %arg14[%c0_127, %c0_128], %570 {strides = array<i32>} : memref<8x2xf32, #tpu.memory_space<vmem>>, vector<8x2xf32>,
    return
  }
}

</mosaic_0001>

<bundles_post_ra>
// kernel: genderperformr_forward.1
= control target key start
LH: loop header
LB: loop body
LE: loop exit
PB: predicated region body
PF: predicated region fallthrough
CT: control target
= control target key end

     0   :  { %19 = vsyncpa [#allocation3], 0  ;;  %s9212_s0 = inlined_call_operand.vmem [shape: f32[8,8,512], index: 0, kind: input, shape index: {}]   ;;  %s9213_s1 = inlined_call_operand.vmem [shape: f32[128,512], index: 1, kind: input, shape index: {}]   ;;  %s9214_s2 = inlined_call_operand.hbm [shape: f32[128,512], index: 2, kind: input, shape index: {}]   ;;  %s9215_s3 = inlined_call_operand.hbm [shape: f32[128,512], index: 3, kind: input, shape index: {}]   ;;  %s9216_s4 = inlined_call_operand.vmem [shape: f32[1,512], index: 4, kind: input, shape index: {}]   ;;  %s9217_s5 = inlined_call_operand.vmem [shape: s32[8,1], index: 5, kind: input, shape index: {}]   ;;  %s9218_s6 = inlined_call_operand.vmem [shape: f32[1,128], index: 6, kind: input, shape index: {}]   ;;  %s9219_s7 = inlined_call_operand.vmem [shape: f32[1,128], index: 7, kind: input, shape index: {}]   ;;  %s9220_s8 = inlined_call_operand.vmem [shape: f32[1,128], index: 8, kind: input, shape index: {}]   ;;  %s9221_s9 = inlined_call_operand.vmem [shape: f32[1,128], index: 9, kind: input, shape index: {}]   ;;  %s9222_s10 = inlined_call_operand.vmem [shape: f32[128,128], index: 10, kind: input, shape index: {}]   ;;  %s9223_s11 = inlined_call_operand.vmem [shape: f32[1,128], index: 11, kind: input, shape index: {}]   ;;  %s9224_s12 = inlined_call_operand.vmem [shape: f32[128,2], index: 12, kind: input, shape index: {}]   ;;  %s9225_s13 = inlined_call_operand.vmem [shape: f32[1,2], index: 13, kind: input, shape index: {}]   ;;  %s9226_s14 = inlined_call_operand.vmem [shape: f32[8,2], index: 14, kind: output, shape index: {}]  }
   0x1   :  { %s29_s15 = sshll.u32 %s9214_s2, 4  ;;  %s30_s15 = int_to_ptr.hbm [resolvable:$true] %s29_s15 }
   0x2   :  { %20 = vsyncpa [#allocation5], 0  ;;  %s4484_s16 = smov [#allocation2]   ;;  %s42_s20 = sshll.u32 %s9215_s3, 4  ;;  %s43_s20 = int_to_ptr.hbm [resolvable:$true] %s42_s20 }
   0x3   :  { %s31_s17 = sshll.u32 %s4484_s16, 4  ;;  %s4485_s21 = smov 512   ;;  %s32_s17 = int_to_ptr.vmem [resolvable:$true] %s31_s17 }
   0x4   :  { %s4486_s22 = smov 32   ;;  %s4487_s23 = smov [#allocation4]  }
   0x5   :  { %37 = dma.hbm_to_vmem [thread:$0]  %s30_s15, 8192, %s32_s17, [#allocation3], %s4485_s21, %s4485_s21, %s4486_s22  }
   0x6   :  { %s44_s24 = sshll.u32 %s4487_s23, 4  ;;  %s45_s24 = int_to_ptr.vmem [resolvable:$true] %s44_s24 }
   0x7   :  { %50 = dma.hbm_to_vmem [thread:$0]  %s43_s20, 8192, %s45_s24, [#allocation5], %s4485_s21, %s4485_s21, %s4486_s22  }
   0x8   :  { %4480 = dma.done.wait [#allocation3], 8192  }
   0x9   :  { %4481 = vsyncadd [#allocation3], 4294959104 }
   0xa   :  { %4482 = dma.done.wait [#allocation5], 8192  }
   0xb   :  { %4483 = vsyncadd [#allocation5], 4294959104  ;;  %v4574_v0 = vld [vmem:[%s9213_s1 + $0x1e0] sm:$0xff]  ;;  %v4579_v1 = vld [vmem:[%s9213_s1 + $0x1e8] sm:$0xff]  ;;  %v9232_v61 = vmov 0.0  }
   0xc   :  { %v4584_v2 = vld [vmem:[%s9213_s1 + $0x1f8] sm:$0xff]  ;;  %277 = vmatpush.msra.mxu0 %v4574_v0  ;;  %297 = vmatpush.msra.mxu1 %v4579_v1  ;;  %v4591_v3 = vld [vmem:[%s9213_s1 + $0x1c0] sm:$0xff]  ;;  %v4596_v4 = vld [vmem:[%s9213_s1 + $0x1c8] sm:$0xff] }
   0xd   :  { %v4601_v5 = vld [vmem:[%s9213_s1 + $0x1d8] sm:$0xff]  ;;  %337 = vmatpush.msra.mxu3 %v4584_v2  ;;  %v4607_v6 = vld [vmem:[%s9213_s1 + $0x1a0] sm:$0xff]  ;;  %v4612_v7 = vld [vmem:[%s9213_s1 + $0x1a8] sm:$0xff] }
   0xe   :  { %278 = vmatpush.msra.mxu0 %v4591_v3  ;;  %298 = vmatpush.msra.mxu1 %v4596_v4  ;;  %v4619_v8 = vld [vmem:[%s9213_s1 + $0x1b8] sm:$0xff]  ;;  %v4625_v9 = vld [vmem:[%s9213_s1 + $0x180] sm:$0xff]  ;;  %v4630_v10 = vld [vmem:[%s9213_s1 + $0x188] sm:$0xff] }
   0xf   :  { %338 = vmatpush.msra.mxu3 %v4601_v5  ;;  %v4637_v11 = vld [vmem:[%s9213_s1 + $0x198] sm:$0xff]  ;;  %v4643_v12 = vld [vmem:[%s9213_s1 + $0x160] sm:$0xff]  ;;  %v4648_v13 = vld [vmem:[%s9213_s1 + $0x168] sm:$0xff] }
  0x10   :  { %279 = vmatpush.msra.mxu0 %v4607_v6  ;;  %299 = vmatpush.msra.mxu1 %v4612_v7  ;;  %v4655_v14 = vld [vmem:[%s9213_s1 + $0x178] sm:$0xff]  ;;  %v4661_v15 = vld [vmem:[%s9213_s1 + $0x140] sm:$0xff]  ;;  %v4666_v16 = vld [vmem:[%s9213_s1 + $0x148] sm:$0xff] }
  0x11   :  { %339 = vmatpush.msra.mxu3 %v4619_v8  ;;  %v4671_v17 = vld [vmem:[%s9213_s1 + $0x1f0] sm:$0xff]  ;;  %v4678_v18 = vld [vmem:[%s9213_s1 + $0x158] sm:$0xff]  ;;  %v4689_v20 = vld [vmem:[%s9213_s1 + $0x120] sm:$0xff] }
  0x12   :  { %280 = vmatpush.msra.mxu0 %v4625_v9  ;;  %300 = vmatpush.msra.mxu1 %v4630_v10  ;;  %v4683_v19 = vld [vmem:[%s9213_s1 + $0x1d0] sm:$0xff]  ;;  %v4694_v21 = vld [vmem:[%s9213_s1 + $0x128] sm:$0xff]  ;;  %v4702_v22 = vld [vmem:[%s9213_s1 + $0x138] sm:$0xff] }
  0x13   :  { %340 = vmatpush.msra.mxu3 %v4637_v11  ;;  %317 = vmatpush.msra.mxu2 %v4671_v17  ;;  %v4707_v23 = vld [vmem:[%s9213_s1 + $0x1b0] sm:$0xff]  ;;  %v4713_v24 = vld [vmem:[%s9213_s1 + $0x100] sm:$0xff]  ;;  %v4718_v25 = vld [vmem:[%s9213_s1 + $0x108] sm:$0xff] }
  0x14   :  { %281 = vmatpush.msra.mxu0 %v4643_v12  ;;  %301 = vmatpush.msra.mxu1 %v4648_v13  ;;  %v4726_v26 = vld [vmem:[%s9213_s1 + $0x118] sm:$0xff]  ;;  %v4731_v27 = vld [vmem:[%s9213_s1 + $0x190] sm:$0xff]  ;;  %v4737_v28 = vld [vmem:[%s9213_s1 + $0xe0] sm:$0xff] }
  0x15   :  { %341 = vmatpush.msra.mxu3 %v4655_v14  ;;  %318 = vmatpush.msra.mxu2 %v4683_v19  ;;  %v4742_v29 = vld [vmem:[%s9213_s1 + $0xe8] sm:$0xff]  ;;  %v4750_v30 = vld [vmem:[%s9213_s1 + $0xf8] sm:$0xff]  ;;  %v4755_v31 = vld [vmem:[%s9213_s1 + $0x170] sm:$0xff] }
  0x16   :  { %282 = vmatpush.msra.mxu0 %v4661_v15  ;;  %302 = vmatpush.msra.mxu1 %v4666_v16  ;;  %v4761_v32 = vld [vmem:[%s9213_s1 + $0xc0] sm:$0xff]  ;;  %v4766_v33 = vld [vmem:[%s9213_s1 + $0xc8] sm:$0xff]  ;;  %v4774_v34 = vld [vmem:[%s9213_s1 + $0xd8] sm:$0xff] }
  0x17   :  { %342 = vmatpush.msra.mxu3 %v4678_v18  ;;  %319 = vmatpush.msra.mxu2 %v4707_v23  ;;  %v4779_v35 = vld [vmem:[%s9213_s1 + $0x150] sm:$0xff]  ;;  %v4785_v36 = vld [vmem:[%s9213_s1 + $0xa0] sm:$0xff]  ;;  %v4790_v37 = vld [vmem:[%s9213_s1 + $0xa8] sm:$0xff] }
  0x18   :  { %283 = vmatpush.msra.mxu0 %v4689_v20  ;;  %303 = vmatpush.msra.mxu1 %v4694_v21  ;;  %v4798_v38 = vld [vmem:[%s9213_s1 + $0xb8] sm:$0xff]  ;;  %v4803_v39 = vld [vmem:[%s9213_s1 + $0x130] sm:$0xff]  ;;  %v4809_v40 = vld [vmem:[%s9213_s1 + $0x80] sm:$0xff] }
  0x19   :  { %343 = vmatpush.msra.mxu3 %v4702_v22  ;;  %320 = vmatpush.msra.mxu2 %v4731_v27  ;;  %v4814_v41 = vld [vmem:[%s9213_s1 + $0x88] sm:$0xff]  ;;  %v4822_v42 = vld [vmem:[%s9213_s1 + $0x98] sm:$0xff]  ;;  %v4827_v43 = vld [vmem:[%s9213_s1 + $0x110] sm:$0xff] }
  0x1a   :  { %284 = vmatpush.msra.mxu0 %v4713_v24  ;;  %304 = vmatpush.msra.mxu1 %v4718_v25  ;;  %v4833_v44 = vld [vmem:[%s9213_s1 + $0x60] sm:$0xff]  ;;  %v4838_v45 = vld [vmem:[%s9213_s1 + $0x68] sm:$0xff]  ;;  %v4846_v46 = vld [vmem:[%s9213_s1 + $0x78] sm:$0xff] }
  0x1b   :  { %344 = vmatpush.msra.mxu3 %v4726_v26  ;;  %321 = vmatpush.msra.mxu2 %v4755_v31  ;;  %9856 = vst [vmem:[#allocation8_spill] sm:$0xff] %v4846_v46  ;;  %v4851_v47 = vld [vmem:[%s9213_s1 + $0xf0] sm:$0xff]  ;;  %v4857_v48 = vld [vmem:[%s9213_s1 + $0x40] sm:$0xff]  ;;  %v4862_v49 = vld [vmem:[%s9213_s1 + $0x48] sm:$0xff] }
  0x1c   :  { %285 = vmatpush.msra.mxu0 %v4737_v28  ;;  %305 = vmatpush.msra.mxu1 %v4742_v29  ;;  %9857 = vst [vmem:[#allocation9_spill] sm:$0xff] %v4857_v48  ;;  %v4870_v50 = vld [vmem:[%s9213_s1 + $0x58] sm:$0xff]  ;;  %v4875_v51 = vld [vmem:[%s9213_s1 + $0xd0] sm:$0xff]  ;;  %v4881_v52 = vld [vmem:[%s9213_s1 + $0x20] sm:$0xff] }
  0x1d   :  { %345 = vmatpush.msra.mxu3 %v4750_v30  ;;  %322 = vmatpush.msra.mxu2 %v4779_v35  ;;  %9858 = vst [vmem:[#allocation10_spill] sm:$0xff] %v4862_v49  ;;  %v4886_v53 = vld [vmem:[%s9213_s1 + $0x28] sm:$0xff]  ;;  %v4894_v54 = vld [vmem:[%s9213_s1 + $0x38] sm:$0xff]  ;;  %v4899_v55 = vld [vmem:[%s9213_s1 + $0xb0] sm:$0xff] }
  0x1e   :  { %286 = vmatpush.msra.mxu0 %v4761_v32  ;;  %306 = vmatpush.msra.mxu1 %v4766_v33  ;;  %9859 = vst [vmem:[#allocation11_spill] sm:$0xff] %v4870_v50  ;;  %v4905_v56 = vld [vmem:[%s9213_s1] sm:$0xff]  ;;  %v4910_v57 = vld [vmem:[%s9213_s1 + $0x8] sm:$0xff]  ;;  %v4918_v58 = vld [vmem:[%s9213_s1 + $0x18] sm:$0xff] }
  0x1f   :  { %346 = vmatpush.msra.mxu3 %v4774_v34  ;;  %323 = vmatpush.msra.mxu2 %v4803_v39  ;;  %9860 = vst [vmem:[#allocation12_spill] sm:$0xff] %v4881_v52  ;;  %v4927_v59 = vld [vmem:[%s9213_s1 + $0x90] sm:$0xff]  ;;  %v4929_v60 = vld [vmem:[#allocation4 + $0x1e0] sm:$0xff]  ;;  %v4933_v62 = vld [vmem:[#allocation4 + $0x1e8] sm:$0xff] }
  0x20   :  { %287 = vmatpush.msra.mxu0 %v4785_v36  ;;  %307 = vmatpush.msra.mxu1 %v4790_v37  ;;  %9861 = vst [vmem:[#allocation13_spill] sm:$0xff] %v4886_v53  ;;  %v4935_v63 = vld [vmem:[#allocation4 + $0x1f8] sm:$0xff] }
  0x21   :  { %347 = vmatpush.msra.mxu3 %v4798_v38  ;;  %324 = vmatpush.msra.mxu2 %v4827_v43  ;;  %9862 = vst [vmem:[#allocation14_spill] sm:$0xff] %v4894_v54 }
  0x22   :  { %288 = vmatpush.msra.mxu0 %v4809_v40  ;;  %308 = vmatpush.msra.mxu1 %v4814_v41  ;;  %9863 = vst [vmem:[#allocation15_spill] sm:$0xff] %v4905_v56 }
  0x23   :  { %348 = vmatpush.msra.mxu3 %v4822_v42  ;;  %325 = vmatpush.msra.mxu2 %v4851_v47  ;;  %9864 = vst [vmem:[#allocation16_spill] sm:$0xff] %v4910_v57 }
  0x24   :  { %289 = vmatpush.msra.mxu0 %v4833_v44  ;;  %309 = vmatpush.msra.mxu1 %v4838_v45  ;;  %9865 = vst [vmem:[#allocation17_spill] sm:$0xff] %v4918_v58 }
  0x25   :  { %349 = vmatpush.msra.mxu3 %v4846_v46  ;;  %326 = vmatpush.msra.mxu2 %v4875_v51  ;;  %9866 = vst [vmem:[#allocation18_spill] sm:$0xff] %v4929_v60  ;;  %v5025_v46 = vld [vmem:[#allocation4 + $0x100] sm:$0xff] }
  0x26   :  { %290 = vmatpush.msra.mxu0 %v4857_v48  ;;  %310 = vmatpush.msra.mxu1 %v4862_v49  ;;  %9867 = vst [vmem:[#allocation19_spill] sm:$0xff] %v4933_v62  ;;  %v4985_v49 = vld [vmem:[%s9213_s1 + $0x10] sm:$0xff]  ;;  %v5011_v48 = vld [vmem:[#allocation4 + $0x158] sm:$0xff] }
  0x27   :  { %350 = vmatpush.msra.mxu3 %v4870_v50  ;;  %327 = vmatpush.msra.mxu2 %v4899_v55  ;;  %9868 = vst [vmem:[#allocation20_spill] sm:$0xff] %v4935_v63  ;;  %v4970_v50 = vld [vmem:[%s9213_s1 + $0x30] sm:$0xff] }
  0x28   :  { %291 = vmatpush.msra.mxu0 %v4881_v52  ;;  %311 = vmatpush.msra.mxu1 %v4886_v53  ;;  %v4955_v53 = vld [vmem:[%s9213_s1 + $0x50] sm:$0xff]  ;;  %v4965_v52 = vld [vmem:[#allocation4 + $0x1b8] sm:$0xff]  ;;  %9876 = vst [vmem:[#allocation28_spill] sm:$0xff] %v4970_v50 }
  0x29   :  { %351 = vmatpush.msra.mxu3 %v4894_v54  ;;  %328 = vmatpush.msra.mxu2 %v4927_v59  ;;  %v4950_v54 = vld [vmem:[#allocation4 + $0x1d8] sm:$0xff]  ;;  %9872 = vst [vmem:[#allocation24_spill] sm:$0xff] %v4955_v53 }
  0x2a   :  { %292 = vmatpush.msra.mxu0 %v4905_v56  ;;  %312 = vmatpush.msra.mxu1 %v4910_v57  ;;  %v4942_v57 = vld [vmem:[%s9213_s1 + $0x70] sm:$0xff]  ;;  %v4944_v56 = vld [vmem:[#allocation4 + $0x1c0] sm:$0xff]  ;;  %9871 = vst [vmem:[#allocation23_spill] sm:$0xff] %v4950_v54 }
  0x2b   :  { %352 = vmatpush.msra.mxu3 %v4918_v58  ;;  %293 = vmatmul.f32.vlgmr.msra.gmra.mxu0 %v9232_v61  ;;  %9869 = vst [vmem:[#allocation21_spill] sm:$0xff] %v4944_v56  ;;  %v4948_v58 = vld [vmem:[#allocation4 + $0x1c8] sm:$0xff] }
  0x2c   :  { %313 = vmatmul.f32.vlgmr.msra.gmra.mxu1 %v9232_v61  ;;  %353 = vmatmul.f32.vlgmr.msra.gmra.mxu3 %v9232_v61  ;;  %9870 = vst [vmem:[#allocation22_spill] sm:$0xff] %v4948_v58  ;;  %v4959_v61 = vld [vmem:[#allocation4 + $0x1a0] sm:$0xff] }
  0x2d   :  { %424 = vmatpush.msrb.mxu0 %v4929_v60  ;;  %444 = vmatpush.msrb.mxu1 %v4933_v62  ;;  %9873 = vst [vmem:[#allocation25_spill] sm:$0xff] %v4959_v61  ;;  %v4963_v60 = vld [vmem:[#allocation4 + $0x1a8] sm:$0xff]  ;;  %v4980_v62 = vld [vmem:[#allocation4 + $0x198] sm:$0xff] }
  0x2e   :  { %484 = vmatpush.msrb.mxu3 %v4935_v63  ;;  %329 = vmatpush.msra.mxu2 %v4942_v57  ;;  %9874 = vst [vmem:[#allocation26_spill] sm:$0xff] %v4963_v60  ;;  %v4974_v63 = vld [vmem:[#allocation4 + $0x180] sm:$0xff] }
  0x2f   :  { %425 = vmatpush.msrb.mxu0 %v4944_v56  ;;  %9875 = vst [vmem:[#allocation27_spill] sm:$0xff] %v4965_v52  ;;  %445 = vmatpush.msrb.mxu1 %v4948_v58  ;;  %v4978_v56 = vld [vmem:[#allocation4 + $0x188] sm:$0xff]  ;;  %v4995_v58 = vld [vmem:[#allocation4 + $0x1f0] sm:$0xff] }
  0x30   :  { %485 = vmatpush.msrb.mxu3 %v4950_v54  ;;  %9877 = vst [vmem:[#allocation29_spill] sm:$0xff] %v4974_v63  ;;  %330 = vmatpush.msra.mxu2 %v4955_v53  ;;  %v4989_v54 = vld [vmem:[#allocation4 + $0x160] sm:$0xff]  ;;  %v4999_v53 = vld [vmem:[#allocation4 + $0x178] sm:$0xff] }
  0x31   :  { %426 = vmatpush.msrb.mxu0 %v4959_v61  ;;  %9878 = vst [vmem:[#allocation30_spill] sm:$0xff] %v4978_v56  ;;  %446 = vmatpush.msrb.mxu1 %v4963_v60  ;;  %v4993_v61 = vld [vmem:[#allocation4 + $0x168] sm:$0xff] }
  0x32   :  { %9879 = vst [vmem:[#allocation31_spill] sm:$0xff] %v4980_v62  ;;  %486 = vmatpush.msrb.mxu3 %v4965_v52  ;;  %331 = vmatpush.msra.mxu2 %v4970_v50  ;;  %v5003_v52 = vld [vmem:[#allocation4 + $0x140] sm:$0xff]  ;;  %v5005_v60 = vld [vmem:[#allocation4 + $0x148] sm:$0xff]  ;;  %v9887_v50 = vmov 0.0  }
  0x33   :  { %9880 = vst [vmem:[#allocation32_spill] sm:$0xff] %v4985_v49  ;;  %427 = vmatpush.msrb.mxu0 %v4974_v63  ;;  %447 = vmatpush.msrb.mxu1 %v4978_v56  ;;  %v5008_v63 = vld [vmem:[#allocation4 + $0x1d0] sm:$0xff]  ;;  %v5017_v56 = vld [vmem:[#allocation4 + $0x128] sm:$0xff] }
  0x34   :  { %9881 = vst [vmem:[#allocation33_spill] sm:$0xff] %v4989_v54  ;;  %487 = vmatpush.msrb.mxu3 %v4980_v62  ;;  %332 = vmatpush.msra.mxu2 %v4985_v49  ;;  %v5015_v62 = vld [vmem:[#allocation4 + $0x120] sm:$0xff]  ;;  %v5023_v49 = vld [vmem:[#allocation4 + $0x138] sm:$0xff] }
  0x35   :  { %9882 = vst [vmem:[#allocation34_spill] sm:$0xff] %v4993_v61  ;;  %428 = vmatpush.msrb.mxu0 %v4989_v54  ;;  %333 = vmatmul.f32.vlgmr.msra.gmra.mxu2 %v9887_v50  ;;  %v5019_v54 = vld [vmem:[#allocation4 + $0x1b0] sm:$0xff] }
  0x36   :  { %9883 = vst [vmem:[#allocation35_spill] sm:$0xff] %v4995_v58  ;;  %448 = vmatpush.msrb.mxu1 %v4993_v61  ;;  %464 = vmatpush.msrb.mxu2 %v4995_v58  ;;  %v5029_v61 = vld [vmem:[#allocation4 + $0x108] sm:$0xff]  ;;  %v5035_v58 = vld [vmem:[#allocation4 + $0x118] sm:$0xff] }
  0x37   :  { %9884 = vst [vmem:[#allocation36_spill] sm:$0xff] %v4999_v53  ;;  %488 = vmatpush.msrb.mxu3 %v4999_v53  ;;  %429 = vmatpush.msrb.mxu0 %v5003_v52  ;;  %v5031_v53 = vld [vmem:[#allocation4 + $0x190] sm:$0xff] }
  0x38   :  { %9885 = vst [vmem:[#allocation37_spill] sm:$0xff] %v5003_v52  ;;  %449 = vmatpush.msrb.mxu1 %v5005_v60  ;;  %465 = vmatpush.msrb.mxu2 %v5008_v63  ;;  %v5037_v52 = vld [vmem:[#allocation4 + $0xe0] sm:$0xff] }
  0x39   :  { %9886 = vst [vmem:[#allocation38_spill] sm:$0xff] %v5005_v60  ;;  %489 = vmatpush.msrb.mxu3 %v5011_v48  ;;  %430 = vmatpush.msrb.mxu0 %v5015_v62  ;;  %v5041_v60 = vld [vmem:[#allocation4 + $0xe8] sm:$0xff] }
  0x3a   :  { %9888 = vst [vmem:[#allocation39_spill] sm:$0xff] %v5008_v63  ;;  %450 = vmatpush.msrb.mxu1 %v5017_v56  ;;  %466 = vmatpush.msrb.mxu2 %v5019_v54  ;;  %v5043_v63 = vld [vmem:[#allocation4 + $0x170] sm:$0xff] }
  0x3b   :  { %9889 = vst [vmem:[#allocation40_spill] sm:$0xff] %v5011_v48  ;;  %490 = vmatpush.msrb.mxu3 %v5023_v49  ;;  %431 = vmatpush.msrb.mxu0 %v5025_v46  ;;  %v5047_v48 = vld [vmem:[#allocation4 + $0xf8] sm:$0xff] }
  0x3c   :  { %9890 = vst [vmem:[#allocation41_spill] sm:$0xff] %v5015_v62  ;;  %451 = vmatpush.msrb.mxu1 %v5029_v61  ;;  %467 = vmatpush.msrb.mxu2 %v5031_v53  ;;  %v5053_v62 = vld [vmem:[#allocation4 + $0xc8] sm:$0xff] }
  0x3d   :  { %9891 = vst [vmem:[#allocation42_spill] sm:$0xff] %v5017_v56  ;;  %491 = vmatpush.msrb.mxu3 %v5035_v58  ;;  %v5051_v56 = vld [vmem:[#allocation4 + $0xc0] sm:$0xff]  ;;  %432 = vmatpush.msrb.mxu0 %v5037_v52 }
  0x3e   :  { %9892 = vst [vmem:[#allocation43_spill] sm:$0xff] %v5019_v54  ;;  %v5055_v54 = vld [vmem:[#allocation4 + $0x150] sm:$0xff]  ;;  %452 = vmatpush.msrb.mxu1 %v5041_v60  ;;  %468 = vmatpush.msrb.mxu2 %v5043_v63 }
  0x3f   :  { %9893 = vst [vmem:[#allocation44_spill] sm:$0xff] %v5023_v49  ;;  %v5059_v49 = vld [vmem:[#allocation4 + $0xd8] sm:$0xff]  ;;  %492 = vmatpush.msrb.mxu3 %v5047_v48  ;;  %433 = vmatpush.msrb.mxu0 %v5051_v56 }
  0x40   :  { %9894 = vst [vmem:[#allocation45_spill] sm:$0xff] %v5025_v46  ;;  %v5065_v46 = vld [vmem:[#allocation4 + $0xa8] sm:$0xff]  ;;  %453 = vmatpush.msrb.mxu1 %v5053_v62  ;;  %469 = vmatpush.msrb.mxu2 %v5055_v54 }
  0x41   :  { %9895 = vst [vmem:[#allocation46_spill] sm:$0xff] %v5029_v61  ;;  %v5063_v61 = vld [vmem:[#allocation4 + $0xa0] sm:$0xff]  ;;  %493 = vmatpush.msrb.mxu3 %v5059_v49 }
  0x42   :  { %9896 = vst [vmem:[#allocation47_spill] sm:$0xff] %v5031_v53  ;;  %v5071_v53 = vld [vmem:[#allocation4 + $0xb8] sm:$0xff]  ;;  %434 = vmatpush.msrb.mxu0 %v5063_v61  ;;  %454 = vmatpush.msrb.mxu1 %v5065_v46 }
  0x43   :  { %9897 = vst [vmem:[#allocation48_spill] sm:$0xff] %v5035_v58  ;;  %v5067_v58 = vld [vmem:[#allocation4 + $0x130] sm:$0xff]  ;;  %494 = vmatpush.msrb.mxu3 %v5071_v53 }
  0x44   :  { %9898 = vst [vmem:[#allocation49_spill] sm:$0xff] %v5037_v52  ;;  %v5077_v52 = vld [vmem:[#allocation4 + $0x88] sm:$0xff]  ;;  %470 = vmatpush.msrb.mxu2 %v5067_v58 }
  0x45   :  { %9899 = vst [vmem:[#allocation50_spill] sm:$0xff] %v5041_v60  ;;  %v5075_v60 = vld [vmem:[#allocation4 + $0x80] sm:$0xff]  ;;  %455 = vmatpush.msrb.mxu1 %v5077_v52 }
  0x46   :  { %9900 = vst [vmem:[#allocation51_spill] sm:$0xff] %v5043_v63  ;;  %v5083_v63 = vld [vmem:[#allocation4 + $0x98] sm:$0xff]  ;;  %435 = vmatpush.msrb.mxu0 %v5075_v60 }
  0x47   :  { %9901 = vst [vmem:[#allocation52_spill] sm:$0xff] %v5047_v48  ;;  %v5079_v48 = vld [vmem:[#allocation4 + $0x110] sm:$0xff]  ;;  %495 = vmatpush.msrb.mxu3 %v5083_v63 }
  0x48   :  { %9902 = vst [vmem:[#allocation53_spill] sm:$0xff] %v5051_v56  ;;  %v5089_v56 = vld [vmem:[#allocation4 + $0x68] sm:$0xff]  ;;  %471 = vmatpush.msrb.mxu2 %v5079_v48 }
  0x49   :  { %9903 = vst [vmem:[#allocation54_spill] sm:$0xff] %v5053_v62  ;;  %v5087_v62 = vld [vmem:[#allocation4 + $0x60] sm:$0xff]  ;;  %456 = vmatpush.msrb.mxu1 %v5089_v56 }
  0x4a   :  { %9904 = vst [vmem:[#allocation55_spill] sm:$0xff] %v5055_v54  ;;  %v5095_v54 = vld [vmem:[#allocation4 + $0x78] sm:$0xff]  ;;  %436 = vmatpush.msrb.mxu0 %v5087_v62 }
  0x4b   :  { %9905 = vst [vmem:[#allocation56_spill] sm:$0xff] %v5059_v49  ;;  %v5091_v49 = vld [vmem:[#allocation4 + $0xf0] sm:$0xff]  ;;  %496 = vmatpush.msrb.mxu3 %v5095_v54 }
  0x4c   :  { %9906 = vst [vmem:[#allocation57_spill] sm:$0xff] %v5063_v61  ;;  %v5101_v61 = vld [vmem:[#allocation4 + $0x48] sm:$0xff]  ;;  %472 = vmatpush.msrb.mxu2 %v5091_v49 }
  0x4d   :  { %9907 = vst [vmem:[#allocation58_spill] sm:$0xff] %v5065_v46  ;;  %v5099_v46 = vld [vmem:[#allocation4 + $0x40] sm:$0xff]  ;;  %457 = vmatpush.msrb.mxu1 %v5101_v61 }
  0x4e   :  { %9908 = vst [vmem:[#allocation59_spill] sm:$0xff] %v5067_v58  ;;  %v5107_v58 = vld [vmem:[#allocation4 + $0x58] sm:$0xff]  ;;  %437 = vmatpush.msrb.mxu0 %v5099_v46 }
  0x4f   :  { %9909 = vst [vmem:[#allocation60_spill] sm:$0xff] %v5071_v53  ;;  %v5103_v53 = vld [vmem:[#allocation4 + $0xd0] sm:$0xff]  ;;  %497 = vmatpush.msrb.mxu3 %v5107_v58 }
  0x50   :  { %9910 = vst [vmem:[#allocation61_spill] sm:$0xff] %v5075_v60  ;;  %v5113_v60 = vld [vmem:[#allocation4 + $0x28] sm:$0xff]  ;;  %473 = vmatpush.msrb.mxu2 %v5103_v53 }
  0x51   :  { %9911 = vst [vmem:[#allocation62_spill] sm:$0xff] %v5077_v52  ;;  %v5111_v52 = vld [vmem:[#allocation4 + $0x20] sm:$0xff]  ;;  %458 = vmatpush.msrb.mxu1 %v5113_v60 }
  0x52   :  { %9912 = vst [vmem:[#allocation63_spill] sm:$0xff] %v5079_v48  ;;  %v5119_v48 = vld [vmem:[#allocation4 + $0x38] sm:$0xff]  ;;  %438 = vmatpush.msrb.mxu0 %v5111_v52 }
  0x53   :  { %9913 = vst [vmem:[#allocation64_spill] sm:$0xff] %v5083_v63  ;;  %v5115_v63 = vld [vmem:[#allocation4 + $0xb0] sm:$0xff]  ;;  %498 = vmatpush.msrb.mxu3 %v5119_v48 }
  0x54   :  { %9914 = vst [vmem:[#allocation65_spill] sm:$0xff] %v5087_v62  ;;  %v5125_v62 = vld [vmem:[#allocation4 + $0x8] sm:$0xff]  ;;  %474 = vmatpush.msrb.mxu2 %v5115_v63 }
  0x55   :  { %9915 = vst [vmem:[#allocation66_spill] sm:$0xff] %v5089_v56  ;;  %v5123_v56 = vld [vmem:[#allocation4] sm:$0xff]  ;;  %459 = vmatpush.msrb.mxu1 %v5125_v62 }
  0x56   :  { %9916 = vst [vmem:[#allocation67_spill] sm:$0xff] %v5091_v49  ;;  %v5131_v49 = vld [vmem:[#allocation4 + $0x18] sm:$0xff]  ;;  %439 = vmatpush.msrb.mxu0 %v5123_v56  ;;  %460 = vmatmul.f32.vlgmr.msrb.gmra.mxu1 %v9887_v50 }
  0x57   :  { %9917 = vst [vmem:[#allocation68_spill] sm:$0xff] %v5095_v54  ;;  %v5127_v54 = vld [vmem:[#allocation4 + $0x90] sm:$0xff]  ;;  %499 = vmatpush.msrb.mxu3 %v5131_v49  ;;  %440 = vmatmul.f32.vlgmr.msrb.gmra.mxu0 %v9887_v50 }
  0x58   :  { %9918 = vst [vmem:[#allocation69_spill] sm:$0xff] %v5099_v46  ;;  %v5137_v46 = vld [vmem:[#allocation2 + $0x1e8] sm:$0xff]  ;;  %475 = vmatpush.msrb.mxu2 %v5127_v54  ;;  %500 = vmatmul.f32.vlgmr.msrb.gmra.mxu3 %v9887_v50 }
  0x59   :  { %9919 = vst [vmem:[#allocation70_spill] sm:$0xff] %v5101_v61  ;;  %v5135_v61 = vld [vmem:[#allocation2 + $0x1e0] sm:$0xff]  ;;  %524 = vmatpush.msra.mxu1 %v5137_v46 }
  0x5a   :  { %9920 = vst [vmem:[#allocation71_spill] sm:$0xff] %v5103_v53  ;;  %v5143_v53 = vld [vmem:[#allocation2 + $0x1f8] sm:$0xff]  ;;  %504 = vmatpush.msra.mxu0 %v5135_v61 }
  0x5b   :  { %9921 = vst [vmem:[#allocation72_spill] sm:$0xff] %v5107_v58  ;;  %v5139_v58 = vld [vmem:[#allocation4 + $0x70] sm:$0xff]  ;;  %564 = vmatpush.msra.mxu3 %v5143_v53 }
  0x5c   :  { %9922 = vst [vmem:[#allocation73_spill] sm:$0xff] %v5111_v52  ;;  %v5149_v52 = vld [vmem:[#allocation2 + $0x1c8] sm:$0xff]  ;;  %476 = vmatpush.msrb.mxu2 %v5139_v58 }
  0x5d   :  { %9923 = vst [vmem:[#allocation74_spill] sm:$0xff] %v5113_v60  ;;  %v5147_v60 = vld [vmem:[#allocation2 + $0x1c0] sm:$0xff]  ;;  %525 = vmatpush.msra.mxu1 %v5149_v52 }
  0x5e   :  { %9924 = vst [vmem:[#allocation75_spill] sm:$0xff] %v5115_v63  ;;  %v5155_v63 = vld [vmem:[#allocation2 + $0x1d8] sm:$0xff]  ;;  %505 = vmatpush.msra.mxu0 %v5147_v60 }
  0x5f   :  { %9925 = vst [vmem:[#allocation76_spill] sm:$0xff] %v5119_v48  ;;  %v5151_v48 = vld [vmem:[#allocation4 + $0x50] sm:$0xff]  ;;  %565 = vmatpush.msra.mxu3 %v5155_v63 }
  0x60   :  { %9926 = vst [vmem:[#allocation77_spill] sm:$0xff] %v5123_v56  ;;  %v5161_v56 = vld [vmem:[#allocation2 + $0x1a8] sm:$0xff]  ;;  %477 = vmatpush.msrb.mxu2 %v5151_v48 }
  0x61   :  { %9927 = vst [vmem:[#allocation78_spill] sm:$0xff] %v5125_v62  ;;  %v5159_v62 = vld [vmem:[#allocation2 + $0x1a0] sm:$0xff]  ;;  %526 = vmatpush.msra.mxu1 %v5161_v56 }
  0x62   :  { %9928 = vst [vmem:[#allocation79_spill] sm:$0xff] %v5127_v54  ;;  %v5167_v54 = vld [vmem:[#allocation2 + $0x1b8] sm:$0xff]  ;;  %506 = vmatpush.msra.mxu0 %v5159_v62 }
  0x63   :  { %9929 = vst [vmem:[#allocation80_spill] sm:$0xff] %v5131_v49  ;;  %v5163_v49 = vld [vmem:[#allocation4 + $0x30] sm:$0xff]  ;;  %566 = vmatpush.msra.mxu3 %v5167_v54 }
  0x64   :  { %9930 = vst [vmem:[#allocation81_spill] sm:$0xff] %v5135_v61  ;;  %v5173_v61 = vld [vmem:[#allocation2 + $0x188] sm:$0xff]  ;;  %478 = vmatpush.msrb.mxu2 %v5163_v49 }
  0x65   :  { %9931 = vst [vmem:[#allocation82_spill] sm:$0xff] %v5137_v46  ;;  %v5171_v46 = vld [vmem:[#allocation2 + $0x180] sm:$0xff]  ;;  %527 = vmatpush.msra.mxu1 %v5173_v61 }
  0x66   :  { %9932 = vst [vmem:[#allocation83_spill] sm:$0xff] %v5139_v58  ;;  %v5179_v58 = vld [vmem:[#allocation2 + $0x198] sm:$0xff]  ;;  %507 = vmatpush.msra.mxu0 %v5171_v46 }
  0x67   :  { %9933 = vst [vmem:[#allocation84_spill] sm:$0xff] %v5143_v53  ;;  %v5175_v53 = vld [vmem:[#allocation4 + $0x10] sm:$0xff]  ;;  %567 = vmatpush.msra.mxu3 %v5179_v58 }
  0x68   :  { %9934 = vst [vmem:[#allocation85_spill] sm:$0xff] %v5147_v60  ;;  %v5185_v60 = vld [vmem:[#allocation2 + $0x160] sm:$0xff]  ;;  %479 = vmatpush.msrb.mxu2 %v5175_v53 }
  0x69   :  { %9935 = vst [vmem:[#allocation86_spill] sm:$0xff] %v5149_v52  ;;  %v5182_v52 = vld [vmem:[#allocation2 + $0x1f0] sm:$0xff]  ;;  %508 = vmatpush.msra.mxu0 %v5185_v60  ;;  %480 = vmatmul.f32.vlgmr.msrb.gmra.mxu2 %v9887_v50  ;;  %v5227_v50 = vld [vmem:[#allocation2 + $0x120] sm:$0xff] }
  0x6a   :  { %9936 = vst [vmem:[#allocation87_spill] sm:$0xff] %v5151_v48  ;;  %v5191_v48 = vld [vmem:[#allocation2 + $0x178] sm:$0xff]  ;;  %544 = vmatpush.msra.mxu2 %v5182_v52 }
  0x6b   :  { %9937 = vst [vmem:[#allocation88_spill] sm:$0xff] %v5155_v63  ;;  %v5189_v63 = vld [vmem:[#allocation2 + $0x168] sm:$0xff]  ;;  %568 = vmatpush.msra.mxu3 %v5191_v48 }
  0x6c   :  { %9938 = vst [vmem:[#allocation89_spill] sm:$0xff] %v5161_v56  ;;  %v5194_v56 = vld [vmem:[#allocation2 + $0x1d0] sm:$0xff]  ;;  %528 = vmatpush.msra.mxu1 %v5189_v63 }
  0x6d   :  { %9939 = vst [vmem:[#allocation90_spill] sm:$0xff] %v5167_v54  ;;  %v5199_v54 = vld [vmem:[#allocation2 + $0x1b0] sm:$0xff]  ;;  %545 = vmatpush.msra.mxu2 %v5194_v56 }
  0x6e   :  { %9940 = vst [vmem:[#allocation91_spill] sm:$0xff] %v5171_v46  ;;  %v5223_v46 = vld [vmem:[#allocation2 + $0x158] sm:$0xff] }
  0x6f   :  { %9941 = vst [vmem:[#allocation92_spill] sm:$0xff] %v5173_v61  ;;  %v5205_v61 = vld [vmem:[#allocation2 + $0x190] sm:$0xff]  ;;  %546 = vmatpush.msra.mxu2 %v5199_v54  ;;  %569 = vmatpush.msra.mxu3 %v5223_v46 }
  0x70   :  { %9942 = vst [vmem:[#allocation93_spill] sm:$0xff] %v5179_v58  ;;  %v5219_v58 = vld [vmem:[#allocation2 + $0x150] sm:$0xff] }
  0x71   :  { %9943 = vst [vmem:[#allocation94_spill] sm:$0xff] %v5185_v60  ;;  %v5211_v60 = vld [vmem:[#allocation2 + $0x170] sm:$0xff]  ;;  %547 = vmatpush.msra.mxu2 %v5205_v61 }
  0x72   :  { %9944 = vst [vmem:[#allocation95_spill] sm:$0xff] %v5189_v63  ;;  %v5217_v63 = vld [vmem:[#allocation2 + $0x148] sm:$0xff] }
  0x73   :  { %9945 = vst [vmem:[#allocation96_spill] sm:$0xff] %v5191_v48  ;;  %548 = vmatpush.msra.mxu2 %v5211_v60  ;;  %v5215_v48 = vld [vmem:[#allocation2 + $0x140] sm:$0xff]  ;;  %529 = vmatpush.msra.mxu1 %v5217_v63 }
  0x74   :  { %9946 = vst [vmem:[#allocation97_spill] sm:$0xff] %v5199_v54  ;;  %509 = vmatpush.msra.mxu0 %v5215_v48  ;;  %v5235_v54 = vld [vmem:[#allocation2 + $0x138] sm:$0xff] }
  0x75   :  { %9947 = vst [vmem:[#allocation98_spill] sm:$0xff] %v5205_v61  ;;  %549 = vmatpush.msra.mxu2 %v5219_v58  ;;  %v5229_v61 = vld [vmem:[#allocation2 + $0x128] sm:$0xff]  ;;  %570 = vmatpush.msra.mxu3 %v5235_v54 }
  0x76   :  { %9948 = vst [vmem:[#allocation99_spill] sm:$0xff] %v5211_v60  ;;  %v5231_v60 = vld [vmem:[#allocation2 + $0x130] sm:$0xff]  ;;  %510 = vmatpush.msra.mxu0 %v5227_v50  ;;  %530 = vmatpush.msra.mxu1 %v5229_v61 }
  0x77   :  { %9949 = vst [vmem:[#allocation100_spill] sm:$0xff] %v5215_v48  ;;  %550 = vmatpush.msra.mxu2 %v5231_v60  ;;  %v5247_v48 = vld [vmem:[#allocation2 + $0x118] sm:$0xff] }
  0x78   :  { %9950 = vst [vmem:[#allocation101_spill] sm:$0xff] %v5217_v63  ;;  %v5239_v63 = vld [vmem:[#allocation2 + $0x100] sm:$0xff]  ;;  %571 = vmatpush.msra.mxu3 %v5247_v48 }
  0x79   :  { %9951 = vst [vmem:[#allocation102_spill] sm:$0xff] %v5219_v58  ;;  %v5241_v58 = vld [vmem:[#allocation2 + $0x108] sm:$0xff]  ;;  %511 = vmatpush.msra.mxu0 %v5239_v63 }
  0x7a   :  { %9952 = vst [vmem:[#allocation103_spill] sm:$0xff] %v5223_v46  ;;  %v5243_v46 = vld [vmem:[#allocation2 + $0x110] sm:$0xff]  ;;  %531 = vmatpush.msra.mxu1 %v5241_v58 }
  0x7b   :  { %9953 = vst [vmem:[#allocation104_spill] sm:$0xff] %v5227_v50  ;;  %551 = vmatpush.msra.mxu2 %v5243_v46  ;;  %v5259_v50 = vld [vmem:[#allocation2 + $0xf8] sm:$0xff] }
  0x7c   :  { %9954 = vst [vmem:[#allocation105_spill] sm:$0xff] %v5229_v61  ;;  %v5251_v61 = vld [vmem:[#allocation2 + $0xe0] sm:$0xff]  ;;  %572 = vmatpush.msra.mxu3 %v5259_v50 }
  0x7d   :  { %9955 = vst [vmem:[#allocation106_spill] sm:$0xff] %v5231_v60  ;;  %v5253_v60 = vld [vmem:[#allocation2 + $0xe8] sm:$0xff]  ;;  %512 = vmatpush.msra.mxu0 %v5251_v61 }
  0x7e   :  { %9956 = vst [vmem:[#allocation107_spill] sm:$0xff] %v5235_v54  ;;  %v5255_v54 = vld [vmem:[#allocation2 + $0xf0] sm:$0xff]  ;;  %532 = vmatpush.msra.mxu1 %v5253_v60 }
  0x7f   :  { %9957 = vst [vmem:[#allocation108_spill] sm:$0xff] %v5239_v63  ;;  %552 = vmatpush.msra.mxu2 %v5255_v54  ;;  %v5271_v63 = vld [vmem:[#allocation2 + $0xd8] sm:$0xff] }
  0x80   :  { %9958 = vst [vmem:[#allocation109_spill] sm:$0xff] %v5241_v58  ;;  %v5263_v58 = vld [vmem:[#allocation2 + $0xc0] sm:$0xff]  ;;  %573 = vmatpush.msra.mxu3 %v5271_v63 }
  0x81   :  { %9959 = vst [vmem:[#allocation110_spill] sm:$0xff] %v5243_v46  ;;  %v5265_v46 = vld [vmem:[#allocation2 + $0xc8] sm:$0xff]  ;;  %513 = vmatpush.msra.mxu0 %v5263_v58 }
  0x82   :  { %9960 = vst [vmem:[#allocation111_spill] sm:$0xff] %v5247_v48  ;;  %v5267_v48 = vld [vmem:[#allocation2 + $0xd0] sm:$0xff]  ;;  %533 = vmatpush.msra.mxu1 %v5265_v46 }
  0x83   :  { %9961 = vst [vmem:[#allocation112_spill] sm:$0xff] %v5251_v61  ;;  %553 = vmatpush.msra.mxu2 %v5267_v48  ;;  %v5283_v61 = vld [vmem:[#allocation2 + $0xb8] sm:$0xff] }
  0x84   :  { %9962 = vst [vmem:[#allocation113_spill] sm:$0xff] %v5253_v60  ;;  %v5275_v60 = vld [vmem:[#allocation2 + $0xa0] sm:$0xff]  ;;  %574 = vmatpush.msra.mxu3 %v5283_v61 }
  0x85   :  { %9963 = vst [vmem:[#allocation114_spill] sm:$0xff] %v5255_v54  ;;  %v5277_v54 = vld [vmem:[#allocation2 + $0xa8] sm:$0xff]  ;;  %514 = vmatpush.msra.mxu0 %v5275_v60 }
  0x86   :  { %9964 = vst [vmem:[#allocation115_spill] sm:$0xff] %v5259_v50  ;;  %v5279_v50 = vld [vmem:[#allocation2 + $0xb0] sm:$0xff]  ;;  %534 = vmatpush.msra.mxu1 %v5277_v54 }
  0x87   :  { %9965 = vst [vmem:[#allocation116_spill] sm:$0xff] %v5263_v58  ;;  %554 = vmatpush.msra.mxu2 %v5279_v50  ;;  %v5295_v58 = vld [vmem:[#allocation2 + $0x98] sm:$0xff] }
  0x88   :  { %9966 = vst [vmem:[#allocation117_spill] sm:$0xff] %v5265_v46  ;;  %v5287_v46 = vld [vmem:[#allocation2 + $0x80] sm:$0xff]  ;;  %575 = vmatpush.msra.mxu3 %v5295_v58 }
  0x89   :  { %9967 = vst [vmem:[#allocation118_spill] sm:$0xff] %v5267_v48  ;;  %v5289_v48 = vld [vmem:[#allocation2 + $0x88] sm:$0xff]  ;;  %515 = vmatpush.msra.mxu0 %v5287_v46 }
  0x8a   :  { %9968 = vst [vmem:[#allocation119_spill] sm:$0xff] %v5271_v63  ;;  %v5291_v63 = vld [vmem:[#allocation2 + $0x90] sm:$0xff]  ;;  %535 = vmatpush.msra.mxu1 %v5289_v48 }
  0x8b   :  { %9969 = vst [vmem:[#allocation120_spill] sm:$0xff] %v5275_v60  ;;  %555 = vmatpush.msra.mxu2 %v5291_v63  ;;  %v5307_v60 = vld [vmem:[#allocation2 + $0x78] sm:$0xff] }
  0x8c   :  { %9970 = vst [vmem:[#allocation121_spill] sm:$0xff] %v5277_v54  ;;  %v5299_v54 = vld [vmem:[#allocation2 + $0x60] sm:$0xff]  ;;  %576 = vmatpush.msra.mxu3 %v5307_v60 }
  0x8d   :  { %9971 = vst [vmem:[#allocation122_spill] sm:$0xff] %v5279_v50  ;;  %v5301_v50 = vld [vmem:[#allocation2 + $0x68] sm:$0xff]  ;;  %516 = vmatpush.msra.mxu0 %v5299_v54 }
  0x8e   :  { %9972 = vst [vmem:[#allocation123_spill] sm:$0xff] %v5283_v61  ;;  %v5303_v61 = vld [vmem:[#allocation2 + $0x70] sm:$0xff]  ;;  %536 = vmatpush.msra.mxu1 %v5301_v50 }
  0x8f   :  { %9973 = vst [vmem:[#allocation124_spill] sm:$0xff] %v5287_v46  ;;  %556 = vmatpush.msra.mxu2 %v5303_v61  ;;  %v5319_v46 = vld [vmem:[#allocation2 + $0x58] sm:$0xff] }
  0x90   :  { %9974 = vst [vmem:[#allocation125_spill] sm:$0xff] %v5289_v48  ;;  %v5311_v48 = vld [vmem:[#allocation2 + $0x40] sm:$0xff]  ;;  %577 = vmatpush.msra.mxu3 %v5319_v46 }
  0x91   :  { %9975 = vst [vmem:[#allocation126_spill] sm:$0xff] %v5291_v63  ;;  %v5313_v63 = vld [vmem:[#allocation2 + $0x48] sm:$0xff]  ;;  %517 = vmatpush.msra.mxu0 %v5311_v48 }
  0x92   :  { %9976 = vst [vmem:[#allocation127_spill] sm:$0xff] %v5295_v58  ;;  %v5315_v58 = vld [vmem:[#allocation2 + $0x50] sm:$0xff]  ;;  %537 = vmatpush.msra.mxu1 %v5313_v63 }
  0x93   :  { %9977 = vst [vmem:[#allocation128_spill] sm:$0xff] %v5299_v54  ;;  %557 = vmatpush.msra.mxu2 %v5315_v58  ;;  %v5331_v54 = vld [vmem:[#allocation2 + $0x38] sm:$0xff] }
  0x94   :  { %9978 = vst [vmem:[#allocation129_spill] sm:$0xff] %v5301_v50  ;;  %v5323_v50 = vld [vmem:[#allocation2 + $0x20] sm:$0xff]  ;;  %578 = vmatpush.msra.mxu3 %v5331_v54 }
  0x95   :  { %9979 = vst [vmem:[#allocation130_spill] sm:$0xff] %v5303_v61  ;;  %v5325_v61 = vld [vmem:[#allocation2 + $0x28] sm:$0xff]  ;;  %518 = vmatpush.msra.mxu0 %v5323_v50 }
  0x96   :  { %9980 = vst [vmem:[#allocation131_spill] sm:$0xff] %v5307_v60  ;;  %v5327_v60 = vld [vmem:[#allocation2 + $0x30] sm:$0xff]  ;;  %538 = vmatpush.msra.mxu1 %v5325_v61 }
  0x97   :  { %9981 = vst [vmem:[#allocation132_spill] sm:$0xff] %v5311_v48  ;;  %558 = vmatpush.msra.mxu2 %v5327_v60  ;;  %v5343_v48 = vld [vmem:[#allocation2 + $0x18] sm:$0xff] }
  0x98   :  { %9982 = vst [vmem:[#allocation133_spill] sm:$0xff] %v5313_v63  ;;  %v5335_v63 = vld [vmem:[#allocation2] sm:$0xff]  ;;  %579 = vmatpush.msra.mxu3 %v5343_v48 }
  0x99   :  { %9983 = vst [vmem:[#allocation134_spill] sm:$0xff] %v5315_v58  ;;  %v5337_v58 = vld [vmem:[#allocation2 + $0x8] sm:$0xff]  ;;  %519 = vmatpush.msra.mxu0 %v5335_v63 }
  0x9a   :  { %9984 = vst [vmem:[#allocation135_spill] sm:$0xff] %v5319_v46  ;;  %v5339_v46 = vld [vmem:[#allocation2 + $0x10] sm:$0xff]  ;;  %539 = vmatpush.msra.mxu1 %v5337_v58  ;;  %732 = vmatpush.msrb.mxu3 %v4584_v2 }
  0x9b   :  { %559 = vmatpush.msra.mxu2 %v5339_v46  ;;  %672 = vmatpush.msrb.mxu0 %v4574_v0  ;;  %v273_v0 = vld [vmem:[%s9212_s0] sm:$0xff] }
  0x9c   :  { %692 = vmatpush.msrb.mxu1 %v4579_v1  ;;  %733 = vmatpush.msrb.mxu3 %v4601_v5  ;;  %v274_v1 = vld [vmem:[%s9212_s0 + $0x8] sm:$0xff] }
  0x9d   :  { %712 = vmatpush.msrb.mxu2 %v4671_v17  ;;  %673 = vmatpush.msrb.mxu0 %v4591_v3  ;;  %v9985_v17 = vld [vmem:[#allocation8_spill] sm:$0xff] }
  0x9e   :  { %693 = vmatpush.msrb.mxu1 %v4596_v4  ;;  %734 = vmatpush.msrb.mxu3 %v4619_v8  ;;  %v276_v8 = vld [vmem:[%s9212_s0 + $0x18] sm:$0xff] }
  0x9f   :  { %713 = vmatpush.msrb.mxu2 %v4683_v19  ;;  %674 = vmatpush.msrb.mxu0 %v4607_v6  ;;  %v9986_v19 = vld [vmem:[#allocation9_spill] sm:$0xff] }
  0xa0   :  { %694 = vmatpush.msrb.mxu1 %v4612_v7  ;;  %735 = vmatpush.msrb.mxu3 %v4637_v11 }
  0xa1   :  { %714 = vmatpush.msrb.mxu2 %v4707_v23  ;;  %675 = vmatpush.msrb.mxu0 %v4625_v9  ;;  %v9988_v23 = vld [vmem:[#allocation24_spill] sm:$0xff] }
  0xa2   :  { %695 = vmatpush.msrb.mxu1 %v4630_v10  ;;  %736 = vmatpush.msrb.mxu3 %v4655_v14 }
  0xa3   :  { %715 = vmatpush.msrb.mxu2 %v4731_v27  ;;  %676 = vmatpush.msrb.mxu0 %v4643_v12  ;;  %v9991_v27 = vld [vmem:[#allocation13_spill] sm:$0xff] }
  0xa4   :  { %696 = vmatpush.msrb.mxu1 %v4648_v13  ;;  %737 = vmatpush.msrb.mxu3 %v4678_v18 }
  0xa5   :  { %716 = vmatpush.msrb.mxu2 %v4755_v31  ;;  %677 = vmatpush.msrb.mxu0 %v4661_v15 }
  0xa6   :  { %697 = vmatpush.msrb.mxu1 %v4666_v16  ;;  %738 = vmatpush.msrb.mxu3 %v4702_v22  ;;  %v275_v16 = vld [vmem:[%s9212_s0 + $0x10] sm:$0xff] }
  0xa7   :  { %717 = vmatpush.msrb.mxu2 %v4779_v35  ;;  %678 = vmatpush.msrb.mxu0 %v4689_v20  ;;  %v9987_v20 = vld [vmem:[#allocation10_spill] sm:$0xff] }
  0xa8   :  { %v294_v2 = vpop.f32.mrf.mxu0  ;;  %698 = vmatpush.msrb.mxu1 %v4694_v21  ;;  %739 = vmatpush.msrb.mxu3 %v4726_v26  ;;  %v9990_v26 = vld [vmem:[#allocation12_spill] sm:$0xff] }
  0xa9   :  { %v357_v3 = vadd.f32 %v294_v2, %v273_v0  ;;  %v314_v4 = vpop.f32.mrf.mxu1  ;;  %718 = vmatpush.msrb.mxu2 %v4803_v39  ;;  %679 = vmatpush.msrb.mxu0 %v4713_v24  ;;  %v9989_v24 = vld [vmem:[#allocation11_spill] sm:$0xff] }
  0xaa   :  { %v358_v5 = vadd.f32 %v314_v4, %v274_v1  ;;  %699 = vmatpush.msrb.mxu1 %v4718_v25  ;;  %740 = vmatpush.msrb.mxu3 %v4750_v30  ;;  %v9993_v30 = vld [vmem:[#allocation14_spill] sm:$0xff] }
  0xab   :  { %v3501_v6 = vmul.f32 -1.442695, %v357_v3  ;;  %719 = vmatpush.msrb.mxu2 %v4827_v43  ;;  %680 = vmatpush.msrb.mxu0 %v4737_v28 }
  0xac   :  { %v3502_v7 = vmul.f32 -1.442695, %v358_v5  ;;  %700 = vmatpush.msrb.mxu1 %v4742_v29  ;;  %741 = vmatpush.msrb.mxu3 %v4774_v34  ;;  %v9992_v29 = vld [vmem:[#allocation28_spill] sm:$0xff] }
  0xad   :  { %3591 = vpow2.f32 %v3501_v6  ;;  %720 = vmatpush.msrb.mxu2 %v4851_v47  ;;  %681 = vmatpush.msrb.mxu0 %v4761_v32  ;;  %v9995_v34 = vld [vmem:[#allocation16_spill] sm:$0xff] }
  0xae   :  { %3593 = vpow2.f32 %v3502_v7  ;;  %701 = vmatpush.msrb.mxu1 %v4766_v33  ;;  %742 = vmatpush.msrb.mxu3 %v4798_v38  ;;  %v9994_v33 = vld [vmem:[#allocation15_spill] sm:$0xff]  ;;  %v5437_v38 = vld [vmem:[%s9217_s5] sm:$0xff] }
  0xaf   :  { %v354_v9 = vpop.f32.mrf.mxu3  ;;  %721 = vmatpush.msrb.mxu2 %v4875_v51  ;;  %682 = vmatpush.msrb.mxu0 %v4785_v36  ;;  %v9996_v36 = vld [vmem:[#allocation32_spill] sm:$0xff]  ;;  %vm660_vm0 = vcmp.eq.s32.totalorder %v5437_v38, 1 }
  0xb0   :  { %v360_v10 = vadd.f32 %v354_v9, %v276_v8  ;;  %702 = vmatpush.msrb.mxu1 %v4790_v37  ;;  %743 = vmatpush.msrb.mxu3 %v4822_v42  ;;  %v9997_v37 = vld [vmem:[#allocation17_spill] sm:$0xff]  ;;  %v9357_v42 = vmov 0  }
  0xb1   :  { %722 = vmatpush.msrb.mxu2 %v4899_v55  ;;  %683 = vmatpush.msrb.mxu0 %v4809_v40  ;;  %v661_v43 = vsel %vm660_vm0, 1, %v9357_v42 }
  0xb2   :  { %v3503_v11 = vmul.f32 -1.442695, %v360_v10  ;;  %703 = vmatpush.msrb.mxu1 %v4814_v41  ;;  %744 = vmatpush.msrb.mxu3 %v9985_v17 }
  0xb3   :  { %v3592_v12 = vpop.eup %3591  ;;  %723 = vmatpush.msrb.mxu2 %v4927_v59  ;;  %684 = vmatpush.msrb.mxu0 %v4833_v44 }
  0xb4   :  { %v3594_v13 = vpop.eup %3593  ;;  %v5398_v14 = vadd.f32 1.0, %v3592_v12  ;;  %3595 = vpow2.f32 %v3503_v11  ;;  %704 = vmatpush.msrb.mxu1 %v4838_v45  ;;  %745 = vmatpush.msrb.mxu3 %v9989_v24  ;;  %v10000_v24 = vld [vmem:[#allocation35_spill] sm:$0xff] }
  0xb5   :  { %v5402_v15 = vadd.f32 1.0, %v3594_v13  ;;  %724 = vmatpush.msrb.mxu2 %v4942_v57  ;;  %685 = vmatpush.msrb.mxu0 %v9986_v19 }
  0xb6   :  { %3597 = vrcp.f32 %v5398_v14  ;;  %705 = vmatpush.msrb.mxu1 %v9987_v20  ;;  %746 = vmatpush.msrb.mxu3 %v9993_v30  ;;  %v376_v41 = vand.u32 2147483648, %v5398_v14  ;;  %v374_v47 = vand.u32 2147483647, %v5398_v14  ;;  %vm370_vm3 = vweird.f32 %v5398_v14  ;;  %v10006_v30 = vld [vmem:[#allocation25_spill] sm:$0xff] }
  0xb7   :  { %3599 = vrcp.f32 %v5402_v15  ;;  %725 = vmatpush.msrb.mxu2 %v9988_v23  ;;  %686 = vmatpush.msrb.mxu0 %v9990_v26  ;;  %v395_v44 = vand.u32 2147483648, %v5402_v15  ;;  %v393_v55 = vand.u32 2147483647, %v5402_v15  ;;  %vm389_vm4 = vweird.f32 %v5402_v15  ;;  %v9999_v23 = vld [vmem:[#allocation19_spill] sm:$0xff]  ;;  %v10001_v26 = vld [vmem:[#allocation20_spill] sm:$0xff] }
  0xb8   :  { %v334_v18 = vpop.f32.mrf.mxu2  ;;  %706 = vmatpush.msrb.mxu1 %v9991_v27  ;;  %747 = vmatpush.msrb.mxu3 %v9997_v37  ;;  %v377_v2 = vor.u32 1.1754944e-38, %v376_v41  ;;  %vm375_vm6 = vcmp.eq.f32.partialorder %v374_v47, 8.507059e+37  ;;  %v10003_v27 = vld [vmem:[#allocation22_spill] sm:$0xff]  ;;  %v10013_v37 = vld [vmem:[#allocation31_spill] sm:$0xff] }
  0xb9   :  { %v359_v22 = vadd.f32 %v334_v18, %v275_v16  ;;  %726 = vmatpush.msrb.mxu2 %v9992_v29  ;;  %687 = vmatpush.msrb.mxu0 %v9994_v33  ;;  %v396_v5 = vor.u32 1.1754944e-38, %v395_v44  ;;  %vm394_vm8 = vcmp.eq.f32.partialorder %v393_v55, 8.507059e+37  ;;  %v10005_v29 = vld [vmem:[#allocation23_spill] sm:$0xff]  ;;  %v10018_v44 = vld [vmem:[#allocation37_spill] sm:$0xff] }
  0xba   :  { %v3596_v21 = vpop.eup %3595  ;;  %707 = vmatpush.msrb.mxu1 %v9995_v34  ;;  %3583 = vset.pattern.permute.xlu0 %v9357_v42  ;;  %v10009_v33 = vld [vmem:[#allocation27_spill] sm:$0xff]  ;;  %v10010_v34 = vld [vmem:[#allocation29_spill] sm:$0xff] }
  0xbb   :  { %v5421_v25 = vadd.f32 1.0, %v3596_v21  ;;  %727 = vmatpush.msrb.mxu2 %v9996_v36  ;;  %3584 = vset.pattern.permute.xlu1 %v9357_v42  ;;  %v10012_v36 = vld [vmem:[#allocation47_spill] sm:$0xff]  ;;  %v10022_v55 = vld [vmem:[#allocation41_spill] sm:$0xff] }
  0xbc   :  { %v3598_v28 = vpop.eup %3597  ;;  %663 = vperm.xlu0 %3583, %v661_v43   ;;  %3585 = vset.pattern.permute.xlu2 %v9357_v42  ;;  %v10016_v41 = vld [vmem:[#allocation51_spill] sm:$0xff]  ;;  %v10017_v43 = vld [vmem:[#allocation36_spill] sm:$0xff]  ;;  %v6021_v42 = vld [vmem:[%s9213_s1 + $0x50] sm:$0xff] }
  0xbd   :  { %v3600_v31 = vpop.eup %3599  ;;  %v366_v32 = vmul.f32 %v3598_v28, %v5398_v14  ;;  %3601 = vrcp.f32 %v5421_v25  ;;  %vm371_vm1 = vweird.f32 %v3598_v28  ;;  %vm409_vm10 = vweird.f32 %v5421_v25  ;;  %v10020_v47 = vld [vmem:[#allocation55_spill] sm:$0xff]  ;;  %10144 = vst [vmem:[#allocation29_spill] sm:$0xff] %v6021_v42 }
  0xbe   :  { %v385_v35 = vmul.f32 %v3600_v31, %v5402_v15  ;;  %3603 = vtanh.f32 %v359_v22  ;;  %vm390_vm2 = vweird.f32 %v3600_v31  ;;  %vm372_vm5 = vmor %vm370_vm3, %vm371_vm1  ;;  %v415_v15 = vand.u32 2147483648, %v5421_v25  ;;  %v9998_v22 = vld [vmem:[#allocation18_spill] sm:$0xff] }
  0xbf   :  { %v367_v39 = vsub.f32 1.0, %v366_v32  ;;  %vm391_vm7 = vmor %vm389_vm4, %vm390_vm2  ;;  %v413_v16 = vand.u32 2147483647, %v5421_v25  ;;  %v10008_v32 = vld [vmem:[#allocation43_spill] sm:$0xff] }
  0xc0   :  { %v386_v40 = vsub.f32 1.0, %v385_v35  ;;  %v416_v18 = vor.u32 1.1754944e-38, %v415_v15  ;;  %v10011_v35 = vld [vmem:[#allocation30_spill] sm:$0xff] }
  0xc1   :  { %v368_v45 = vmul.f32 %v3598_v28, %v367_v39  ;;  %vm414_vm12 = vcmp.eq.f32.partialorder %v413_v16, 8.507059e+37  ;;  %v10014_v39 = vld [vmem:[#allocation33_spill] sm:$0xff]  ;;  %v10039_v15 = vld [vmem:[#allocation58_spill] sm:$0xff]  ;;  %v10040_v16 = vld [vmem:[#allocation75_spill] sm:$0xff] }
  0xc2   :  { %v387_v51 = vmul.f32 %v3600_v31, %v386_v40  ;;  %v10015_v40 = vld [vmem:[#allocation34_spill] sm:$0xff] }
  0xc3   :  { %v3602_v57 = vpop.eup %3601  ;;  %v369_v59 = vadd.f32 %v3598_v28, %v368_v45  ;;  %v10019_v45 = vld [vmem:[#allocation38_spill] sm:$0xff] }
  0xc4   :  { %v3604_v0 = vpop.eup %3603  ;;  %v405_v1 = vmul.f32 %v3602_v57, %v5421_v25  ;;  %v388_v3 = vadd.f32 %v3600_v31, %v387_v51  ;;  %vm410_vm9 = vweird.f32 %v3602_v57  ;;  %v10002_v25 = vld [vmem:[#allocation21_spill] sm:$0xff]  ;;  %v10021_v51 = vld [vmem:[#allocation40_spill] sm:$0xff] }
  0xc5   :  { %v373_v4 = vsel %vm372_vm5, %v3598_v28, %v369_v59  ;;  %vm411_vm11 = vmor %vm409_vm10, %vm410_vm9  ;;  %v10004_v28 = vld [vmem:[#allocation39_spill] sm:$0xff] }
  0xc6   :  { %v406_v6 = vsub.f32 1.0, %v405_v1  ;;  %v378_v7 = vsel %vm375_vm6, %v377_v2, %v373_v4  ;;  %v392_v8 = vsel %vm391_vm7, %v3600_v31, %v388_v3  ;;  %v10007_v31 = vld [vmem:[#allocation26_spill] sm:$0xff]  ;;  %v10024_v59 = vld [vmem:[#allocation59_spill] sm:$0xff]  ;;  %v10026_v1 = vld [vmem:[#allocation45_spill] sm:$0xff] }
  0xc7   :  { %v397_v9 = vsel %vm394_vm8, %v396_v5, %v392_v8  ;;  %v420_v10 = vmul.f32 %v3604_v0, %v378_v7  ;;  %v10025_v0 = vld [vmem:[#allocation44_spill] sm:$0xff]  ;;  %v10027_v2 = vld [vmem:[#allocation46_spill] sm:$0xff]  ;;  %v10028_v3 = vld [vmem:[#allocation63_spill] sm:$0xff] }
  0xc8   :  { %v407_v11 = vmul.f32 %v3602_v57, %v406_v6  ;;  %v419_v12 = vmul.f32 0.0, %v397_v9  ;;  %v10029_v4 = vld [vmem:[#allocation48_spill] sm:$0xff]  ;;  %v10030_v5 = vld [vmem:[#allocation49_spill] sm:$0xff]  ;;  %v10031_v6 = vld [vmem:[#allocation50_spill] sm:$0xff] }
  0xc9   :  { %v10032_v7 = vld [vmem:[#allocation67_spill] sm:$0xff]  ;;  %v10033_v8 = vld [vmem:[#allocation52_spill] sm:$0xff]  ;;  %v10034_v9 = vld [vmem:[#allocation53_spill] sm:$0xff] }
  0xca   :  { %v5451_v13 = vadd.f32 %v420_v10, %v419_v12  ;;  %v408_v14 = vadd.f32 %v3602_v57, %v407_v11  ;;  %v10035_v10 = vld [vmem:[#allocation54_spill] sm:$0xff]  ;;  %v10036_v11 = vld [vmem:[#allocation71_spill] sm:$0xff]  ;;  %v10037_v12 = vld [vmem:[#allocation56_spill] sm:$0xff] }
  0xcc   :  { %3605 = vtanh.f32 %v5451_v13  ;;  %v412_v17 = vsel %vm411_vm11, %v3602_v57, %v408_v14  ;;  %v10023_v57 = vld [vmem:[#allocation42_spill] sm:$0xff]  ;;  %v10038_v14 = vld [vmem:[#allocation57_spill] sm:$0xff] }
  0xcd   :  { %v417_v20 = vsel %vm414_vm12, %v416_v18, %v412_v17  ;;  %v10041_v17 = vld [vmem:[#allocation60_spill] sm:$0xff]  ;;  %v10042_v18 = vld [vmem:[#allocation61_spill] sm:$0xff] }
  0xd2   :  { %v3606_v19 = vpop.eup %3605 }
  0xd3   :  { %v423_v21 = vmul.f32 %v3606_v19, %v417_v20  ;;  %v10043_v19 = vld [vmem:[#allocation62_spill] sm:$0xff]  ;;  %v10044_v20 = vld [vmem:[#allocation79_spill] sm:$0xff] }
  0xd5   :  { %520 = vmatmul.f32.vlgmr.msra.gmra.mxu0 %v423_v21  ;;  %540 = vmatmul.f32.vlgmr.msra.gmra.mxu1 %v423_v21 }
  0xd6   :  { %560 = vmatmul.f32.vlgmr.msra.gmra.mxu2 %v423_v21  ;;  %580 = vmatmul.f32.vlgmr.msra.gmra.mxu3 %v423_v21 }
  0xd7   :  { %819 = vmatpush.msra.mxu0 %v9998_v22  ;;  %839 = vmatpush.msra.mxu1 %v9999_v23  ;;  %v10046_v22 = vld [vmem:[#allocation65_spill] sm:$0xff]  ;;  %v10047_v23 = vld [vmem:[#allocation66_spill] sm:$0xff] }
  0xd8   :  { %859 = vmatpush.msra.mxu2 %v10000_v24  ;;  %879 = vmatpush.msra.mxu3 %v10001_v26  ;;  %v10048_v24 = vld [vmem:[#allocation83_spill] sm:$0xff]  ;;  %v10049_v26 = vld [vmem:[#allocation68_spill] sm:$0xff] }
  0xd9   :  { %820 = vmatpush.msra.mxu0 %v10002_v25  ;;  %840 = vmatpush.msra.mxu1 %v10003_v27  ;;  %v10050_v25 = vld [vmem:[#allocation69_spill] sm:$0xff]  ;;  %v10051_v27 = vld [vmem:[#allocation70_spill] sm:$0xff] }
  0xda   :  { %860 = vmatpush.msra.mxu2 %v10004_v28  ;;  %880 = vmatpush.msra.mxu3 %v10005_v29  ;;  %v10052_v28 = vld [vmem:[#allocation87_spill] sm:$0xff]  ;;  %v10053_v29 = vld [vmem:[#allocation72_spill] sm:$0xff] }
  0xdb   :  { %821 = vmatpush.msra.mxu0 %v10006_v30  ;;  %841 = vmatpush.msra.mxu1 %v10007_v31  ;;  %v10054_v30 = vld [vmem:[#allocation73_spill] sm:$0xff]  ;;  %v10055_v31 = vld [vmem:[#allocation74_spill] sm:$0xff] }
  0xdc   :  { %861 = vmatpush.msra.mxu2 %v10008_v32  ;;  %881 = vmatpush.msra.mxu3 %v10009_v33  ;;  %v10056_v32 = vld [vmem:[#allocation76_spill] sm:$0xff]  ;;  %v10057_v33 = vld [vmem:[#allocation77_spill] sm:$0xff] }
  0xdd   :  { %688 = vmatmul.f32.vlgmr.msrb.gmra.mxu0 %v423_v21  ;;  %708 = vmatmul.f32.vlgmr.msrb.gmra.mxu1 %v423_v21 }
  0xde   :  { %728 = vmatmul.f32.vlgmr.msrb.gmra.mxu2 %v423_v21  ;;  %748 = vmatmul.f32.vlgmr.msrb.gmra.mxu3 %v423_v21  ;;  %v10045_v21 = vld [vmem:[#allocation64_spill] sm:$0xff] }
  0xdf   :  { %822 = vmatpush.msra.mxu0 %v10010_v34  ;;  %842 = vmatpush.msra.mxu1 %v10011_v35  ;;  %v10058_v34 = vld [vmem:[#allocation78_spill] sm:$0xff]  ;;  %v10059_v35 = vld [vmem:[#allocation80_spill] sm:$0xff] }
  0xe0   :  { %862 = vmatpush.msra.mxu2 %v10012_v36  ;;  %882 = vmatpush.msra.mxu3 %v10013_v37  ;;  %v10060_v36 = vld [vmem:[#allocation81_spill] sm:$0xff]  ;;  %v10061_v37 = vld [vmem:[#allocation82_spill] sm:$0xff] }
  0xe1   :  { %823 = vmatpush.msra.mxu0 %v10014_v39  ;;  %843 = vmatpush.msra.mxu1 %v10015_v40  ;;  %v10062_v39 = vld [vmem:[#allocation84_spill] sm:$0xff]  ;;  %v10063_v40 = vld [vmem:[#allocation85_spill] sm:$0xff] }
  0xe2   :  { %863 = vmatpush.msra.mxu2 %v10016_v41  ;;  %883 = vmatpush.msra.mxu3 %v10017_v43  ;;  %v10065_v41 = vld [vmem:[#allocation88_spill] sm:$0xff]  ;;  %v10067_v43 = vld [vmem:[#allocation97_spill] sm:$0xff] }
  0xe3   :  { %824 = vmatpush.msra.mxu0 %v10018_v44  ;;  %844 = vmatpush.msra.mxu1 %v10019_v45  ;;  %v10068_v44 = vld [vmem:[#allocation90_spill] sm:$0xff]  ;;  %v10069_v45 = vld [vmem:[#allocation91_spill] sm:$0xff] }
  0xe4   :  { %864 = vmatpush.msra.mxu2 %v10020_v47  ;;  %884 = vmatpush.msra.mxu3 %v10021_v51  ;;  %v10071_v47 = vld [vmem:[#allocation98_spill] sm:$0xff]  ;;  %v10072_v51 = vld [vmem:[#allocation93_spill] sm:$0xff] }
  0xe5   :  { %825 = vmatpush.msra.mxu0 %v10022_v55  ;;  %845 = vmatpush.msra.mxu1 %v10023_v57  ;;  %v10073_v55 = vld [vmem:[#allocation94_spill] sm:$0xff]  ;;  %v10075_v57 = vld [vmem:[#allocation99_spill] sm:$0xff] }
  0xe6   :  { %865 = vmatpush.msra.mxu2 %v10024_v59  ;;  %885 = vmatpush.msra.mxu3 %v10025_v0  ;;  %v10077_v59 = vld [vmem:[#allocation100_spill] sm:$0xff]  ;;  %v10078_v0 = vld [vmem:[#allocation101_spill] sm:$0xff] }
  0xe7   :  { %826 = vmatpush.msra.mxu0 %v10026_v1  ;;  %846 = vmatpush.msra.mxu1 %v10027_v2  ;;  %v10079_v1 = vld [vmem:[#allocation102_spill] sm:$0xff]  ;;  %v10080_v2 = vld [vmem:[#allocation103_spill] sm:$0xff] }
  0xe8   :  { %866 = vmatpush.msra.mxu2 %v10028_v3  ;;  %886 = vmatpush.msra.mxu3 %v10029_v4  ;;  %v10081_v3 = vld [vmem:[#allocation104_spill] sm:$0xff]  ;;  %v10082_v4 = vld [vmem:[#allocation105_spill] sm:$0xff] }
  0xe9   :  { %827 = vmatpush.msra.mxu0 %v10030_v5  ;;  %847 = vmatpush.msra.mxu1 %v10031_v6  ;;  %v10083_v5 = vld [vmem:[#allocation106_spill] sm:$0xff]  ;;  %v10084_v6 = vld [vmem:[#allocation107_spill] sm:$0xff] }
  0xea   :  { %867 = vmatpush.msra.mxu2 %v10032_v7  ;;  %887 = vmatpush.msra.mxu3 %v10033_v8  ;;  %v10085_v7 = vld [vmem:[#allocation108_spill] sm:$0xff]  ;;  %v10086_v8 = vld [vmem:[#allocation109_spill] sm:$0xff] }
  0xeb   :  { %828 = vmatpush.msra.mxu0 %v10034_v9  ;;  %848 = vmatpush.msra.mxu1 %v10035_v10  ;;  %v10087_v9 = vld [vmem:[#allocation110_spill] sm:$0xff]  ;;  %v10088_v10 = vld [vmem:[#allocation111_spill] sm:$0xff] }
  0xec   :  { %868 = vmatpush.msra.mxu2 %v10036_v11  ;;  %888 = vmatpush.msra.mxu3 %v10037_v12  ;;  %v10089_v11 = vld [vmem:[#allocation112_spill] sm:$0xff]  ;;  %v10090_v12 = vld [vmem:[#allocation113_spill] sm:$0xff] }
  0xed   :  { %829 = vmatpush.msra.mxu0 %v10038_v14  ;;  %849 = vmatpush.msra.mxu1 %v10039_v15  ;;  %v10091_v14 = vld [vmem:[#allocation114_spill] sm:$0xff]  ;;  %v10092_v15 = vld [vmem:[#allocation115_spill] sm:$0xff] }
  0xee   :  { %869 = vmatpush.msra.mxu2 %v10040_v16  ;;  %889 = vmatpush.msra.mxu3 %v10041_v17  ;;  %v10093_v16 = vld [vmem:[#allocation116_spill] sm:$0xff]  ;;  %v10094_v17 = vld [vmem:[#allocation117_spill] sm:$0xff] }
  0xef   :  { %830 = vmatpush.msra.mxu0 %v10042_v18  ;;  %850 = vmatpush.msra.mxu1 %v10043_v19  ;;  %v10095_v18 = vld [vmem:[#allocation118_spill] sm:$0xff]  ;;  %v10096_v19 = vld [vmem:[#allocation119_spill] sm:$0xff] }
  0xf0   :  { %870 = vmatpush.msra.mxu2 %v10044_v20  ;;  %890 = vmatpush.msra.mxu3 %v10045_v21  ;;  %v10097_v20 = vld [vmem:[#allocation120_spill] sm:$0xff]  ;;  %v10098_v21 = vld [vmem:[#allocation121_spill] sm:$0xff] }
  0xf1   :  { %831 = vmatpush.msra.mxu0 %v10046_v22  ;;  %851 = vmatpush.msra.mxu1 %v10047_v23  ;;  %v10099_v22 = vld [vmem:[#allocation122_spill] sm:$0xff]  ;;  %v10100_v23 = vld [vmem:[#allocation123_spill] sm:$0xff] }
  0xf2   :  { %871 = vmatpush.msra.mxu2 %v10048_v24  ;;  %891 = vmatpush.msra.mxu3 %v10049_v26  ;;  %v10101_v24 = vld [vmem:[#allocation124_spill] sm:$0xff]  ;;  %v10102_v26 = vld [vmem:[#allocation125_spill] sm:$0xff] }
  0xf3   :  { %832 = vmatpush.msra.mxu0 %v10050_v25  ;;  %852 = vmatpush.msra.mxu1 %v10051_v27  ;;  %v10103_v25 = vld [vmem:[#allocation126_spill] sm:$0xff]  ;;  %v10104_v27 = vld [vmem:[#allocation127_spill] sm:$0xff] }
  0xf4   :  { %872 = vmatpush.msra.mxu2 %v10052_v28  ;;  %892 = vmatpush.msra.mxu3 %v10053_v29  ;;  %v10105_v28 = vld [vmem:[#allocation128_spill] sm:$0xff]  ;;  %v10106_v29 = vld [vmem:[#allocation129_spill] sm:$0xff] }
  0xf5   :  { %833 = vmatpush.msra.mxu0 %v10054_v30  ;;  %853 = vmatpush.msra.mxu1 %v10055_v31  ;;  %v10107_v30 = vld [vmem:[#allocation130_spill] sm:$0xff]  ;;  %v10108_v31 = vld [vmem:[#allocation131_spill] sm:$0xff] }
  0xf6   :  { %873 = vmatpush.msra.mxu2 %v5163_v49  ;;  %893 = vmatpush.msra.mxu3 %v10056_v32  ;;  %v10064_v49 = vld [vmem:[#allocation86_spill] sm:$0xff]  ;;  %v10109_v32 = vld [vmem:[#allocation132_spill] sm:$0xff] }
  0xf7   :  { %834 = vmatpush.msra.mxu0 %v10057_v33  ;;  %854 = vmatpush.msra.mxu1 %v10058_v34  ;;  %v10110_v33 = vld [vmem:[#allocation133_spill] sm:$0xff]  ;;  %v10111_v34 = vld [vmem:[#allocation134_spill] sm:$0xff] }
  0xf8   :  { %874 = vmatpush.msra.mxu2 %v5175_v53  ;;  %894 = vmatpush.msra.mxu3 %v10059_v35  ;;  %v10066_v53 = vld [vmem:[#allocation89_spill] sm:$0xff]  ;;  %v10112_v35 = vld [vmem:[#allocation135_spill] sm:$0xff] }
  0xf9   :  { %899 = vmatpush.msrb.mxu0 %v10060_v36  ;;  %919 = vmatpush.msrb.mxu1 %v10061_v37  ;;  %v441_v36 = vpop.f32.mrf.mxu0  ;;  %v461_v37 = vpop.f32.mrf.mxu1 }
  0xfa   :  { %939 = vmatpush.msrb.mxu2 %v5182_v52  ;;  %959 = vmatpush.msrb.mxu3 %v10062_v39  ;;  %v10070_v52 = vld [vmem:[#allocation92_spill] sm:$0xff]  ;;  %v501_v39 = vpop.f32.mrf.mxu3 }
  0xfb   :  { %900 = vmatpush.msrb.mxu0 %v10063_v40  ;;  %920 = vmatpush.msrb.mxu1 %v10064_v49 }
  0xfc   :  { %940 = vmatpush.msrb.mxu2 %v5194_v56  ;;  %960 = vmatpush.msrb.mxu3 %v10065_v41  ;;  %v10074_v56 = vld [vmem:[#allocation95_spill] sm:$0xff] }
  0xfd   :  { %901 = vmatpush.msrb.mxu0 %v5159_v62  ;;  %921 = vmatpush.msrb.mxu1 %v10066_v53  ;;  %v10076_v62 = vld [vmem:[#allocation96_spill] sm:$0xff] }
  0xfe   :  { %941 = vmatpush.msrb.mxu2 %v10067_v43  ;;  %961 = vmatpush.msrb.mxu3 %v10068_v44  ;;  %v3507_v44 = vld [vmem:[%s9212_s0 + $0x20] sm:$0xff] }
  0xff   :  { %902 = vmatpush.msrb.mxu0 %v10069_v45  ;;  %922 = vmatpush.msrb.mxu1 %v10070_v52  ;;  %v3508_v45 = vld [vmem:[%s9212_s0 + $0x28] sm:$0xff] }
 0x100   :  { %942 = vmatpush.msrb.mxu2 %v10071_v47  ;;  %962 = vmatpush.msrb.mxu3 %v10072_v51 }
 0x101   :  { %903 = vmatpush.msrb.mxu0 %v10073_v55  ;;  %923 = vmatpush.msrb.mxu1 %v10074_v56 }
 0x102   :  { %943 = vmatpush.msrb.mxu2 %v10075_v57  ;;  %963 = vmatpush.msrb.mxu3 %v10076_v62 }
 0x103   :  { %904 = vmatpush.msrb.mxu0 %v10077_v59  ;;  %924 = vmatpush.msrb.mxu1 %v10078_v0 }
 0x104   :  { %944 = vmatpush.msrb.mxu2 %v10079_v1  ;;  %964 = vmatpush.msrb.mxu3 %v10080_v2 }
 0x105   :  { %905 = vmatpush.msrb.mxu0 %v10081_v3  ;;  %925 = vmatpush.msrb.mxu1 %v10082_v4 }
 0x106   :  { %945 = vmatpush.msrb.mxu2 %v10083_v5  ;;  %965 = vmatpush.msrb.mxu3 %v10084_v6 }
 0x107   :  { %906 = vmatpush.msrb.mxu0 %v10085_v7  ;;  %926 = vmatpush.msrb.mxu1 %v10086_v8  ;;  %v3510_v7 = vld [vmem:[%s9212_s0 + $0x38] sm:$0xff] }
 0x108   :  { %946 = vmatpush.msrb.mxu2 %v10087_v9  ;;  %966 = vmatpush.msrb.mxu3 %v10088_v10 }
 0x109   :  { %907 = vmatpush.msrb.mxu0 %v10089_v11  ;;  %927 = vmatpush.msrb.mxu1 %v10090_v12 }
 0x10a   :  { %947 = vmatpush.msrb.mxu2 %v10091_v14  ;;  %967 = vmatpush.msrb.mxu3 %v10092_v15 }
 0x10b   :  { %908 = vmatpush.msrb.mxu0 %v10093_v16  ;;  %928 = vmatpush.msrb.mxu1 %v10094_v17 }
 0x10c   :  { %948 = vmatpush.msrb.mxu2 %v10095_v18  ;;  %968 = vmatpush.msrb.mxu3 %v10096_v19 }
 0x10d   :  { %909 = vmatpush.msrb.mxu0 %v10097_v20  ;;  %929 = vmatpush.msrb.mxu1 %v10098_v21 }
 0x10e   :  { %949 = vmatpush.msrb.mxu2 %v10099_v22  ;;  %969 = vmatpush.msrb.mxu3 %v10100_v23  ;;  %v3509_v22 = vld [vmem:[%s9212_s0 + $0x30] sm:$0xff] }
 0x10f   :  { %910 = vmatpush.msrb.mxu0 %v10101_v24  ;;  %930 = vmatpush.msrb.mxu1 %v10102_v26 }
 0x110   :  { %950 = vmatpush.msrb.mxu2 %v10103_v25  ;;  %970 = vmatpush.msrb.mxu3 %v10104_v27 }
 0x111   :  { %911 = vmatpush.msrb.mxu0 %v10105_v28  ;;  %931 = vmatpush.msrb.mxu1 %v10106_v29 }
 0x112   :  { %951 = vmatpush.msrb.mxu2 %v10107_v30  ;;  %971 = vmatpush.msrb.mxu3 %v10108_v31 }
 0x113   :  { %912 = vmatpush.msrb.mxu0 %v10109_v32  ;;  %932 = vmatpush.msrb.mxu1 %v10110_v33 }
 0x114   :  { %952 = vmatpush.msrb.mxu2 %v10111_v34  ;;  %972 = vmatpush.msrb.mxu3 %v10112_v35 }
 0x115   :  { %913 = vmatpush.msrb.mxu0 %v5323_v50  ;;  %933 = vmatpush.msrb.mxu1 %v5325_v61  ;;  %v271_v50 = vld [vmem:[%s9216_s4] sm:$0xf] }
 0x116   :  { %953 = vmatpush.msrb.mxu2 %v5327_v60  ;;  %973 = vmatpush.msrb.mxu3 %v5331_v54  ;;  %v5588_v61 = vperm.slane %v271_v50, 0  ;;  %v5590_v60 = vperm.slane %v271_v50, 1  ;;  %v5594_v43 = vperm.slane %v271_v50, 3  ;;  %v5606_v10 = vperm.slane %v271_v50, 2 }
 0x117   :  { %914 = vmatpush.msrb.mxu0 %v5335_v63  ;;  %934 = vmatpush.msrb.mxu1 %v5337_v58  ;;  %v481_v58 = vpop.f32.mrf.mxu2 }
 0x118   :  { %954 = vmatpush.msrb.mxu2 %v5339_v46  ;;  %974 = vmatpush.msrb.mxu3 %v5343_v48  ;;  %10113 = vst [vmem:[#allocation8_spill] sm:$0xff] %v5588_v61 }
 0x119   :  { %10114 = vst [vmem:[#allocation9_spill] sm:$0xff] %v5590_v60 }
 0x11a   :  { %10115 = vst [vmem:[#allocation10_spill] sm:$0xff] %v5594_v43 }
 0x11b   :  { %10116 = vst [vmem:[#allocation24_spill] sm:$0xff] %v5606_v10 }
 0x152   :  { %v521_v54 = vpop.f32.mrf.mxu0  ;;  %v541_v40 = vpop.f32.mrf.mxu1 }
 0x153   :  { %v522_v63 = vadd.f32 %v521_v54, %v441_v36  ;;  %v542_v49 = vadd.f32 %v541_v40, %v461_v37  ;;  %v5701_v54 = vld [vmem:[%s9213_s1 + $0x1f0] sm:$0xff] }
 0x155   :  { %v593_v46 = vadd.f32 %v5588_v61, %v522_v63  ;;  %v594_v48 = vadd.f32 %v5590_v60, %v542_v49 }
 0x157   :  { %v3504_v41 = vmul.f32 -1.442695, %v593_v46  ;;  %v3505_v53 = vmul.f32 -1.442695, %v594_v48 }
 0x159   :  { %3607 = vpow2.f32 %v3504_v41  ;;  %v581_v52 = vpop.f32.mrf.mxu3  ;;  %v561_v1 = vpop.f32.mrf.mxu2 }
 0x15a   :  { %3609 = vpow2.f32 %v3505_v53  ;;  %v582_v47 = vadd.f32 %v581_v52, %v501_v39  ;;  %v689_v51 = vpop.f32.mrf.mxu0  ;;  %v709_v55 = vpop.f32.mrf.mxu1  ;;  %v562_v9 = vadd.f32 %v561_v1, %v481_v58 }
 0x15b   :  { %v752_v56 = vadd.f32 %v3507_v44, %v689_v51  ;;  %v753_v57 = vadd.f32 %v3508_v45, %v709_v55 }
 0x15c   :  { %v596_v62 = vadd.f32 %v5594_v43, %v582_v47  ;;  %v595_v17 = vadd.f32 %v5606_v10, %v562_v9 }
 0x15d   :  { %v3511_v59 = vmul.f32 -1.442695, %v752_v56  ;;  %v3512_v0 = vmul.f32 -1.442695, %v753_v57 }
 0x15e   :  { %v3506_v2 = vmul.f32 -1.442695, %v596_v62 }
 0x15f   :  { %v3608_v3 = vpop.eup %3607  ;;  %3611 = vpow2.f32 %v3511_v59 }
 0x160   :  { %v3610_v4 = vpop.eup %3609  ;;  %v600_v5 = vadd.f32 1.0, %v3608_v3  ;;  %3613 = vpow2.f32 %v3506_v2 }
 0x161   :  { %v619_v6 = vadd.f32 1.0, %v3610_v4  ;;  %3615 = vpow2.f32 %v3512_v0  ;;  %v749_v8 = vpop.f32.mrf.mxu3  ;;  %v729_v23 = vpop.f32.mrf.mxu2 }
 0x162   :  { %3617 = vrcp.f32 %v600_v5  ;;  %v755_v12 = vadd.f32 %v3510_v7, %v749_v8  ;;  %v610_v20 = vand.u32 2147483647, %v600_v5  ;;  %v612_v25 = vand.u32 2147483648, %v600_v5 }
 0x163   :  { %3619 = vrcp.f32 %v619_v6  ;;  %v631_v29 = vand.u32 2147483648, %v619_v6  ;;  %v629_v30 = vand.u32 2147483647, %v619_v6  ;;  %v754_v32 = vadd.f32 %v3509_v22, %v729_v23 }
 0x164   :  { %v3513_v27 = vmul.f32 -1.442695, %v755_v12  ;;  %vm625_vm13 = vweird.f32 %v619_v6  ;;  %vm606_vm14 = vweird.f32 %v600_v5  ;;  %vm5621_vm15 = vcmp.eq.f32.partialorder %v610_v20, 8.507059e+37 }
 0x165   :  { %v3612_v11 = vpop.eup %3611  ;;  %v613_v36 = vor.u32 1.1754944e-38, %v612_v25  ;;  %v632_v39 = vor.u32 1.1754944e-38, %v631_v29  ;;  %vm5625_vm2 = vcmp.eq.f32.partialorder %v629_v30, 8.507059e+37 }
 0x166   :  { %v3614_v14 = vpop.eup %3613  ;;  %v5608_v15 = vadd.f32 1.0, %v3612_v11 }
 0x167   :  { %v3616_v16 = vpop.eup %3615  ;;  %v5611_v18 = vadd.f32 1.0, %v3614_v14 }
 0x168   :  { %v3618_v19 = vpop.eup %3617  ;;  %3621 = vrcp.f32 %v5608_v15  ;;  %v5614_v21 = vadd.f32 1.0, %v3616_v16  ;;  %vm765_vm3 = vweird.f32 %v5608_v15  ;;  %v769_v41 = vand.u32 2147483647, %v5608_v15 }
 0x169   :  { %v3620_v24 = vpop.eup %3619  ;;  %v602_v26 = vmul.f32 %v3618_v19, %v600_v5  ;;  %3623 = vrcp.f32 %v5611_v18  ;;  %vm607_vm0 = vweird.f32 %v3618_v19  ;;  %vm645_vm7 = vweird.f32 %v5611_v18 }
 0x16a   :  { %v621_v28 = vmul.f32 %v3620_v24, %v619_v6  ;;  %3625 = vrcp.f32 %v5614_v21  ;;  %vm626_vm1 = vweird.f32 %v3620_v24  ;;  %vm608_vm4 = vmor %vm606_vm14, %vm607_vm0  ;;  %vm784_vm5 = vweird.f32 %v5614_v21 }
 0x16b   :  { %v603_v31 = vsub.f32 1.0, %v602_v26  ;;  %3627 = vtanh.f32 %v595_v17  ;;  %vm627_vm6 = vmor %vm625_vm13, %vm626_vm1  ;;  %v771_v47 = vand.u32 2147483648, %v5608_v15  ;;  %v790_v4 = vand.u32 2147483648, %v5614_v21 }
 0x16c   :  { %v622_v33 = vsub.f32 1.0, %v621_v28  ;;  %3629 = vpow2.f32 %v3513_v27  ;;  %v788_v9 = vand.u32 2147483647, %v5614_v21  ;;  %vm770_vm11 = vcmp.eq.f32.partialorder %v769_v41, 8.507059e+37  ;;  %v5727_v41 = vld [vmem:[%s9213_s1 + $0x1d0] sm:$0xff] }
 0x16d   :  { %v604_v35 = vmul.f32 %v3618_v19, %v603_v31  ;;  %3631 = vtanh.f32 %v754_v32  ;;  %v772_v12 = vor.u32 1.1754944e-38, %v771_v47  ;;  %v791_v20 = vor.u32 1.1754944e-38, %v790_v4  ;;  %v5751_v47 = vld [vmem:[%s9213_s1 + $0x1b0] sm:$0xff]  ;;  %v5817_v4 = vld [vmem:[%s9213_s1 + $0x140] sm:$0xff] }
 0x16e   :  { %v3622_v37 = vpop.eup %3621  ;;  %v623_v50 = vmul.f32 %v3620_v24, %v622_v33  ;;  %vm789_vm14 = vcmp.eq.f32.partialorder %v788_v9, 8.507059e+37  ;;  %v5847_v9 = vld [vmem:[%s9213_s1 + $0x128] sm:$0xff] }
 0x16f   :  { %v5629_v40 = vpop.eup %3623  ;;  %v605_v63 = vadd.f32 %v3618_v19, %v604_v35  ;;  %v761_v49 = vmul.f32 %v3622_v37, %v5608_v15  ;;  %vm766_vm8 = vweird.f32 %v3622_v37 }
 0x170   :  { %v3626_v58 = vpop.eup %3625  ;;  %v624_v46 = vadd.f32 %v3620_v24, %v623_v50  ;;  %v641_v48 = vmul.f32 %v5629_v40, %v5611_v18  ;;  %vm767_vm10 = vmor %vm765_vm3, %vm766_vm8  ;;  %vm646_vm12 = vweird.f32 %v5629_v40  ;;  %v5691_v50 = vld [vmem:[%s9213_s1 + $0x1e8] sm:$0xff] }
 0x171   :  { %v3628_v53 = vpop.eup %3627  ;;  %v609_v44 = vsel %vm608_vm4, %v3618_v19, %v605_v63  ;;  %v762_v45 = vsub.f32 1.0, %v761_v49  ;;  %v780_v52 = vmul.f32 %v3626_v58, %v5614_v21  ;;  %vm785_vm9 = vweird.f32 %v3626_v58  ;;  %v5715_v49 = vld [vmem:[%s9213_s1 + $0x1c0] sm:$0xff] }
 0x172   :  { %v614_v51 = vsel %vm5621_vm15, %v613_v36, %v609_v44  ;;  %v628_v55 = vsel %vm627_vm6, %v3620_v24, %v624_v46  ;;  %v642_v56 = vsub.f32 1.0, %v641_v48  ;;  %v3630_v57 = vpop.eup %3629  ;;  %v651_v19 = vand.u32 2147483648, %v5611_v18  ;;  %vm786_vm13 = vmor %vm784_vm5, %vm785_vm9  ;;  %v5739_v44 = vld [vmem:[%s9213_s1 + $0x1a0] sm:$0xff] }
 0x173   :  { %v633_v62 = vsel %vm5625_vm2, %v632_v39, %v628_v55  ;;  %v656_v59 = vmul.f32 %v3628_v53, %v614_v51  ;;  %v781_v0 = vsub.f32 1.0, %v780_v52  ;;  %v763_v1 = vmul.f32 %v3622_v37, %v762_v45  ;;  %v3632_v6 = vpop.eup %3631  ;;  %vm647_vm15 = vmor %vm645_vm7, %vm646_vm12  ;;  %v5733_v53 = vld [vmem:[%s9213_s1 + $0x1d8] sm:$0xff]  ;;  %v5745_v45 = vld [vmem:[%s9213_s1 + $0x1a8] sm:$0xff] }
 0x174   :  { %v655_v2 = vmul.f32 0.0, %v633_v62  ;;  %v643_v3 = vmul.f32 %v5629_v40, %v642_v56  ;;  %v5649_v5 = vadd.f32 1.0, %v3630_v57  ;;  %v649_v24 = vand.u32 2147483647, %v5611_v18  ;;  %v5757_v51 = vld [vmem:[%s9213_s1 + $0x1b8] sm:$0xff]  ;;  %v5765_v56 = vld [vmem:[%s9213_s1 + $0x180] sm:$0xff] }
 0x175   :  { %v782_v7 = vmul.f32 %v3626_v58, %v781_v0  ;;  %v764_v8 = vadd.f32 %v3622_v37, %v763_v1  ;;  %v652_v29 = vor.u32 1.1754944e-38, %v651_v19  ;;  %v5771_v57 = vld [vmem:[%s9213_s1 + $0x188] sm:$0xff]  ;;  %v5777_v62 = vld [vmem:[%s9213_s1 + $0x190] sm:$0xff]  ;;  %v5793_v0 = vld [vmem:[%s9213_s1 + $0x160] sm:$0xff]  ;;  %vm1046_vm5 = vcmp.eq.s32.totalorder %v5437_v38, 2 }
 0x176   :  { %v5652_v11 = vadd.f32 %v656_v59, %v655_v2  ;;  %3633 = vrcp.f32 %v5649_v5  ;;  %v644_v17 = vadd.f32 %v5629_v40, %v643_v3  ;;  %vm650_vm0 = vcmp.eq.f32.partialorder %v649_v24, 8.507059e+37  ;;  %v5783_v59 = vld [vmem:[%s9213_s1 + $0x198] sm:$0xff]  ;;  %v5799_v1 = vld [vmem:[%s9213_s1 + $0x168] sm:$0xff]  ;;  %v5805_v2 = vld [vmem:[%s9213_s1 + $0x170] sm:$0xff] }
 0x177   :  { %v768_v14 = vsel %vm767_vm10, %v3622_v37, %v764_v8  ;;  %v783_v16 = vadd.f32 %v3626_v58, %v782_v7  ;;  %vm804_vm2 = vweird.f32 %v5649_v5  ;;  %v808_v36 = vand.u32 2147483647, %v5649_v5  ;;  %v5685_v37 = vld [vmem:[%s9213_s1 + $0x1e0] sm:$0xff]  ;;  %v5811_v3 = vld [vmem:[%s9213_s1 + $0x178] sm:$0xff]  ;;  %v5877_v19 = vld [vmem:[%s9213_s1 + $0x110] sm:$0xff] }
 0x178   :  { %3635 = vtanh.f32 %v5652_v11  ;;  %v773_v15 = vsel %vm770_vm11, %v772_v12, %v768_v14  ;;  %v648_v27 = vsel %vm647_vm15, %v5629_v40, %v644_v17  ;;  %v5707_v40 = vld [vmem:[%s9213_s1 + $0x1f8] sm:$0xff]  ;;  %v5841_v8 = vld [vmem:[%s9213_s1 + $0x120] sm:$0xff]  ;;  %v5853_v12 = vld [vmem:[%s9213_s1 + $0x130] sm:$0xff] }
 0x179   :  { %v787_v22 = vsel %vm786_vm13, %v3626_v58, %v783_v16  ;;  %v815_v23 = vmul.f32 %v3632_v6, %v773_v15  ;;  %v653_v32 = vsel %vm650_vm0, %v652_v29, %v648_v27  ;;  %v5721_v58 = vld [vmem:[%s9213_s1 + $0x1c8] sm:$0xff]  ;;  %vm809_vm4 = vcmp.eq.f32.partialorder %v808_v36, 8.507059e+37  ;;  %v5829_v6 = vld [vmem:[%s9213_s1 + $0x150] sm:$0xff]  ;;  %v5835_v7 = vld [vmem:[%s9213_s1 + $0x158] sm:$0xff] }
 0x17a   :  { %v792_v26 = vsel %vm789_vm14, %v791_v20, %v787_v22  ;;  %v5859_v14 = vld [vmem:[%s9213_s1 + $0x138] sm:$0xff]  ;;  %v5865_v16 = vld [vmem:[%s9213_s1 + $0x100] sm:$0xff]  ;;  %v5871_v17 = vld [vmem:[%s9213_s1 + $0x108] sm:$0xff] }
 0x17b   :  { %v814_v25 = vmul.f32 %v792_v26, %v5451_v13  ;;  %v810_v13 = vand.u32 2147483648, %v5649_v5  ;;  %v5883_v20 = vld [vmem:[%s9213_s1 + $0x118] sm:$0xff]  ;;  %v5889_v15 = vld [vmem:[%s9213_s1 + $0xe0] sm:$0xff]  ;;  %v5895_v22 = vld [vmem:[%s9213_s1 + $0xe8] sm:$0xff] }
 0x17c   :  { %v3634_v28 = vpop.eup %3633  ;;  %10123 = vst [vmem:[#allocation11_spill] sm:$0xff] %v5895_v22  ;;  %v5907_v24 = vld [vmem:[%s9213_s1 + $0xf8] sm:$0xff]  ;;  %v5913_v26 = vld [vmem:[%s9213_s1 + $0xc0] sm:$0xff]  ;;  %v5925_v27 = vld [vmem:[%s9213_s1 + $0xd0] sm:$0xff] }
 0x17d   :  { %v5669_v30 = vadd.f32 %v815_v23, %v814_v25  ;;  %v800_v21 = vmul.f32 %v3634_v28, %v5649_v5  ;;  %vm805_vm1 = vweird.f32 %v3634_v28  ;;  %v811_v48 = vor.u32 1.1754944e-38, %v810_v13  ;;  %v5823_v5 = vld [vmem:[%s9213_s1 + $0x148] sm:$0xff]  ;;  %v5901_v23 = vld [vmem:[%s9213_s1 + $0xf0] sm:$0xff]  ;;  %10125 = vst [vmem:[#allocation13_spill] sm:$0xff] %v5907_v24  ;;  %v5937_v29 = vld [vmem:[%s9213_s1 + $0xa0] sm:$0xff] }
 0x17e   :  { %v3636_v31 = vpop.eup %3635  ;;  %vm5694_vm3 = vmor %vm804_vm2, %vm805_vm1  ;;  %10124 = vst [vmem:[#allocation12_spill] sm:$0xff] %v5901_v23  ;;  %v5919_v25 = vld [vmem:[%s9213_s1 + $0xc8] sm:$0xff]  ;;  %v5973_v13 = vld [vmem:[%s9213_s1 + $0x90] sm:$0xff] }
 0x17f   :  { %v801_v33 = vsub.f32 1.0, %v800_v21  ;;  %v5672_v34 = vmul.f32 %v3636_v31, %v653_v32  ;;  %3637 = vtanh.f32 %v5669_v30  ;;  %10126 = vst [vmem:[#allocation28_spill] sm:$0xff] %v5913_v26  ;;  %v5943_v21 = vld [vmem:[%s9213_s1 + $0xa8] sm:$0xff]  ;;  %v5949_v31 = vld [vmem:[%s9213_s1 + $0xb0] sm:$0xff]  ;;  %v5955_v32 = vld [vmem:[%s9213_s1 + $0xb8] sm:$0xff] }
 0x180   :  { %10127 = vst [vmem:[#allocation14_spill] sm:$0xff] %v5919_v25  ;;  %v5985_v36 = vld [vmem:[%s9213_s1 + $0x60] sm:$0xff]  ;;  %v5991_v39 = vld [vmem:[%s9213_s1 + $0x68] sm:$0xff] }
 0x181   :  { %v802_v18 = vmul.f32 %v3634_v28, %v801_v33  ;;  %835 = vmatmul.f32.vlgmr.msra.gmra.mxu0 %v5672_v34  ;;  %855 = vmatmul.f32.vlgmr.msra.gmra.mxu1 %v5672_v34  ;;  %10128 = vst [vmem:[#allocation15_spill] sm:$0xff] %v5925_v27  ;;  %v5961_v33 = vld [vmem:[%s9213_s1 + $0x80] sm:$0xff]  ;;  %v6064_v38 = vld [vmem:[%s9213_s1 + $0x8] sm:$0xff] }
 0x182   :  { %875 = vmatmul.f32.vlgmr.msra.gmra.mxu2 %v5672_v34  ;;  %895 = vmatmul.f32.vlgmr.msra.gmra.mxu3 %v5672_v34  ;;  %10130 = vst [vmem:[#allocation32_spill] sm:$0xff] %v5937_v29 }
 0x183   :  { %v803_v35 = vadd.f32 %v3634_v28, %v802_v18  ;;  %1058 = vmatpush.msra.mxu0 %v5685_v37  ;;  %1078 = vmatpush.msra.mxu1 %v5691_v50  ;;  %10131 = vst [vmem:[#allocation17_spill] sm:$0xff] %v5943_v21  ;;  %v5967_v18 = vld [vmem:[%s9213_s1 + $0x88] sm:$0xff] }
 0x184   :  { %1098 = vmatpush.msra.mxu2 %v5701_v54  ;;  %1118 = vmatpush.msra.mxu3 %v5707_v40  ;;  %10132 = vst [vmem:[#allocation18_spill] sm:$0xff] %v5949_v31 }
 0x185   :  { %v807_v63 = vsel %vm5694_vm3, %v3634_v28, %v803_v35  ;;  %1059 = vmatpush.msra.mxu0 %v5715_v49  ;;  %1079 = vmatpush.msra.mxu1 %v5721_v58  ;;  %v3638_v46 = vpop.eup %3637  ;;  %v5931_v28 = vld [vmem:[%s9213_s1 + $0xd8] sm:$0xff]  ;;  %10133 = vst [vmem:[#allocation19_spill] sm:$0xff] %v5955_v32 }
 0x186   :  { %1099 = vmatpush.msra.mxu2 %v5727_v41  ;;  %1119 = vmatpush.msra.mxu3 %v5733_v53  ;;  %v812_v52 = vsel %vm809_vm4, %v811_v48, %v807_v63  ;;  %10129 = vst [vmem:[#allocation16_spill] sm:$0xff] %v5931_v28  ;;  %v5979_v35 = vld [vmem:[%s9213_s1 + $0x98] sm:$0xff]  ;;  %v5997_v63 = vld [vmem:[%s9213_s1 + $0x70] sm:$0xff]  ;;  %v6009_v48 = vld [vmem:[%s9213_s1 + $0x40] sm:$0xff] }
 0x187   :  { %1060 = vmatpush.msra.mxu0 %v5739_v44  ;;  %1080 = vmatpush.msra.mxu1 %v5745_v45  ;;  %v5760_v55 = vmul.f32 %v3638_v46, %v812_v52  ;;  %10134 = vst [vmem:[#allocation35_spill] sm:$0xff] %v5961_v33  ;;  %v6003_v46 = vld [vmem:[%s9213_s1 + $0x78] sm:$0xff]  ;;  %v6015_v52 = vld [vmem:[%s9213_s1 + $0x48] sm:$0xff] }
 0x188   :  { %1100 = vmatpush.msra.mxu2 %v5751_v47  ;;  %1120 = vmatpush.msra.mxu3 %v5757_v51  ;;  %10135 = vst [vmem:[#allocation20_spill] sm:$0xff] %v5967_v18 }
 0x189   :  { %1061 = vmatpush.msra.mxu0 %v5765_v56  ;;  %1081 = vmatpush.msra.mxu1 %v5771_v57  ;;  %10136 = vst [vmem:[#allocation21_spill] sm:$0xff] %v5973_v13 }
 0x18a   :  { %1101 = vmatpush.msra.mxu2 %v5777_v62  ;;  %1121 = vmatpush.msra.mxu3 %v5783_v59  ;;  %10137 = vst [vmem:[#allocation22_spill] sm:$0xff] %v5979_v35 }
 0x18b   :  { %915 = vmatmul.f32.vlgmr.msrb.gmra.mxu0 %v5760_v55  ;;  %935 = vmatmul.f32.vlgmr.msrb.gmra.mxu1 %v5760_v55  ;;  %10138 = vst [vmem:[#allocation39_spill] sm:$0xff] %v5985_v36 }
 0x18c   :  { %955 = vmatmul.f32.vlgmr.msrb.gmra.mxu2 %v5760_v55  ;;  %975 = vmatmul.f32.vlgmr.msrb.gmra.mxu3 %v5760_v55  ;;  %10139 = vst [vmem:[#allocation23_spill] sm:$0xff] %v5991_v39 }
 0x18d   :  { %1062 = vmatpush.msra.mxu0 %v5793_v0  ;;  %1082 = vmatpush.msra.mxu1 %v5799_v1  ;;  %10140 = vst [vmem:[#allocation25_spill] sm:$0xff] %v5997_v63 }
 0x18e   :  { %1102 = vmatpush.msra.mxu2 %v5805_v2  ;;  %1122 = vmatpush.msra.mxu3 %v5811_v3  ;;  %10141 = vst [vmem:[#allocation26_spill] sm:$0xff] %v6003_v46 }
 0x18f   :  { %1063 = vmatpush.msra.mxu0 %v5817_v4  ;;  %1083 = vmatpush.msra.mxu1 %v5823_v5  ;;  %10142 = vst [vmem:[#allocation43_spill] sm:$0xff] %v6009_v48 }
 0x190   :  { %1103 = vmatpush.msra.mxu2 %v5829_v6  ;;  %1123 = vmatpush.msra.mxu3 %v5835_v7  ;;  %10143 = vst [vmem:[#allocation27_spill] sm:$0xff] %v6015_v52 }
 0x191   :  { %1064 = vmatpush.msra.mxu0 %v5841_v8  ;;  %1084 = vmatpush.msra.mxu1 %v5847_v9  ;;  %10151 = vst [vmem:[#allocation36_spill] sm:$0xff] %v6064_v38 }
 0x192   :  { %1104 = vmatpush.msra.mxu2 %v5853_v12  ;;  %1124 = vmatpush.msra.mxu3 %v5859_v14 }
 0x193   :  { %1065 = vmatpush.msra.mxu0 %v5865_v16  ;;  %1085 = vmatpush.msra.mxu1 %v5871_v17 }
 0x194   :  { %1105 = vmatpush.msra.mxu2 %v5877_v19  ;;  %1125 = vmatpush.msra.mxu3 %v5883_v20 }
 0x195   :  { %1066 = vmatpush.msra.mxu0 %v5889_v15  ;;  %1086 = vmatpush.msra.mxu1 %v5895_v22 }
 0x196   :  { %1106 = vmatpush.msra.mxu2 %v5901_v23  ;;  %1126 = vmatpush.msra.mxu3 %v5907_v24 }
 0x197   :  { %1067 = vmatpush.msra.mxu0 %v5913_v26  ;;  %1087 = vmatpush.msra.mxu1 %v5919_v25 }
 0x198   :  { %1107 = vmatpush.msra.mxu2 %v5925_v27  ;;  %1127 = vmatpush.msra.mxu3 %v5931_v28 }
 0x199   :  { %1068 = vmatpush.msra.mxu0 %v5937_v29  ;;  %1088 = vmatpush.msra.mxu1 %v5943_v21 }
 0x19a   :  { %1108 = vmatpush.msra.mxu2 %v5949_v31  ;;  %1128 = vmatpush.msra.mxu3 %v5955_v32 }
 0x19b   :  { %1069 = vmatpush.msra.mxu0 %v5961_v33  ;;  %1089 = vmatpush.msra.mxu1 %v5967_v18 }
 0x19c   :  { %1109 = vmatpush.msra.mxu2 %v5973_v13  ;;  %1129 = vmatpush.msra.mxu3 %v5979_v35 }
 0x19d   :  { %1070 = vmatpush.msra.mxu0 %v5985_v36  ;;  %1090 = vmatpush.msra.mxu1 %v5991_v39 }
 0x19e   :  { %1110 = vmatpush.msra.mxu2 %v5997_v63  ;;  %1130 = vmatpush.msra.mxu3 %v6003_v46  ;;  %v6027_v46 = vld [vmem:[%s9213_s1 + $0x58] sm:$0xff]  ;;  %v6096_v63 = vld [vmem:[#allocation4 + $0x1c0] sm:$0xff] }
 0x19f   :  { %1071 = vmatpush.msra.mxu0 %v6009_v48  ;;  %1091 = vmatpush.msra.mxu1 %v6015_v52  ;;  %10145 = vst [vmem:[#allocation30_spill] sm:$0xff] %v6027_v46  ;;  %v6033_v48 = vld [vmem:[%s9213_s1 + $0x20] sm:$0xff]  ;;  %v6039_v52 = vld [vmem:[%s9213_s1 + $0x28] sm:$0xff] }
 0x1a0   :  { %1111 = vmatpush.msra.mxu2 %v6021_v42  ;;  %1131 = vmatpush.msra.mxu3 %v6027_v46  ;;  %10146 = vst [vmem:[#allocation47_spill] sm:$0xff] %v6033_v48  ;;  %v6046_v46 = vld [vmem:[%s9213_s1 + $0x30] sm:$0xff] }
 0x1a1   :  { %1072 = vmatpush.msra.mxu0 %v6033_v48  ;;  %10147 = vst [vmem:[#allocation31_spill] sm:$0xff] %v6039_v52  ;;  %1092 = vmatpush.msra.mxu1 %v6039_v52  ;;  %v6052_v48 = vld [vmem:[%s9213_s1 + $0x38] sm:$0xff]  ;;  %v6058_v52 = vld [vmem:[%s9213_s1] sm:$0xff] }
 0x1a2   :  { %10148 = vst [vmem:[#allocation33_spill] sm:$0xff] %v6046_v46  ;;  %1112 = vmatpush.msra.mxu2 %v6046_v46  ;;  %1132 = vmatpush.msra.mxu3 %v6052_v48  ;;  %v6070_v46 = vld [vmem:[%s9213_s1 + $0x10] sm:$0xff] }
 0x1a3   :  { %10149 = vst [vmem:[#allocation34_spill] sm:$0xff] %v6052_v48  ;;  %1073 = vmatpush.msra.mxu0 %v6058_v52  ;;  %1093 = vmatpush.msra.mxu1 %v6064_v38  ;;  %v6076_v48 = vld [vmem:[%s9213_s1 + $0x18] sm:$0xff]  ;;  %v6084_v38 = vld [vmem:[#allocation4 + $0x1e0] sm:$0xff] }
 0x1a4   :  { %10150 = vst [vmem:[#allocation51_spill] sm:$0xff] %v6058_v52  ;;  %1113 = vmatpush.msra.mxu2 %v6070_v46  ;;  %1133 = vmatpush.msra.mxu3 %v6076_v48  ;;  %v10154_v52 = vmov 0  }
 0x1a5   :  { %10152 = vst [vmem:[#allocation37_spill] sm:$0xff] %v6070_v46  ;;  %v1047_v42 = vsel %vm1046_vm5, 1, %v10154_v52  ;;  %1074 = vmatmul.f32.vlgmr.msra.gmra.mxu0 %v5760_v55  ;;  %1094 = vmatmul.f32.vlgmr.msra.gmra.mxu1 %v5760_v55  ;;  %v6087_v46 = vld [vmem:[#allocation4 + $0x1e8] sm:$0xff]  ;;  %v6093_v52 = vld [vmem:[#allocation4 + $0x1f8] sm:$0xff] }
 0x1a6   :  { %10153 = vst [vmem:[#allocation38_spill] sm:$0xff] %v6076_v48  ;;  %1114 = vmatmul.f32.vlgmr.msra.gmra.mxu2 %v5760_v55  ;;  %1134 = vmatmul.f32.vlgmr.msra.gmra.mxu3 %v5760_v55  ;;  %v6090_v48 = vld [vmem:[#allocation4 + $0x1f0] sm:$0xff] }
 0x1a7   :  { %1049 = vperm.xlu0 %3583, %v1047_v42   ;;  %10155 = vst [vmem:[#allocation55_spill] sm:$0xff] %v6084_v38  ;;  %1205 = vmatpush.msrb.mxu0 %v6084_v38  ;;  %v6099_v42 = vld [vmem:[#allocation4 + $0x1c8] sm:$0xff]  ;;  %v6102_v55 = vld [vmem:[#allocation4 + $0x1d0] sm:$0xff] }
 0x1a8   :  { %10156 = vst [vmem:[#allocation40_spill] sm:$0xff] %v6087_v46  ;;  %1225 = vmatpush.msrb.mxu1 %v6087_v46  ;;  %1245 = vmatpush.msrb.mxu2 %v6090_v48  ;;  %v6105_v46 = vld [vmem:[#allocation4 + $0x1d8] sm:$0xff] }
 0x1a9   :  { %10157 = vst [vmem:[#allocation41_spill] sm:$0xff] %v6090_v48  ;;  %1265 = vmatpush.msrb.mxu3 %v6093_v52  ;;  %1206 = vmatpush.msrb.mxu0 %v6096_v63  ;;  %v6108_v48 = vld [vmem:[#allocation4 + $0x1a0] sm:$0xff] }
 0x1aa   :  { %10158 = vst [vmem:[#allocation42_spill] sm:$0xff] %v6093_v52  ;;  %1226 = vmatpush.msrb.mxu1 %v6099_v42  ;;  %1246 = vmatpush.msrb.mxu2 %v6102_v55  ;;  %v6111_v52 = vld [vmem:[#allocation4 + $0x1a8] sm:$0xff] }
 0x1ab   :  { %10159 = vst [vmem:[#allocation59_spill] sm:$0xff] %v6096_v63  ;;  %1266 = vmatpush.msrb.mxu3 %v6105_v46  ;;  %1207 = vmatpush.msrb.mxu0 %v6108_v48  ;;  %v6114_v63 = vld [vmem:[#allocation4 + $0x1b0] sm:$0xff] }
 0x1ac   :  { %10160 = vst [vmem:[#allocation44_spill] sm:$0xff] %v6099_v42  ;;  %1227 = vmatpush.msrb.mxu1 %v6111_v52  ;;  %1247 = vmatpush.msrb.mxu2 %v6114_v63  ;;  %v6117_v42 = vld [vmem:[#allocation4 + $0x1b8] sm:$0xff] }
 0x1ad   :  { %10161 = vst [vmem:[#allocation45_spill] sm:$0xff] %v6102_v55  ;;  %1267 = vmatpush.msrb.mxu3 %v6117_v42  ;;  %v6120_v55 = vld [vmem:[#allocation4 + $0x180] sm:$0xff] }
 0x1ae   :  { %10162 = vst [vmem:[#allocation46_spill] sm:$0xff] %v6105_v46  ;;  %1208 = vmatpush.msrb.mxu0 %v6120_v55  ;;  %v6123_v46 = vld [vmem:[#allocation4 + $0x188] sm:$0xff] }
 0x1af   :  { %10163 = vst [vmem:[#allocation63_spill] sm:$0xff] %v6108_v48  ;;  %1228 = vmatpush.msrb.mxu1 %v6123_v46  ;;  %v6126_v48 = vld [vmem:[#allocation4 + $0x190] sm:$0xff] }
 0x1b0   :  { %10164 = vst [vmem:[#allocation48_spill] sm:$0xff] %v6111_v52  ;;  %1248 = vmatpush.msrb.mxu2 %v6126_v48  ;;  %v6129_v52 = vld [vmem:[#allocation4 + $0x198] sm:$0xff] }
 0x1b1   :  { %10165 = vst [vmem:[#allocation49_spill] sm:$0xff] %v6114_v63  ;;  %1268 = vmatpush.msrb.mxu3 %v6129_v52  ;;  %v6132_v63 = vld [vmem:[#allocation4 + $0x160] sm:$0xff] }
 0x1b2   :  { %10166 = vst [vmem:[#allocation50_spill] sm:$0xff] %v6117_v42  ;;  %1209 = vmatpush.msrb.mxu0 %v6132_v63  ;;  %v6135_v42 = vld [vmem:[#allocation4 + $0x168] sm:$0xff] }
 0x1b3   :  { %10167 = vst [vmem:[#allocation67_spill] sm:$0xff] %v6120_v55  ;;  %1229 = vmatpush.msrb.mxu1 %v6135_v42  ;;  %v6138_v55 = vld [vmem:[#allocation4 + $0x170] sm:$0xff] }
 0x1b4   :  { %10168 = vst [vmem:[#allocation52_spill] sm:$0xff] %v6123_v46  ;;  %1249 = vmatpush.msrb.mxu2 %v6138_v55  ;;  %v6141_v46 = vld [vmem:[#allocation4 + $0x178] sm:$0xff] }
 0x1b5   :  { %10169 = vst [vmem:[#allocation53_spill] sm:$0xff] %v6126_v48  ;;  %1269 = vmatpush.msrb.mxu3 %v6141_v46  ;;  %v6144_v48 = vld [vmem:[#allocation4 + $0x140] sm:$0xff] }
 0x1b6   :  { %10170 = vst [vmem:[#allocation54_spill] sm:$0xff] %v6129_v52  ;;  %1210 = vmatpush.msrb.mxu0 %v6144_v48  ;;  %v6147_v52 = vld [vmem:[#allocation4 + $0x148] sm:$0xff] }
 0x1b7   :  { %10171 = vst [vmem:[#allocation71_spill] sm:$0xff] %v6132_v63  ;;  %1230 = vmatpush.msrb.mxu1 %v6147_v52  ;;  %v6150_v63 = vld [vmem:[#allocation4 + $0x150] sm:$0xff] }
 0x1b8   :  { %10172 = vst [vmem:[#allocation56_spill] sm:$0xff] %v6135_v42  ;;  %1250 = vmatpush.msrb.mxu2 %v6150_v63  ;;  %v6153_v42 = vld [vmem:[#allocation4 + $0x158] sm:$0xff] }
 0x1b9   :  { %10173 = vst [vmem:[#allocation57_spill] sm:$0xff] %v6138_v55  ;;  %1270 = vmatpush.msrb.mxu3 %v6153_v42  ;;  %v6156_v55 = vld [vmem:[#allocation4 + $0x120] sm:$0xff] }
 0x1ba   :  { %10174 = vst [vmem:[#allocation58_spill] sm:$0xff] %v6141_v46  ;;  %1211 = vmatpush.msrb.mxu0 %v6156_v55  ;;  %v6159_v46 = vld [vmem:[#allocation4 + $0x128] sm:$0xff] }
 0x1bb   :  { %10175 = vst [vmem:[#allocation75_spill] sm:$0xff] %v6144_v48  ;;  %1231 = vmatpush.msrb.mxu1 %v6159_v46  ;;  %v6162_v48 = vld [vmem:[#allocation4 + $0x130] sm:$0xff] }
 0x1bc   :  { %10176 = vst [vmem:[#allocation60_spill] sm:$0xff] %v6147_v52  ;;  %1251 = vmatpush.msrb.mxu2 %v6162_v48  ;;  %v6165_v52 = vld [vmem:[#allocation4 + $0x138] sm:$0xff] }
 0x1bd   :  { %10177 = vst [vmem:[#allocation61_spill] sm:$0xff] %v6150_v63  ;;  %1271 = vmatpush.msrb.mxu3 %v6165_v52  ;;  %v6168_v63 = vld [vmem:[#allocation4 + $0x100] sm:$0xff] }
 0x1be   :  { %10178 = vst [vmem:[#allocation62_spill] sm:$0xff] %v6153_v42  ;;  %1212 = vmatpush.msrb.mxu0 %v6168_v63  ;;  %v6171_v42 = vld [vmem:[#allocation4 + $0x108] sm:$0xff] }
 0x1bf   :  { %10179 = vst [vmem:[#allocation79_spill] sm:$0xff] %v6156_v55  ;;  %1232 = vmatpush.msrb.mxu1 %v6171_v42  ;;  %v6174_v55 = vld [vmem:[#allocation4 + $0x110] sm:$0xff] }
 0x1c0   :  { %10180 = vst [vmem:[#allocation64_spill] sm:$0xff] %v6159_v46  ;;  %1252 = vmatpush.msrb.mxu2 %v6174_v55  ;;  %v6177_v46 = vld [vmem:[#allocation4 + $0x118] sm:$0xff] }
 0x1c1   :  { %10181 = vst [vmem:[#allocation65_spill] sm:$0xff] %v6162_v48  ;;  %1272 = vmatpush.msrb.mxu3 %v6177_v46  ;;  %v6180_v48 = vld [vmem:[#allocation4 + $0xe0] sm:$0xff] }
 0x1c2   :  { %10182 = vst [vmem:[#allocation66_spill] sm:$0xff] %v6165_v52  ;;  %1213 = vmatpush.msrb.mxu0 %v6180_v48  ;;  %v6183_v52 = vld [vmem:[#allocation4 + $0xe8] sm:$0xff] }
 0x1c3   :  { %10183 = vst [vmem:[#allocation83_spill] sm:$0xff] %v6168_v63  ;;  %1233 = vmatpush.msrb.mxu1 %v6183_v52  ;;  %v6186_v63 = vld [vmem:[#allocation4 + $0xf0] sm:$0xff] }
 0x1c4   :  { %10184 = vst [vmem:[#allocation68_spill] sm:$0xff] %v6171_v42  ;;  %1253 = vmatpush.msrb.mxu2 %v6186_v63  ;;  %v6189_v42 = vld [vmem:[#allocation4 + $0xf8] sm:$0xff] }
 0x1c5   :  { %10185 = vst [vmem:[#allocation69_spill] sm:$0xff] %v6174_v55  ;;  %1273 = vmatpush.msrb.mxu3 %v6189_v42  ;;  %v6192_v55 = vld [vmem:[#allocation4 + $0xc0] sm:$0xff] }
 0x1c6   :  { %10186 = vst [vmem:[#allocation70_spill] sm:$0xff] %v6177_v46  ;;  %1214 = vmatpush.msrb.mxu0 %v6192_v55  ;;  %v6195_v46 = vld [vmem:[#allocation4 + $0xc8] sm:$0xff] }
 0x1c7   :  { %10187 = vst [vmem:[#allocation87_spill] sm:$0xff] %v6180_v48  ;;  %1234 = vmatpush.msrb.mxu1 %v6195_v46  ;;  %v6198_v48 = vld [vmem:[#allocation4 + $0xd0] sm:$0xff] }
 0x1c8   :  { %10188 = vst [vmem:[#allocation72_spill] sm:$0xff] %v6183_v52  ;;  %1254 = vmatpush.msrb.mxu2 %v6198_v48  ;;  %v6201_v52 = vld [vmem:[#allocation4 + $0xd8] sm:$0xff] }
 0x1c9   :  { %10189 = vst [vmem:[#allocation73_spill] sm:$0xff] %v6186_v63  ;;  %1274 = vmatpush.msrb.mxu3 %v6201_v52  ;;  %v6204_v63 = vld [vmem:[#allocation4 + $0xa0] sm:$0xff] }
 0x1ca   :  { %10190 = vst [vmem:[#allocation74_spill] sm:$0xff] %v6189_v42  ;;  %1215 = vmatpush.msrb.mxu0 %v6204_v63  ;;  %v6207_v42 = vld [vmem:[#allocation4 + $0xa8] sm:$0xff] }
 0x1cb   :  { %10191 = vst [vmem:[#allocation76_spill] sm:$0xff] %v6192_v55  ;;  %1235 = vmatpush.msrb.mxu1 %v6207_v42  ;;  %v6210_v55 = vld [vmem:[#allocation4 + $0xb0] sm:$0xff] }
 0x1cc   :  { %10192 = vst [vmem:[#allocation77_spill] sm:$0xff] %v6195_v46  ;;  %1255 = vmatpush.msrb.mxu2 %v6210_v55  ;;  %v6213_v46 = vld [vmem:[#allocation4 + $0xb8] sm:$0xff] }
 0x1cd   :  { %10193 = vst [vmem:[#allocation78_spill] sm:$0xff] %v6198_v48  ;;  %1275 = vmatpush.msrb.mxu3 %v6213_v46  ;;  %v6216_v48 = vld [vmem:[#allocation4 + $0x80] sm:$0xff] }
 0x1ce   :  { %10194 = vst [vmem:[#allocation80_spill] sm:$0xff] %v6201_v52  ;;  %1216 = vmatpush.msrb.mxu0 %v6216_v48  ;;  %v6219_v52 = vld [vmem:[#allocation4 + $0x88] sm:$0xff] }
 0x1cf   :  { %10195 = vst [vmem:[#allocation81_spill] sm:$0xff] %v6204_v63  ;;  %1236 = vmatpush.msrb.mxu1 %v6219_v52  ;;  %v6222_v63 = vld [vmem:[#allocation4 + $0x90] sm:$0xff] }
 0x1d0   :  { %10196 = vst [vmem:[#allocation82_spill] sm:$0xff] %v6207_v42  ;;  %1256 = vmatpush.msrb.mxu2 %v6222_v63  ;;  %v6225_v42 = vld [vmem:[#allocation4 + $0x98] sm:$0xff] }
 0x1d1   :  { %10197 = vst [vmem:[#allocation84_spill] sm:$0xff] %v6210_v55  ;;  %1276 = vmatpush.msrb.mxu3 %v6225_v42  ;;  %v6228_v55 = vld [vmem:[#allocation4 + $0x60] sm:$0xff] }
 0x1d2   :  { %10198 = vst [vmem:[#allocation85_spill] sm:$0xff] %v6213_v46  ;;  %1217 = vmatpush.msrb.mxu0 %v6228_v55  ;;  %v6231_v46 = vld [vmem:[#allocation4 + $0x68] sm:$0xff] }
 0x1d3   :  { %10199 = vst [vmem:[#allocation86_spill] sm:$0xff] %v6216_v48  ;;  %1237 = vmatpush.msrb.mxu1 %v6231_v46  ;;  %v6234_v48 = vld [vmem:[#allocation4 + $0x70] sm:$0xff] }
 0x1d4   :  { %10200 = vst [vmem:[#allocation88_spill] sm:$0xff] %v6219_v52  ;;  %1257 = vmatpush.msrb.mxu2 %v6234_v48  ;;  %v6237_v52 = vld [vmem:[#allocation4 + $0x78] sm:$0xff] }
 0x1d5   :  { %10201 = vst [vmem:[#allocation89_spill] sm:$0xff] %v6222_v63  ;;  %1277 = vmatpush.msrb.mxu3 %v6237_v52  ;;  %v6240_v63 = vld [vmem:[#allocation4 + $0x40] sm:$0xff] }
 0x1d6   :  { %10202 = vst [vmem:[#allocation97_spill] sm:$0xff] %v6225_v42  ;;  %1218 = vmatpush.msrb.mxu0 %v6240_v63  ;;  %v6243_v42 = vld [vmem:[#allocation4 + $0x48] sm:$0xff] }
 0x1d7   :  { %10203 = vst [vmem:[#allocation90_spill] sm:$0xff] %v6228_v55  ;;  %1238 = vmatpush.msrb.mxu1 %v6243_v42  ;;  %v6246_v55 = vld [vmem:[#allocation4 + $0x50] sm:$0xff] }
 0x1d8   :  { %10204 = vst [vmem:[#allocation91_spill] sm:$0xff] %v6231_v46  ;;  %1258 = vmatpush.msrb.mxu2 %v6246_v55  ;;  %v6249_v46 = vld [vmem:[#allocation4 + $0x58] sm:$0xff] }
 0x1d9   :  { %10205 = vst [vmem:[#allocation92_spill] sm:$0xff] %v6234_v48  ;;  %1278 = vmatpush.msrb.mxu3 %v6249_v46  ;;  %v6252_v48 = vld [vmem:[#allocation4 + $0x20] sm:$0xff] }
 0x1da   :  { %10206 = vst [vmem:[#allocation98_spill] sm:$0xff] %v6237_v52  ;;  %1219 = vmatpush.msrb.mxu0 %v6252_v48  ;;  %v6255_v52 = vld [vmem:[#allocation4 + $0x28] sm:$0xff] }
 0x1db   :  { %10207 = vst [vmem:[#allocation93_spill] sm:$0xff] %v6240_v63  ;;  %1239 = vmatpush.msrb.mxu1 %v6255_v52  ;;  %v6258_v63 = vld [vmem:[#allocation4 + $0x30] sm:$0xff] }
 0x1dc   :  { %10208 = vst [vmem:[#allocation94_spill] sm:$0xff] %v6243_v42  ;;  %1259 = vmatpush.msrb.mxu2 %v6258_v63  ;;  %v6261_v42 = vld [vmem:[#allocation4 + $0x38] sm:$0xff] }
 0x1dd   :  { %10209 = vst [vmem:[#allocation95_spill] sm:$0xff] %v6246_v55  ;;  %1279 = vmatpush.msrb.mxu3 %v6261_v42  ;;  %v6264_v55 = vld [vmem:[#allocation4] sm:$0xff] }
 0x1de   :  { %10210 = vst [vmem:[#allocation99_spill] sm:$0xff] %v6249_v46  ;;  %1220 = vmatpush.msrb.mxu0 %v6264_v55  ;;  %v6267_v46 = vld [vmem:[#allocation4 + $0x8] sm:$0xff] }
 0x1df   :  { %10211 = vst [vmem:[#allocation96_spill] sm:$0xff] %v6252_v48  ;;  %1240 = vmatpush.msrb.mxu1 %v6267_v46  ;;  %v6270_v48 = vld [vmem:[#allocation4 + $0x10] sm:$0xff] }
 0x1e0   :  { %10212 = vst [vmem:[#allocation100_spill] sm:$0xff] %v6255_v52  ;;  %1260 = vmatpush.msrb.mxu2 %v6270_v48  ;;  %v6273_v52 = vld [vmem:[#allocation4 + $0x18] sm:$0xff] }
 0x1e1   :  { %10213 = vst [vmem:[#allocation101_spill] sm:$0xff] %v6258_v63  ;;  %1280 = vmatpush.msrb.mxu3 %v6273_v52  ;;  %v6276_v63 = vld [vmem:[#allocation2 + $0x1e0] sm:$0xff] }
 0x1e2   :  { %10214 = vst [vmem:[#allocation102_spill] sm:$0xff] %v6261_v42  ;;  %1285 = vmatpush.msra.mxu0 %v6276_v63  ;;  %v6279_v42 = vld [vmem:[#allocation2 + $0x1e8] sm:$0xff] }
 0x1e3   :  { %10215 = vst [vmem:[#allocation103_spill] sm:$0xff] %v6264_v55  ;;  %1305 = vmatpush.msra.mxu1 %v6279_v42  ;;  %v6282_v55 = vld [vmem:[#allocation2 + $0x1f0] sm:$0xff] }
 0x1e4   :  { %10216 = vst [vmem:[#allocation104_spill] sm:$0xff] %v6267_v46  ;;  %1325 = vmatpush.msra.mxu2 %v6282_v55  ;;  %v6285_v46 = vld [vmem:[#allocation2 + $0x1f8] sm:$0xff] }
 0x1e5   :  { %10217 = vst [vmem:[#allocation105_spill] sm:$0xff] %v6270_v48  ;;  %1345 = vmatpush.msra.mxu3 %v6285_v46  ;;  %v6288_v48 = vld [vmem:[#allocation2 + $0x1c0] sm:$0xff] }
 0x1e6   :  { %10218 = vst [vmem:[#allocation106_spill] sm:$0xff] %v6273_v52  ;;  %1286 = vmatpush.msra.mxu0 %v6288_v48  ;;  %v6291_v52 = vld [vmem:[#allocation2 + $0x1c8] sm:$0xff] }
 0x1e7   :  { %10219 = vst [vmem:[#allocation107_spill] sm:$0xff] %v6276_v63  ;;  %1306 = vmatpush.msra.mxu1 %v6291_v52  ;;  %v6294_v63 = vld [vmem:[#allocation2 + $0x1d0] sm:$0xff] }
 0x1e8   :  { %10220 = vst [vmem:[#allocation108_spill] sm:$0xff] %v6279_v42  ;;  %1326 = vmatpush.msra.mxu2 %v6294_v63  ;;  %v6297_v42 = vld [vmem:[#allocation2 + $0x1d8] sm:$0xff] }
 0x1e9   :  { %10221 = vst [vmem:[#allocation109_spill] sm:$0xff] %v6282_v55  ;;  %1346 = vmatpush.msra.mxu3 %v6297_v42  ;;  %v6300_v55 = vld [vmem:[#allocation2 + $0x1a0] sm:$0xff] }
 0x1ea   :  { %10222 = vst [vmem:[#allocation110_spill] sm:$0xff] %v6285_v46  ;;  %1287 = vmatpush.msra.mxu0 %v6300_v55  ;;  %v6303_v46 = vld [vmem:[#allocation2 + $0x1a8] sm:$0xff] }
 0x1eb   :  { %10223 = vst [vmem:[#allocation111_spill] sm:$0xff] %v6288_v48  ;;  %1307 = vmatpush.msra.mxu1 %v6303_v46  ;;  %v6306_v48 = vld [vmem:[#allocation2 + $0x1b0] sm:$0xff] }
 0x1ec   :  { %10224 = vst [vmem:[#allocation112_spill] sm:$0xff] %v6291_v52  ;;  %1327 = vmatpush.msra.mxu2 %v6306_v48  ;;  %v6309_v52 = vld [vmem:[#allocation2 + $0x1b8] sm:$0xff] }
 0x1ed   :  { %10225 = vst [vmem:[#allocation113_spill] sm:$0xff] %v6294_v63  ;;  %1347 = vmatpush.msra.mxu3 %v6309_v52  ;;  %v6312_v63 = vld [vmem:[#allocation2 + $0x180] sm:$0xff] }
 0x1ee   :  { %10226 = vst [vmem:[#allocation114_spill] sm:$0xff] %v6297_v42  ;;  %1288 = vmatpush.msra.mxu0 %v6312_v63  ;;  %v6315_v42 = vld [vmem:[#allocation2 + $0x188] sm:$0xff] }
 0x1ef   :  { %10227 = vst [vmem:[#allocation115_spill] sm:$0xff] %v6300_v55  ;;  %1308 = vmatpush.msra.mxu1 %v6315_v42  ;;  %v6318_v55 = vld [vmem:[#allocation2 + $0x190] sm:$0xff] }
 0x1f0   :  { %10228 = vst [vmem:[#allocation116_spill] sm:$0xff] %v6303_v46  ;;  %1328 = vmatpush.msra.mxu2 %v6318_v55  ;;  %v6321_v46 = vld [vmem:[#allocation2 + $0x198] sm:$0xff] }
 0x1f1   :  { %10229 = vst [vmem:[#allocation117_spill] sm:$0xff] %v6306_v48  ;;  %1348 = vmatpush.msra.mxu3 %v6321_v46  ;;  %v6324_v48 = vld [vmem:[#allocation2 + $0x160] sm:$0xff] }
 0x1f2   :  { %10230 = vst [vmem:[#allocation118_spill] sm:$0xff] %v6309_v52  ;;  %1289 = vmatpush.msra.mxu0 %v6324_v48  ;;  %v6327_v52 = vld [vmem:[#allocation2 + $0x168] sm:$0xff] }
 0x1f3   :  { %10231 = vst [vmem:[#allocation119_spill] sm:$0xff] %v6312_v63  ;;  %1309 = vmatpush.msra.mxu1 %v6327_v52  ;;  %v6330_v63 = vld [vmem:[#allocation2 + $0x170] sm:$0xff] }
 0x1f4   :  { %10232 = vst [vmem:[#allocation120_spill] sm:$0xff] %v6315_v42  ;;  %1329 = vmatpush.msra.mxu2 %v6330_v63  ;;  %v6333_v42 = vld [vmem:[#allocation2 + $0x178] sm:$0xff] }
 0x1f5   :  { %10233 = vst [vmem:[#allocation121_spill] sm:$0xff] %v6318_v55  ;;  %1349 = vmatpush.msra.mxu3 %v6333_v42  ;;  %v6336_v55 = vld [vmem:[#allocation2 + $0x140] sm:$0xff] }
 0x1f6   :  { %10234 = vst [vmem:[#allocation122_spill] sm:$0xff] %v6321_v46  ;;  %1290 = vmatpush.msra.mxu0 %v6336_v55  ;;  %v6339_v46 = vld [vmem:[#allocation2 + $0x148] sm:$0xff] }
 0x1f7   :  { %10235 = vst [vmem:[#allocation123_spill] sm:$0xff] %v6324_v48  ;;  %1310 = vmatpush.msra.mxu1 %v6339_v46  ;;  %v6342_v48 = vld [vmem:[#allocation2 + $0x150] sm:$0xff] }
 0x1f8   :  { %10236 = vst [vmem:[#allocation124_spill] sm:$0xff] %v6327_v52  ;;  %1330 = vmatpush.msra.mxu2 %v6342_v48  ;;  %v6345_v52 = vld [vmem:[#allocation2 + $0x158] sm:$0xff] }
 0x1f9   :  { %10237 = vst [vmem:[#allocation125_spill] sm:$0xff] %v6330_v63  ;;  %1350 = vmatpush.msra.mxu3 %v6345_v52  ;;  %v6348_v63 = vld [vmem:[#allocation2 + $0x120] sm:$0xff] }
 0x1fa   :  { %10238 = vst [vmem:[#allocation126_spill] sm:$0xff] %v6333_v42  ;;  %1291 = vmatpush.msra.mxu0 %v6348_v63  ;;  %v6351_v42 = vld [vmem:[#allocation2 + $0x128] sm:$0xff] }
 0x1fb   :  { %10239 = vst [vmem:[#allocation127_spill] sm:$0xff] %v6336_v55  ;;  %1311 = vmatpush.msra.mxu1 %v6351_v42  ;;  %v6354_v55 = vld [vmem:[#allocation2 + $0x130] sm:$0xff] }
 0x1fc   :  { %10240 = vst [vmem:[#allocation128_spill] sm:$0xff] %v6339_v46  ;;  %1331 = vmatpush.msra.mxu2 %v6354_v55  ;;  %v6357_v46 = vld [vmem:[#allocation2 + $0x138] sm:$0xff] }
 0x1fd   :  { %10241 = vst [vmem:[#allocation129_spill] sm:$0xff] %v6342_v48  ;;  %1351 = vmatpush.msra.mxu3 %v6357_v46  ;;  %v6360_v48 = vld [vmem:[#allocation2 + $0x100] sm:$0xff] }
 0x1fe   :  { %10242 = vst [vmem:[#allocation130_spill] sm:$0xff] %v6345_v52  ;;  %1292 = vmatpush.msra.mxu0 %v6360_v48  ;;  %v6363_v52 = vld [vmem:[#allocation2 + $0x108] sm:$0xff]  ;;  %v856_v38 = vpop.f32.mrf.mxu1 }
 0x1ff   :  { %10243 = vst [vmem:[#allocation131_spill] sm:$0xff] %v6348_v63  ;;  %1312 = vmatpush.msra.mxu1 %v6363_v52  ;;  %v6366_v63 = vld [vmem:[#allocation2 + $0x110] sm:$0xff] }
 0x200   :  { %10244 = vst [vmem:[#allocation132_spill] sm:$0xff] %v6351_v42  ;;  %1332 = vmatpush.msra.mxu2 %v6366_v63  ;;  %v6369_v42 = vld [vmem:[#allocation2 + $0x118] sm:$0xff] }
 0x201   :  { %10245 = vst [vmem:[#allocation133_spill] sm:$0xff] %v6354_v55  ;;  %1352 = vmatpush.msra.mxu3 %v6369_v42  ;;  %v6372_v55 = vld [vmem:[#allocation2 + $0xe0] sm:$0xff] }
 0x202   :  { %10246 = vst [vmem:[#allocation134_spill] sm:$0xff] %v6357_v46  ;;  %1293 = vmatpush.msra.mxu0 %v6372_v55  ;;  %v6375_v46 = vld [vmem:[#allocation2 + $0xe8] sm:$0xff] }
 0x203   :  { %10247 = vst [vmem:[#allocation135_spill] sm:$0xff] %v6360_v48  ;;  %1313 = vmatpush.msra.mxu1 %v6375_v46  ;;  %v6378_v48 = vld [vmem:[#allocation2 + $0xf0] sm:$0xff] }
 0x204   :  { %10248 = vst [vmem:[#allocation136_spill] sm:$0xff] %v6363_v52  ;;  %1333 = vmatpush.msra.mxu2 %v6378_v48  ;;  %v6381_v52 = vld [vmem:[#allocation2 + $0xf8] sm:$0xff] }
 0x205   :  { %10249 = vst [vmem:[#allocation137_spill] sm:$0xff] %v6366_v63  ;;  %1353 = vmatpush.msra.mxu3 %v6381_v52  ;;  %v6384_v63 = vld [vmem:[#allocation2 + $0xc0] sm:$0xff]  ;;  %v896_v39 = vpop.f32.mrf.mxu3 }
 0x206   :  { %10250 = vst [vmem:[#allocation138_spill] sm:$0xff] %v6369_v42  ;;  %1294 = vmatpush.msra.mxu0 %v6384_v63  ;;  %v6387_v42 = vld [vmem:[#allocation2 + $0xc8] sm:$0xff] }
 0x207   :  { %10251 = vst [vmem:[#allocation139_spill] sm:$0xff] %v6372_v55  ;;  %1314 = vmatpush.msra.mxu1 %v6387_v42  ;;  %v6390_v55 = vld [vmem:[#allocation2 + $0xd0] sm:$0xff] }
 0x208   :  { %10252 = vst [vmem:[#allocation140_spill] sm:$0xff] %v6375_v46  ;;  %1334 = vmatpush.msra.mxu2 %v6390_v55  ;;  %v6393_v46 = vld [vmem:[#allocation2 + $0xd8] sm:$0xff]  ;;  %v936_v36 = vpop.f32.mrf.mxu1 }
 0x209   :  { %10253 = vst [vmem:[#allocation141_spill] sm:$0xff] %v6378_v48  ;;  %1354 = vmatpush.msra.mxu3 %v6393_v46  ;;  %v6396_v48 = vld [vmem:[#allocation2 + $0xa0] sm:$0xff]  ;;  %v937_v13 = vadd.f32 %v936_v36, %v856_v38 }
 0x20a   :  { %10254 = vst [vmem:[#allocation142_spill] sm:$0xff] %v6381_v52  ;;  %1295 = vmatpush.msra.mxu0 %v6396_v48  ;;  %v6399_v52 = vld [vmem:[#allocation2 + $0xa8] sm:$0xff] }
 0x20b   :  { %10255 = vst [vmem:[#allocation143_spill] sm:$0xff] %v6384_v63  ;;  %1315 = vmatpush.msra.mxu1 %v6399_v52  ;;  %v6402_v63 = vld [vmem:[#allocation2 + $0xb0] sm:$0xff]  ;;  %v980_v18 = vadd.f32 %v937_v13, %v5590_v60 }
 0x20c   :  { %10256 = vst [vmem:[#allocation144_spill] sm:$0xff] %v6387_v42  ;;  %1335 = vmatpush.msra.mxu2 %v6402_v63  ;;  %v6405_v42 = vld [vmem:[#allocation2 + $0xb8] sm:$0xff] }
 0x20d   :  { %10257 = vst [vmem:[#allocation145_spill] sm:$0xff] %v6390_v55  ;;  %1355 = vmatpush.msra.mxu3 %v6405_v42  ;;  %v6408_v55 = vld [vmem:[#allocation2 + $0x80] sm:$0xff]  ;;  %v3515_v32 = vmul.f32 -1.442695, %v980_v18 }
 0x20e   :  { %10258 = vst [vmem:[#allocation146_spill] sm:$0xff] %v6393_v46  ;;  %1296 = vmatpush.msra.mxu0 %v6408_v55  ;;  %v6411_v46 = vld [vmem:[#allocation2 + $0x88] sm:$0xff] }
 0x20f   :  { %10259 = vst [vmem:[#allocation147_spill] sm:$0xff] %v6396_v48  ;;  %1316 = vmatpush.msra.mxu1 %v6411_v46  ;;  %v6414_v48 = vld [vmem:[#allocation2 + $0x90] sm:$0xff] }
 0x210   :  { %10260 = vst [vmem:[#allocation148_spill] sm:$0xff] %v6399_v52  ;;  %1336 = vmatpush.msra.mxu2 %v6414_v48  ;;  %v6417_v52 = vld [vmem:[#allocation2 + $0x98] sm:$0xff] }
 0x211   :  { %10261 = vst [vmem:[#allocation149_spill] sm:$0xff] %v6402_v63  ;;  %1356 = vmatpush.msra.mxu3 %v6417_v52  ;;  %v6420_v63 = vld [vmem:[#allocation2 + $0x60] sm:$0xff] }
 0x212   :  { %10262 = vst [vmem:[#allocation150_spill] sm:$0xff] %v6405_v42  ;;  %1297 = vmatpush.msra.mxu0 %v6420_v63  ;;  %v6423_v42 = vld [vmem:[#allocation2 + $0x68] sm:$0xff] }
 0x213   :  { %10263 = vst [vmem:[#allocation151_spill] sm:$0xff] %v6408_v55  ;;  %1317 = vmatpush.msra.mxu1 %v6423_v42  ;;  %v6426_v55 = vld [vmem:[#allocation2 + $0x70] sm:$0xff] }
 0x214   :  { %10264 = vst [vmem:[#allocation152_spill] sm:$0xff] %v6411_v46  ;;  %1337 = vmatpush.msra.mxu2 %v6426_v55  ;;  %v6429_v46 = vld [vmem:[#allocation2 + $0x78] sm:$0xff] }
 0x215   :  { %10265 = vst [vmem:[#allocation153_spill] sm:$0xff] %v6414_v48  ;;  %1357 = vmatpush.msra.mxu3 %v6429_v46  ;;  %v6432_v48 = vld [vmem:[#allocation2 + $0x40] sm:$0xff] }
 0x216   :  { %10266 = vst [vmem:[#allocation154_spill] sm:$0xff] %v6417_v52  ;;  %1298 = vmatpush.msra.mxu0 %v6432_v48  ;;  %v6435_v52 = vld [vmem:[#allocation2 + $0x48] sm:$0xff] }
 0x217   :  { %10267 = vst [vmem:[#allocation155_spill] sm:$0xff] %v6420_v63  ;;  %1318 = vmatpush.msra.mxu1 %v6435_v52  ;;  %v6438_v63 = vld [vmem:[#allocation2 + $0x50] sm:$0xff] }
 0x218   :  { %10268 = vst [vmem:[#allocation156_spill] sm:$0xff] %v6423_v42  ;;  %1338 = vmatpush.msra.mxu2 %v6438_v63  ;;  %v6441_v42 = vld [vmem:[#allocation2 + $0x58] sm:$0xff] }
 0x219   :  { %10269 = vst [vmem:[#allocation157_spill] sm:$0xff] %v6426_v55  ;;  %1358 = vmatpush.msra.mxu3 %v6441_v42  ;;  %v6444_v55 = vld [vmem:[#allocation2 + $0x20] sm:$0xff] }
 0x21a   :  { %10270 = vst [vmem:[#allocation158_spill] sm:$0xff] %v6429_v46  ;;  %1299 = vmatpush.msra.mxu0 %v6444_v55  ;;  %v6447_v46 = vld [vmem:[#allocation2 + $0x28] sm:$0xff] }
 0x21b   :  { %10271 = vst [vmem:[#allocation159_spill] sm:$0xff] %v6432_v48  ;;  %1319 = vmatpush.msra.mxu1 %v6447_v46  ;;  %v6450_v48 = vld [vmem:[#allocation2 + $0x30] sm:$0xff] }
 0x21c   :  { %10272 = vst [vmem:[#allocation160_spill] sm:$0xff] %v6435_v52  ;;  %1339 = vmatpush.msra.mxu2 %v6450_v48  ;;  %v6453_v52 = vld [vmem:[#allocation2 + $0x38] sm:$0xff] }
 0x21d   :  { %10273 = vst [vmem:[#allocation161_spill] sm:$0xff] %v6438_v63  ;;  %1359 = vmatpush.msra.mxu3 %v6453_v52  ;;  %v6456_v63 = vld [vmem:[#allocation2] sm:$0xff] }
 0x21e   :  { %10274 = vst [vmem:[#allocation162_spill] sm:$0xff] %v6441_v42  ;;  %1300 = vmatpush.msra.mxu0 %v6456_v63  ;;  %v6459_v42 = vld [vmem:[#allocation2 + $0x8] sm:$0xff] }
 0x21f   :  { %10275 = vst [vmem:[#allocation163_spill] sm:$0xff] %v6444_v55  ;;  %1320 = vmatpush.msra.mxu1 %v6459_v42  ;;  %v6462_v55 = vld [vmem:[#allocation2 + $0x10] sm:$0xff] }
 0x220   :  { %10276 = vst [vmem:[#allocation164_spill] sm:$0xff] %v6447_v46  ;;  %1340 = vmatpush.msra.mxu2 %v6462_v55  ;;  %v6465_v46 = vld [vmem:[#allocation2 + $0x18] sm:$0xff] }
 0x221   :  { %10277 = vst [vmem:[#allocation165_spill] sm:$0xff] %v6450_v48  ;;  %1360 = vmatpush.msra.mxu3 %v6465_v46  ;;  %v836_v48 = vpop.f32.mrf.mxu0 }
 0x222   :  { %10278 = vst [vmem:[#allocation166_spill] sm:$0xff] %v6453_v52 }
 0x223   :  { %10279 = vst [vmem:[#allocation167_spill] sm:$0xff] %v6456_v63 }
 0x224   :  { %10280 = vst [vmem:[#allocation168_spill] sm:$0xff] %v6459_v42  ;;  %v876_v42 = vpop.f32.mrf.mxu2 }
 0x225   :  { %10281 = vst [vmem:[#allocation169_spill] sm:$0xff] %v6462_v55  ;;  %v976_v55 = vpop.f32.mrf.mxu3 }
 0x226   :  { %10282 = vst [vmem:[#allocation170_spill] sm:$0xff] %v6465_v46  ;;  %v977_v31 = vadd.f32 %v976_v55, %v896_v39  ;;  %v1095_v55 = vpop.f32.mrf.mxu1 }
 0x228   :  { %v982_v46 = vadd.f32 %v977_v31, %v5594_v43 }
 0x229   :  { %v916_v52 = vpop.f32.mrf.mxu0 }
 0x22a   :  { %v917_v35 = vadd.f32 %v916_v52, %v836_v48  ;;  %v3516_v21 = vmul.f32 -1.442695, %v982_v46 }
 0x22c   :  { %v979_v63 = vadd.f32 %v917_v35, %v5588_v61  ;;  %v956_v25 = vpop.f32.mrf.mxu2 }
 0x22d   :  { %v957_v35 = vadd.f32 %v956_v25, %v876_v42 }
 0x22e   :  { %v3514_v33 = vmul.f32 -1.442695, %v979_v63 }
 0x22f   :  { %v981_v63 = vadd.f32 %v957_v35, %v5606_v10 }
 0x230   :  { %3639 = vpow2.f32 %v3514_v33 }
 0x231   :  { %3641 = vpow2.f32 %v3515_v32  ;;  %v1075_v42 = vpop.f32.mrf.mxu0 }
 0x232   :  { %3643 = vpow2.f32 %v3516_v21 }
 0x236   :  { %v3640_v29 = vpop.eup %3639 }
 0x237   :  { %v3642_v28 = vpop.eup %3641  ;;  %v986_v27 = vadd.f32 1.0, %v3640_v29  ;;  %v3517_v29 = vld [vmem:[%s9212_s0 + $0x40] sm:$0xff] }
 0x238   :  { %v1005_v36 = vadd.f32 1.0, %v3642_v28  ;;  %v3644_v13 = vpop.eup %3643  ;;  %v3518_v28 = vld [vmem:[%s9212_s0 + $0x48] sm:$0xff] }
 0x239   :  { %3645 = vrcp.f32 %v986_v27  ;;  %v6472_v18 = vadd.f32 1.0, %v3644_v13  ;;  %v996_v21 = vand.u32 2147483647, %v986_v27  ;;  %v998_v52 = vand.u32 2147483648, %v986_v27 }
 0x23a   :  { %3647 = vrcp.f32 %v1005_v36  ;;  %v1017_v48 = vand.u32 2147483648, %v1005_v36  ;;  %v1015_v38 = vand.u32 2147483647, %v1005_v36  ;;  %v1138_v13 = vadd.f32 %v3517_v29, %v1075_v42 }
 0x23b   :  { %3649 = vrcp.f32 %v6472_v18  ;;  %v1139_v10 = vadd.f32 %v3518_v28, %v1095_v55  ;;  %vm992_vm8 = vweird.f32 %v986_v27  ;;  %vm1011_vm9 = vweird.f32 %v1005_v36 }
 0x23c   :  { %3651 = vtanh.f32 %v981_v63  ;;  %v3521_v26 = vmul.f32 -1.442695, %v1138_v13  ;;  %vm997_vm11 = vcmp.eq.f32.partialorder %v996_v21, 8.507059e+37  ;;  %v999_v63 = vor.u32 1.1754944e-38, %v998_v52 }
 0x23d   :  { %vm1016_vm13 = vcmp.eq.f32.partialorder %v1015_v38, 8.507059e+37  ;;  %vm1031_vm15 = vweird.f32 %v6472_v18 }
 0x23e   :  { %3653 = vpow2.f32 %v3521_v26 }
 0x23f   :  { %v3646_v33 = vpop.eup %3645 }
 0x240   :  { %v3648_v32 = vpop.eup %3647  ;;  %v988_v39 = vmul.f32 %v3646_v33, %v986_v27  ;;  %vm993_vm6 = vweird.f32 %v3646_v33  ;;  %v3520_v27 = vld [vmem:[%s9212_s0 + $0x58] sm:$0xff] }
 0x241   :  { %v1007_v31 = vmul.f32 %v3648_v32, %v1005_v36  ;;  %vm1012_vm7 = vweird.f32 %v3648_v32  ;;  %v3650_v60 = vpop.eup %3649  ;;  %vm994_vm10 = vmor %vm992_vm8, %vm993_vm6 }
 0x242   :  { %v989_v25 = vsub.f32 1.0, %v988_v39  ;;  %v3522_v39 = vmul.f32 -1.442695, %v1139_v10  ;;  %v1027_v24 = vmul.f32 %v3650_v60, %v6472_v18  ;;  %v3652_v23 = vpop.eup %3651  ;;  %vm1013_vm12 = vmor %vm1011_vm9, %vm1012_vm7  ;;  %v664_v10 = vpop.permute.xlu0 %663  ;;  %vm1032_vm14 = vweird.f32 %v3650_v60 }
 0x243   :  { %v1008_v46 = vsub.f32 1.0, %v1007_v31  ;;  %vm1033_vm0 = vmor %vm1031_vm15, %vm1032_vm14  ;;  %vm665_vm1 = vcmp.eq.s32.totalorder %v664_v10, 1 }
 0x244   :  { %v990_v35 = vmul.f32 %v3646_v33, %v989_v25  ;;  %v1018_v25 = vor.u32 1.1754944e-38, %v1017_v48  ;;  %v1028_v28 = vsub.f32 1.0, %v1027_v24  ;;  %3655 = vpow2.f32 %v3522_v39  ;;  %v3654_v26 = vpop.eup %3653  ;;  %v3519_v39 = vld [vmem:[%s9212_s0 + $0x50] sm:$0xff] }
 0x245   :  { %v1009_v43 = vmul.f32 %v3648_v32, %v1008_v46  ;;  %v6490_v24 = vadd.f32 1.0, %v3654_v26 }
 0x246   :  { %v991_v61 = vadd.f32 %v3646_v33, %v990_v35  ;;  %v1029_v42 = vmul.f32 %v3650_v60, %v1028_v28 }
 0x247   :  { %v1010_v31 = vadd.f32 %v3648_v32, %v1009_v43  ;;  %v1135_v43 = vpop.f32.mrf.mxu3  ;;  %v1155_v26 = vand.u32 2147483647, %v6490_v24  ;;  %vm1151_vm6 = vweird.f32 %v6490_v24 }
 0x248   :  { %v995_v22 = vsel %vm994_vm10, %v3646_v33, %v991_v61  ;;  %v1141_v55 = vadd.f32 %v3520_v27, %v1135_v43  ;;  %v1030_v33 = vadd.f32 %v3650_v60, %v1029_v42  ;;  %v1157_v42 = vand.u32 2147483648, %v6490_v24 }
 0x249   :  { %v1000_v36 = vsel %vm997_vm11, %v999_v63, %v995_v22  ;;  %v1014_v29 = vsel %vm1013_vm12, %v3648_v32, %v1010_v31  ;;  %v1037_v22 = vand.u32 2147483648, %v6472_v18  ;;  %v1115_v63 = vpop.f32.mrf.mxu2  ;;  %vm1156_vm10 = vcmp.eq.f32.partialorder %v1155_v26, 8.507059e+37  ;;  %v10316_v26 = vld [vmem:[#allocation40_spill] sm:$0xff] }
 0x24a   :  { %v1019_v21 = vsel %vm1016_vm13, %v1018_v25, %v1014_v29  ;;  %v1042_v46 = vmul.f32 %v3652_v23, %v1000_v36  ;;  %v3523_v61 = vmul.f32 -1.442695, %v1141_v55  ;;  %v3656_v38 = vpop.eup %3655  ;;  %v1035_v23 = vand.u32 2147483647, %v6472_v18  ;;  %v1050_v32 = vpop.permute.xlu0 %1049 }
 0x24b   :  { %v1041_v52 = vmul.f32 %v1019_v21, %v5652_v11  ;;  %v6494_v11 = vadd.f32 1.0, %v3656_v38  ;;  %v1034_v35 = vsel %vm1033_vm0, %v3650_v60, %v1030_v33  ;;  %v1038_v13 = vor.u32 1.1754944e-38, %v1037_v22 }
 0x24c   :  { %vm1036_vm2 = vcmp.eq.f32.partialorder %v1035_v23, 8.507059e+37  ;;  %vm1051_vm3 = vcmp.eq.s32.totalorder %v1050_v32, 1  ;;  %v666_v29 = vsel %vm665_vm1, %v5672_v34, 0.0  ;;  %v1140_v28 = vadd.f32 %v3519_v39, %v1115_v63  ;;  %v10295_v23 = vld [vmem:[#allocation20_spill] sm:$0xff]  ;;  %v10297_v32 = vld [vmem:[#allocation22_spill] sm:$0xff]  ;;  %v10300_v39 = vld [vmem:[#allocation25_spill] sm:$0xff] }
 0x24d   :  { %v6486_v48 = vadd.f32 %v1042_v46, %v1041_v52  ;;  %v1039_v18 = vsel %vm1036_vm2, %v1038_v13, %v1034_v35  ;;  %v1176_v55 = vand.u32 2147483648, %v6494_v11  ;;  %vm1170_vm7 = vweird.f32 %v6494_v11  ;;  %v10298_v35 = vld [vmem:[#allocation39_spill] sm:$0xff]  ;;  %v10301_v63 = vld [vmem:[#allocation26_spill] sm:$0xff] }
 0x24e   :  { %v10299_v13 = vld [vmem:[#allocation23_spill] sm:$0xff] }
 0x24f   :  { %3657 = vtanh.f32 %v6486_v48 }
 0x250   :  { %3659 = vpow2.f32 %v3523_v61 }
 0x251   :  { %3661 = vrcp.f32 %v6490_v24 }
 0x252   :  { %3663 = vrcp.f32 %v6494_v11 }
 0x255   :  { %v3658_v31 = vpop.eup %3657 }
 0x256   :  { %v3660_v25 = vpop.eup %3659  ;;  %v1045_v27 = vmul.f32 %v3658_v31, %v1039_v18  ;;  %v10302_v31 = vld [vmem:[#allocation43_spill] sm:$0xff] }
 0x257   :  { %v3662_v36 = vpop.eup %3661  ;;  %v6502_v21 = vadd.f32 1.0, %v3660_v25  ;;  %v10303_v18 = vld [vmem:[#allocation27_spill] sm:$0xff]  ;;  %v10304_v25 = vld [vmem:[#allocation29_spill] sm:$0xff] }
 0x258   :  { %v3664_v60 = vpop.eup %3663  ;;  %v1147_v10 = vmul.f32 %v3662_v36, %v6490_v24  ;;  %v6505_v46 = vsel %vm1051_vm3, %v1045_v27, %v666_v29  ;;  %1221 = vmatmul.f32.vlgmr.msrb.gmra.mxu0 %v1045_v27  ;;  %1241 = vmatmul.f32.vlgmr.msrb.gmra.mxu1 %v1045_v27  ;;  %vm1152_vm4 = vweird.f32 %v3662_v36  ;;  %v10307_v29 = vld [vmem:[#allocation31_spill] sm:$0xff] }
 0x259   :  { %v1166_v43 = vmul.f32 %v3664_v60, %v6494_v11  ;;  %3665 = vrcp.f32 %v6502_v21  ;;  %1261 = vmatmul.f32.vlgmr.msrb.gmra.mxu2 %v1045_v27  ;;  %1281 = vmatmul.f32.vlgmr.msrb.gmra.mxu3 %v1045_v27  ;;  %vm1171_vm5 = vweird.f32 %v3664_v60  ;;  %vm1153_vm8 = vmor %vm1151_vm6, %vm1152_vm4  ;;  %vm1190_vm13 = vweird.f32 %v6502_v21  ;;  %v10305_v27 = vld [vmem:[#allocation30_spill] sm:$0xff] }
 0x25a   :  { %v1148_v52 = vsub.f32 1.0, %v1147_v10  ;;  %1444 = vmatpush.msrb.mxu0 %v5685_v37  ;;  %1464 = vmatpush.msrb.mxu1 %v5691_v50  ;;  %3667 = vtanh.f32 %v1140_v28  ;;  %v1174_v50 = vand.u32 2147483647, %v6494_v11  ;;  %vm1172_vm9 = vmor %vm1170_vm7, %vm1171_vm5  ;;  %v10296_v11 = vld [vmem:[#allocation21_spill] sm:$0xff]  ;;  %v6586_v28 = vld [vmem:[%s9217_s5] sm:$0xff] }
 0x25b   :  { %v1167_v34 = vsub.f32 1.0, %v1166_v43  ;;  %1484 = vmatpush.msrb.mxu2 %v5701_v54  ;;  %1504 = vmatpush.msrb.mxu3 %v5707_v40  ;;  %vm1432_vm0 = vcmp.eq.s32.totalorder %v6586_v28, 3  ;;  %v10310_v10 = vld [vmem:[#allocation51_spill] sm:$0xff]  ;;  %v10311_v43 = vld [vmem:[#allocation36_spill] sm:$0xff] }
 0x25c   :  { %v1149_v61 = vmul.f32 %v3662_v36, %v1148_v52  ;;  %1445 = vmatpush.msrb.mxu0 %v5715_v49  ;;  %1465 = vmatpush.msrb.mxu1 %v5721_v58  ;;  %v1158_v49 = vor.u32 1.1754944e-38, %v1157_v42  ;;  %vm1175_vm11 = vcmp.eq.f32.partialorder %v1174_v50, 8.507059e+37  ;;  %v10312_v52 = vld [vmem:[#allocation37_spill] sm:$0xff]  ;;  %v10314_v42 = vmov 0   ;;  %v10318_v50 = vld [vmem:[#allocation42_spill] sm:$0xff] }
 0x25d   :  { %v1168_v37 = vmul.f32 %v3664_v60, %v1167_v34  ;;  %1485 = vmatpush.msrb.mxu2 %v5727_v41  ;;  %1505 = vmatpush.msrb.mxu3 %v5733_v53  ;;  %v1177_v41 = vor.u32 1.1754944e-38, %v1176_v55  ;;  %v10313_v34 = vld [vmem:[#allocation38_spill] sm:$0xff]  ;;  %v1433_v55 = vsel %vm1432_vm0, 1, %v10314_v42 }
 0x25e   :  { %v1150_v54 = vadd.f32 %v3662_v36, %v1149_v61  ;;  %1446 = vmatpush.msrb.mxu0 %v5739_v44  ;;  %1466 = vmatpush.msrb.mxu1 %v5745_v45  ;;  %v10315_v61 = vld [vmem:[#allocation55_spill] sm:$0xff] }
 0x25f   :  { %v3666_v40 = vpop.eup %3665  ;;  %v1169_v58 = vadd.f32 %v3664_v60, %v1168_v37  ;;  %1486 = vmatpush.msrb.mxu2 %v5751_v47  ;;  %1506 = vmatpush.msrb.mxu3 %v5757_v51  ;;  %v10317_v37 = vld [vmem:[#allocation41_spill] sm:$0xff] }
 0x260   :  { %v1154_v53 = vsel %vm1153_vm8, %v3662_v36, %v1150_v54  ;;  %v1186_v44 = vmul.f32 %v3666_v40, %v6502_v21  ;;  %1447 = vmatpush.msrb.mxu0 %v5765_v56  ;;  %1467 = vmatpush.msrb.mxu1 %v5771_v57  ;;  %v3668_v45 = vpop.eup %3667  ;;  %vm1191_vm12 = vweird.f32 %v3666_v40  ;;  %v10306_v36 = vld [vmem:[#allocation47_spill] sm:$0xff] }
 0x261   :  { %v1159_v33 = vsel %vm1156_vm10, %v1158_v49, %v1154_v53  ;;  %v1173_v38 = vsel %vm1172_vm9, %v3664_v60, %v1169_v58  ;;  %1487 = vmatpush.msrb.mxu2 %v5777_v62  ;;  %1507 = vmatpush.msrb.mxu3 %v5783_v59  ;;  %v1194_v59 = vand.u32 2147483647, %v6502_v21  ;;  %vm1192_vm14 = vmor %vm1190_vm13, %vm1191_vm12  ;;  %v10309_v60 = vld [vmem:[#allocation34_spill] sm:$0xff]  ;;  %v10319_v54 = vld [vmem:[#allocation59_spill] sm:$0xff] }
 0x262   :  { %v1178_v47 = vsel %vm1175_vm11, %v1177_v41, %v1173_v38  ;;  %v1201_v51 = vmul.f32 %v3668_v45, %v1159_v33  ;;  %v1187_v22 = vsub.f32 1.0, %v1186_v44  ;;  %1448 = vmatpush.msrb.mxu0 %v5793_v0  ;;  %1468 = vmatpush.msrb.mxu1 %v5799_v1  ;;  %v10283_v1 = vld [vmem:[#allocation11_spill] sm:$0xff]  ;;  %v10321_v49 = vld [vmem:[#allocation45_spill] sm:$0xff]  ;;  %v10322_v58 = vld [vmem:[#allocation46_spill] sm:$0xff] }
 0x263   :  { %v1200_v24 = vmul.f32 %v1178_v47, %v5669_v30  ;;  %1488 = vmatpush.msrb.mxu2 %v5805_v2  ;;  %1508 = vmatpush.msrb.mxu3 %v5811_v3  ;;  %v1196_v30 = vand.u32 2147483648, %v6502_v21  ;;  %v10284_v3 = vld [vmem:[#allocation12_spill] sm:$0xff]  ;;  %vm1195_vm15 = vcmp.eq.f32.partialorder %v1194_v59, 8.507059e+37  ;;  %v10308_v21 = vld [vmem:[#allocation33_spill] sm:$0xff]  ;;  %v10323_v41 = vld [vmem:[#allocation63_spill] sm:$0xff] }
 0x264   :  { %v1188_v56 = vmul.f32 %v3666_v40, %v1187_v22  ;;  %1449 = vmatpush.msrb.mxu0 %v5817_v4  ;;  %1469 = vmatpush.msrb.mxu1 %v5823_v5  ;;  %v10285_v4 = vld [vmem:[#allocation13_spill] sm:$0xff]  ;;  %v10286_v5 = vld [vmem:[#allocation28_spill] sm:$0xff]  ;;  %v10326_v45 = vld [vmem:[#allocation50_spill] sm:$0xff] }
 0x265   :  { %v6541_v57 = vadd.f32 %v1201_v51, %v1200_v24  ;;  %1489 = vmatpush.msrb.mxu2 %v5829_v6  ;;  %1509 = vmatpush.msrb.mxu3 %v5835_v7  ;;  %v1197_v2 = vor.u32 1.1754944e-38, %v1196_v30  ;;  %v10287_v6 = vld [vmem:[#allocation14_spill] sm:$0xff]  ;;  %v10324_v53 = vld [vmem:[#allocation48_spill] sm:$0xff]  ;;  %v10325_v44 = vld [vmem:[#allocation49_spill] sm:$0xff] }
 0x266   :  { %v1189_v62 = vadd.f32 %v3666_v40, %v1188_v56  ;;  %1450 = vmatpush.msrb.mxu0 %v5841_v8  ;;  %1470 = vmatpush.msrb.mxu1 %v5847_v9  ;;  %v10288_v9 = vld [vmem:[#allocation15_spill] sm:$0xff]  ;;  %v10328_v38 = vld [vmem:[#allocation52_spill] sm:$0xff]  ;;  %v10329_v47 = vld [vmem:[#allocation53_spill] sm:$0xff] }
 0x267   :  { %3669 = vtanh.f32 %v6541_v57  ;;  %1490 = vmatpush.msrb.mxu2 %v5853_v12  ;;  %1510 = vmatpush.msrb.mxu3 %v5859_v14  ;;  %v10289_v12 = vld [vmem:[#allocation16_spill] sm:$0xff]  ;;  %v10327_v33 = vld [vmem:[#allocation67_spill] sm:$0xff]  ;;  %v10330_v51 = vld [vmem:[#allocation54_spill] sm:$0xff] }
 0x268   :  { %1451 = vmatpush.msrb.mxu0 %v5865_v16  ;;  %1471 = vmatpush.msrb.mxu1 %v5871_v17  ;;  %v1193_v0 = vsel %vm1192_vm14, %v3666_v40, %v1189_v62  ;;  %v10290_v16 = vld [vmem:[#allocation32_spill] sm:$0xff]  ;;  %v10291_v17 = vld [vmem:[#allocation17_spill] sm:$0xff]  ;;  %v10331_v22 = vld [vmem:[#allocation71_spill] sm:$0xff] }
 0x269   :  { %1491 = vmatpush.msrb.mxu2 %v5877_v19  ;;  %1511 = vmatpush.msrb.mxu3 %v5883_v20  ;;  %v1198_v8 = vsel %vm1195_vm15, %v1197_v2, %v1193_v0  ;;  %v10292_v19 = vld [vmem:[#allocation18_spill] sm:$0xff]  ;;  %v10293_v20 = vld [vmem:[#allocation19_spill] sm:$0xff]  ;;  %v10320_v40 = vld [vmem:[#allocation44_spill] sm:$0xff] }
 0x26a   :  { %1452 = vmatpush.msrb.mxu0 %v5889_v15  ;;  %1472 = vmatpush.msrb.mxu1 %v10283_v1  ;;  %v10294_v15 = vld [vmem:[#allocation35_spill] sm:$0xff]  ;;  %v10332_v24 = vld [vmem:[#allocation56_spill] sm:$0xff]  ;;  %v10333_v56 = vld [vmem:[#allocation57_spill] sm:$0xff] }
 0x26b   :  { %1492 = vmatpush.msrb.mxu2 %v10284_v3  ;;  %1512 = vmatpush.msrb.mxu3 %v10285_v4  ;;  %v10334_v62 = vld [vmem:[#allocation58_spill] sm:$0xff]  ;;  %v10335_v30 = vld [vmem:[#allocation75_spill] sm:$0xff]  ;;  %v10336_v59 = vld [vmem:[#allocation60_spill] sm:$0xff] }
 0x26c   :  { %1453 = vmatpush.msrb.mxu0 %v10286_v5  ;;  %1473 = vmatpush.msrb.mxu1 %v10287_v6  ;;  %v10337_v0 = vld [vmem:[#allocation61_spill] sm:$0xff]  ;;  %v10338_v1 = vld [vmem:[#allocation62_spill] sm:$0xff]  ;;  %v10339_v2 = vld [vmem:[#allocation79_spill] sm:$0xff] }
 0x26d   :  { %v3670_v7 = vpop.eup %3669  ;;  %1493 = vmatpush.msrb.mxu2 %v10288_v9  ;;  %1513 = vmatpush.msrb.mxu3 %v10289_v12  ;;  %v10340_v3 = vld [vmem:[#allocation64_spill] sm:$0xff]  ;;  %v10341_v4 = vld [vmem:[#allocation65_spill] sm:$0xff]  ;;  %v10342_v5 = vld [vmem:[#allocation66_spill] sm:$0xff] }
 0x26e   :  { %v1204_v14 = vmul.f32 %v3670_v7, %v1198_v8  ;;  %1454 = vmatpush.msrb.mxu0 %v10290_v16  ;;  %1474 = vmatpush.msrb.mxu1 %v10291_v17  ;;  %v10343_v6 = vld [vmem:[#allocation83_spill] sm:$0xff]  ;;  %v10344_v7 = vld [vmem:[#allocation68_spill] sm:$0xff]  ;;  %v10345_v8 = vld [vmem:[#allocation69_spill] sm:$0xff] }
 0x26f   :  { %1494 = vmatpush.msrb.mxu2 %v10292_v19  ;;  %1514 = vmatpush.msrb.mxu3 %v10293_v20  ;;  %v10346_v9 = vld [vmem:[#allocation70_spill] sm:$0xff]  ;;  %v10347_v12 = vld [vmem:[#allocation87_spill] sm:$0xff]  ;;  %v10349_v16 = vld [vmem:[#allocation73_spill] sm:$0xff] }
 0x270   :  { %1301 = vmatmul.f32.vlgmr.msra.gmra.mxu0 %v1204_v14  ;;  %1321 = vmatmul.f32.vlgmr.msra.gmra.mxu1 %v1204_v14  ;;  %v10350_v17 = vld [vmem:[#allocation74_spill] sm:$0xff]  ;;  %v10351_v19 = vld [vmem:[#allocation76_spill] sm:$0xff]  ;;  %v10352_v20 = vld [vmem:[#allocation77_spill] sm:$0xff] }
 0x271   :  { %1341 = vmatmul.f32.vlgmr.msra.gmra.mxu2 %v1204_v14  ;;  %1361 = vmatmul.f32.vlgmr.msra.gmra.mxu3 %v1204_v14 }
 0x272   :  { %1455 = vmatpush.msrb.mxu0 %v10294_v15  ;;  %1475 = vmatpush.msrb.mxu1 %v10295_v23  ;;  %v10353_v15 = vld [vmem:[#allocation78_spill] sm:$0xff]  ;;  %v10354_v23 = vld [vmem:[#allocation80_spill] sm:$0xff] }
 0x273   :  { %1495 = vmatpush.msrb.mxu2 %v10296_v11  ;;  %1515 = vmatpush.msrb.mxu3 %v10297_v32  ;;  %v10355_v11 = vld [vmem:[#allocation81_spill] sm:$0xff]  ;;  %v10356_v32 = vld [vmem:[#allocation82_spill] sm:$0xff] }
 0x274   :  { %1456 = vmatpush.msrb.mxu0 %v10298_v35  ;;  %1476 = vmatpush.msrb.mxu1 %v10299_v13  ;;  %v10357_v35 = vld [vmem:[#allocation84_spill] sm:$0xff]  ;;  %v10358_v13 = vld [vmem:[#allocation85_spill] sm:$0xff] }
 0x275   :  { %1496 = vmatpush.msrb.mxu2 %v10300_v39  ;;  %1516 = vmatpush.msrb.mxu3 %v10301_v63  ;;  %v10359_v39 = vld [vmem:[#allocation86_spill] sm:$0xff]  ;;  %v10360_v63 = vld [vmem:[#allocation88_spill] sm:$0xff] }
 0x276   :  { %1457 = vmatpush.msrb.mxu0 %v10302_v31  ;;  %1477 = vmatpush.msrb.mxu1 %v10303_v18  ;;  %v10361_v31 = vld [vmem:[#allocation89_spill] sm:$0xff] }
 0x277   :  { %1497 = vmatpush.msrb.mxu2 %v10304_v25  ;;  %1517 = vmatpush.msrb.mxu3 %v10305_v27  ;;  %v10362_v18 = vld [vmem:[#allocation97_spill] sm:$0xff]  ;;  %v10363_v25 = vld [vmem:[#allocation90_spill] sm:$0xff]  ;;  %v10364_v27 = vld [vmem:[#allocation91_spill] sm:$0xff] }
 0x278   :  { %1458 = vmatpush.msrb.mxu0 %v10306_v36  ;;  %1478 = vmatpush.msrb.mxu1 %v10307_v29  ;;  %v10365_v36 = vld [vmem:[#allocation92_spill] sm:$0xff]  ;;  %v10366_v29 = vld [vmem:[#allocation98_spill] sm:$0xff] }
 0x279   :  { %1498 = vmatpush.msrb.mxu2 %v10308_v21  ;;  %1518 = vmatpush.msrb.mxu3 %v10309_v60  ;;  %v10367_v21 = vld [vmem:[#allocation93_spill] sm:$0xff]  ;;  %v10368_v60 = vld [vmem:[#allocation94_spill] sm:$0xff] }
 0x27a   :  { %1459 = vmatpush.msrb.mxu0 %v10310_v10  ;;  %1479 = vmatpush.msrb.mxu1 %v10311_v43  ;;  %v10369_v10 = vld [vmem:[#allocation95_spill] sm:$0xff] }
 0x27b   :  { %1499 = vmatpush.msrb.mxu2 %v10312_v52  ;;  %1519 = vmatpush.msrb.mxu3 %v10313_v34  ;;  %v10370_v43 = vld [vmem:[#allocation99_spill] sm:$0xff]  ;;  %v10371_v52 = vld [vmem:[#allocation96_spill] sm:$0xff] }
 0x27c   :  { %1460 = vmatmul.f32.vlgmr.msrb.gmra.mxu0 %v1204_v14  ;;  %1480 = vmatmul.f32.vlgmr.msrb.gmra.mxu1 %v1204_v14  ;;  %v10372_v34 = vld [vmem:[#allocation100_spill] sm:$0xff] }
 0x27d   :  { %1500 = vmatmul.f32.vlgmr.msrb.gmra.mxu2 %v1204_v14  ;;  %1520 = vmatmul.f32.vlgmr.msrb.gmra.mxu3 %v1204_v14  ;;  %v10348_v14 = vld [vmem:[#allocation72_spill] sm:$0xff] }
 0x27e   :  { %1435 = vperm.xlu1 %3584, %v1433_v55   ;;  %1591 = vmatpush.msra.mxu0 %v10315_v61  ;;  %v10373_v55 = vld [vmem:[#allocation101_spill] sm:$0xff]  ;;  %v10374_v61 = vld [vmem:[#allocation102_spill] sm:$0xff] }
 0x27f   :  { %1611 = vmatpush.msra.mxu1 %v10316_v26  ;;  %1631 = vmatpush.msra.mxu2 %v10317_v37  ;;  %v10375_v26 = vld [vmem:[#allocation103_spill] sm:$0xff]  ;;  %v10376_v37 = vld [vmem:[#allocation104_spill] sm:$0xff] }
 0x280   :  { %1651 = vmatpush.msra.mxu3 %v10318_v50  ;;  %1592 = vmatpush.msra.mxu0 %v10319_v54  ;;  %v10377_v50 = vld [vmem:[#allocation105_spill] sm:$0xff]  ;;  %v10378_v54 = vld [vmem:[#allocation106_spill] sm:$0xff] }
 0x281   :  { %1612 = vmatpush.msra.mxu1 %v10320_v40  ;;  %1632 = vmatpush.msra.mxu2 %v10321_v49  ;;  %v10379_v40 = vld [vmem:[#allocation107_spill] sm:$0xff]  ;;  %v10380_v49 = vld [vmem:[#allocation108_spill] sm:$0xff] }
 0x282   :  { %1652 = vmatpush.msra.mxu3 %v10322_v58  ;;  %1593 = vmatpush.msra.mxu0 %v10323_v41  ;;  %v10381_v58 = vld [vmem:[#allocation109_spill] sm:$0xff]  ;;  %v10382_v41 = vld [vmem:[#allocation110_spill] sm:$0xff] }
 0x283   :  { %1613 = vmatpush.msra.mxu1 %v10324_v53  ;;  %1633 = vmatpush.msra.mxu2 %v10325_v44  ;;  %v10383_v53 = vld [vmem:[#allocation111_spill] sm:$0xff]  ;;  %v10384_v44 = vld [vmem:[#allocation112_spill] sm:$0xff] }
 0x284   :  { %1653 = vmatpush.msra.mxu3 %v10326_v45  ;;  %1594 = vmatpush.msra.mxu0 %v10327_v33  ;;  %v10385_v45 = vld [vmem:[#allocation113_spill] sm:$0xff]  ;;  %v10386_v33 = vld [vmem:[#allocation114_spill] sm:$0xff] }
 0x285   :  { %1614 = vmatpush.msra.mxu1 %v10328_v38  ;;  %1634 = vmatpush.msra.mxu2 %v10329_v47  ;;  %v10387_v38 = vld [vmem:[#allocation115_spill] sm:$0xff]  ;;  %v10388_v47 = vld [vmem:[#allocation116_spill] sm:$0xff] }
 0x286   :  { %1654 = vmatpush.msra.mxu3 %v10330_v51  ;;  %1595 = vmatpush.msra.mxu0 %v10331_v22  ;;  %v10389_v51 = vld [vmem:[#allocation117_spill] sm:$0xff]  ;;  %v10390_v22 = vld [vmem:[#allocation118_spill] sm:$0xff] }
 0x287   :  { %1615 = vmatpush.msra.mxu1 %v10332_v24  ;;  %1635 = vmatpush.msra.mxu2 %v10333_v56  ;;  %v10391_v24 = vld [vmem:[#allocation119_spill] sm:$0xff]  ;;  %v10392_v56 = vld [vmem:[#allocation120_spill] sm:$0xff] }
 0x288   :  { %1655 = vmatpush.msra.mxu3 %v10334_v62  ;;  %1596 = vmatpush.msra.mxu0 %v10335_v30  ;;  %v10393_v62 = vld [vmem:[#allocation121_spill] sm:$0xff]  ;;  %v10394_v30 = vld [vmem:[#allocation122_spill] sm:$0xff] }
 0x289   :  { %1616 = vmatpush.msra.mxu1 %v10336_v59  ;;  %1636 = vmatpush.msra.mxu2 %v10337_v0  ;;  %v10395_v59 = vld [vmem:[#allocation123_spill] sm:$0xff]  ;;  %v10396_v0 = vld [vmem:[#allocation124_spill] sm:$0xff] }
 0x28a   :  { %1656 = vmatpush.msra.mxu3 %v10338_v1  ;;  %1597 = vmatpush.msra.mxu0 %v10339_v2  ;;  %v10397_v1 = vld [vmem:[#allocation125_spill] sm:$0xff]  ;;  %v10398_v2 = vld [vmem:[#allocation126_spill] sm:$0xff] }
 0x28b   :  { %1617 = vmatpush.msra.mxu1 %v10340_v3  ;;  %1637 = vmatpush.msra.mxu2 %v10341_v4  ;;  %v10399_v3 = vld [vmem:[#allocation127_spill] sm:$0xff]  ;;  %v10400_v4 = vld [vmem:[#allocation128_spill] sm:$0xff] }
 0x28c   :  { %1657 = vmatpush.msra.mxu3 %v10342_v5  ;;  %1598 = vmatpush.msra.mxu0 %v10343_v6  ;;  %v10401_v5 = vld [vmem:[#allocation129_spill] sm:$0xff]  ;;  %v10402_v6 = vld [vmem:[#allocation130_spill] sm:$0xff] }
 0x28d   :  { %1618 = vmatpush.msra.mxu1 %v10344_v7  ;;  %1638 = vmatpush.msra.mxu2 %v10345_v8  ;;  %v10403_v7 = vld [vmem:[#allocation131_spill] sm:$0xff]  ;;  %v10404_v8 = vld [vmem:[#allocation132_spill] sm:$0xff] }
 0x28e   :  { %1658 = vmatpush.msra.mxu3 %v10346_v9  ;;  %1599 = vmatpush.msra.mxu0 %v10347_v12  ;;  %v10405_v9 = vld [vmem:[#allocation133_spill] sm:$0xff]  ;;  %v10406_v12 = vld [vmem:[#allocation134_spill] sm:$0xff] }
 0x28f   :  { %1619 = vmatpush.msra.mxu1 %v10348_v14  ;;  %1639 = vmatpush.msra.mxu2 %v10349_v16  ;;  %v10407_v14 = vld [vmem:[#allocation135_spill] sm:$0xff]  ;;  %v10408_v16 = vld [vmem:[#allocation136_spill] sm:$0xff] }
 0x290   :  { %1659 = vmatpush.msra.mxu3 %v10350_v17  ;;  %1600 = vmatpush.msra.mxu0 %v10351_v19  ;;  %v10409_v17 = vld [vmem:[#allocation137_spill] sm:$0xff]  ;;  %v10410_v19 = vld [vmem:[#allocation138_spill] sm:$0xff] }
 0x291   :  { %1620 = vmatpush.msra.mxu1 %v10352_v20  ;;  %1640 = vmatpush.msra.mxu2 %v10353_v15  ;;  %v10411_v20 = vld [vmem:[#allocation139_spill] sm:$0xff]  ;;  %v10412_v15 = vld [vmem:[#allocation140_spill] sm:$0xff] }
 0x292   :  { %1660 = vmatpush.msra.mxu3 %v10354_v23  ;;  %1601 = vmatpush.msra.mxu0 %v10355_v11  ;;  %v10413_v23 = vld [vmem:[#allocation141_spill] sm:$0xff]  ;;  %v10414_v11 = vld [vmem:[#allocation142_spill] sm:$0xff] }
 0x293   :  { %1621 = vmatpush.msra.mxu1 %v10356_v32  ;;  %1641 = vmatpush.msra.mxu2 %v10357_v35  ;;  %v10415_v32 = vld [vmem:[#allocation143_spill] sm:$0xff]  ;;  %v10416_v35 = vld [vmem:[#allocation144_spill] sm:$0xff] }
 0x294   :  { %1661 = vmatpush.msra.mxu3 %v10358_v13  ;;  %1602 = vmatpush.msra.mxu0 %v10359_v39  ;;  %v10417_v13 = vld [vmem:[#allocation145_spill] sm:$0xff]  ;;  %v10418_v39 = vld [vmem:[#allocation146_spill] sm:$0xff] }
 0x295   :  { %1622 = vmatpush.msra.mxu1 %v10360_v63  ;;  %1642 = vmatpush.msra.mxu2 %v10361_v31  ;;  %v10419_v63 = vld [vmem:[#allocation147_spill] sm:$0xff]  ;;  %v10420_v31 = vld [vmem:[#allocation148_spill] sm:$0xff] }
 0x296   :  { %1662 = vmatpush.msra.mxu3 %v10362_v18  ;;  %1603 = vmatpush.msra.mxu0 %v10363_v25  ;;  %v10421_v18 = vld [vmem:[#allocation149_spill] sm:$0xff]  ;;  %v10422_v25 = vld [vmem:[#allocation150_spill] sm:$0xff] }
 0x297   :  { %1623 = vmatpush.msra.mxu1 %v10364_v27  ;;  %1643 = vmatpush.msra.mxu2 %v10365_v36  ;;  %v10423_v27 = vld [vmem:[#allocation151_spill] sm:$0xff]  ;;  %v10424_v36 = vld [vmem:[#allocation152_spill] sm:$0xff] }
 0x298   :  { %1663 = vmatpush.msra.mxu3 %v10366_v29  ;;  %1604 = vmatpush.msra.mxu0 %v10367_v21  ;;  %v10425_v29 = vld [vmem:[#allocation153_spill] sm:$0xff]  ;;  %v10426_v21 = vld [vmem:[#allocation154_spill] sm:$0xff] }
 0x299   :  { %1624 = vmatpush.msra.mxu1 %v10368_v60  ;;  %1644 = vmatpush.msra.mxu2 %v10369_v10  ;;  %v10427_v60 = vld [vmem:[#allocation155_spill] sm:$0xff]  ;;  %v10428_v10 = vld [vmem:[#allocation156_spill] sm:$0xff] }
 0x29a   :  { %1664 = vmatpush.msra.mxu3 %v10370_v43  ;;  %1605 = vmatpush.msra.mxu0 %v10371_v52  ;;  %v10429_v43 = vld [vmem:[#allocation157_spill] sm:$0xff]  ;;  %v10430_v52 = vld [vmem:[#allocation158_spill] sm:$0xff] }
 0x29b   :  { %1625 = vmatpush.msra.mxu1 %v10372_v34  ;;  %1645 = vmatpush.msra.mxu2 %v10373_v55  ;;  %v10431_v34 = vld [vmem:[#allocation159_spill] sm:$0xff]  ;;  %v10432_v55 = vld [vmem:[#allocation160_spill] sm:$0xff] }
 0x29c   :  { %1665 = vmatpush.msra.mxu3 %v10374_v61  ;;  %1606 = vmatpush.msra.mxu0 %v10375_v26  ;;  %v10433_v61 = vld [vmem:[#allocation161_spill] sm:$0xff]  ;;  %v10434_v26 = vld [vmem:[#allocation162_spill] sm:$0xff] }
 0x29d   :  { %1626 = vmatpush.msra.mxu1 %v10376_v37  ;;  %1646 = vmatpush.msra.mxu2 %v10377_v50  ;;  %v10435_v37 = vld [vmem:[#allocation163_spill] sm:$0xff]  ;;  %v10436_v50 = vld [vmem:[#allocation164_spill] sm:$0xff] }
 0x29e   :  { %1666 = vmatpush.msra.mxu3 %v10378_v54  ;;  %1671 = vmatpush.msrb.mxu0 %v10379_v40  ;;  %v10437_v54 = vld [vmem:[#allocation165_spill] sm:$0xff]  ;;  %v10438_v40 = vld [vmem:[#allocation166_spill] sm:$0xff] }
 0x29f   :  { %1691 = vmatpush.msrb.mxu1 %v10380_v49  ;;  %1711 = vmatpush.msrb.mxu2 %v10381_v58  ;;  %v10439_v49 = vld [vmem:[#allocation167_spill] sm:$0xff]  ;;  %v10440_v58 = vld [vmem:[#allocation168_spill] sm:$0xff] }
 0x2a0   :  { %1731 = vmatpush.msrb.mxu3 %v10382_v41  ;;  %1672 = vmatpush.msrb.mxu0 %v10383_v53  ;;  %v10441_v41 = vld [vmem:[#allocation169_spill] sm:$0xff]  ;;  %v10442_v53 = vld [vmem:[#allocation170_spill] sm:$0xff] }
 0x2a1   :  { %1692 = vmatpush.msrb.mxu1 %v10384_v44  ;;  %1712 = vmatpush.msrb.mxu2 %v10385_v45 }
 0x2a2   :  { %1732 = vmatpush.msrb.mxu3 %v10386_v33  ;;  %1673 = vmatpush.msrb.mxu0 %v10387_v38 }
 0x2a3   :  { %1693 = vmatpush.msrb.mxu1 %v10388_v47  ;;  %1713 = vmatpush.msrb.mxu2 %v10389_v51 }
 0x2a4   :  { %1733 = vmatpush.msrb.mxu3 %v10390_v22  ;;  %1674 = vmatpush.msrb.mxu0 %v10391_v24  ;;  %v10443_v24 = vld [vmem:[#allocation8_spill] sm:$0xff] }
 0x2a5   :  { %1694 = vmatpush.msrb.mxu1 %v10392_v56  ;;  %1714 = vmatpush.msrb.mxu2 %v10393_v62  ;;  %v10444_v62 = vld [vmem:[#allocation9_spill] sm:$0xff] }
 0x2a6   :  { %1734 = vmatpush.msrb.mxu3 %v10394_v30  ;;  %1675 = vmatpush.msrb.mxu0 %v10395_v59 }
 0x2a7   :  { %1695 = vmatpush.msrb.mxu1 %v10396_v0  ;;  %1715 = vmatpush.msrb.mxu2 %v10397_v1 }
 0x2a8   :  { %1735 = vmatpush.msrb.mxu3 %v10398_v2  ;;  %1676 = vmatpush.msrb.mxu0 %v10399_v3 }
 0x2a9   :  { %1696 = vmatpush.msrb.mxu1 %v10400_v4  ;;  %1716 = vmatpush.msrb.mxu2 %v10401_v5  ;;  %v10445_v4 = vld [vmem:[#allocation10_spill] sm:$0xff] }
 0x2aa   :  { %1736 = vmatpush.msrb.mxu3 %v10402_v6  ;;  %1677 = vmatpush.msrb.mxu0 %v10403_v7  ;;  %v3527_v6 = vld [vmem:[%s9212_s0 + $0x60] sm:$0xff]  ;;  %v3528_v7 = vld [vmem:[%s9212_s0 + $0x68] sm:$0xff] }
 0x2ab   :  { %1697 = vmatpush.msrb.mxu1 %v10404_v8  ;;  %1717 = vmatpush.msrb.mxu2 %v10405_v9 }
 0x2ac   :  { %1737 = vmatpush.msrb.mxu3 %v10406_v12  ;;  %1678 = vmatpush.msrb.mxu0 %v10407_v14 }
 0x2ad   :  { %1698 = vmatpush.msrb.mxu1 %v10408_v16  ;;  %1718 = vmatpush.msrb.mxu2 %v10409_v17 }
 0x2ae   :  { %1738 = vmatpush.msrb.mxu3 %v10410_v19  ;;  %1679 = vmatpush.msrb.mxu0 %v10411_v20 }
 0x2af   :  { %1699 = vmatpush.msrb.mxu1 %v10412_v15  ;;  %1719 = vmatpush.msrb.mxu2 %v10413_v23 }
 0x2b0   :  { %1739 = vmatpush.msrb.mxu3 %v10414_v11  ;;  %1680 = vmatpush.msrb.mxu0 %v10415_v32 }
 0x2b1   :  { %1700 = vmatpush.msrb.mxu1 %v10416_v35  ;;  %1720 = vmatpush.msrb.mxu2 %v10417_v13  ;;  %v3530_v13 = vld [vmem:[%s9212_s0 + $0x78] sm:$0xff] }
 0x2b2   :  { %1740 = vmatpush.msrb.mxu3 %v10418_v39  ;;  %1681 = vmatpush.msrb.mxu0 %v10419_v63 }
 0x2b3   :  { %1701 = vmatpush.msrb.mxu1 %v10420_v31  ;;  %1721 = vmatpush.msrb.mxu2 %v10421_v18  ;;  %v10446_v31 = vld [vmem:[#allocation24_spill] sm:$0xff] }
 0x2b4   :  { %1741 = vmatpush.msrb.mxu3 %v10422_v25  ;;  %1682 = vmatpush.msrb.mxu0 %v10423_v27 }
 0x2b5   :  { %1702 = vmatpush.msrb.mxu1 %v10424_v36  ;;  %1722 = vmatpush.msrb.mxu2 %v10425_v29 }
 0x2b6   :  { %1742 = vmatpush.msrb.mxu3 %v10426_v21  ;;  %1683 = vmatpush.msrb.mxu0 %v10427_v60 }
 0x2b7   :  { %1703 = vmatpush.msrb.mxu1 %v10428_v10  ;;  %1723 = vmatpush.msrb.mxu2 %v10429_v43 }
 0x2b8   :  { %1743 = vmatpush.msrb.mxu3 %v10430_v52  ;;  %1684 = vmatpush.msrb.mxu0 %v10431_v34 }
 0x2b9   :  { %1704 = vmatpush.msrb.mxu1 %v10432_v55  ;;  %1724 = vmatpush.msrb.mxu2 %v10433_v61 }
 0x2ba   :  { %1744 = vmatpush.msrb.mxu3 %v10434_v26  ;;  %1685 = vmatpush.msrb.mxu0 %v10435_v37 }
 0x2bb   :  { %1705 = vmatpush.msrb.mxu1 %v10436_v50  ;;  %1725 = vmatpush.msrb.mxu2 %v10437_v54 }
 0x2bc   :  { %1745 = vmatpush.msrb.mxu3 %v10438_v40  ;;  %1686 = vmatpush.msrb.mxu0 %v10439_v49 }
 0x2bd   :  { %1706 = vmatpush.msrb.mxu1 %v10440_v58  ;;  %1726 = vmatpush.msrb.mxu2 %v10441_v41  ;;  %v3529_v58 = vld [vmem:[%s9212_s0 + $0x70] sm:$0xff] }
 0x2be   :  { %1746 = vmatpush.msrb.mxu3 %v10442_v53 }
 0x2d5   :  { %v1222_v44 = vpop.f32.mrf.mxu0  ;;  %v1242_v45 = vpop.f32.mrf.mxu1 }
 0x2dc   :  { %v1282_v33 = vpop.f32.mrf.mxu3  ;;  %v1262_v59 = vpop.f32.mrf.mxu2 }
 0x2ed   :  { %v1302_v38 = vpop.f32.mrf.mxu0  ;;  %v1322_v47 = vpop.f32.mrf.mxu1 }
 0x2ee   :  { %v1303_v51 = vadd.f32 %v1302_v38, %v1222_v44  ;;  %v1323_v22 = vadd.f32 %v1322_v47, %v1242_v45 }
 0x2f0   :  { %v1365_v56 = vadd.f32 %v1303_v51, %v10443_v24  ;;  %v1366_v30 = vadd.f32 %v1323_v22, %v10444_v62 }
 0x2f2   :  { %v3524_v0 = vmul.f32 -1.442695, %v1365_v56  ;;  %v3525_v1 = vmul.f32 -1.442695, %v1366_v30 }
 0x2f4   :  { %3671 = vpow2.f32 %v3524_v0  ;;  %v1362_v2 = vpop.f32.mrf.mxu3  ;;  %v1342_v16 = vpop.f32.mrf.mxu2 }
 0x2f5   :  { %3673 = vpow2.f32 %v3525_v1  ;;  %v1363_v3 = vadd.f32 %v1362_v2, %v1282_v33  ;;  %v1343_v35 = vadd.f32 %v1342_v16, %v1262_v59 }
 0x2f7   :  { %v1368_v5 = vadd.f32 %v1363_v3, %v10445_v4  ;;  %v1367_v18 = vadd.f32 %v1343_v35, %v10446_v31 }
 0x2f9   :  { %v3526_v8 = vmul.f32 -1.442695, %v1368_v5  ;;  %v1461_v9 = vpop.f32.mrf.mxu0  ;;  %v1481_v12 = vpop.f32.mrf.mxu1 }
 0x2fa   :  { %v3672_v14 = vpop.eup %3671  ;;  %v1524_v17 = vadd.f32 %v3527_v6, %v1461_v9  ;;  %v1525_v19 = vadd.f32 %v3528_v7, %v1481_v12 }
 0x2fb   :  { %v3674_v20 = vpop.eup %3673  ;;  %v1372_v15 = vadd.f32 1.0, %v3672_v14  ;;  %3675 = vpow2.f32 %v3526_v8 }
 0x2fc   :  { %v1391_v23 = vadd.f32 1.0, %v3674_v20  ;;  %v3531_v11 = vmul.f32 -1.442695, %v1524_v17  ;;  %v3532_v32 = vmul.f32 -1.442695, %v1525_v19 }
 0x2fd   :  { %3677 = vrcp.f32 %v1372_v15  ;;  %v1382_v55 = vand.u32 2147483647, %v1372_v15  ;;  %v1384_v50 = vand.u32 2147483648, %v1372_v15  ;;  %vm1378_vm4 = vweird.f32 %v1372_v15 }
 0x2fe   :  { %3679 = vrcp.f32 %v1391_v23  ;;  %v1403_v37 = vand.u32 2147483648, %v1391_v23  ;;  %v1401_v49 = vand.u32 2147483647, %v1391_v23  ;;  %vm1397_vm3 = vweird.f32 %v1391_v23 }
 0x2ff   :  { %3681 = vpow2.f32 %v3531_v11  ;;  %v1385_v38 = vor.u32 1.1754944e-38, %v1384_v50  ;;  %vm1383_vm7 = vcmp.eq.f32.partialorder %v1382_v55, 8.507059e+37 }
 0x300   :  { %3683 = vpow2.f32 %v3532_v32  ;;  %v1521_v39 = vpop.f32.mrf.mxu3  ;;  %v1501_v41 = vpop.f32.mrf.mxu2  ;;  %v1404_v30 = vor.u32 1.1754944e-38, %v1403_v37  ;;  %vm1402_vm8 = vcmp.eq.f32.partialorder %v1401_v49, 8.507059e+37 }
 0x301   :  { %v3676_v63 = vpop.eup %3675  ;;  %v1527_v25 = vadd.f32 %v3530_v13, %v1521_v39  ;;  %v1526_v22 = vadd.f32 %v3529_v58, %v1501_v41  ;;  %v1436_v32 = vpop.permute.xlu1 %1435 }
 0x302   :  { %v6737_v27 = vadd.f32 1.0, %v3676_v63  ;;  %vm1437_vm15 = vcmp.eq.s32.totalorder %v1436_v32, 1  ;;  %v6933_v32 = vld [vmem:[%s9213_s1 + $0x178] sm:$0xff] }
 0x303   :  { %v3678_v36 = vpop.eup %3677  ;;  %v3533_v29 = vmul.f32 -1.442695, %v1527_v25 }
 0x304   :  { %v3680_v21 = vpop.eup %3679  ;;  %v1374_v60 = vmul.f32 %v3678_v36, %v1372_v15  ;;  %3685 = vrcp.f32 %v6737_v27  ;;  %vm1379_vm1 = vweird.f32 %v3678_v36  ;;  %vm1417_vm9 = vweird.f32 %v6737_v27 }
 0x305   :  { %v3682_v10 = vpop.eup %3681  ;;  %v1393_v43 = vmul.f32 %v3680_v21, %v1391_v23  ;;  %3687 = vtanh.f32 %v1367_v18  ;;  %vm1398_vm2 = vweird.f32 %v3680_v21  ;;  %vm1380_vm5 = vmor %vm1378_vm4, %vm1379_vm1  ;;  %v1423_v19 = vand.u32 2147483648, %v6737_v27 }
 0x306   :  { %v3684_v52 = vpop.eup %3683  ;;  %v1375_v34 = vsub.f32 1.0, %v1374_v60  ;;  %v6740_v61 = vadd.f32 1.0, %v3682_v10  ;;  %3689 = vpow2.f32 %v3533_v29  ;;  %vm1399_vm6 = vmor %vm1397_vm3, %vm1398_vm2  ;;  %v1421_v39 = vand.u32 2147483647, %v6737_v27 }
 0x307   :  { %v1394_v26 = vsub.f32 1.0, %v1393_v43  ;;  %v6742_v54 = vadd.f32 1.0, %v3684_v52  ;;  %v1424_v29 = vor.u32 1.1754944e-38, %v1423_v19 }
 0x308   :  { %v1376_v40 = vmul.f32 %v3678_v36, %v1375_v34  ;;  %3691 = vrcp.f32 %v6740_v61  ;;  %v1541_v15 = vand.u32 2147483647, %v6740_v61  ;;  %v1543_v11 = vand.u32 2147483648, %v6740_v61 }
 0x309   :  { %v1395_v53 = vmul.f32 %v3680_v21, %v1394_v26  ;;  %3693 = vrcp.f32 %v6742_v54  ;;  %v1562_v35 = vand.u32 2147483648, %v6742_v54  ;;  %v1560_v18 = vand.u32 2147483647, %v6742_v54 }
 0x30a   :  { %v6749_v44 = vpop.eup %3685  ;;  %v1377_v45 = vadd.f32 %v3678_v36, %v1376_v40  ;;  %3695 = vtanh.f32 %v1526_v22  ;;  %vm1537_vm14 = vweird.f32 %v6740_v61  ;;  %vm1556_vm0 = vweird.f32 %v6742_v54  ;;  %v6822_v22 = vld [vmem:[%s9213_s1 + $0x1f8] sm:$0xff] }
 0x30b   :  { %v3688_v33 = vpop.eup %3687  ;;  %v1396_v47 = vadd.f32 %v3680_v21, %v1395_v53  ;;  %v1413_v51 = vmul.f32 %v6749_v44, %v6737_v27  ;;  %vm1418_vm10 = vweird.f32 %v6749_v44  ;;  %v1544_v10 = vor.u32 1.1754944e-38, %v1543_v11  ;;  %v6927_v11 = vld [vmem:[%s9213_s1 + $0x170] sm:$0xff] }
 0x30c   :  { %v3690_v56 = vpop.eup %3689  ;;  %v1381_v59 = vsel %vm1380_vm5, %v3678_v36, %v1377_v45  ;;  %vm6774_vm13 = vmor %vm1417_vm9, %vm1418_vm10  ;;  %v1563_v52 = vor.u32 1.1754944e-38, %v1562_v35  ;;  %vm1542_vm3 = vcmp.eq.f32.partialorder %v1541_v15, 8.507059e+37  ;;  %vm1422_vm4 = vcmp.eq.f32.partialorder %v1421_v39, 8.507059e+37  ;;  %v6905_v15 = vld [vmem:[%s9213_s1 + $0x198] sm:$0xff]  ;;  %v6939_v35 = vld [vmem:[%s9213_s1 + $0x140] sm:$0xff] }
 0x30d   :  { %v1386_v0 = vsel %vm1383_vm7, %v1385_v38, %v1381_v59  ;;  %v1400_v1 = vsel %vm1399_vm6, %v3680_v21, %v1396_v47  ;;  %v1414_v2 = vsub.f32 1.0, %v1413_v51  ;;  %v6753_v3 = vadd.f32 1.0, %v3690_v56  ;;  %v6802_v38 = vld [vmem:[%s9213_s1 + $0x1e0] sm:$0xff]  ;;  %v6816_v51 = vld [vmem:[%s9213_s1 + $0x1f0] sm:$0xff]  ;;  %v6840_v59 = vld [vmem:[%s9213_s1 + $0x1c8] sm:$0xff] }
 0x30e   :  { %v3692_v5 = vpop.eup %3691  ;;  %v1405_v6 = vsel %vm1402_vm8, %v1404_v30, %v1400_v1  ;;  %v1428_v7 = vmul.f32 %v3688_v33, %v1386_v0  ;;  %vm1561_vm5 = vcmp.eq.f32.partialorder %v1560_v18, 8.507059e+37  ;;  %v6834_v30 = vld [vmem:[%s9213_s1 + $0x1c0] sm:$0xff]  ;;  %v6849_v1 = vld [vmem:[%s9213_s1 + $0x1d0] sm:$0xff]  ;;  %v7113_v56 = vld [vmem:[%s9213_s1 + $0x68] sm:$0xff]  ;;  %vm1818_vm10 = vcmp.eq.s32.totalorder %v6586_v28, 4 }
 0x30f   :  { %v3694_v8 = vpop.eup %3693  ;;  %v1427_v9 = vmul.f32 %v1405_v6, %v6486_v48  ;;  %v1415_v12 = vmul.f32 %v6749_v44, %v1414_v2  ;;  %v1533_v14 = vmul.f32 %v3692_v5, %v6740_v61  ;;  %3697 = vrcp.f32 %v6753_v3  ;;  %v6855_v2 = vld [vmem:[%s9213_s1 + $0x1d8] sm:$0xff]  ;;  %v6867_v6 = vld [vmem:[%s9213_s1 + $0x1a8] sm:$0xff]  ;;  %v6951_v39 = vld [vmem:[%s9213_s1 + $0x150] sm:$0xff]  ;;  %10468 = vst [vmem:[#allocation25_spill] sm:$0xff] %v7113_v56 }
 0x310   :  { %v1552_v16 = vmul.f32 %v3694_v8, %v6742_v54  ;;  %vm1538_vm11 = vweird.f32 %v3692_v5  ;;  %vm1557_vm12 = vweird.f32 %v3694_v8  ;;  %v3696_v25 = vpop.eup %3695  ;;  %vm1576_vm7 = vweird.f32 %v6753_v3  ;;  %v6963_v18 = vld [vmem:[%s9213_s1 + $0x120] sm:$0xff]  ;;  %v6975_v36 = vld [vmem:[%s9213_s1 + $0x130] sm:$0xff]  ;;  %v7186_v28 = vld [vmem:[%s9213_s1 + $0x8] sm:$0xff] }
 0x311   :  { %v6761_v17 = vadd.f32 %v1428_v7, %v1427_v9  ;;  %v1534_v20 = vsub.f32 1.0, %v1533_v14  ;;  %v1416_v48 = vadd.f32 %v6749_v44, %v1415_v12  ;;  %vm1539_vm1 = vmor %vm1537_vm14, %vm1538_vm11  ;;  %v1580_v47 = vand.u32 2147483647, %v6753_v3  ;;  %v6873_v7 = vld [vmem:[%s9213_s1 + $0x1b0] sm:$0xff]  ;;  %v6885_v14 = vld [vmem:[%s9213_s1 + $0x180] sm:$0xff]  ;;  %10480 = vst [vmem:[#allocation37_spill] sm:$0xff] %v7186_v28 }
 0x312   :  { %v1553_v23 = vsub.f32 1.0, %v1552_v16  ;;  %vm1558_vm2 = vmor %vm1556_vm0, %vm1557_vm12  ;;  %v6891_v16 = vld [vmem:[%s9213_s1 + $0x188] sm:$0xff] }
 0x313   :  { %3699 = vtanh.f32 %v6761_v17  ;;  %v1535_v13 = vmul.f32 %v3692_v5, %v1534_v20  ;;  %v1420_v27 = vsel %vm6774_vm13, %v6749_v44, %v1416_v48  ;;  %vm1581_vm9 = vcmp.eq.f32.partialorder %v1580_v47, 8.507059e+37  ;;  %v6899_v20 = vld [vmem:[%s9213_s1 + $0x190] sm:$0xff]  ;;  %v6911_v48 = vld [vmem:[%s9213_s1 + $0x160] sm:$0xff] }
 0x314   :  { %v1554_v63 = vmul.f32 %v3694_v8, %v1553_v23  ;;  %v1425_v49 = vsel %vm1422_vm4, %v1424_v29, %v1420_v27  ;;  %v6917_v23 = vld [vmem:[%s9213_s1 + $0x168] sm:$0xff]  ;;  %v6981_v29 = vld [vmem:[%s9213_s1 + $0x138] sm:$0xff]  ;;  %v7011_v27 = vld [vmem:[%s9213_s1 + $0xe0] sm:$0xff] }
 0x315   :  { %v1536_v21 = vadd.f32 %v3692_v5, %v1535_v13  ;;  %v6779_v60 = vpop.eup %3697  ;;  %v6945_v13 = vld [vmem:[%s9213_s1 + $0x148] sm:$0xff]  ;;  %10451 = vst [vmem:[#allocation11_spill] sm:$0xff] %v7011_v27  ;;  %v7107_v47 = vld [vmem:[%s9213_s1 + $0x60] sm:$0xff] }
 0x316   :  { %v1555_v43 = vadd.f32 %v3694_v8, %v1554_v63  ;;  %v1572_v55 = vmul.f32 %v6779_v60, %v6753_v3  ;;  %vm1577_vm6 = vweird.f32 %v6779_v60  ;;  %v6957_v63 = vld [vmem:[%s9213_s1 + $0x158] sm:$0xff]  ;;  %10467 = vst [vmem:[#allocation23_spill] sm:$0xff] %v7107_v47 }
 0x317   :  { %v1540_v34 = vsel %vm1539_vm1, %v3692_v5, %v1536_v21  ;;  %vm6827_vm8 = vmor %vm1576_vm7, %vm1577_vm6  ;;  %v6861_v5 = vld [vmem:[%s9213_s1 + $0x1a0] sm:$0xff] }
 0x318   :  { %v1545_v61 = vsel %vm1542_vm3, %v1544_v10, %v1540_v34  ;;  %v1559_v26 = vsel %vm1558_vm2, %v3694_v8, %v1555_v43  ;;  %v1573_v40 = vsub.f32 1.0, %v1572_v55  ;;  %v6879_v8 = vld [vmem:[%s9213_s1 + $0x1b8] sm:$0xff]  ;;  %v6987_v21 = vld [vmem:[%s9213_s1 + $0x100] sm:$0xff]  ;;  %v6999_v10 = vld [vmem:[%s9213_s1 + $0x110] sm:$0xff] }
 0x319   :  { %v3700_v37 = vpop.eup %3699  ;;  %v1564_v50 = vsel %vm1561_vm5, %v1563_v52, %v1559_v26  ;;  %v1587_v54 = vmul.f32 %v3696_v25, %v1545_v61  ;;  %v6969_v25 = vld [vmem:[%s9213_s1 + $0x128] sm:$0xff]  ;;  %v7005_v43 = vld [vmem:[%s9213_s1 + $0x118] sm:$0xff]  ;;  %v7023_v34 = vld [vmem:[%s9213_s1 + $0xf0] sm:$0xff] }
 0x31a   :  { %v1586_v58 = vmul.f32 %v1564_v50, %v6541_v57  ;;  %v1431_v41 = vmul.f32 %v3700_v37, %v1425_v49  ;;  %v1574_v53 = vmul.f32 %v6779_v60, %v1573_v40  ;;  %v1582_v57 = vand.u32 2147483648, %v6753_v3  ;;  %v7017_v52 = vld [vmem:[%s9213_s1 + $0xe8] sm:$0xff]  ;;  %10453 = vst [vmem:[#allocation13_spill] sm:$0xff] %v7023_v34  ;;  %v7029_v55 = vld [vmem:[%s9213_s1 + $0xf8] sm:$0xff]  ;;  %v7035_v61 = vld [vmem:[%s9213_s1 + $0xc0] sm:$0xff] }
 0x31b   :  { %10452 = vst [vmem:[#allocation12_spill] sm:$0xff] %v7017_v52  ;;  %v7041_v26 = vld [vmem:[%s9213_s1 + $0xc8] sm:$0xff]  ;;  %v7047_v37 = vld [vmem:[%s9213_s1 + $0xd0] sm:$0xff]  ;;  %v7053_v50 = vld [vmem:[%s9213_s1 + $0xd8] sm:$0xff] }
 0x31c   :  { %v6789_v44 = vadd.f32 %v1587_v54, %v1586_v58  ;;  %v6793_v45 = vsel %vm1437_vm15, %v1431_v41, %v6505_v46  ;;  %1607 = vmatmul.f32.vlgmr.msra.gmra.mxu0 %v1431_v41  ;;  %1627 = vmatmul.f32.vlgmr.msra.gmra.mxu1 %v1431_v41  ;;  %v1575_v33 = vadd.f32 %v6779_v60, %v1574_v53  ;;  %v6808_v46 = vld [vmem:[%s9213_s1 + $0x1e8] sm:$0xff]  ;;  %v1583_v3 = vor.u32 1.1754944e-38, %v1582_v57  ;;  %v7059_v54 = vld [vmem:[%s9213_s1 + $0xa0] sm:$0xff]  ;;  %v7071_v49 = vld [vmem:[%s9213_s1 + $0xb0] sm:$0xff] }
 0x31d   :  { %1647 = vmatmul.f32.vlgmr.msra.gmra.mxu2 %v1431_v41  ;;  %1667 = vmatmul.f32.vlgmr.msra.gmra.mxu3 %v1431_v41  ;;  %10454 = vst [vmem:[#allocation28_spill] sm:$0xff] %v7029_v55  ;;  %v7065_v40 = vld [vmem:[%s9213_s1 + $0xa8] sm:$0xff]  ;;  %v7077_v58 = vld [vmem:[%s9213_s1 + $0xb8] sm:$0xff]  ;;  %v7083_v41 = vld [vmem:[%s9213_s1 + $0x80] sm:$0xff] }
 0x31e   :  { %3701 = vtanh.f32 %v6789_v44  ;;  %1830 = vmatpush.msra.mxu0 %v6802_v38  ;;  %1850 = vmatpush.msra.mxu1 %v6808_v46  ;;  %v1579_v0 = vsel %vm6827_vm8, %v6779_v60, %v1575_v33  ;;  %v6993_v60 = vld [vmem:[%s9213_s1 + $0x108] sm:$0xff]  ;;  %10455 = vst [vmem:[#allocation14_spill] sm:$0xff] %v7035_v61  ;;  %v7095_v33 = vld [vmem:[%s9213_s1 + $0x90] sm:$0xff]  ;;  %v7101_v57 = vld [vmem:[%s9213_s1 + $0x98] sm:$0xff] }
 0x31f   :  { %1870 = vmatpush.msra.mxu2 %v6816_v51  ;;  %1890 = vmatpush.msra.mxu3 %v6822_v22  ;;  %v1584_v12 = vsel %vm1581_vm9, %v1583_v3, %v1579_v0  ;;  %10456 = vst [vmem:[#allocation15_spill] sm:$0xff] %v7041_v26  ;;  %v7089_v53 = vld [vmem:[%s9213_s1 + $0x88] sm:$0xff]  ;;  %v7119_v0 = vld [vmem:[%s9213_s1 + $0x70] sm:$0xff]  ;;  %v7125_v3 = vld [vmem:[%s9213_s1 + $0x78] sm:$0xff] }
 0x320   :  { %1831 = vmatpush.msra.mxu0 %v6834_v30  ;;  %1851 = vmatpush.msra.mxu1 %v6840_v59  ;;  %10457 = vst [vmem:[#allocation16_spill] sm:$0xff] %v7047_v37 }
 0x321   :  { %1871 = vmatpush.msra.mxu2 %v6849_v1  ;;  %1891 = vmatpush.msra.mxu3 %v6855_v2  ;;  %10458 = vst [vmem:[#allocation32_spill] sm:$0xff] %v7053_v50 }
 0x322   :  { %1832 = vmatpush.msra.mxu0 %v6861_v5  ;;  %1852 = vmatpush.msra.mxu1 %v6867_v6  ;;  %10459 = vst [vmem:[#allocation17_spill] sm:$0xff] %v7059_v54 }
 0x323   :  { %1872 = vmatpush.msra.mxu2 %v6873_v7  ;;  %1892 = vmatpush.msra.mxu3 %v6879_v8  ;;  %10460 = vst [vmem:[#allocation18_spill] sm:$0xff] %v7065_v40 }
 0x324   :  { %v3702_v9 = vpop.eup %3701  ;;  %1833 = vmatpush.msra.mxu0 %v6885_v14  ;;  %1853 = vmatpush.msra.mxu1 %v6891_v16  ;;  %10461 = vst [vmem:[#allocation19_spill] sm:$0xff] %v7071_v49 }
 0x325   :  { %v6894_v19 = vmul.f32 %v3702_v9, %v1584_v12  ;;  %1873 = vmatpush.msra.mxu2 %v6899_v20  ;;  %1893 = vmatpush.msra.mxu3 %v6905_v15  ;;  %10462 = vst [vmem:[#allocation35_spill] sm:$0xff] %v7077_v58  ;;  %v7131_v9 = vld [vmem:[%s9213_s1 + $0x40] sm:$0xff]  ;;  %v7137_v12 = vld [vmem:[%s9213_s1 + $0x48] sm:$0xff] }
 0x326   :  { %1834 = vmatpush.msra.mxu0 %v6911_v48  ;;  %1854 = vmatpush.msra.mxu1 %v6917_v23  ;;  %10463 = vst [vmem:[#allocation20_spill] sm:$0xff] %v7083_v41 }
 0x327   :  { %1687 = vmatmul.f32.vlgmr.msrb.gmra.mxu0 %v6894_v19  ;;  %1707 = vmatmul.f32.vlgmr.msrb.gmra.mxu1 %v6894_v19  ;;  %10464 = vst [vmem:[#allocation21_spill] sm:$0xff] %v7089_v53 }
 0x328   :  { %1727 = vmatmul.f32.vlgmr.msrb.gmra.mxu2 %v6894_v19  ;;  %1747 = vmatmul.f32.vlgmr.msrb.gmra.mxu3 %v6894_v19  ;;  %10465 = vst [vmem:[#allocation22_spill] sm:$0xff] %v7095_v33 }
 0x329   :  { %1874 = vmatpush.msra.mxu2 %v6927_v11  ;;  %1894 = vmatpush.msra.mxu3 %v6933_v32  ;;  %10466 = vst [vmem:[#allocation39_spill] sm:$0xff] %v7101_v57 }
 0x32a   :  { %1835 = vmatpush.msra.mxu0 %v6939_v35  ;;  %1855 = vmatpush.msra.mxu1 %v6945_v13  ;;  %10469 = vst [vmem:[#allocation26_spill] sm:$0xff] %v7119_v0 }
 0x32b   :  { %1875 = vmatpush.msra.mxu2 %v6951_v39  ;;  %1895 = vmatpush.msra.mxu3 %v6957_v63  ;;  %10470 = vst [vmem:[#allocation43_spill] sm:$0xff] %v7125_v3 }
 0x32c   :  { %1836 = vmatpush.msra.mxu0 %v6963_v18  ;;  %1856 = vmatpush.msra.mxu1 %v6969_v25  ;;  %10471 = vst [vmem:[#allocation27_spill] sm:$0xff] %v7131_v9 }
 0x32d   :  { %1876 = vmatpush.msra.mxu2 %v6975_v36  ;;  %1896 = vmatpush.msra.mxu3 %v6981_v29  ;;  %10472 = vst [vmem:[#allocation29_spill] sm:$0xff] %v7137_v12 }
 0x32e   :  { %1837 = vmatpush.msra.mxu0 %v6987_v21  ;;  %1857 = vmatpush.msra.mxu1 %v6993_v60 }
 0x32f   :  { %1877 = vmatpush.msra.mxu2 %v6999_v10  ;;  %1897 = vmatpush.msra.mxu3 %v7005_v43 }
 0x330   :  { %1838 = vmatpush.msra.mxu0 %v7011_v27  ;;  %1858 = vmatpush.msra.mxu1 %v7017_v52 }
 0x331   :  { %1878 = vmatpush.msra.mxu2 %v7023_v34  ;;  %1898 = vmatpush.msra.mxu3 %v7029_v55 }
 0x332   :  { %1839 = vmatpush.msra.mxu0 %v7035_v61  ;;  %1859 = vmatpush.msra.mxu1 %v7041_v26 }
 0x333   :  { %1879 = vmatpush.msra.mxu2 %v7047_v37  ;;  %1899 = vmatpush.msra.mxu3 %v7053_v50 }
 0x334   :  { %1840 = vmatpush.msra.mxu0 %v7059_v54  ;;  %1860 = vmatpush.msra.mxu1 %v7065_v40 }
 0x335   :  { %1880 = vmatpush.msra.mxu2 %v7071_v49  ;;  %1900 = vmatpush.msra.mxu3 %v7077_v58 }
 0x336   :  { %1841 = vmatpush.msra.mxu0 %v7083_v41  ;;  %1861 = vmatpush.msra.mxu1 %v7089_v53 }
 0x337   :  { %1881 = vmatpush.msra.mxu2 %v7095_v33  ;;  %1901 = vmatpush.msra.mxu3 %v7101_v57 }
 0x338   :  { %1842 = vmatpush.msra.mxu0 %v7107_v47  ;;  %1862 = vmatpush.msra.mxu1 %v7113_v56 }
 0x339   :  { %1882 = vmatpush.msra.mxu2 %v7119_v0  ;;  %1902 = vmatpush.msra.mxu3 %v7125_v3  ;;  %v7143_v0 = vld [vmem:[%s9213_s1 + $0x50] sm:$0xff]  ;;  %v7149_v3 = vld [vmem:[%s9213_s1 + $0x58] sm:$0xff] }
 0x33a   :  { %1843 = vmatpush.msra.mxu0 %v7131_v9  ;;  %1863 = vmatpush.msra.mxu1 %v7137_v12  ;;  %10473 = vst [vmem:[#allocation30_spill] sm:$0xff] %v7143_v0  ;;  %v7155_v9 = vld [vmem:[%s9213_s1 + $0x20] sm:$0xff]  ;;  %v7161_v12 = vld [vmem:[%s9213_s1 + $0x28] sm:$0xff] }
 0x33b   :  { %1883 = vmatpush.msra.mxu2 %v7143_v0  ;;  %10474 = vst [vmem:[#allocation47_spill] sm:$0xff] %v7149_v3  ;;  %1903 = vmatpush.msra.mxu3 %v7149_v3  ;;  %v7168_v3 = vld [vmem:[%s9213_s1 + $0x30] sm:$0xff]  ;;  %v7218_v0 = vld [vmem:[#allocation4 + $0x1c0] sm:$0xff] }
 0x33c   :  { %10475 = vst [vmem:[#allocation31_spill] sm:$0xff] %v7155_v9  ;;  %1844 = vmatpush.msra.mxu0 %v7155_v9  ;;  %1864 = vmatpush.msra.mxu1 %v7161_v12  ;;  %v7174_v9 = vld [vmem:[%s9213_s1 + $0x38] sm:$0xff] }
 0x33d   :  { %10476 = vst [vmem:[#allocation33_spill] sm:$0xff] %v7161_v12  ;;  %1884 = vmatpush.msra.mxu2 %v7168_v3  ;;  %1904 = vmatpush.msra.mxu3 %v7174_v9  ;;  %v7180_v12 = vld [vmem:[%s9213_s1] sm:$0xff] }
 0x33e   :  { %10477 = vst [vmem:[#allocation34_spill] sm:$0xff] %v7168_v3  ;;  %1845 = vmatpush.msra.mxu0 %v7180_v12  ;;  %1865 = vmatpush.msra.mxu1 %v7186_v28  ;;  %v7192_v3 = vld [vmem:[%s9213_s1 + $0x10] sm:$0xff]  ;;  %v7206_v28 = vld [vmem:[#allocation4 + $0x1e0] sm:$0xff] }
 0x33f   :  { %10478 = vst [vmem:[#allocation51_spill] sm:$0xff] %v7174_v9  ;;  %1885 = vmatpush.msra.mxu2 %v7192_v3  ;;  %v7198_v9 = vld [vmem:[%s9213_s1 + $0x18] sm:$0xff]  ;;  %1846 = vmatmul.f32.vlgmr.msra.gmra.mxu0 %v6894_v19 }
 0x340   :  { %10479 = vst [vmem:[#allocation36_spill] sm:$0xff] %v7180_v12  ;;  %1905 = vmatpush.msra.mxu3 %v7198_v9  ;;  %v1819_v12 = vsel %vm1818_vm10, 1, %v10314_v42  ;;  %1866 = vmatmul.f32.vlgmr.msra.gmra.mxu1 %v6894_v19  ;;  %v7215_v42 = vld [vmem:[#allocation4 + $0x1f8] sm:$0xff] }
 0x341   :  { %10481 = vst [vmem:[#allocation38_spill] sm:$0xff] %v7192_v3  ;;  %1886 = vmatmul.f32.vlgmr.msra.gmra.mxu2 %v6894_v19  ;;  %1906 = vmatmul.f32.vlgmr.msra.gmra.mxu3 %v6894_v19  ;;  %v7209_v3 = vld [vmem:[#allocation4 + $0x1e8] sm:$0xff] }
 0x342   :  { %10482 = vst [vmem:[#allocation55_spill] sm:$0xff] %v7198_v9  ;;  %1821 = vperm.xlu1 %3584, %v1819_v12   ;;  %1977 = vmatpush.msrb.mxu0 %v7206_v28  ;;  %v7212_v9 = vld [vmem:[#allocation4 + $0x1f0] sm:$0xff]  ;;  %v7221_v19 = vld [vmem:[#allocation4 + $0x1c8] sm:$0xff] }
 0x343   :  { %10483 = vst [vmem:[#allocation40_spill] sm:$0xff] %v7206_v28  ;;  %1997 = vmatpush.msrb.mxu1 %v7209_v3  ;;  %2017 = vmatpush.msrb.mxu2 %v7212_v9  ;;  %v7224_v12 = vld [vmem:[#allocation4 + $0x1d0] sm:$0xff] }
 0x344   :  { %10484 = vst [vmem:[#allocation41_spill] sm:$0xff] %v7209_v3  ;;  %2037 = vmatpush.msrb.mxu3 %v7215_v42  ;;  %1978 = vmatpush.msrb.mxu0 %v7218_v0  ;;  %v7227_v3 = vld [vmem:[#allocation4 + $0x1d8] sm:$0xff] }
 0x345   :  { %10485 = vst [vmem:[#allocation42_spill] sm:$0xff] %v7212_v9  ;;  %1998 = vmatpush.msrb.mxu1 %v7221_v19  ;;  %2018 = vmatpush.msrb.mxu2 %v7224_v12  ;;  %v7230_v9 = vld [vmem:[#allocation4 + $0x1a0] sm:$0xff] }
 0x346   :  { %10486 = vst [vmem:[#allocation59_spill] sm:$0xff] %v7215_v42  ;;  %2038 = vmatpush.msrb.mxu3 %v7227_v3  ;;  %1979 = vmatpush.msrb.mxu0 %v7230_v9  ;;  %v7233_v42 = vld [vmem:[#allocation4 + $0x1a8] sm:$0xff] }
 0x347   :  { %10487 = vst [vmem:[#allocation44_spill] sm:$0xff] %v7218_v0  ;;  %1999 = vmatpush.msrb.mxu1 %v7233_v42  ;;  %v7236_v0 = vld [vmem:[#allocation4 + $0x1b0] sm:$0xff] }
 0x348   :  { %10488 = vst [vmem:[#allocation45_spill] sm:$0xff] %v7221_v19  ;;  %2019 = vmatpush.msrb.mxu2 %v7236_v0  ;;  %v7239_v19 = vld [vmem:[#allocation4 + $0x1b8] sm:$0xff] }
 0x349   :  { %10489 = vst [vmem:[#allocation46_spill] sm:$0xff] %v7224_v12  ;;  %2039 = vmatpush.msrb.mxu3 %v7239_v19  ;;  %v7242_v12 = vld [vmem:[#allocation4 + $0x180] sm:$0xff] }
 0x34a   :  { %10490 = vst [vmem:[#allocation63_spill] sm:$0xff] %v7227_v3  ;;  %1980 = vmatpush.msrb.mxu0 %v7242_v12  ;;  %v7245_v3 = vld [vmem:[#allocation4 + $0x188] sm:$0xff] }
 0x34b   :  { %10491 = vst [vmem:[#allocation48_spill] sm:$0xff] %v7230_v9  ;;  %2000 = vmatpush.msrb.mxu1 %v7245_v3  ;;  %v7248_v9 = vld [vmem:[#allocation4 + $0x190] sm:$0xff] }
 0x34c   :  { %10492 = vst [vmem:[#allocation49_spill] sm:$0xff] %v7233_v42  ;;  %2020 = vmatpush.msrb.mxu2 %v7248_v9  ;;  %v7251_v42 = vld [vmem:[#allocation4 + $0x198] sm:$0xff] }
 0x34d   :  { %10493 = vst [vmem:[#allocation50_spill] sm:$0xff] %v7236_v0  ;;  %2040 = vmatpush.msrb.mxu3 %v7251_v42  ;;  %v7254_v0 = vld [vmem:[#allocation4 + $0x160] sm:$0xff] }
 0x34e   :  { %10494 = vst [vmem:[#allocation67_spill] sm:$0xff] %v7239_v19  ;;  %1981 = vmatpush.msrb.mxu0 %v7254_v0  ;;  %v7257_v19 = vld [vmem:[#allocation4 + $0x168] sm:$0xff] }
 0x34f   :  { %10495 = vst [vmem:[#allocation52_spill] sm:$0xff] %v7242_v12  ;;  %2001 = vmatpush.msrb.mxu1 %v7257_v19  ;;  %v7260_v12 = vld [vmem:[#allocation4 + $0x170] sm:$0xff] }
 0x350   :  { %10496 = vst [vmem:[#allocation53_spill] sm:$0xff] %v7245_v3  ;;  %2021 = vmatpush.msrb.mxu2 %v7260_v12  ;;  %v7263_v3 = vld [vmem:[#allocation4 + $0x178] sm:$0xff] }
 0x351   :  { %10497 = vst [vmem:[#allocation54_spill] sm:$0xff] %v7248_v9  ;;  %2041 = vmatpush.msrb.mxu3 %v7263_v3  ;;  %v7266_v9 = vld [vmem:[#allocation4 + $0x140] sm:$0xff] }
 0x352   :  { %10498 = vst [vmem:[#allocation71_spill] sm:$0xff] %v7251_v42  ;;  %1982 = vmatpush.msrb.mxu0 %v7266_v9  ;;  %v7269_v42 = vld [vmem:[#allocation4 + $0x148] sm:$0xff] }
 0x353   :  { %10499 = vst [vmem:[#allocation56_spill] sm:$0xff] %v7254_v0  ;;  %2002 = vmatpush.msrb.mxu1 %v7269_v42  ;;  %v7272_v0 = vld [vmem:[#allocation4 + $0x150] sm:$0xff] }
 0x354   :  { %10500 = vst [vmem:[#allocation57_spill] sm:$0xff] %v7257_v19  ;;  %2022 = vmatpush.msrb.mxu2 %v7272_v0  ;;  %v7275_v19 = vld [vmem:[#allocation4 + $0x158] sm:$0xff] }
 0x355   :  { %10501 = vst [vmem:[#allocation58_spill] sm:$0xff] %v7260_v12  ;;  %2042 = vmatpush.msrb.mxu3 %v7275_v19  ;;  %v7278_v12 = vld [vmem:[#allocation4 + $0x120] sm:$0xff] }
 0x356   :  { %10502 = vst [vmem:[#allocation75_spill] sm:$0xff] %v7263_v3  ;;  %1983 = vmatpush.msrb.mxu0 %v7278_v12  ;;  %v7281_v3 = vld [vmem:[#allocation4 + $0x128] sm:$0xff] }
 0x357   :  { %10503 = vst [vmem:[#allocation60_spill] sm:$0xff] %v7266_v9  ;;  %2003 = vmatpush.msrb.mxu1 %v7281_v3  ;;  %v7284_v9 = vld [vmem:[#allocation4 + $0x130] sm:$0xff] }
 0x358   :  { %10504 = vst [vmem:[#allocation61_spill] sm:$0xff] %v7269_v42  ;;  %2023 = vmatpush.msrb.mxu2 %v7284_v9  ;;  %v7287_v42 = vld [vmem:[#allocation4 + $0x138] sm:$0xff] }
 0x359   :  { %10505 = vst [vmem:[#allocation62_spill] sm:$0xff] %v7272_v0  ;;  %2043 = vmatpush.msrb.mxu3 %v7287_v42  ;;  %v7290_v0 = vld [vmem:[#allocation4 + $0x100] sm:$0xff] }
 0x35a   :  { %10506 = vst [vmem:[#allocation79_spill] sm:$0xff] %v7275_v19  ;;  %1984 = vmatpush.msrb.mxu0 %v7290_v0  ;;  %v7293_v19 = vld [vmem:[#allocation4 + $0x108] sm:$0xff] }
 0x35b   :  { %10507 = vst [vmem:[#allocation64_spill] sm:$0xff] %v7278_v12  ;;  %2004 = vmatpush.msrb.mxu1 %v7293_v19  ;;  %v7296_v12 = vld [vmem:[#allocation4 + $0x110] sm:$0xff] }
 0x35c   :  { %10508 = vst [vmem:[#allocation65_spill] sm:$0xff] %v7281_v3  ;;  %2024 = vmatpush.msrb.mxu2 %v7296_v12  ;;  %v7299_v3 = vld [vmem:[#allocation4 + $0x118] sm:$0xff] }
 0x35d   :  { %10509 = vst [vmem:[#allocation66_spill] sm:$0xff] %v7284_v9  ;;  %2044 = vmatpush.msrb.mxu3 %v7299_v3  ;;  %v7302_v9 = vld [vmem:[#allocation4 + $0xe0] sm:$0xff] }
 0x35e   :  { %10510 = vst [vmem:[#allocation83_spill] sm:$0xff] %v7287_v42  ;;  %1985 = vmatpush.msrb.mxu0 %v7302_v9  ;;  %v7305_v42 = vld [vmem:[#allocation4 + $0xe8] sm:$0xff] }
 0x35f   :  { %10511 = vst [vmem:[#allocation68_spill] sm:$0xff] %v7290_v0  ;;  %2005 = vmatpush.msrb.mxu1 %v7305_v42  ;;  %v7308_v0 = vld [vmem:[#allocation4 + $0xf0] sm:$0xff] }
 0x360   :  { %10512 = vst [vmem:[#allocation69_spill] sm:$0xff] %v7293_v19  ;;  %2025 = vmatpush.msrb.mxu2 %v7308_v0  ;;  %v7311_v19 = vld [vmem:[#allocation4 + $0xf8] sm:$0xff] }
 0x361   :  { %10513 = vst [vmem:[#allocation70_spill] sm:$0xff] %v7296_v12  ;;  %2045 = vmatpush.msrb.mxu3 %v7311_v19  ;;  %v7314_v12 = vld [vmem:[#allocation4 + $0xc0] sm:$0xff] }
 0x362   :  { %10514 = vst [vmem:[#allocation87_spill] sm:$0xff] %v7299_v3  ;;  %1986 = vmatpush.msrb.mxu0 %v7314_v12  ;;  %v7317_v3 = vld [vmem:[#allocation4 + $0xc8] sm:$0xff] }
 0x363   :  { %10515 = vst [vmem:[#allocation72_spill] sm:$0xff] %v7302_v9  ;;  %2006 = vmatpush.msrb.mxu1 %v7317_v3  ;;  %v7320_v9 = vld [vmem:[#allocation4 + $0xd0] sm:$0xff] }
 0x364   :  { %10516 = vst [vmem:[#allocation73_spill] sm:$0xff] %v7305_v42  ;;  %2026 = vmatpush.msrb.mxu2 %v7320_v9  ;;  %v7323_v42 = vld [vmem:[#allocation4 + $0xd8] sm:$0xff] }
 0x365   :  { %10517 = vst [vmem:[#allocation74_spill] sm:$0xff] %v7308_v0  ;;  %2046 = vmatpush.msrb.mxu3 %v7323_v42  ;;  %v7326_v0 = vld [vmem:[#allocation4 + $0xa0] sm:$0xff] }
 0x366   :  { %10518 = vst [vmem:[#allocation76_spill] sm:$0xff] %v7311_v19  ;;  %1987 = vmatpush.msrb.mxu0 %v7326_v0  ;;  %v7329_v19 = vld [vmem:[#allocation4 + $0xa8] sm:$0xff] }
 0x367   :  { %10519 = vst [vmem:[#allocation77_spill] sm:$0xff] %v7314_v12  ;;  %2007 = vmatpush.msrb.mxu1 %v7329_v19  ;;  %v7332_v12 = vld [vmem:[#allocation4 + $0xb0] sm:$0xff] }
 0x368   :  { %10520 = vst [vmem:[#allocation78_spill] sm:$0xff] %v7317_v3  ;;  %2027 = vmatpush.msrb.mxu2 %v7332_v12  ;;  %v7335_v3 = vld [vmem:[#allocation4 + $0xb8] sm:$0xff] }
 0x369   :  { %10521 = vst [vmem:[#allocation80_spill] sm:$0xff] %v7320_v9  ;;  %2047 = vmatpush.msrb.mxu3 %v7335_v3  ;;  %v7338_v9 = vld [vmem:[#allocation4 + $0x80] sm:$0xff] }
 0x36a   :  { %10522 = vst [vmem:[#allocation81_spill] sm:$0xff] %v7323_v42  ;;  %1988 = vmatpush.msrb.mxu0 %v7338_v9  ;;  %v7341_v42 = vld [vmem:[#allocation4 + $0x88] sm:$0xff] }
 0x36b   :  { %10523 = vst [vmem:[#allocation82_spill] sm:$0xff] %v7326_v0  ;;  %2008 = vmatpush.msrb.mxu1 %v7341_v42  ;;  %v7344_v0 = vld [vmem:[#allocation4 + $0x90] sm:$0xff] }
 0x36c   :  { %10524 = vst [vmem:[#allocation84_spill] sm:$0xff] %v7329_v19  ;;  %2028 = vmatpush.msrb.mxu2 %v7344_v0  ;;  %v7347_v19 = vld [vmem:[#allocation4 + $0x98] sm:$0xff] }
 0x36d   :  { %10525 = vst [vmem:[#allocation85_spill] sm:$0xff] %v7332_v12  ;;  %2048 = vmatpush.msrb.mxu3 %v7347_v19  ;;  %v7350_v12 = vld [vmem:[#allocation4 + $0x60] sm:$0xff] }
 0x36e   :  { %10526 = vst [vmem:[#allocation86_spill] sm:$0xff] %v7335_v3  ;;  %1989 = vmatpush.msrb.mxu0 %v7350_v12  ;;  %v7353_v3 = vld [vmem:[#allocation4 + $0x68] sm:$0xff] }
 0x36f   :  { %10527 = vst [vmem:[#allocation88_spill] sm:$0xff] %v7338_v9  ;;  %2009 = vmatpush.msrb.mxu1 %v7353_v3  ;;  %v7356_v9 = vld [vmem:[#allocation4 + $0x70] sm:$0xff] }
 0x370   :  { %10528 = vst [vmem:[#allocation89_spill] sm:$0xff] %v7341_v42  ;;  %2029 = vmatpush.msrb.mxu2 %v7356_v9  ;;  %v7359_v42 = vld [vmem:[#allocation4 + $0x78] sm:$0xff] }
 0x371   :  { %10529 = vst [vmem:[#allocation97_spill] sm:$0xff] %v7344_v0  ;;  %2049 = vmatpush.msrb.mxu3 %v7359_v42  ;;  %v7362_v0 = vld [vmem:[#allocation4 + $0x40] sm:$0xff] }
 0x372   :  { %10530 = vst [vmem:[#allocation90_spill] sm:$0xff] %v7347_v19  ;;  %1990 = vmatpush.msrb.mxu0 %v7362_v0  ;;  %v7365_v19 = vld [vmem:[#allocation4 + $0x48] sm:$0xff] }
 0x373   :  { %10531 = vst [vmem:[#allocation91_spill] sm:$0xff] %v7350_v12  ;;  %2010 = vmatpush.msrb.mxu1 %v7365_v19  ;;  %v7368_v12 = vld [vmem:[#allocation4 + $0x50] sm:$0xff] }
 0x374   :  { %10532 = vst [vmem:[#allocation92_spill] sm:$0xff] %v7353_v3  ;;  %2030 = vmatpush.msrb.mxu2 %v7368_v12  ;;  %v7371_v3 = vld [vmem:[#allocation4 + $0x58] sm:$0xff] }
 0x375   :  { %10533 = vst [vmem:[#allocation98_spill] sm:$0xff] %v7356_v9  ;;  %2050 = vmatpush.msrb.mxu3 %v7371_v3  ;;  %v7374_v9 = vld [vmem:[#allocation4 + $0x20] sm:$0xff] }
 0x376   :  { %10534 = vst [vmem:[#allocation93_spill] sm:$0xff] %v7359_v42  ;;  %1991 = vmatpush.msrb.mxu0 %v7374_v9  ;;  %v7377_v42 = vld [vmem:[#allocation4 + $0x28] sm:$0xff] }
 0x377   :  { %10535 = vst [vmem:[#allocation94_spill] sm:$0xff] %v7362_v0  ;;  %2011 = vmatpush.msrb.mxu1 %v7377_v42  ;;  %v7380_v0 = vld [vmem:[#allocation4 + $0x30] sm:$0xff] }
 0x378   :  { %10536 = vst [vmem:[#allocation95_spill] sm:$0xff] %v7365_v19  ;;  %2031 = vmatpush.msrb.mxu2 %v7380_v0  ;;  %v7383_v19 = vld [vmem:[#allocation4 + $0x38] sm:$0xff] }
 0x379   :  { %10537 = vst [vmem:[#allocation99_spill] sm:$0xff] %v7368_v12  ;;  %2051 = vmatpush.msrb.mxu3 %v7383_v19  ;;  %v7386_v12 = vld [vmem:[#allocation4] sm:$0xff] }
 0x37a   :  { %10538 = vst [vmem:[#allocation96_spill] sm:$0xff] %v7371_v3  ;;  %1992 = vmatpush.msrb.mxu0 %v7386_v12  ;;  %v7389_v3 = vld [vmem:[#allocation4 + $0x8] sm:$0xff] }
 0x37b   :  { %10539 = vst [vmem:[#allocation100_spill] sm:$0xff] %v7374_v9  ;;  %2012 = vmatpush.msrb.mxu1 %v7389_v3  ;;  %v7392_v9 = vld [vmem:[#allocation4 + $0x10] sm:$0xff] }
 0x37c   :  { %10540 = vst [vmem:[#allocation101_spill] sm:$0xff] %v7377_v42  ;;  %2032 = vmatpush.msrb.mxu2 %v7392_v9  ;;  %v7395_v42 = vld [vmem:[#allocation4 + $0x18] sm:$0xff] }
 0x37d   :  { %10541 = vst [vmem:[#allocation102_spill] sm:$0xff] %v7380_v0  ;;  %2052 = vmatpush.msrb.mxu3 %v7395_v42  ;;  %v7398_v0 = vld [vmem:[#allocation2 + $0x1e0] sm:$0xff] }
 0x37e   :  { %10542 = vst [vmem:[#allocation103_spill] sm:$0xff] %v7383_v19  ;;  %2057 = vmatpush.msra.mxu0 %v7398_v0  ;;  %v7401_v19 = vld [vmem:[#allocation2 + $0x1e8] sm:$0xff] }
 0x37f   :  { %10543 = vst [vmem:[#allocation104_spill] sm:$0xff] %v7386_v12  ;;  %2077 = vmatpush.msra.mxu1 %v7401_v19  ;;  %v7404_v12 = vld [vmem:[#allocation2 + $0x1f0] sm:$0xff] }
 0x380   :  { %10544 = vst [vmem:[#allocation105_spill] sm:$0xff] %v7389_v3  ;;  %2097 = vmatpush.msra.mxu2 %v7404_v12  ;;  %v7407_v3 = vld [vmem:[#allocation2 + $0x1f8] sm:$0xff] }
 0x381   :  { %10545 = vst [vmem:[#allocation106_spill] sm:$0xff] %v7392_v9  ;;  %2117 = vmatpush.msra.mxu3 %v7407_v3  ;;  %v7410_v9 = vld [vmem:[#allocation2 + $0x1c0] sm:$0xff] }
 0x382   :  { %10546 = vst [vmem:[#allocation107_spill] sm:$0xff] %v7395_v42  ;;  %2058 = vmatpush.msra.mxu0 %v7410_v9  ;;  %v7413_v42 = vld [vmem:[#allocation2 + $0x1c8] sm:$0xff] }
 0x383   :  { %10547 = vst [vmem:[#allocation108_spill] sm:$0xff] %v7398_v0  ;;  %2078 = vmatpush.msra.mxu1 %v7413_v42  ;;  %v7416_v0 = vld [vmem:[#allocation2 + $0x1d0] sm:$0xff] }
 0x384   :  { %10548 = vst [vmem:[#allocation109_spill] sm:$0xff] %v7401_v19  ;;  %2098 = vmatpush.msra.mxu2 %v7416_v0  ;;  %v7419_v19 = vld [vmem:[#allocation2 + $0x1d8] sm:$0xff] }
 0x385   :  { %10549 = vst [vmem:[#allocation110_spill] sm:$0xff] %v7404_v12  ;;  %2118 = vmatpush.msra.mxu3 %v7419_v19  ;;  %v7422_v12 = vld [vmem:[#allocation2 + $0x1a0] sm:$0xff] }
 0x386   :  { %10550 = vst [vmem:[#allocation111_spill] sm:$0xff] %v7407_v3  ;;  %2059 = vmatpush.msra.mxu0 %v7422_v12  ;;  %v7425_v3 = vld [vmem:[#allocation2 + $0x1a8] sm:$0xff] }
 0x387   :  { %10551 = vst [vmem:[#allocation112_spill] sm:$0xff] %v7410_v9  ;;  %2079 = vmatpush.msra.mxu1 %v7425_v3  ;;  %v7428_v9 = vld [vmem:[#allocation2 + $0x1b0] sm:$0xff] }
 0x388   :  { %10552 = vst [vmem:[#allocation113_spill] sm:$0xff] %v7413_v42  ;;  %2099 = vmatpush.msra.mxu2 %v7428_v9  ;;  %v7431_v42 = vld [vmem:[#allocation2 + $0x1b8] sm:$0xff] }
 0x389   :  { %10553 = vst [vmem:[#allocation114_spill] sm:$0xff] %v7416_v0  ;;  %2119 = vmatpush.msra.mxu3 %v7431_v42  ;;  %v7434_v0 = vld [vmem:[#allocation2 + $0x180] sm:$0xff] }
 0x38a   :  { %10554 = vst [vmem:[#allocation115_spill] sm:$0xff] %v7419_v19  ;;  %2060 = vmatpush.msra.mxu0 %v7434_v0  ;;  %v7437_v19 = vld [vmem:[#allocation2 + $0x188] sm:$0xff] }
 0x38b   :  { %10555 = vst [vmem:[#allocation116_spill] sm:$0xff] %v7422_v12  ;;  %2080 = vmatpush.msra.mxu1 %v7437_v19  ;;  %v7440_v12 = vld [vmem:[#allocation2 + $0x190] sm:$0xff] }
 0x38c   :  { %10556 = vst [vmem:[#allocation117_spill] sm:$0xff] %v7425_v3  ;;  %2100 = vmatpush.msra.mxu2 %v7440_v12  ;;  %v7443_v3 = vld [vmem:[#allocation2 + $0x198] sm:$0xff] }
 0x38d   :  { %10557 = vst [vmem:[#allocation118_spill] sm:$0xff] %v7428_v9  ;;  %2120 = vmatpush.msra.mxu3 %v7443_v3  ;;  %v7446_v9 = vld [vmem:[#allocation2 + $0x160] sm:$0xff] }
 0x38e   :  { %10558 = vst [vmem:[#allocation119_spill] sm:$0xff] %v7431_v42  ;;  %2061 = vmatpush.msra.mxu0 %v7446_v9  ;;  %v7449_v42 = vld [vmem:[#allocation2 + $0x168] sm:$0xff] }
 0x38f   :  { %10559 = vst [vmem:[#allocation120_spill] sm:$0xff] %v7434_v0  ;;  %2081 = vmatpush.msra.mxu1 %v7449_v42  ;;  %v7452_v0 = vld [vmem:[#allocation2 + $0x170] sm:$0xff] }
 0x390   :  { %10560 = vst [vmem:[#allocation121_spill] sm:$0xff] %v7437_v19  ;;  %2101 = vmatpush.msra.mxu2 %v7452_v0  ;;  %v7455_v19 = vld [vmem:[#allocation2 + $0x178] sm:$0xff] }
 0x391   :  { %10561 = vst [vmem:[#allocation122_spill] sm:$0xff] %v7440_v12  ;;  %2121 = vmatpush.msra.mxu3 %v7455_v19  ;;  %v7458_v12 = vld [vmem:[#allocation2 + $0x140] sm:$0xff] }
 0x392   :  { %10562 = vst [vmem:[#allocation123_spill] sm:$0xff] %v7443_v3  ;;  %2062 = vmatpush.msra.mxu0 %v7458_v12  ;;  %v7461_v3 = vld [vmem:[#allocation2 + $0x148] sm:$0xff] }
 0x393   :  { %10563 = vst [vmem:[#allocation124_spill] sm:$0xff] %v7446_v9  ;;  %2082 = vmatpush.msra.mxu1 %v7461_v3  ;;  %v7464_v9 = vld [vmem:[#allocation2 + $0x150] sm:$0xff] }
 0x394   :  { %10564 = vst [vmem:[#allocation125_spill] sm:$0xff] %v7449_v42  ;;  %2102 = vmatpush.msra.mxu2 %v7464_v9  ;;  %v7467_v42 = vld [vmem:[#allocation2 + $0x158] sm:$0xff] }
 0x395   :  { %10565 = vst [vmem:[#allocation126_spill] sm:$0xff] %v7452_v0  ;;  %2122 = vmatpush.msra.mxu3 %v7467_v42  ;;  %v7470_v0 = vld [vmem:[#allocation2 + $0x120] sm:$0xff] }
 0x396   :  { %10566 = vst [vmem:[#allocation127_spill] sm:$0xff] %v7455_v19  ;;  %2063 = vmatpush.msra.mxu0 %v7470_v0  ;;  %v7473_v19 = vld [vmem:[#allocation2 + $0x128] sm:$0xff] }
 0x397   :  { %10567 = vst [vmem:[#allocation128_spill] sm:$0xff] %v7458_v12  ;;  %2083 = vmatpush.msra.mxu1 %v7473_v19  ;;  %v7476_v12 = vld [vmem:[#allocation2 + $0x130] sm:$0xff] }
 0x398   :  { %10568 = vst [vmem:[#allocation129_spill] sm:$0xff] %v7461_v3  ;;  %2103 = vmatpush.msra.mxu2 %v7476_v12  ;;  %v7479_v3 = vld [vmem:[#allocation2 + $0x138] sm:$0xff] }
 0x399   :  { %10569 = vst [vmem:[#allocation130_spill] sm:$0xff] %v7464_v9  ;;  %2123 = vmatpush.msra.mxu3 %v7479_v3  ;;  %v7482_v9 = vld [vmem:[#allocation2 + $0x100] sm:$0xff]  ;;  %v1628_v28 = vpop.f32.mrf.mxu1 }
 0x39a   :  { %10570 = vst [vmem:[#allocation131_spill] sm:$0xff] %v7467_v42  ;;  %2064 = vmatpush.msra.mxu0 %v7482_v9  ;;  %v7485_v42 = vld [vmem:[#allocation2 + $0x108] sm:$0xff] }
 0x39b   :  { %10571 = vst [vmem:[#allocation132_spill] sm:$0xff] %v7470_v0  ;;  %2084 = vmatpush.msra.mxu1 %v7485_v42  ;;  %v7488_v0 = vld [vmem:[#allocation2 + $0x110] sm:$0xff] }
 0x39c   :  { %10572 = vst [vmem:[#allocation133_spill] sm:$0xff] %v7473_v19  ;;  %2104 = vmatpush.msra.mxu2 %v7488_v0  ;;  %v7491_v19 = vld [vmem:[#allocation2 + $0x118] sm:$0xff] }
 0x39d   :  { %10573 = vst [vmem:[#allocation134_spill] sm:$0xff] %v7476_v12  ;;  %2124 = vmatpush.msra.mxu3 %v7491_v19  ;;  %v7494_v12 = vld [vmem:[#allocation2 + $0xe0] sm:$0xff] }
 0x39e   :  { %10574 = vst [vmem:[#allocation135_spill] sm:$0xff] %v7479_v3  ;;  %2065 = vmatpush.msra.mxu0 %v7494_v12  ;;  %v7497_v3 = vld [vmem:[#allocation2 + $0xe8] sm:$0xff] }
 0x39f   :  { %10575 = vst [vmem:[#allocation136_spill] sm:$0xff] %v7482_v9  ;;  %2085 = vmatpush.msra.mxu1 %v7497_v3  ;;  %v7500_v9 = vld [vmem:[#allocation2 + $0xf0] sm:$0xff] }
 0x3a0   :  { %10576 = vst [vmem:[#allocation137_spill] sm:$0xff] %v7485_v42  ;;  %2105 = vmatpush.msra.mxu2 %v7500_v9  ;;  %v7503_v42 = vld [vmem:[#allocation2 + $0xf8] sm:$0xff]  ;;  %v1668_v56 = vpop.f32.mrf.mxu3 }
 0x3a1   :  { %10577 = vst [vmem:[#allocation138_spill] sm:$0xff] %v7488_v0  ;;  %2125 = vmatpush.msra.mxu3 %v7503_v42  ;;  %v7506_v0 = vld [vmem:[#allocation2 + $0xc0] sm:$0xff] }
 0x3a2   :  { %10578 = vst [vmem:[#allocation139_spill] sm:$0xff] %v7491_v19  ;;  %2066 = vmatpush.msra.mxu0 %v7506_v0  ;;  %v7509_v19 = vld [vmem:[#allocation2 + $0xc8] sm:$0xff] }
 0x3a3   :  { %10579 = vst [vmem:[#allocation140_spill] sm:$0xff] %v7494_v12  ;;  %2086 = vmatpush.msra.mxu1 %v7509_v19  ;;  %v7512_v12 = vld [vmem:[#allocation2 + $0xd0] sm:$0xff] }
 0x3a4   :  { %10580 = vst [vmem:[#allocation141_spill] sm:$0xff] %v7497_v3  ;;  %2106 = vmatpush.msra.mxu2 %v7512_v12  ;;  %v7515_v3 = vld [vmem:[#allocation2 + $0xd8] sm:$0xff]  ;;  %v1708_v47 = vpop.f32.mrf.mxu1 }
 0x3a5   :  { %10581 = vst [vmem:[#allocation142_spill] sm:$0xff] %v7500_v9  ;;  %2126 = vmatpush.msra.mxu3 %v7515_v3  ;;  %v7518_v9 = vld [vmem:[#allocation2 + $0xa0] sm:$0xff]  ;;  %v1709_v33 = vadd.f32 %v1708_v47, %v1628_v28 }
 0x3a6   :  { %10582 = vst [vmem:[#allocation143_spill] sm:$0xff] %v7503_v42  ;;  %2067 = vmatpush.msra.mxu0 %v7518_v9  ;;  %v7521_v42 = vld [vmem:[#allocation2 + $0xa8] sm:$0xff] }
 0x3a7   :  { %10583 = vst [vmem:[#allocation144_spill] sm:$0xff] %v7506_v0  ;;  %2087 = vmatpush.msra.mxu1 %v7521_v42  ;;  %v7524_v0 = vld [vmem:[#allocation2 + $0xb0] sm:$0xff]  ;;  %v1752_v53 = vadd.f32 %v1709_v33, %v10444_v62 }
 0x3a8   :  { %10584 = vst [vmem:[#allocation145_spill] sm:$0xff] %v7509_v19  ;;  %2107 = vmatpush.msra.mxu2 %v7524_v0  ;;  %v7527_v19 = vld [vmem:[#allocation2 + $0xb8] sm:$0xff] }
 0x3a9   :  { %10585 = vst [vmem:[#allocation146_spill] sm:$0xff] %v7512_v12  ;;  %2127 = vmatpush.msra.mxu3 %v7527_v19  ;;  %v7530_v12 = vld [vmem:[#allocation2 + $0x80] sm:$0xff]  ;;  %v3535_v58 = vmul.f32 -1.442695, %v1752_v53 }
 0x3aa   :  { %10586 = vst [vmem:[#allocation147_spill] sm:$0xff] %v7515_v3  ;;  %2068 = vmatpush.msra.mxu0 %v7530_v12  ;;  %v7533_v3 = vld [vmem:[#allocation2 + $0x88] sm:$0xff] }
 0x3ab   :  { %10587 = vst [vmem:[#allocation148_spill] sm:$0xff] %v7518_v9  ;;  %2088 = vmatpush.msra.mxu1 %v7533_v3  ;;  %v7536_v9 = vld [vmem:[#allocation2 + $0x90] sm:$0xff] }
 0x3ac   :  { %10588 = vst [vmem:[#allocation149_spill] sm:$0xff] %v7521_v42  ;;  %2108 = vmatpush.msra.mxu2 %v7536_v9  ;;  %v7539_v42 = vld [vmem:[#allocation2 + $0x98] sm:$0xff] }
 0x3ad   :  { %10589 = vst [vmem:[#allocation150_spill] sm:$0xff] %v7524_v0  ;;  %2128 = vmatpush.msra.mxu3 %v7539_v42  ;;  %v7542_v0 = vld [vmem:[#allocation2 + $0x60] sm:$0xff] }
 0x3ae   :  { %10590 = vst [vmem:[#allocation151_spill] sm:$0xff] %v7527_v19  ;;  %2069 = vmatpush.msra.mxu0 %v7542_v0  ;;  %v7545_v19 = vld [vmem:[#allocation2 + $0x68] sm:$0xff] }
 0x3af   :  { %10591 = vst [vmem:[#allocation152_spill] sm:$0xff] %v7530_v12  ;;  %2089 = vmatpush.msra.mxu1 %v7545_v19  ;;  %v7548_v12 = vld [vmem:[#allocation2 + $0x70] sm:$0xff] }
 0x3b0   :  { %10592 = vst [vmem:[#allocation153_spill] sm:$0xff] %v7533_v3  ;;  %2109 = vmatpush.msra.mxu2 %v7548_v12  ;;  %v7551_v3 = vld [vmem:[#allocation2 + $0x78] sm:$0xff] }
 0x3b1   :  { %10593 = vst [vmem:[#allocation154_spill] sm:$0xff] %v7536_v9  ;;  %2129 = vmatpush.msra.mxu3 %v7551_v3  ;;  %v7554_v9 = vld [vmem:[#allocation2 + $0x40] sm:$0xff] }
 0x3b2   :  { %10594 = vst [vmem:[#allocation155_spill] sm:$0xff] %v7539_v42  ;;  %2070 = vmatpush.msra.mxu0 %v7554_v9  ;;  %v7557_v42 = vld [vmem:[#allocation2 + $0x48] sm:$0xff] }
 0x3b3   :  { %10595 = vst [vmem:[#allocation156_spill] sm:$0xff] %v7542_v0  ;;  %2090 = vmatpush.msra.mxu1 %v7557_v42  ;;  %v7560_v0 = vld [vmem:[#allocation2 + $0x50] sm:$0xff] }
 0x3b4   :  { %10596 = vst [vmem:[#allocation157_spill] sm:$0xff] %v7545_v19  ;;  %2110 = vmatpush.msra.mxu2 %v7560_v0  ;;  %v7563_v19 = vld [vmem:[#allocation2 + $0x58] sm:$0xff] }
 0x3b5   :  { %10597 = vst [vmem:[#allocation158_spill] sm:$0xff] %v7548_v12  ;;  %2130 = vmatpush.msra.mxu3 %v7563_v19  ;;  %v7566_v12 = vld [vmem:[#allocation2 + $0x20] sm:$0xff] }
 0x3b6   :  { %10598 = vst [vmem:[#allocation159_spill] sm:$0xff] %v7551_v3  ;;  %2071 = vmatpush.msra.mxu0 %v7566_v12  ;;  %v7569_v3 = vld [vmem:[#allocation2 + $0x28] sm:$0xff] }
 0x3b7   :  { %10599 = vst [vmem:[#allocation160_spill] sm:$0xff] %v7554_v9  ;;  %2091 = vmatpush.msra.mxu1 %v7569_v3  ;;  %v7572_v9 = vld [vmem:[#allocation2 + $0x30] sm:$0xff] }
 0x3b8   :  { %10600 = vst [vmem:[#allocation161_spill] sm:$0xff] %v7557_v42  ;;  %2111 = vmatpush.msra.mxu2 %v7572_v9  ;;  %v7575_v42 = vld [vmem:[#allocation2 + $0x38] sm:$0xff] }
 0x3b9   :  { %10601 = vst [vmem:[#allocation162_spill] sm:$0xff] %v7560_v0  ;;  %2131 = vmatpush.msra.mxu3 %v7575_v42  ;;  %v7578_v0 = vld [vmem:[#allocation2] sm:$0xff] }
 0x3ba   :  { %10602 = vst [vmem:[#allocation163_spill] sm:$0xff] %v7563_v19  ;;  %2072 = vmatpush.msra.mxu0 %v7578_v0  ;;  %v7581_v19 = vld [vmem:[#allocation2 + $0x8] sm:$0xff] }
 0x3bb   :  { %10603 = vst [vmem:[#allocation164_spill] sm:$0xff] %v7566_v12  ;;  %2092 = vmatpush.msra.mxu1 %v7581_v19  ;;  %v7584_v12 = vld [vmem:[#allocation2 + $0x10] sm:$0xff] }
 0x3bc   :  { %10604 = vst [vmem:[#allocation165_spill] sm:$0xff] %v7569_v3  ;;  %2112 = vmatpush.msra.mxu2 %v7584_v12  ;;  %v7587_v3 = vld [vmem:[#allocation2 + $0x18] sm:$0xff] }
 0x3bd   :  { %10605 = vst [vmem:[#allocation166_spill] sm:$0xff] %v7572_v9  ;;  %2132 = vmatpush.msra.mxu3 %v7587_v3  ;;  %v1608_v9 = vpop.f32.mrf.mxu0 }
 0x3be   :  { %10606 = vst [vmem:[#allocation167_spill] sm:$0xff] %v7575_v42 }
 0x3bf   :  { %10607 = vst [vmem:[#allocation168_spill] sm:$0xff] %v7578_v0 }
 0x3c0   :  { %10608 = vst [vmem:[#allocation169_spill] sm:$0xff] %v7581_v19  ;;  %v1648_v19 = vpop.f32.mrf.mxu2 }
 0x3c1   :  { %10609 = vst [vmem:[#allocation170_spill] sm:$0xff] %v7584_v12  ;;  %v1748_v12 = vpop.f32.mrf.mxu3 }
 0x3c2   :  { %10610 = vst [vmem:[#allocation171_spill] sm:$0xff] %v7587_v3  ;;  %v1749_v49 = vadd.f32 %v1748_v12, %v1668_v56 }
 0x3c4   :  { %v1754_v3 = vadd.f32 %v1749_v49, %v10445_v4 }
 0x3c5   :  { %v1688_v42 = vpop.f32.mrf.mxu0 }
 0x3c6   :  { %v1689_v57 = vadd.f32 %v1688_v42, %v1608_v9  ;;  %v3536_v40 = vmul.f32 -1.442695, %v1754_v3 }
 0x3c8   :  { %v1751_v0 = vadd.f32 %v1689_v57, %v10443_v24  ;;  %v1728_v26 = vpop.f32.mrf.mxu2 }
 0x3c9   :  { %v1729_v57 = vadd.f32 %v1728_v26, %v1648_v19 }
 0x3ca   :  { %v3534_v41 = vmul.f32 -1.442695, %v1751_v0  ;;  %v1867_v0 = vpop.f32.mrf.mxu1 }
 0x3cb   :  { %v1753_v47 = vadd.f32 %v1729_v57, %v10446_v31 }
 0x3cc   :  { %3703 = vpow2.f32 %v3534_v41 }
 0x3cd   :  { %3705 = vpow2.f32 %v3535_v58 }
 0x3ce   :  { %3707 = vpow2.f32 %v3536_v40  ;;  %v1847_v40 = vpop.f32.mrf.mxu0 }
 0x3d2   :  { %v3704_v54 = vpop.eup %3703 }
 0x3d3   :  { %v3706_v50 = vpop.eup %3705  ;;  %v1758_v37 = vadd.f32 1.0, %v3704_v54  ;;  %v3537_v54 = vld [vmem:[%s9212_s0 + $0x80] sm:$0xff] }
 0x3d4   :  { %v1777_v42 = vadd.f32 1.0, %v3706_v50  ;;  %v3708_v33 = vpop.eup %3707  ;;  %v3538_v50 = vld [vmem:[%s9212_s0 + $0x88] sm:$0xff]  ;;  %v1910_v19 = vadd.f32 %v3537_v54, %v1847_v40  ;;  %v3540_v54 = vld [vmem:[%s9212_s0 + $0x98] sm:$0xff] }
 0x3d5   :  { %3709 = vrcp.f32 %v1758_v37  ;;  %v7594_v53 = vadd.f32 1.0, %v3708_v33  ;;  %v1768_v9 = vand.u32 2147483647, %v1758_v37  ;;  %v1770_v28 = vand.u32 2147483648, %v1758_v37 }
 0x3d6   :  { %3711 = vrcp.f32 %v1777_v42  ;;  %v1789_v12 = vand.u32 2147483648, %v1777_v42  ;;  %v1911_v33 = vadd.f32 %v3538_v50, %v1867_v0  ;;  %v1787_v4 = vand.u32 2147483647, %v1777_v42 }
 0x3d7   :  { %3713 = vrcp.f32 %v7594_v53  ;;  %v3541_v62 = vmul.f32 -1.442695, %v1910_v19  ;;  %vm1783_vm13 = vweird.f32 %v1777_v42  ;;  %vm1764_vm14 = vweird.f32 %v1758_v37 }
 0x3d8   :  { %3715 = vtanh.f32 %v1753_v47  ;;  %v1771_v47 = vor.u32 1.1754944e-38, %v1770_v28  ;;  %vm1769_vm1 = vcmp.eq.f32.partialorder %v1768_v9, 8.507059e+37  ;;  %vm1788_vm2 = vcmp.eq.f32.partialorder %v1787_v4, 8.507059e+37  ;;  %v1887_v9 = vpop.f32.mrf.mxu2 }
 0x3d9   :  { %3717 = vpow2.f32 %v3541_v62  ;;  %v1809_v4 = vand.u32 2147483648, %v7594_v53  ;;  %vm1803_vm4 = vweird.f32 %v7594_v53 }
 0x3db   :  { %v3710_v41 = vpop.eup %3709 }
 0x3dc   :  { %v3712_v58 = vpop.eup %3711  ;;  %v1760_v56 = vmul.f32 %v3710_v41, %v1758_v37  ;;  %vm1765_vm11 = vweird.f32 %v3710_v41 }
 0x3dd   :  { %v1779_v49 = vmul.f32 %v3712_v58, %v1777_v42  ;;  %vm1784_vm12 = vweird.f32 %v3712_v58  ;;  %v3714_v24 = vpop.eup %3713  ;;  %vm1766_vm15 = vmor %vm1764_vm14, %vm1765_vm11 }
 0x3de   :  { %v1761_v26 = vsub.f32 1.0, %v1760_v56  ;;  %v3542_v56 = vmul.f32 -1.442695, %v1911_v33  ;;  %v3716_v50 = vpop.eup %3715  ;;  %vm1785_vm0 = vmor %vm1783_vm13, %vm1784_vm12  ;;  %vm1804_vm3 = vweird.f32 %v3714_v24 }
 0x3df   :  { %v1780_v3 = vsub.f32 1.0, %v1779_v49  ;;  %v1799_v49 = vmul.f32 %v3714_v24, %v7594_v53  ;;  %v3718_v34 = vpop.eup %3717  ;;  %vm1805_vm5 = vmor %vm1803_vm4, %vm1804_vm3 }
 0x3e0   :  { %v1762_v57 = vmul.f32 %v3710_v41, %v1761_v26  ;;  %v1790_v26 = vor.u32 1.1754944e-38, %v1789_v12  ;;  %3719 = vpow2.f32 %v3542_v56  ;;  %v1822_v56 = vpop.permute.xlu1 %1821 }
 0x3e1   :  { %v1781_v31 = vmul.f32 %v3712_v58, %v1780_v3  ;;  %v1800_v0 = vsub.f32 1.0, %v1799_v49  ;;  %v1907_v3 = vpop.f32.mrf.mxu3  ;;  %vm1823_vm7 = vcmp.eq.s32.totalorder %v1822_v56, 1  ;;  %v10630_v56 = vld [vmem:[#allocation43_spill] sm:$0xff] }
 0x3e2   :  { %v1763_v61 = vadd.f32 %v3710_v41, %v1762_v57  ;;  %v1913_v19 = vadd.f32 %v3540_v54, %v1907_v3 }
 0x3e3   :  { %v1782_v55 = vadd.f32 %v3712_v58, %v1781_v31  ;;  %v1801_v57 = vmul.f32 %v3714_v24, %v1800_v0 }
 0x3e4   :  { %v1767_v40 = vsel %vm1766_vm15, %v3710_v41, %v1763_v61  ;;  %v3543_v33 = vmul.f32 -1.442695, %v1913_v19  ;;  %v7611_v61 = vadd.f32 1.0, %v3718_v34  ;;  %v3539_v34 = vld [vmem:[%s9212_s0 + $0x90] sm:$0xff] }
 0x3e5   :  { %v1772_v42 = vsel %vm1769_vm1, %v1771_v47, %v1767_v40  ;;  %v1786_v37 = vsel %vm1785_vm0, %v3712_v58, %v1782_v55  ;;  %v1802_v12 = vadd.f32 %v3714_v24, %v1801_v57  ;;  %v1810_v58 = vor.u32 1.1754944e-38, %v1809_v4 }
 0x3e6   :  { %v1791_v31 = vsel %vm1788_vm2, %v1790_v26, %v1786_v37  ;;  %v1814_v28 = vmul.f32 %v3716_v50, %v1772_v42  ;;  %v3720_v27 = vpop.eup %3719  ;;  %3721 = vpow2.f32 %v3543_v33  ;;  %v1912_v50 = vadd.f32 %v3539_v34, %v1887_v9  ;;  %v10628_v34 = vld [vmem:[#allocation25_spill] sm:$0xff]  ;;  %v10629_v9 = vld [vmem:[#allocation26_spill] sm:$0xff] }
 0x3e7   :  { %v1813_v62 = vmul.f32 %v1791_v31, %v6761_v17  ;;  %v7615_v55 = vadd.f32 1.0, %v3720_v27  ;;  %v1807_v17 = vand.u32 2147483647, %v7594_v53  ;;  %v1806_v41 = vsel %vm1805_vm5, %v3714_v24, %v1802_v12 }
 0x3e8   :  { %v1929_v31 = vand.u32 2147483648, %v7611_v61  ;;  %vm1923_vm10 = vweird.f32 %v7611_v61 }
 0x3e9   :  { %v7609_v52 = vadd.f32 %v1814_v28, %v1813_v62  ;;  %vm1808_vm6 = vcmp.eq.f32.partialorder %v1807_v17, 8.507059e+37  ;;  %v1948_v28 = vand.u32 2147483648, %v7615_v55  ;;  %v1927_v62 = vand.u32 2147483647, %v7611_v61  ;;  %v10625_v17 = vld [vmem:[#allocation22_spill] sm:$0xff] }
 0x3ea   :  { %v1811_v54 = vsel %vm1808_vm6, %v1810_v58, %v1806_v41  ;;  %v1946_v57 = vand.u32 2147483647, %v7615_v55  ;;  %vm1942_vm11 = vweird.f32 %v7615_v55  ;;  %v10626_v41 = vld [vmem:[#allocation39_spill] sm:$0xff] }
 0x3eb   :  { %3723 = vtanh.f32 %v7609_v52  ;;  %vm1928_vm14 = vcmp.eq.f32.partialorder %v1927_v62, 8.507059e+37  ;;  %v10627_v58 = vld [vmem:[#allocation23_spill] sm:$0xff]  ;;  %v10644_v62 = vld [vmem:[#allocation40_spill] sm:$0xff] }
 0x3ec   :  { %3725 = vrcp.f32 %v7611_v61  ;;  %v3722_v47 = vpop.eup %3721  ;;  %vm1947_vm15 = vcmp.eq.f32.partialorder %v1946_v57, 8.507059e+37  ;;  %v10646_v57 = vld [vmem:[#allocation42_spill] sm:$0xff] }
 0x3ed   :  { %3727 = vrcp.f32 %v7615_v55  ;;  %v7624_v49 = vadd.f32 1.0, %v3722_v47  ;;  %v10631_v47 = vld [vmem:[#allocation27_spill] sm:$0xff] }
 0x3ef   :  { %3729 = vrcp.f32 %v7624_v49  ;;  %vm1962_vm1 = vweird.f32 %v7624_v49 }
 0x3f0   :  { %3731 = vtanh.f32 %v1912_v50  ;;  %v10636_v50 = vld [vmem:[#allocation33_spill] sm:$0xff] }
 0x3f1   :  { %v3724_v27 = vpop.eup %3723 }
 0x3f2   :  { %v3726_v53 = vpop.eup %3725  ;;  %v1817_v26 = vmul.f32 %v3724_v27, %v1811_v54  ;;  %v10632_v27 = vld [vmem:[#allocation29_spill] sm:$0xff]  ;;  %v10634_v54 = vld [vmem:[#allocation47_spill] sm:$0xff] }
 0x3f3   :  { %v3728_v40 = vpop.eup %3727  ;;  %v1919_v24 = vmul.f32 %v3726_v53, %v7611_v61  ;;  %vm1924_vm8 = vweird.f32 %v3726_v53 }
 0x3f4   :  { %v1938_v42 = vmul.f32 %v3728_v40, %v7615_v55  ;;  %1993 = vmatmul.f32.vlgmr.msrb.gmra.mxu0 %v1817_v26  ;;  %2013 = vmatmul.f32.vlgmr.msrb.gmra.mxu1 %v1817_v26  ;;  %v7630_v0 = vsel %vm1823_vm7, %v1817_v26, %v6793_v45  ;;  %vm1943_vm9 = vweird.f32 %v3728_v40  ;;  %vm1925_vm12 = vmor %vm1923_vm10, %vm1924_vm8  ;;  %v10624_v55 = vld [vmem:[#allocation21_spill] sm:$0xff] }
 0x3f5   :  { %v1920_v37 = vsub.f32 1.0, %v1919_v24  ;;  %2033 = vmatmul.f32.vlgmr.msrb.gmra.mxu2 %v1817_v26  ;;  %2053 = vmatmul.f32.vlgmr.msrb.gmra.mxu3 %v1817_v26  ;;  %vm1944_vm13 = vmor %vm1942_vm11, %vm1943_vm9  ;;  %v7716_v26 = vld [vmem:[%s9217_s5] sm:$0xff]  ;;  %v10638_v24 = vld [vmem:[#allocation51_spill] sm:$0xff] }
 0x3f6   :  { %v1939_v3 = vsub.f32 1.0, %v1938_v42  ;;  %2216 = vmatpush.msrb.mxu0 %v6802_v38  ;;  %2236 = vmatpush.msrb.mxu1 %v6808_v46  ;;  %v7642_v38 = vpop.eup %3729  ;;  %vm2204_vm4 = vcmp.eq.s32.totalorder %v7716_v26, 5  ;;  %v10639_v42 = vld [vmem:[#allocation36_spill] sm:$0xff] }
 0x3f7   :  { %v1921_v19 = vmul.f32 %v3726_v53, %v1920_v37  ;;  %2256 = vmatpush.msrb.mxu2 %v6816_v51  ;;  %2276 = vmatpush.msrb.mxu3 %v6822_v22  ;;  %v1930_v51 = vor.u32 1.1754944e-38, %v1929_v31  ;;  %vm1963_vm0 = vweird.f32 %v7642_v38  ;;  %v10640_v37 = vld [vmem:[#allocation37_spill] sm:$0xff]  ;;  %v10642_v31 = vld [vmem:[#allocation55_spill] sm:$0xff] }
 0x3f8   :  { %v1940_v45 = vmul.f32 %v3728_v40, %v1939_v3  ;;  %2217 = vmatpush.msrb.mxu0 %v6834_v30  ;;  %2237 = vmatpush.msrb.mxu1 %v6840_v59  ;;  %v1958_v30 = vmul.f32 %v7642_v38, %v7624_v49  ;;  %v1949_v59 = vor.u32 1.1754944e-38, %v1948_v28  ;;  %vm1964_vm2 = vmor %vm1962_vm1, %vm1963_vm0  ;;  %v10641_v3 = vld [vmem:[#allocation38_spill] sm:$0xff]  ;;  %v10643_v28 = vmov 0  }
 0x3f9   :  { %v1922_v46 = vadd.f32 %v3726_v53, %v1921_v19  ;;  %2257 = vmatpush.msrb.mxu2 %v6849_v1  ;;  %2277 = vmatpush.msrb.mxu3 %v6855_v2  ;;  %v3732_v1 = vpop.eup %3731  ;;  %v2205_v19 = vsel %vm2204_vm4, 1, %v10643_v28 }
 0x3fa   :  { %v1941_v22 = vadd.f32 %v3728_v40, %v1940_v45  ;;  %2218 = vmatpush.msrb.mxu0 %v6861_v5  ;;  %2238 = vmatpush.msrb.mxu1 %v6867_v6  ;;  %v1959_v61 = vsub.f32 1.0, %v1958_v30  ;;  %v10645_v45 = vld [vmem:[#allocation41_spill] sm:$0xff]  ;;  %v10651_v30 = vld [vmem:[#allocation63_spill] sm:$0xff] }
 0x3fb   :  { %v1926_v33 = vsel %vm1925_vm12, %v3726_v53, %v1922_v46  ;;  %2258 = vmatpush.msrb.mxu2 %v6873_v7  ;;  %2278 = vmatpush.msrb.mxu3 %v6879_v8  ;;  %v10635_v53 = vld [vmem:[#allocation31_spill] sm:$0xff]  ;;  %v10648_v46 = vld [vmem:[#allocation44_spill] sm:$0xff] }
 0x3fc   :  { %v1931_v2 = vsel %vm1928_vm14, %v1930_v51, %v1926_v33  ;;  %v1945_v12 = vsel %vm1944_vm13, %v3728_v40, %v1941_v22  ;;  %2219 = vmatpush.msrb.mxu0 %v6885_v14  ;;  %2239 = vmatpush.msrb.mxu1 %v6891_v16  ;;  %v1960_v7 = vmul.f32 %v7642_v38, %v1959_v61  ;;  %v1966_v16 = vand.u32 2147483647, %v7624_v49  ;;  %v10637_v40 = vld [vmem:[#allocation34_spill] sm:$0xff]  ;;  %v10649_v51 = vld [vmem:[#allocation45_spill] sm:$0xff] }
 0x3fd   :  { %v1950_v5 = vsel %vm1947_vm15, %v1949_v59, %v1945_v12  ;;  %v1973_v6 = vmul.f32 %v3732_v1, %v1931_v2  ;;  %2259 = vmatpush.msrb.mxu2 %v6899_v20  ;;  %2279 = vmatpush.msrb.mxu3 %v6905_v15  ;;  %v10650_v22 = vld [vmem:[#allocation46_spill] sm:$0xff]  ;;  %v10652_v59 = vld [vmem:[#allocation48_spill] sm:$0xff]  ;;  %v10653_v33 = vld [vmem:[#allocation49_spill] sm:$0xff] }
 0x3fe   :  { %v1972_v4 = vmul.f32 %v1950_v5, %v6789_v44  ;;  %2220 = vmatpush.msrb.mxu0 %v6911_v48  ;;  %2240 = vmatpush.msrb.mxu1 %v6917_v23  ;;  %v1961_v14 = vadd.f32 %v7642_v38, %v1960_v7  ;;  %v1968_v44 = vand.u32 2147483648, %v7624_v49  ;;  %v10611_v48 = vld [vmem:[#allocation11_spill] sm:$0xff]  ;;  %v10612_v23 = vld [vmem:[#allocation12_spill] sm:$0xff]  ;;  %vm1967_vm3 = vcmp.eq.f32.partialorder %v1966_v16, 8.507059e+37  ;;  %v10633_v49 = vld [vmem:[#allocation30_spill] sm:$0xff] }
 0x3ff   :  { %2260 = vmatpush.msrb.mxu2 %v6927_v11  ;;  %2280 = vmatpush.msrb.mxu3 %v6933_v32  ;;  %v10613_v11 = vld [vmem:[#allocation13_spill] sm:$0xff]  ;;  %v10614_v32 = vld [vmem:[#allocation28_spill] sm:$0xff]  ;;  %v10654_v1 = vld [vmem:[#allocation50_spill] sm:$0xff] }
 0x400   :  { %v7666_v8 = vadd.f32 %v1973_v6, %v1972_v4  ;;  %2221 = vmatpush.msrb.mxu0 %v6939_v35  ;;  %2241 = vmatpush.msrb.mxu1 %v6945_v13  ;;  %v1965_v20 = vsel %vm1964_vm2, %v7642_v38, %v1961_v14  ;;  %v1969_v15 = vor.u32 1.1754944e-38, %v1968_v44  ;;  %v10647_v38 = vld [vmem:[#allocation59_spill] sm:$0xff]  ;;  %v10656_v12 = vld [vmem:[#allocation52_spill] sm:$0xff]  ;;  %v10657_v61 = vld [vmem:[#allocation53_spill] sm:$0xff] }
 0x401   :  { %2261 = vmatpush.msrb.mxu2 %v6951_v39  ;;  %2281 = vmatpush.msrb.mxu3 %v6957_v63  ;;  %v10615_v39 = vld [vmem:[#allocation14_spill] sm:$0xff]  ;;  %v10616_v63 = vld [vmem:[#allocation15_spill] sm:$0xff]  ;;  %v10660_v4 = vld [vmem:[#allocation56_spill] sm:$0xff] }
 0x402   :  { %3733 = vtanh.f32 %v7666_v8  ;;  %2222 = vmatpush.msrb.mxu0 %v6963_v18  ;;  %2242 = vmatpush.msrb.mxu1 %v6969_v25  ;;  %v1970_v13 = vsel %vm1967_vm3, %v1969_v15, %v1965_v20  ;;  %v10617_v25 = vld [vmem:[#allocation16_spill] sm:$0xff]  ;;  %v10655_v2 = vld [vmem:[#allocation67_spill] sm:$0xff]  ;;  %v10658_v5 = vld [vmem:[#allocation54_spill] sm:$0xff] }
 0x403   :  { %2262 = vmatpush.msrb.mxu2 %v6975_v36  ;;  %2282 = vmatpush.msrb.mxu3 %v6981_v29  ;;  %v10618_v36 = vld [vmem:[#allocation32_spill] sm:$0xff]  ;;  %v10619_v29 = vld [vmem:[#allocation17_spill] sm:$0xff]  ;;  %v10659_v6 = vld [vmem:[#allocation71_spill] sm:$0xff] }
 0x404   :  { %2223 = vmatpush.msrb.mxu0 %v6987_v21  ;;  %2243 = vmatpush.msrb.mxu1 %v6993_v60  ;;  %v10620_v21 = vld [vmem:[#allocation18_spill] sm:$0xff]  ;;  %v10621_v60 = vld [vmem:[#allocation19_spill] sm:$0xff]  ;;  %v10661_v7 = vld [vmem:[#allocation57_spill] sm:$0xff] }
 0x405   :  { %2263 = vmatpush.msrb.mxu2 %v6999_v10  ;;  %2283 = vmatpush.msrb.mxu3 %v7005_v43  ;;  %v10622_v10 = vld [vmem:[#allocation35_spill] sm:$0xff]  ;;  %v10623_v43 = vld [vmem:[#allocation20_spill] sm:$0xff]  ;;  %v10662_v14 = vld [vmem:[#allocation58_spill] sm:$0xff] }
 0x406   :  { %2224 = vmatpush.msrb.mxu0 %v10611_v48  ;;  %2244 = vmatpush.msrb.mxu1 %v10612_v23  ;;  %v10663_v44 = vld [vmem:[#allocation75_spill] sm:$0xff]  ;;  %v10664_v16 = vld [vmem:[#allocation60_spill] sm:$0xff]  ;;  %v10665_v20 = vld [vmem:[#allocation61_spill] sm:$0xff] }
 0x407   :  { %2264 = vmatpush.msrb.mxu2 %v10613_v11  ;;  %2284 = vmatpush.msrb.mxu3 %v10614_v32  ;;  %v10666_v15 = vld [vmem:[#allocation62_spill] sm:$0xff]  ;;  %v10667_v48 = vld [vmem:[#allocation79_spill] sm:$0xff]  ;;  %v10668_v23 = vld [vmem:[#allocation64_spill] sm:$0xff] }
 0x408   :  { %v3734_v35 = vpop.eup %3733  ;;  %2225 = vmatpush.msrb.mxu0 %v10615_v39  ;;  %2245 = vmatpush.msrb.mxu1 %v10616_v63  ;;  %v10669_v11 = vld [vmem:[#allocation65_spill] sm:$0xff]  ;;  %v10670_v32 = vld [vmem:[#allocation66_spill] sm:$0xff] }
 0x409   :  { %v1976_v18 = vmul.f32 %v3734_v35, %v1970_v13  ;;  %2265 = vmatpush.msrb.mxu2 %v10617_v25  ;;  %2285 = vmatpush.msrb.mxu3 %v10618_v36  ;;  %v10671_v35 = vld [vmem:[#allocation83_spill] sm:$0xff]  ;;  %v10672_v13 = vld [vmem:[#allocation68_spill] sm:$0xff]  ;;  %v10673_v39 = vld [vmem:[#allocation69_spill] sm:$0xff] }
 0x40a   :  { %2226 = vmatpush.msrb.mxu0 %v10619_v29  ;;  %2246 = vmatpush.msrb.mxu1 %v10620_v21  ;;  %v10674_v63 = vld [vmem:[#allocation70_spill] sm:$0xff]  ;;  %v10676_v25 = vld [vmem:[#allocation72_spill] sm:$0xff]  ;;  %v10677_v36 = vld [vmem:[#allocation73_spill] sm:$0xff] }
 0x40b   :  { %2266 = vmatpush.msrb.mxu2 %v10621_v60  ;;  %2286 = vmatpush.msrb.mxu3 %v10622_v10  ;;  %v10678_v29 = vld [vmem:[#allocation74_spill] sm:$0xff]  ;;  %v10679_v21 = vld [vmem:[#allocation76_spill] sm:$0xff]  ;;  %v10680_v60 = vld [vmem:[#allocation77_spill] sm:$0xff] }
 0x40c   :  { %2073 = vmatmul.f32.vlgmr.msra.gmra.mxu0 %v1976_v18  ;;  %2093 = vmatmul.f32.vlgmr.msra.gmra.mxu1 %v1976_v18  ;;  %v10681_v10 = vld [vmem:[#allocation78_spill] sm:$0xff] }
 0x40d   :  { %2113 = vmatmul.f32.vlgmr.msra.gmra.mxu2 %v1976_v18  ;;  %2133 = vmatmul.f32.vlgmr.msra.gmra.mxu3 %v1976_v18 }
 0x40e   :  { %2227 = vmatpush.msrb.mxu0 %v10623_v43  ;;  %2247 = vmatpush.msrb.mxu1 %v10624_v55  ;;  %v10682_v43 = vld [vmem:[#allocation80_spill] sm:$0xff]  ;;  %v10683_v55 = vld [vmem:[#allocation81_spill] sm:$0xff] }
 0x40f   :  { %2267 = vmatpush.msrb.mxu2 %v10625_v17  ;;  %2287 = vmatpush.msrb.mxu3 %v10626_v41  ;;  %v10684_v17 = vld [vmem:[#allocation82_spill] sm:$0xff]  ;;  %v10685_v41 = vld [vmem:[#allocation84_spill] sm:$0xff] }
 0x410   :  { %2228 = vmatpush.msrb.mxu0 %v10627_v58  ;;  %2248 = vmatpush.msrb.mxu1 %v10628_v34  ;;  %v10686_v58 = vld [vmem:[#allocation85_spill] sm:$0xff]  ;;  %v10687_v34 = vld [vmem:[#allocation86_spill] sm:$0xff] }
 0x411   :  { %2268 = vmatpush.msrb.mxu2 %v10629_v9  ;;  %2288 = vmatpush.msrb.mxu3 %v10630_v56  ;;  %v10688_v9 = vld [vmem:[#allocation88_spill] sm:$0xff]  ;;  %v10689_v56 = vld [vmem:[#allocation89_spill] sm:$0xff] }
 0x412   :  { %2229 = vmatpush.msrb.mxu0 %v10631_v47  ;;  %2249 = vmatpush.msrb.mxu1 %v10632_v27  ;;  %v10690_v47 = vld [vmem:[#allocation97_spill] sm:$0xff]  ;;  %v10691_v27 = vld [vmem:[#allocation90_spill] sm:$0xff] }
 0x413   :  { %2269 = vmatpush.msrb.mxu2 %v10633_v49  ;;  %2289 = vmatpush.msrb.mxu3 %v10634_v54  ;;  %v10692_v49 = vld [vmem:[#allocation91_spill] sm:$0xff]  ;;  %v10693_v54 = vld [vmem:[#allocation92_spill] sm:$0xff] }
 0x414   :  { %2230 = vmatpush.msrb.mxu0 %v10635_v53  ;;  %2250 = vmatpush.msrb.mxu1 %v10636_v50  ;;  %v10694_v53 = vld [vmem:[#allocation98_spill] sm:$0xff]  ;;  %v10695_v50 = vld [vmem:[#allocation93_spill] sm:$0xff] }
 0x415   :  { %2270 = vmatpush.msrb.mxu2 %v10637_v40  ;;  %2290 = vmatpush.msrb.mxu3 %v10638_v24  ;;  %v10696_v40 = vld [vmem:[#allocation94_spill] sm:$0xff]  ;;  %v10697_v24 = vld [vmem:[#allocation95_spill] sm:$0xff] }
 0x416   :  { %2231 = vmatpush.msrb.mxu0 %v10639_v42  ;;  %2251 = vmatpush.msrb.mxu1 %v10640_v37  ;;  %v10698_v42 = vld [vmem:[#allocation99_spill] sm:$0xff]  ;;  %v10699_v37 = vld [vmem:[#allocation96_spill] sm:$0xff] }
 0x417   :  { %2271 = vmatpush.msrb.mxu2 %v10641_v3  ;;  %2291 = vmatpush.msrb.mxu3 %v10642_v31  ;;  %v10700_v3 = vld [vmem:[#allocation100_spill] sm:$0xff]  ;;  %v10701_v31 = vld [vmem:[#allocation101_spill] sm:$0xff] }
 0x418   :  { %2232 = vmatmul.f32.vlgmr.msrb.gmra.mxu0 %v1976_v18  ;;  %2252 = vmatmul.f32.vlgmr.msrb.gmra.mxu1 %v1976_v18 }
 0x419   :  { %2272 = vmatmul.f32.vlgmr.msrb.gmra.mxu2 %v1976_v18  ;;  %2292 = vmatmul.f32.vlgmr.msrb.gmra.mxu3 %v1976_v18  ;;  %v10675_v18 = vld [vmem:[#allocation87_spill] sm:$0xff] }
 0x41a   :  { %2207 = vperm.xlu2 %3585, %v2205_v19   ;;  %2363 = vmatpush.msra.mxu0 %v10644_v62  ;;  %v10702_v19 = vld [vmem:[#allocation102_spill] sm:$0xff]  ;;  %v10703_v62 = vld [vmem:[#allocation103_spill] sm:$0xff] }
 0x41b   :  { %2383 = vmatpush.msra.mxu1 %v10645_v45  ;;  %2403 = vmatpush.msra.mxu2 %v10646_v57  ;;  %v10704_v45 = vld [vmem:[#allocation104_spill] sm:$0xff]  ;;  %v10705_v57 = vld [vmem:[#allocation105_spill] sm:$0xff] }
 0x41c   :  { %2423 = vmatpush.msra.mxu3 %v10647_v38  ;;  %2364 = vmatpush.msra.mxu0 %v10648_v46  ;;  %v10706_v38 = vld [vmem:[#allocation106_spill] sm:$0xff]  ;;  %v10707_v46 = vld [vmem:[#allocation107_spill] sm:$0xff] }
 0x41d   :  { %2384 = vmatpush.msra.mxu1 %v10649_v51  ;;  %2404 = vmatpush.msra.mxu2 %v10650_v22  ;;  %v10708_v51 = vld [vmem:[#allocation108_spill] sm:$0xff]  ;;  %v10709_v22 = vld [vmem:[#allocation109_spill] sm:$0xff] }
 0x41e   :  { %2424 = vmatpush.msra.mxu3 %v10651_v30  ;;  %2365 = vmatpush.msra.mxu0 %v10652_v59  ;;  %v10710_v30 = vld [vmem:[#allocation110_spill] sm:$0xff]  ;;  %v10711_v59 = vld [vmem:[#allocation111_spill] sm:$0xff] }
 0x41f   :  { %2385 = vmatpush.msra.mxu1 %v10653_v33  ;;  %2405 = vmatpush.msra.mxu2 %v10654_v1  ;;  %v10712_v33 = vld [vmem:[#allocation112_spill] sm:$0xff]  ;;  %v10713_v1 = vld [vmem:[#allocation113_spill] sm:$0xff] }
 0x420   :  { %2425 = vmatpush.msra.mxu3 %v10655_v2  ;;  %2366 = vmatpush.msra.mxu0 %v10656_v12  ;;  %v10714_v2 = vld [vmem:[#allocation114_spill] sm:$0xff]  ;;  %v10715_v12 = vld [vmem:[#allocation115_spill] sm:$0xff] }
 0x421   :  { %2386 = vmatpush.msra.mxu1 %v10657_v61  ;;  %2406 = vmatpush.msra.mxu2 %v10658_v5  ;;  %v10716_v61 = vld [vmem:[#allocation116_spill] sm:$0xff]  ;;  %v10717_v5 = vld [vmem:[#allocation117_spill] sm:$0xff] }
 0x422   :  { %2426 = vmatpush.msra.mxu3 %v10659_v6  ;;  %2367 = vmatpush.msra.mxu0 %v10660_v4  ;;  %v10718_v6 = vld [vmem:[#allocation118_spill] sm:$0xff]  ;;  %v10719_v4 = vld [vmem:[#allocation119_spill] sm:$0xff] }
 0x423   :  { %2387 = vmatpush.msra.mxu1 %v10661_v7  ;;  %2407 = vmatpush.msra.mxu2 %v10662_v14  ;;  %v10720_v7 = vld [vmem:[#allocation120_spill] sm:$0xff]  ;;  %v10721_v14 = vld [vmem:[#allocation121_spill] sm:$0xff] }
 0x424   :  { %2427 = vmatpush.msra.mxu3 %v10663_v44  ;;  %2368 = vmatpush.msra.mxu0 %v10664_v16  ;;  %v10722_v44 = vld [vmem:[#allocation122_spill] sm:$0xff]  ;;  %v10723_v16 = vld [vmem:[#allocation123_spill] sm:$0xff] }
 0x425   :  { %2388 = vmatpush.msra.mxu1 %v10665_v20  ;;  %2408 = vmatpush.msra.mxu2 %v10666_v15  ;;  %v10724_v20 = vld [vmem:[#allocation124_spill] sm:$0xff]  ;;  %v10725_v15 = vld [vmem:[#allocation125_spill] sm:$0xff] }
 0x426   :  { %2428 = vmatpush.msra.mxu3 %v10667_v48  ;;  %2369 = vmatpush.msra.mxu0 %v10668_v23  ;;  %v10726_v48 = vld [vmem:[#allocation126_spill] sm:$0xff]  ;;  %v10727_v23 = vld [vmem:[#allocation127_spill] sm:$0xff] }
 0x427   :  { %2389 = vmatpush.msra.mxu1 %v10669_v11  ;;  %2409 = vmatpush.msra.mxu2 %v10670_v32  ;;  %v10728_v11 = vld [vmem:[#allocation128_spill] sm:$0xff]  ;;  %v10729_v32 = vld [vmem:[#allocation129_spill] sm:$0xff] }
 0x428   :  { %2429 = vmatpush.msra.mxu3 %v10671_v35  ;;  %2370 = vmatpush.msra.mxu0 %v10672_v13  ;;  %v10730_v35 = vld [vmem:[#allocation130_spill] sm:$0xff]  ;;  %v10731_v13 = vld [vmem:[#allocation131_spill] sm:$0xff] }
 0x429   :  { %2390 = vmatpush.msra.mxu1 %v10673_v39  ;;  %2410 = vmatpush.msra.mxu2 %v10674_v63  ;;  %v10732_v39 = vld [vmem:[#allocation132_spill] sm:$0xff]  ;;  %v10733_v63 = vld [vmem:[#allocation133_spill] sm:$0xff] }
 0x42a   :  { %2430 = vmatpush.msra.mxu3 %v10675_v18  ;;  %2371 = vmatpush.msra.mxu0 %v10676_v25  ;;  %v10734_v18 = vld [vmem:[#allocation134_spill] sm:$0xff]  ;;  %v10735_v25 = vld [vmem:[#allocation135_spill] sm:$0xff] }
 0x42b   :  { %2391 = vmatpush.msra.mxu1 %v10677_v36  ;;  %2411 = vmatpush.msra.mxu2 %v10678_v29  ;;  %v10736_v36 = vld [vmem:[#allocation136_spill] sm:$0xff]  ;;  %v10737_v29 = vld [vmem:[#allocation137_spill] sm:$0xff] }
 0x42c   :  { %2431 = vmatpush.msra.mxu3 %v10679_v21  ;;  %2372 = vmatpush.msra.mxu0 %v10680_v60  ;;  %v10738_v21 = vld [vmem:[#allocation138_spill] sm:$0xff]  ;;  %v10739_v60 = vld [vmem:[#allocation139_spill] sm:$0xff] }
 0x42d   :  { %2392 = vmatpush.msra.mxu1 %v10681_v10  ;;  %2412 = vmatpush.msra.mxu2 %v10682_v43  ;;  %v10740_v10 = vld [vmem:[#allocation140_spill] sm:$0xff]  ;;  %v10741_v43 = vld [vmem:[#allocation141_spill] sm:$0xff] }
 0x42e   :  { %2432 = vmatpush.msra.mxu3 %v10683_v55  ;;  %2373 = vmatpush.msra.mxu0 %v10684_v17  ;;  %v10742_v55 = vld [vmem:[#allocation142_spill] sm:$0xff]  ;;  %v10743_v17 = vld [vmem:[#allocation143_spill] sm:$0xff] }
 0x42f   :  { %2393 = vmatpush.msra.mxu1 %v10685_v41  ;;  %2413 = vmatpush.msra.mxu2 %v10686_v58  ;;  %v10744_v41 = vld [vmem:[#allocation144_spill] sm:$0xff]  ;;  %v10745_v58 = vld [vmem:[#allocation145_spill] sm:$0xff] }
 0x430   :  { %2433 = vmatpush.msra.mxu3 %v10687_v34  ;;  %2374 = vmatpush.msra.mxu0 %v10688_v9  ;;  %v10746_v34 = vld [vmem:[#allocation146_spill] sm:$0xff]  ;;  %v10747_v9 = vld [vmem:[#allocation147_spill] sm:$0xff] }
 0x431   :  { %2394 = vmatpush.msra.mxu1 %v10689_v56  ;;  %2414 = vmatpush.msra.mxu2 %v10690_v47  ;;  %v10748_v56 = vld [vmem:[#allocation148_spill] sm:$0xff]  ;;  %v10749_v47 = vld [vmem:[#allocation149_spill] sm:$0xff] }
 0x432   :  { %2434 = vmatpush.msra.mxu3 %v10691_v27  ;;  %2375 = vmatpush.msra.mxu0 %v10692_v49  ;;  %v10750_v27 = vld [vmem:[#allocation150_spill] sm:$0xff]  ;;  %v10751_v49 = vld [vmem:[#allocation151_spill] sm:$0xff] }
 0x433   :  { %2395 = vmatpush.msra.mxu1 %v10693_v54  ;;  %2415 = vmatpush.msra.mxu2 %v10694_v53  ;;  %v10752_v54 = vld [vmem:[#allocation152_spill] sm:$0xff]  ;;  %v10753_v53 = vld [vmem:[#allocation153_spill] sm:$0xff] }
 0x434   :  { %2435 = vmatpush.msra.mxu3 %v10695_v50  ;;  %2376 = vmatpush.msra.mxu0 %v10696_v40  ;;  %v10754_v50 = vld [vmem:[#allocation154_spill] sm:$0xff]  ;;  %v10755_v40 = vld [vmem:[#allocation155_spill] sm:$0xff] }
 0x435   :  { %2396 = vmatpush.msra.mxu1 %v10697_v24  ;;  %2416 = vmatpush.msra.mxu2 %v10698_v42  ;;  %v10756_v24 = vld [vmem:[#allocation156_spill] sm:$0xff]  ;;  %v10757_v42 = vld [vmem:[#allocation157_spill] sm:$0xff] }
 0x436   :  { %2436 = vmatpush.msra.mxu3 %v10699_v37  ;;  %2377 = vmatpush.msra.mxu0 %v10700_v3  ;;  %v10758_v37 = vld [vmem:[#allocation158_spill] sm:$0xff]  ;;  %v10759_v3 = vld [vmem:[#allocation159_spill] sm:$0xff] }
 0x437   :  { %2397 = vmatpush.msra.mxu1 %v10701_v31  ;;  %2417 = vmatpush.msra.mxu2 %v10702_v19  ;;  %v10760_v31 = vld [vmem:[#allocation160_spill] sm:$0xff]  ;;  %v10761_v19 = vld [vmem:[#allocation161_spill] sm:$0xff] }
 0x438   :  { %2437 = vmatpush.msra.mxu3 %v10703_v62  ;;  %2378 = vmatpush.msra.mxu0 %v10704_v45  ;;  %v10762_v62 = vld [vmem:[#allocation162_spill] sm:$0xff]  ;;  %v10763_v45 = vld [vmem:[#allocation163_spill] sm:$0xff] }
 0x439   :  { %2398 = vmatpush.msra.mxu1 %v10705_v57  ;;  %2418 = vmatpush.msra.mxu2 %v10706_v38  ;;  %v10764_v57 = vld [vmem:[#allocation164_spill] sm:$0xff]  ;;  %v10765_v38 = vld [vmem:[#allocation165_spill] sm:$0xff] }
 0x43a   :  { %2438 = vmatpush.msra.mxu3 %v10707_v46  ;;  %2443 = vmatpush.msrb.mxu0 %v10708_v51  ;;  %v10766_v46 = vld [vmem:[#allocation166_spill] sm:$0xff]  ;;  %v10767_v51 = vld [vmem:[#allocation167_spill] sm:$0xff] }
 0x43b   :  { %2463 = vmatpush.msrb.mxu1 %v10709_v22  ;;  %2483 = vmatpush.msrb.mxu2 %v10710_v30  ;;  %v10768_v22 = vld [vmem:[#allocation168_spill] sm:$0xff]  ;;  %v10769_v30 = vld [vmem:[#allocation169_spill] sm:$0xff] }
 0x43c   :  { %2503 = vmatpush.msrb.mxu3 %v10711_v59  ;;  %2444 = vmatpush.msrb.mxu0 %v10712_v33  ;;  %v10770_v59 = vld [vmem:[#allocation170_spill] sm:$0xff]  ;;  %v10771_v33 = vld [vmem:[#allocation171_spill] sm:$0xff] }
 0x43d   :  { %2464 = vmatpush.msrb.mxu1 %v10713_v1  ;;  %2484 = vmatpush.msrb.mxu2 %v10714_v2 }
 0x43e   :  { %2504 = vmatpush.msrb.mxu3 %v10715_v12  ;;  %2445 = vmatpush.msrb.mxu0 %v10716_v61 }
 0x43f   :  { %2465 = vmatpush.msrb.mxu1 %v10717_v5  ;;  %2485 = vmatpush.msrb.mxu2 %v10718_v6 }
 0x440   :  { %2505 = vmatpush.msrb.mxu3 %v10719_v4  ;;  %2446 = vmatpush.msrb.mxu0 %v10720_v7  ;;  %v10772_v7 = vld [vmem:[#allocation8_spill] sm:$0xff] }
 0x441   :  { %2466 = vmatpush.msrb.mxu1 %v10721_v14  ;;  %2486 = vmatpush.msrb.mxu2 %v10722_v44  ;;  %v10773_v44 = vld [vmem:[#allocation9_spill] sm:$0xff] }
 0x442   :  { %2506 = vmatpush.msrb.mxu3 %v10723_v16  ;;  %2447 = vmatpush.msrb.mxu0 %v10724_v20 }
 0x443   :  { %2467 = vmatpush.msrb.mxu1 %v10725_v15  ;;  %2487 = vmatpush.msrb.mxu2 %v10726_v48 }
 0x444   :  { %2507 = vmatpush.msrb.mxu3 %v10727_v23  ;;  %2448 = vmatpush.msrb.mxu0 %v10728_v11 }
 0x445   :  { %2468 = vmatpush.msrb.mxu1 %v10729_v32  ;;  %2488 = vmatpush.msrb.mxu2 %v10730_v35  ;;  %v10774_v32 = vld [vmem:[#allocation10_spill] sm:$0xff] }
 0x446   :  { %2508 = vmatpush.msrb.mxu3 %v10731_v13  ;;  %2449 = vmatpush.msrb.mxu0 %v10732_v39  ;;  %v3547_v13 = vld [vmem:[%s9212_s0 + $0xa0] sm:$0xff]  ;;  %v3548_v39 = vld [vmem:[%s9212_s0 + $0xa8] sm:$0xff] }
 0x447   :  { %2469 = vmatpush.msrb.mxu1 %v10733_v63  ;;  %2489 = vmatpush.msrb.mxu2 %v10734_v18 }
 0x448   :  { %2509 = vmatpush.msrb.mxu3 %v10735_v25  ;;  %2450 = vmatpush.msrb.mxu0 %v10736_v36 }
 0x449   :  { %2470 = vmatpush.msrb.mxu1 %v10737_v29  ;;  %2490 = vmatpush.msrb.mxu2 %v10738_v21 }
 0x44a   :  { %2510 = vmatpush.msrb.mxu3 %v10739_v60  ;;  %2451 = vmatpush.msrb.mxu0 %v10740_v10 }
 0x44b   :  { %2471 = vmatpush.msrb.mxu1 %v10741_v43  ;;  %2491 = vmatpush.msrb.mxu2 %v10742_v55 }
 0x44c   :  { %2511 = vmatpush.msrb.mxu3 %v10743_v17  ;;  %2452 = vmatpush.msrb.mxu0 %v10744_v41 }
 0x44d   :  { %2472 = vmatpush.msrb.mxu1 %v10745_v58  ;;  %2492 = vmatpush.msrb.mxu2 %v10746_v34  ;;  %v3550_v34 = vld [vmem:[%s9212_s0 + $0xb8] sm:$0xff] }
 0x44e   :  { %2512 = vmatpush.msrb.mxu3 %v10747_v9  ;;  %2453 = vmatpush.msrb.mxu0 %v10748_v56 }
 0x44f   :  { %2473 = vmatpush.msrb.mxu1 %v10749_v47  ;;  %2493 = vmatpush.msrb.mxu2 %v10750_v27  ;;  %v10775_v47 = vld [vmem:[#allocation24_spill] sm:$0xff] }
 0x450   :  { %2513 = vmatpush.msrb.mxu3 %v10751_v49  ;;  %2454 = vmatpush.msrb.mxu0 %v10752_v54 }
 0x451   :  { %2474 = vmatpush.msrb.mxu1 %v10753_v53  ;;  %2494 = vmatpush.msrb.mxu2 %v10754_v50 }
 0x452   :  { %2514 = vmatpush.msrb.mxu3 %v10755_v40  ;;  %2455 = vmatpush.msrb.mxu0 %v10756_v24 }
 0x453   :  { %2475 = vmatpush.msrb.mxu1 %v10757_v42  ;;  %2495 = vmatpush.msrb.mxu2 %v10758_v37 }
 0x454   :  { %2515 = vmatpush.msrb.mxu3 %v10759_v3  ;;  %2456 = vmatpush.msrb.mxu0 %v10760_v31 }
 0x455   :  { %2476 = vmatpush.msrb.mxu1 %v10761_v19  ;;  %2496 = vmatpush.msrb.mxu2 %v10762_v62 }
 0x456   :  { %2516 = vmatpush.msrb.mxu3 %v10763_v45  ;;  %2457 = vmatpush.msrb.mxu0 %v10764_v57 }
 0x457   :  { %2477 = vmatpush.msrb.mxu1 %v10765_v38  ;;  %2497 = vmatpush.msrb.mxu2 %v10766_v46 }
 0x458   :  { %2517 = vmatpush.msrb.mxu3 %v10767_v51  ;;  %2458 = vmatpush.msrb.mxu0 %v10768_v22 }
 0x459   :  { %2478 = vmatpush.msrb.mxu1 %v10769_v30  ;;  %2498 = vmatpush.msrb.mxu2 %v10770_v59  ;;  %v3549_v30 = vld [vmem:[%s9212_s0 + $0xb0] sm:$0xff] }
 0x45a   :  { %2518 = vmatpush.msrb.mxu3 %v10771_v33 }
 0x471   :  { %v1994_v1 = vpop.f32.mrf.mxu0  ;;  %v2014_v2 = vpop.f32.mrf.mxu1 }
 0x478   :  { %v2054_v12 = vpop.f32.mrf.mxu3  ;;  %v2034_v20 = vpop.f32.mrf.mxu2 }
 0x489   :  { %v2074_v61 = vpop.f32.mrf.mxu0  ;;  %v2094_v5 = vpop.f32.mrf.mxu1 }
 0x48a   :  { %v2075_v6 = vadd.f32 %v2074_v61, %v1994_v1  ;;  %v2095_v4 = vadd.f32 %v2094_v5, %v2014_v2 }
 0x48c   :  { %v2137_v14 = vadd.f32 %v2075_v6, %v10772_v7  ;;  %v2138_v16 = vadd.f32 %v2095_v4, %v10773_v44 }
 0x48e   :  { %v3544_v15 = vmul.f32 -1.442695, %v2137_v14  ;;  %v3545_v48 = vmul.f32 -1.442695, %v2138_v16 }
 0x490   :  { %3735 = vpow2.f32 %v3544_v15  ;;  %v2134_v23 = vpop.f32.mrf.mxu3  ;;  %v2114_v29 = vpop.f32.mrf.mxu2 }
 0x491   :  { %3737 = vpow2.f32 %v3545_v48  ;;  %v2135_v11 = vadd.f32 %v2134_v23, %v2054_v12  ;;  %v2115_v58 = vadd.f32 %v2114_v29, %v2034_v20 }
 0x493   :  { %v2140_v35 = vadd.f32 %v2135_v11, %v10774_v32  ;;  %v2139_v27 = vadd.f32 %v2115_v58, %v10775_v47 }
 0x495   :  { %v3546_v63 = vmul.f32 -1.442695, %v2140_v35  ;;  %v2233_v18 = vpop.f32.mrf.mxu0  ;;  %v2253_v25 = vpop.f32.mrf.mxu1 }
 0x496   :  { %v3736_v36 = vpop.eup %3735  ;;  %v2296_v21 = vadd.f32 %v3547_v13, %v2233_v18  ;;  %v2297_v60 = vadd.f32 %v3548_v39, %v2253_v25 }
 0x497   :  { %v3738_v10 = vpop.eup %3737  ;;  %v2144_v43 = vadd.f32 1.0, %v3736_v36  ;;  %3739 = vpow2.f32 %v3546_v63 }
 0x498   :  { %v2163_v55 = vadd.f32 1.0, %v3738_v10  ;;  %v3551_v17 = vmul.f32 -1.442695, %v2296_v21  ;;  %v3552_v41 = vmul.f32 -1.442695, %v2297_v60 }
 0x499   :  { %3741 = vrcp.f32 %v2144_v43  ;;  %v2154_v19 = vand.u32 2147483647, %v2144_v43  ;;  %v2156_v38 = vand.u32 2147483648, %v2144_v43  ;;  %vm2150_vm8 = vweird.f32 %v2144_v43 }
 0x49a   :  { %3743 = vrcp.f32 %v2163_v55  ;;  %v2175_v57 = vand.u32 2147483648, %v2163_v55  ;;  %v2173_v22 = vand.u32 2147483647, %v2163_v55  ;;  %vm2169_vm7 = vweird.f32 %v2163_v55 }
 0x49b   :  { %3745 = vpow2.f32 %v3551_v17  ;;  %v2157_v61 = vor.u32 1.1754944e-38, %v2156_v38  ;;  %vm2155_vm11 = vcmp.eq.f32.partialorder %v2154_v19, 8.507059e+37 }
 0x49c   :  { %3747 = vpow2.f32 %v3552_v41  ;;  %v2293_v9 = vpop.f32.mrf.mxu3  ;;  %v2273_v59 = vpop.f32.mrf.mxu2  ;;  %v2176_v16 = vor.u32 1.1754944e-38, %v2175_v57  ;;  %vm2174_vm12 = vcmp.eq.f32.partialorder %v2173_v22, 8.507059e+37 }
 0x49d   :  { %v3740_v56 = vpop.eup %3739  ;;  %v2299_v49 = vadd.f32 %v3550_v34, %v2293_v9  ;;  %v2298_v4 = vadd.f32 %v3549_v30, %v2273_v59  ;;  %v2208_v41 = vpop.permute.xlu2 %2207 }
 0x49e   :  { %v7867_v54 = vadd.f32 1.0, %v3740_v56  ;;  %vm2209_vm3 = vcmp.eq.s32.totalorder %v2208_v41, 1  ;;  %v8063_v41 = vld [vmem:[%s9213_s1 + $0x178] sm:$0xff] }
 0x49f   :  { %v3742_v53 = vpop.eup %3741  ;;  %v3553_v50 = vmul.f32 -1.442695, %v2299_v49 }
 0x4a0   :  { %v3744_v40 = vpop.eup %3743  ;;  %v2146_v24 = vmul.f32 %v3742_v53, %v2144_v43  ;;  %3749 = vrcp.f32 %v7867_v54  ;;  %vm2151_vm5 = vweird.f32 %v3742_v53  ;;  %vm2189_vm13 = vweird.f32 %v7867_v54 }
 0x4a1   :  { %v3746_v42 = vpop.eup %3745  ;;  %v2165_v37 = vmul.f32 %v3744_v40, %v2163_v55  ;;  %3751 = vtanh.f32 %v2139_v27  ;;  %vm2170_vm6 = vweird.f32 %v3744_v40  ;;  %vm2152_vm9 = vmor %vm2150_vm8, %vm2151_vm5  ;;  %v2195_v60 = vand.u32 2147483648, %v7867_v54 }
 0x4a2   :  { %v3748_v3 = vpop.eup %3747  ;;  %v2147_v31 = vsub.f32 1.0, %v2146_v24  ;;  %v7870_v62 = vadd.f32 1.0, %v3746_v42  ;;  %3753 = vpow2.f32 %v3553_v50  ;;  %vm2171_vm10 = vmor %vm2169_vm7, %vm2170_vm6  ;;  %v2193_v9 = vand.u32 2147483647, %v7867_v54 }
 0x4a3   :  { %v2166_v45 = vsub.f32 1.0, %v2165_v37  ;;  %v7872_v46 = vadd.f32 1.0, %v3748_v3  ;;  %v2196_v50 = vor.u32 1.1754944e-38, %v2195_v60 }
 0x4a4   :  { %v2148_v51 = vmul.f32 %v3742_v53, %v2147_v31  ;;  %3755 = vrcp.f32 %v7870_v62  ;;  %v2313_v43 = vand.u32 2147483647, %v7870_v62  ;;  %v2315_v17 = vand.u32 2147483648, %v7870_v62 }
 0x4a5   :  { %v2167_v33 = vmul.f32 %v3744_v40, %v2166_v45  ;;  %3757 = vrcp.f32 %v7872_v46  ;;  %v2334_v58 = vand.u32 2147483648, %v7872_v46  ;;  %v2332_v27 = vand.u32 2147483647, %v7872_v46 }
 0x4a6   :  { %v7879_v1 = vpop.eup %3749  ;;  %v2149_v2 = vadd.f32 %v3742_v53, %v2148_v51  ;;  %3759 = vtanh.f32 %v2298_v4  ;;  %vm2309_vm2 = vweird.f32 %v7870_v62  ;;  %vm2328_vm4 = vweird.f32 %v7872_v46  ;;  %v7952_v4 = vld [vmem:[%s9213_s1 + $0x1f8] sm:$0xff] }
 0x4a7   :  { %v3752_v12 = vpop.eup %3751  ;;  %v2168_v5 = vadd.f32 %v3744_v40, %v2167_v33  ;;  %v2185_v6 = vmul.f32 %v7879_v1, %v7867_v54  ;;  %vm2190_vm14 = vweird.f32 %v7879_v1  ;;  %v2316_v42 = vor.u32 1.1754944e-38, %v2315_v17  ;;  %v8057_v17 = vld [vmem:[%s9213_s1 + $0x170] sm:$0xff] }
 0x4a8   :  { %v3754_v14 = vpop.eup %3753  ;;  %v2153_v20 = vsel %vm2152_vm9, %v3742_v53, %v2149_v2  ;;  %vm7904_vm1 = vmor %vm2189_vm13, %vm2190_vm14  ;;  %v2335_v3 = vor.u32 1.1754944e-38, %v2334_v58  ;;  %vm2314_vm7 = vcmp.eq.f32.partialorder %v2313_v43, 8.507059e+37  ;;  %vm2194_vm8 = vcmp.eq.f32.partialorder %v2193_v9, 8.507059e+37  ;;  %v8035_v43 = vld [vmem:[%s9213_s1 + $0x198] sm:$0xff]  ;;  %v8069_v58 = vld [vmem:[%s9213_s1 + $0x140] sm:$0xff] }
 0x4a9   :  { %v2158_v15 = vsel %vm2155_vm11, %v2157_v61, %v2153_v20  ;;  %v2172_v48 = vsel %vm2171_vm10, %v3744_v40, %v2168_v5  ;;  %v2186_v23 = vsub.f32 1.0, %v2185_v6  ;;  %v7883_v11 = vadd.f32 1.0, %v3754_v14  ;;  %v7932_v61 = vld [vmem:[%s9213_s1 + $0x1e0] sm:$0xff]  ;;  %v7946_v6 = vld [vmem:[%s9213_s1 + $0x1f0] sm:$0xff]  ;;  %v7970_v20 = vld [vmem:[%s9213_s1 + $0x1c8] sm:$0xff] }
 0x4aa   :  { %v3756_v35 = vpop.eup %3755  ;;  %v2177_v13 = vsel %vm2174_vm12, %v2176_v16, %v2172_v48  ;;  %v2200_v39 = vmul.f32 %v3752_v12, %v2158_v15  ;;  %vm2333_vm9 = vcmp.eq.f32.partialorder %v2332_v27, 8.507059e+37  ;;  %v7964_v16 = vld [vmem:[%s9213_s1 + $0x1c0] sm:$0xff]  ;;  %v7979_v48 = vld [vmem:[%s9213_s1 + $0x1d0] sm:$0xff]  ;;  %v8243_v14 = vld [vmem:[%s9213_s1 + $0x68] sm:$0xff]  ;;  %vm2590_vm14 = vcmp.eq.s32.totalorder %v7716_v26, 6 }
 0x4ab   :  { %v3758_v63 = vpop.eup %3757  ;;  %v2199_v18 = vmul.f32 %v2177_v13, %v7609_v52  ;;  %v2187_v25 = vmul.f32 %v7879_v1, %v2186_v23  ;;  %v2305_v36 = vmul.f32 %v3756_v35, %v7870_v62  ;;  %3761 = vrcp.f32 %v7883_v11  ;;  %v7985_v23 = vld [vmem:[%s9213_s1 + $0x1d8] sm:$0xff]  ;;  %v7997_v13 = vld [vmem:[%s9213_s1 + $0x1a8] sm:$0xff]  ;;  %v8081_v9 = vld [vmem:[%s9213_s1 + $0x150] sm:$0xff]  ;;  %10797 = vst [vmem:[#allocation25_spill] sm:$0xff] %v8243_v14 }
 0x4ac   :  { %v2324_v29 = vmul.f32 %v3758_v63, %v7872_v46  ;;  %vm2310_vm15 = vweird.f32 %v3756_v35  ;;  %vm2329_vm0 = vweird.f32 %v3758_v63  ;;  %v3760_v49 = vpop.eup %3759  ;;  %vm2348_vm11 = vweird.f32 %v7883_v11  ;;  %v8093_v27 = vld [vmem:[%s9213_s1 + $0x120] sm:$0xff]  ;;  %v8105_v53 = vld [vmem:[%s9213_s1 + $0x130] sm:$0xff]  ;;  %v8316_v26 = vld [vmem:[%s9213_s1 + $0x8] sm:$0xff] }
 0x4ad   :  { %v7891_v21 = vadd.f32 %v2200_v39, %v2199_v18  ;;  %v2306_v10 = vsub.f32 1.0, %v2305_v36  ;;  %v2188_v52 = vadd.f32 %v7879_v1, %v2187_v25  ;;  %vm2311_vm5 = vmor %vm2309_vm2, %vm2310_vm15  ;;  %v2352_v5 = vand.u32 2147483647, %v7883_v11  ;;  %v8003_v39 = vld [vmem:[%s9213_s1 + $0x1b0] sm:$0xff]  ;;  %v8015_v36 = vld [vmem:[%s9213_s1 + $0x180] sm:$0xff]  ;;  %10809 = vst [vmem:[#allocation37_spill] sm:$0xff] %v8316_v26 }
 0x4ae   :  { %v2325_v55 = vsub.f32 1.0, %v2324_v29  ;;  %vm2330_vm6 = vmor %vm2328_vm4, %vm2329_vm0  ;;  %v8021_v29 = vld [vmem:[%s9213_s1 + $0x188] sm:$0xff] }
 0x4af   :  { %3763 = vtanh.f32 %v7891_v21  ;;  %v2307_v34 = vmul.f32 %v3756_v35, %v2306_v10  ;;  %v2192_v54 = vsel %vm7904_vm1, %v7879_v1, %v2188_v52  ;;  %vm2353_vm13 = vcmp.eq.f32.partialorder %v2352_v5, 8.507059e+37  ;;  %v8029_v10 = vld [vmem:[%s9213_s1 + $0x190] sm:$0xff]  ;;  %v8041_v52 = vld [vmem:[%s9213_s1 + $0x160] sm:$0xff] }
 0x4b0   :  { %v2326_v56 = vmul.f32 %v3758_v63, %v2325_v55  ;;  %v2197_v22 = vsel %vm2194_vm8, %v2196_v50, %v2192_v54  ;;  %v8047_v55 = vld [vmem:[%s9213_s1 + $0x168] sm:$0xff]  ;;  %v8111_v50 = vld [vmem:[%s9213_s1 + $0x138] sm:$0xff]  ;;  %v8141_v54 = vld [vmem:[%s9213_s1 + $0xe0] sm:$0xff] }
 0x4b1   :  { %v2308_v40 = vadd.f32 %v3756_v35, %v2307_v34  ;;  %v7909_v24 = vpop.eup %3761  ;;  %v8075_v34 = vld [vmem:[%s9213_s1 + $0x148] sm:$0xff]  ;;  %10780 = vst [vmem:[#allocation11_spill] sm:$0xff] %v8141_v54  ;;  %v8237_v5 = vld [vmem:[%s9213_s1 + $0x60] sm:$0xff] }
 0x4b2   :  { %v2327_v37 = vadd.f32 %v3758_v63, %v2326_v56  ;;  %v2344_v19 = vmul.f32 %v7909_v24, %v7883_v11  ;;  %vm2349_vm10 = vweird.f32 %v7909_v24  ;;  %v8087_v56 = vld [vmem:[%s9213_s1 + $0x158] sm:$0xff]  ;;  %10796 = vst [vmem:[#allocation23_spill] sm:$0xff] %v8237_v5 }
 0x4b3   :  { %v2312_v31 = vsel %vm2311_vm5, %v3756_v35, %v2308_v40  ;;  %vm7957_vm12 = vmor %vm2348_vm11, %vm2349_vm10  ;;  %v7991_v35 = vld [vmem:[%s9213_s1 + $0x1a0] sm:$0xff] }
 0x4b4   :  { %v2317_v62 = vsel %vm2314_vm7, %v2316_v42, %v2312_v31  ;;  %v2331_v45 = vsel %vm2330_vm6, %v3758_v63, %v2327_v37  ;;  %v2345_v51 = vsub.f32 1.0, %v2344_v19  ;;  %v8009_v63 = vld [vmem:[%s9213_s1 + $0x1b8] sm:$0xff]  ;;  %v8117_v40 = vld [vmem:[%s9213_s1 + $0x100] sm:$0xff]  ;;  %v8129_v42 = vld [vmem:[%s9213_s1 + $0x110] sm:$0xff] }
 0x4b5   :  { %v3764_v57 = vpop.eup %3763  ;;  %v2336_v38 = vsel %vm2333_vm9, %v2335_v3, %v2331_v45  ;;  %v2359_v46 = vmul.f32 %v3760_v49, %v2317_v62  ;;  %v8099_v49 = vld [vmem:[%s9213_s1 + $0x128] sm:$0xff]  ;;  %v8135_v37 = vld [vmem:[%s9213_s1 + $0x118] sm:$0xff]  ;;  %v8153_v31 = vld [vmem:[%s9213_s1 + $0xf0] sm:$0xff] }
 0x4b6   :  { %v2358_v30 = vmul.f32 %v2336_v38, %v7666_v8  ;;  %v2203_v59 = vmul.f32 %v3764_v57, %v2197_v22  ;;  %v2346_v33 = vmul.f32 %v7909_v24, %v2345_v51  ;;  %v2354_v8 = vand.u32 2147483648, %v7883_v11  ;;  %v8147_v3 = vld [vmem:[%s9213_s1 + $0xe8] sm:$0xff]  ;;  %10782 = vst [vmem:[#allocation13_spill] sm:$0xff] %v8153_v31  ;;  %v8159_v19 = vld [vmem:[%s9213_s1 + $0xf8] sm:$0xff]  ;;  %v8165_v62 = vld [vmem:[%s9213_s1 + $0xc0] sm:$0xff] }
 0x4b7   :  { %10781 = vst [vmem:[#allocation12_spill] sm:$0xff] %v8147_v3  ;;  %v8171_v45 = vld [vmem:[%s9213_s1 + $0xc8] sm:$0xff]  ;;  %v8177_v57 = vld [vmem:[%s9213_s1 + $0xd0] sm:$0xff]  ;;  %v8183_v38 = vld [vmem:[%s9213_s1 + $0xd8] sm:$0xff] }
 0x4b8   :  { %v7919_v1 = vadd.f32 %v2359_v46, %v2358_v30  ;;  %v7923_v2 = vsel %vm2209_vm3, %v2203_v59, %v7630_v0  ;;  %2379 = vmatmul.f32.vlgmr.msra.gmra.mxu0 %v2203_v59  ;;  %2399 = vmatmul.f32.vlgmr.msra.gmra.mxu1 %v2203_v59  ;;  %v2347_v12 = vadd.f32 %v7909_v24, %v2346_v33  ;;  %v7938_v0 = vld [vmem:[%s9213_s1 + $0x1e8] sm:$0xff]  ;;  %v2355_v11 = vor.u32 1.1754944e-38, %v2354_v8  ;;  %v8189_v46 = vld [vmem:[%s9213_s1 + $0xa0] sm:$0xff]  ;;  %v8201_v22 = vld [vmem:[%s9213_s1 + $0xb0] sm:$0xff] }
 0x4b9   :  { %2419 = vmatmul.f32.vlgmr.msra.gmra.mxu2 %v2203_v59  ;;  %2439 = vmatmul.f32.vlgmr.msra.gmra.mxu3 %v2203_v59  ;;  %10783 = vst [vmem:[#allocation28_spill] sm:$0xff] %v8159_v19  ;;  %v8195_v51 = vld [vmem:[%s9213_s1 + $0xa8] sm:$0xff]  ;;  %v8207_v30 = vld [vmem:[%s9213_s1 + $0xb8] sm:$0xff]  ;;  %v8213_v59 = vld [vmem:[%s9213_s1 + $0x80] sm:$0xff] }
 0x4ba   :  { %3765 = vtanh.f32 %v7919_v1  ;;  %2602 = vmatpush.msra.mxu0 %v7932_v61  ;;  %2622 = vmatpush.msra.mxu1 %v7938_v0  ;;  %v2351_v15 = vsel %vm7957_vm12, %v7909_v24, %v2347_v12  ;;  %v8123_v24 = vld [vmem:[%s9213_s1 + $0x108] sm:$0xff]  ;;  %10784 = vst [vmem:[#allocation14_spill] sm:$0xff] %v8165_v62  ;;  %v8225_v12 = vld [vmem:[%s9213_s1 + $0x90] sm:$0xff]  ;;  %v8231_v8 = vld [vmem:[%s9213_s1 + $0x98] sm:$0xff] }
 0x4bb   :  { %2642 = vmatpush.msra.mxu2 %v7946_v6  ;;  %2662 = vmatpush.msra.mxu3 %v7952_v4  ;;  %v2356_v25 = vsel %vm2353_vm13, %v2355_v11, %v2351_v15  ;;  %10785 = vst [vmem:[#allocation15_spill] sm:$0xff] %v8171_v45  ;;  %v8219_v33 = vld [vmem:[%s9213_s1 + $0x88] sm:$0xff]  ;;  %v8249_v15 = vld [vmem:[%s9213_s1 + $0x70] sm:$0xff]  ;;  %v8255_v11 = vld [vmem:[%s9213_s1 + $0x78] sm:$0xff] }
 0x4bc   :  { %2603 = vmatpush.msra.mxu0 %v7964_v16  ;;  %2623 = vmatpush.msra.mxu1 %v7970_v20  ;;  %10786 = vst [vmem:[#allocation16_spill] sm:$0xff] %v8177_v57 }
 0x4bd   :  { %2643 = vmatpush.msra.mxu2 %v7979_v48  ;;  %2663 = vmatpush.msra.mxu3 %v7985_v23  ;;  %10787 = vst [vmem:[#allocation32_spill] sm:$0xff] %v8183_v38 }
 0x4be   :  { %2604 = vmatpush.msra.mxu0 %v7991_v35  ;;  %2624 = vmatpush.msra.mxu1 %v7997_v13  ;;  %10788 = vst [vmem:[#allocation17_spill] sm:$0xff] %v8189_v46 }
 0x4bf   :  { %2644 = vmatpush.msra.mxu2 %v8003_v39  ;;  %2664 = vmatpush.msra.mxu3 %v8009_v63  ;;  %10789 = vst [vmem:[#allocation18_spill] sm:$0xff] %v8195_v51 }
 0x4c0   :  { %v3766_v18 = vpop.eup %3765  ;;  %2605 = vmatpush.msra.mxu0 %v8015_v36  ;;  %2625 = vmatpush.msra.mxu1 %v8021_v29  ;;  %10790 = vst [vmem:[#allocation19_spill] sm:$0xff] %v8201_v22 }
 0x4c1   :  { %v8024_v60 = vmul.f32 %v3766_v18, %v2356_v25  ;;  %2645 = vmatpush.msra.mxu2 %v8029_v10  ;;  %2665 = vmatpush.msra.mxu3 %v8035_v43  ;;  %10791 = vst [vmem:[#allocation35_spill] sm:$0xff] %v8207_v30  ;;  %v8261_v18 = vld [vmem:[%s9213_s1 + $0x40] sm:$0xff]  ;;  %v8267_v25 = vld [vmem:[%s9213_s1 + $0x48] sm:$0xff] }
 0x4c2   :  { %2606 = vmatpush.msra.mxu0 %v8041_v52  ;;  %2626 = vmatpush.msra.mxu1 %v8047_v55  ;;  %10792 = vst [vmem:[#allocation20_spill] sm:$0xff] %v8213_v59 }
 0x4c3   :  { %2459 = vmatmul.f32.vlgmr.msrb.gmra.mxu0 %v8024_v60  ;;  %2479 = vmatmul.f32.vlgmr.msrb.gmra.mxu1 %v8024_v60  ;;  %10793 = vst [vmem:[#allocation21_spill] sm:$0xff] %v8219_v33 }
 0x4c4   :  { %2499 = vmatmul.f32.vlgmr.msrb.gmra.mxu2 %v8024_v60  ;;  %2519 = vmatmul.f32.vlgmr.msrb.gmra.mxu3 %v8024_v60  ;;  %10794 = vst [vmem:[#allocation22_spill] sm:$0xff] %v8225_v12 }
 0x4c5   :  { %2646 = vmatpush.msra.mxu2 %v8057_v17  ;;  %2666 = vmatpush.msra.mxu3 %v8063_v41  ;;  %10795 = vst [vmem:[#allocation39_spill] sm:$0xff] %v8231_v8 }
 0x4c6   :  { %2607 = vmatpush.msra.mxu0 %v8069_v58  ;;  %2627 = vmatpush.msra.mxu1 %v8075_v34  ;;  %10798 = vst [vmem:[#allocation26_spill] sm:$0xff] %v8249_v15 }
 0x4c7   :  { %2647 = vmatpush.msra.mxu2 %v8081_v9  ;;  %2667 = vmatpush.msra.mxu3 %v8087_v56  ;;  %10799 = vst [vmem:[#allocation43_spill] sm:$0xff] %v8255_v11 }
 0x4c8   :  { %2608 = vmatpush.msra.mxu0 %v8093_v27  ;;  %2628 = vmatpush.msra.mxu1 %v8099_v49  ;;  %10800 = vst [vmem:[#allocation27_spill] sm:$0xff] %v8261_v18 }
 0x4c9   :  { %2648 = vmatpush.msra.mxu2 %v8105_v53  ;;  %2668 = vmatpush.msra.mxu3 %v8111_v50  ;;  %10801 = vst [vmem:[#allocation29_spill] sm:$0xff] %v8267_v25 }
 0x4ca   :  { %2609 = vmatpush.msra.mxu0 %v8117_v40  ;;  %2629 = vmatpush.msra.mxu1 %v8123_v24 }
 0x4cb   :  { %2649 = vmatpush.msra.mxu2 %v8129_v42  ;;  %2669 = vmatpush.msra.mxu3 %v8135_v37 }
 0x4cc   :  { %2610 = vmatpush.msra.mxu0 %v8141_v54  ;;  %2630 = vmatpush.msra.mxu1 %v8147_v3 }
 0x4cd   :  { %2650 = vmatpush.msra.mxu2 %v8153_v31  ;;  %2670 = vmatpush.msra.mxu3 %v8159_v19 }
 0x4ce   :  { %2611 = vmatpush.msra.mxu0 %v8165_v62  ;;  %2631 = vmatpush.msra.mxu1 %v8171_v45 }
 0x4cf   :  { %2651 = vmatpush.msra.mxu2 %v8177_v57  ;;  %2671 = vmatpush.msra.mxu3 %v8183_v38 }
 0x4d0   :  { %2612 = vmatpush.msra.mxu0 %v8189_v46  ;;  %2632 = vmatpush.msra.mxu1 %v8195_v51 }
 0x4d1   :  { %2652 = vmatpush.msra.mxu2 %v8201_v22  ;;  %2672 = vmatpush.msra.mxu3 %v8207_v30 }
 0x4d2   :  { %2613 = vmatpush.msra.mxu0 %v8213_v59  ;;  %2633 = vmatpush.msra.mxu1 %v8219_v33 }
 0x4d3   :  { %2653 = vmatpush.msra.mxu2 %v8225_v12  ;;  %2673 = vmatpush.msra.mxu3 %v8231_v8 }
 0x4d4   :  { %2614 = vmatpush.msra.mxu0 %v8237_v5  ;;  %2634 = vmatpush.msra.mxu1 %v8243_v14 }
 0x4d5   :  { %2654 = vmatpush.msra.mxu2 %v8249_v15  ;;  %2674 = vmatpush.msra.mxu3 %v8255_v11  ;;  %v8273_v15 = vld [vmem:[%s9213_s1 + $0x50] sm:$0xff]  ;;  %v8279_v11 = vld [vmem:[%s9213_s1 + $0x58] sm:$0xff] }
 0x4d6   :  { %2615 = vmatpush.msra.mxu0 %v8261_v18  ;;  %2635 = vmatpush.msra.mxu1 %v8267_v25  ;;  %10802 = vst [vmem:[#allocation30_spill] sm:$0xff] %v8273_v15  ;;  %v8285_v18 = vld [vmem:[%s9213_s1 + $0x20] sm:$0xff]  ;;  %v8291_v25 = vld [vmem:[%s9213_s1 + $0x28] sm:$0xff] }
 0x4d7   :  { %2655 = vmatpush.msra.mxu2 %v8273_v15  ;;  %10803 = vst [vmem:[#allocation47_spill] sm:$0xff] %v8279_v11  ;;  %2675 = vmatpush.msra.mxu3 %v8279_v11  ;;  %v8298_v11 = vld [vmem:[%s9213_s1 + $0x30] sm:$0xff]  ;;  %v8348_v15 = vld [vmem:[#allocation4 + $0x1c0] sm:$0xff] }
 0x4d8   :  { %10804 = vst [vmem:[#allocation31_spill] sm:$0xff] %v8285_v18  ;;  %2616 = vmatpush.msra.mxu0 %v8285_v18  ;;  %2636 = vmatpush.msra.mxu1 %v8291_v25  ;;  %v8304_v18 = vld [vmem:[%s9213_s1 + $0x38] sm:$0xff] }
 0x4d9   :  { %10805 = vst [vmem:[#allocation33_spill] sm:$0xff] %v8291_v25  ;;  %2656 = vmatpush.msra.mxu2 %v8298_v11  ;;  %2676 = vmatpush.msra.mxu3 %v8304_v18  ;;  %v8310_v25 = vld [vmem:[%s9213_s1] sm:$0xff] }
 0x4da   :  { %10806 = vst [vmem:[#allocation34_spill] sm:$0xff] %v8298_v11  ;;  %2617 = vmatpush.msra.mxu0 %v8310_v25  ;;  %2637 = vmatpush.msra.mxu1 %v8316_v26  ;;  %v8322_v11 = vld [vmem:[%s9213_s1 + $0x10] sm:$0xff]  ;;  %v8336_v26 = vld [vmem:[#allocation4 + $0x1e0] sm:$0xff] }
 0x4db   :  { %10807 = vst [vmem:[#allocation51_spill] sm:$0xff] %v8304_v18  ;;  %2657 = vmatpush.msra.mxu2 %v8322_v11  ;;  %v8328_v18 = vld [vmem:[%s9213_s1 + $0x18] sm:$0xff]  ;;  %2618 = vmatmul.f32.vlgmr.msra.gmra.mxu0 %v8024_v60 }
 0x4dc   :  { %10808 = vst [vmem:[#allocation36_spill] sm:$0xff] %v8310_v25  ;;  %2677 = vmatpush.msra.mxu3 %v8328_v18  ;;  %v2591_v25 = vsel %vm2590_vm14, 1, %v10643_v28  ;;  %2638 = vmatmul.f32.vlgmr.msra.gmra.mxu1 %v8024_v60  ;;  %v8345_v28 = vld [vmem:[#allocation4 + $0x1f8] sm:$0xff] }
 0x4dd   :  { %10810 = vst [vmem:[#allocation38_spill] sm:$0xff] %v8322_v11  ;;  %2658 = vmatmul.f32.vlgmr.msra.gmra.mxu2 %v8024_v60  ;;  %2678 = vmatmul.f32.vlgmr.msra.gmra.mxu3 %v8024_v60  ;;  %v8339_v11 = vld [vmem:[#allocation4 + $0x1e8] sm:$0xff] }
 0x4de   :  { %10811 = vst [vmem:[#allocation55_spill] sm:$0xff] %v8328_v18  ;;  %2593 = vperm.xlu2 %3585, %v2591_v25   ;;  %2749 = vmatpush.msrb.mxu0 %v8336_v26  ;;  %v8342_v18 = vld [vmem:[#allocation4 + $0x1f0] sm:$0xff]  ;;  %v8351_v60 = vld [vmem:[#allocation4 + $0x1c8] sm:$0xff] }
 0x4df   :  { %10812 = vst [vmem:[#allocation40_spill] sm:$0xff] %v8336_v26  ;;  %2769 = vmatpush.msrb.mxu1 %v8339_v11  ;;  %2789 = vmatpush.msrb.mxu2 %v8342_v18  ;;  %v8354_v25 = vld [vmem:[#allocation4 + $0x1d0] sm:$0xff] }
 0x4e0   :  { %10813 = vst [vmem:[#allocation41_spill] sm:$0xff] %v8339_v11  ;;  %2809 = vmatpush.msrb.mxu3 %v8345_v28  ;;  %2750 = vmatpush.msrb.mxu0 %v8348_v15  ;;  %v8357_v11 = vld [vmem:[#allocation4 + $0x1d8] sm:$0xff] }
 0x4e1   :  { %10814 = vst [vmem:[#allocation42_spill] sm:$0xff] %v8342_v18  ;;  %2770 = vmatpush.msrb.mxu1 %v8351_v60  ;;  %2790 = vmatpush.msrb.mxu2 %v8354_v25  ;;  %v8360_v18 = vld [vmem:[#allocation4 + $0x1a0] sm:$0xff] }
 0x4e2   :  { %10815 = vst [vmem:[#allocation59_spill] sm:$0xff] %v8345_v28  ;;  %2810 = vmatpush.msrb.mxu3 %v8357_v11  ;;  %2751 = vmatpush.msrb.mxu0 %v8360_v18  ;;  %v8363_v28 = vld [vmem:[#allocation4 + $0x1a8] sm:$0xff] }
 0x4e3   :  { %10816 = vst [vmem:[#allocation44_spill] sm:$0xff] %v8348_v15  ;;  %2771 = vmatpush.msrb.mxu1 %v8363_v28  ;;  %v8366_v15 = vld [vmem:[#allocation4 + $0x1b0] sm:$0xff] }
 0x4e4   :  { %10817 = vst [vmem:[#allocation45_spill] sm:$0xff] %v8351_v60  ;;  %2791 = vmatpush.msrb.mxu2 %v8366_v15  ;;  %v8369_v60 = vld [vmem:[#allocation4 + $0x1b8] sm:$0xff] }
 0x4e5   :  { %10818 = vst [vmem:[#allocation46_spill] sm:$0xff] %v8354_v25  ;;  %2811 = vmatpush.msrb.mxu3 %v8369_v60  ;;  %v8372_v25 = vld [vmem:[#allocation4 + $0x180] sm:$0xff] }
 0x4e6   :  { %10819 = vst [vmem:[#allocation63_spill] sm:$0xff] %v8357_v11  ;;  %2752 = vmatpush.msrb.mxu0 %v8372_v25  ;;  %v8375_v11 = vld [vmem:[#allocation4 + $0x188] sm:$0xff] }
 0x4e7   :  { %10820 = vst [vmem:[#allocation48_spill] sm:$0xff] %v8360_v18  ;;  %2772 = vmatpush.msrb.mxu1 %v8375_v11  ;;  %v8378_v18 = vld [vmem:[#allocation4 + $0x190] sm:$0xff] }
 0x4e8   :  { %10821 = vst [vmem:[#allocation49_spill] sm:$0xff] %v8363_v28  ;;  %2792 = vmatpush.msrb.mxu2 %v8378_v18  ;;  %v8381_v28 = vld [vmem:[#allocation4 + $0x198] sm:$0xff] }
 0x4e9   :  { %10822 = vst [vmem:[#allocation50_spill] sm:$0xff] %v8366_v15  ;;  %2812 = vmatpush.msrb.mxu3 %v8381_v28  ;;  %v8384_v15 = vld [vmem:[#allocation4 + $0x160] sm:$0xff] }
 0x4ea   :  { %10823 = vst [vmem:[#allocation67_spill] sm:$0xff] %v8369_v60  ;;  %2753 = vmatpush.msrb.mxu0 %v8384_v15  ;;  %v8387_v60 = vld [vmem:[#allocation4 + $0x168] sm:$0xff] }
 0x4eb   :  { %10824 = vst [vmem:[#allocation52_spill] sm:$0xff] %v8372_v25  ;;  %2773 = vmatpush.msrb.mxu1 %v8387_v60  ;;  %v8390_v25 = vld [vmem:[#allocation4 + $0x170] sm:$0xff] }
 0x4ec   :  { %10825 = vst [vmem:[#allocation53_spill] sm:$0xff] %v8375_v11  ;;  %2793 = vmatpush.msrb.mxu2 %v8390_v25  ;;  %v8393_v11 = vld [vmem:[#allocation4 + $0x178] sm:$0xff] }
 0x4ed   :  { %10826 = vst [vmem:[#allocation54_spill] sm:$0xff] %v8378_v18  ;;  %2813 = vmatpush.msrb.mxu3 %v8393_v11  ;;  %v8396_v18 = vld [vmem:[#allocation4 + $0x140] sm:$0xff] }
 0x4ee   :  { %10827 = vst [vmem:[#allocation71_spill] sm:$0xff] %v8381_v28  ;;  %2754 = vmatpush.msrb.mxu0 %v8396_v18  ;;  %v8399_v28 = vld [vmem:[#allocation4 + $0x148] sm:$0xff] }
 0x4ef   :  { %10828 = vst [vmem:[#allocation56_spill] sm:$0xff] %v8384_v15  ;;  %2774 = vmatpush.msrb.mxu1 %v8399_v28  ;;  %v8402_v15 = vld [vmem:[#allocation4 + $0x150] sm:$0xff] }
 0x4f0   :  { %10829 = vst [vmem:[#allocation57_spill] sm:$0xff] %v8387_v60  ;;  %2794 = vmatpush.msrb.mxu2 %v8402_v15  ;;  %v8405_v60 = vld [vmem:[#allocation4 + $0x158] sm:$0xff] }
 0x4f1   :  { %10830 = vst [vmem:[#allocation58_spill] sm:$0xff] %v8390_v25  ;;  %2814 = vmatpush.msrb.mxu3 %v8405_v60  ;;  %v8408_v25 = vld [vmem:[#allocation4 + $0x120] sm:$0xff] }
 0x4f2   :  { %10831 = vst [vmem:[#allocation75_spill] sm:$0xff] %v8393_v11  ;;  %2755 = vmatpush.msrb.mxu0 %v8408_v25  ;;  %v8411_v11 = vld [vmem:[#allocation4 + $0x128] sm:$0xff] }
 0x4f3   :  { %10832 = vst [vmem:[#allocation60_spill] sm:$0xff] %v8396_v18  ;;  %2775 = vmatpush.msrb.mxu1 %v8411_v11  ;;  %v8414_v18 = vld [vmem:[#allocation4 + $0x130] sm:$0xff] }
 0x4f4   :  { %10833 = vst [vmem:[#allocation61_spill] sm:$0xff] %v8399_v28  ;;  %2795 = vmatpush.msrb.mxu2 %v8414_v18  ;;  %v8417_v28 = vld [vmem:[#allocation4 + $0x138] sm:$0xff] }
 0x4f5   :  { %10834 = vst [vmem:[#allocation62_spill] sm:$0xff] %v8402_v15  ;;  %2815 = vmatpush.msrb.mxu3 %v8417_v28  ;;  %v8420_v15 = vld [vmem:[#allocation4 + $0x100] sm:$0xff] }
 0x4f6   :  { %10835 = vst [vmem:[#allocation79_spill] sm:$0xff] %v8405_v60  ;;  %2756 = vmatpush.msrb.mxu0 %v8420_v15  ;;  %v8423_v60 = vld [vmem:[#allocation4 + $0x108] sm:$0xff] }
 0x4f7   :  { %10836 = vst [vmem:[#allocation64_spill] sm:$0xff] %v8408_v25  ;;  %2776 = vmatpush.msrb.mxu1 %v8423_v60  ;;  %v8426_v25 = vld [vmem:[#allocation4 + $0x110] sm:$0xff] }
 0x4f8   :  { %10837 = vst [vmem:[#allocation65_spill] sm:$0xff] %v8411_v11  ;;  %2796 = vmatpush.msrb.mxu2 %v8426_v25  ;;  %v8429_v11 = vld [vmem:[#allocation4 + $0x118] sm:$0xff] }
 0x4f9   :  { %10838 = vst [vmem:[#allocation66_spill] sm:$0xff] %v8414_v18  ;;  %2816 = vmatpush.msrb.mxu3 %v8429_v11  ;;  %v8432_v18 = vld [vmem:[#allocation4 + $0xe0] sm:$0xff] }
 0x4fa   :  { %10839 = vst [vmem:[#allocation83_spill] sm:$0xff] %v8417_v28  ;;  %2757 = vmatpush.msrb.mxu0 %v8432_v18  ;;  %v8435_v28 = vld [vmem:[#allocation4 + $0xe8] sm:$0xff] }
 0x4fb   :  { %10840 = vst [vmem:[#allocation68_spill] sm:$0xff] %v8420_v15  ;;  %2777 = vmatpush.msrb.mxu1 %v8435_v28  ;;  %v8438_v15 = vld [vmem:[#allocation4 + $0xf0] sm:$0xff] }
 0x4fc   :  { %10841 = vst [vmem:[#allocation69_spill] sm:$0xff] %v8423_v60  ;;  %2797 = vmatpush.msrb.mxu2 %v8438_v15  ;;  %v8441_v60 = vld [vmem:[#allocation4 + $0xf8] sm:$0xff] }
 0x4fd   :  { %10842 = vst [vmem:[#allocation70_spill] sm:$0xff] %v8426_v25  ;;  %2817 = vmatpush.msrb.mxu3 %v8441_v60  ;;  %v8444_v25 = vld [vmem:[#allocation4 + $0xc0] sm:$0xff] }
 0x4fe   :  { %10843 = vst [vmem:[#allocation87_spill] sm:$0xff] %v8429_v11  ;;  %2758 = vmatpush.msrb.mxu0 %v8444_v25  ;;  %v8447_v11 = vld [vmem:[#allocation4 + $0xc8] sm:$0xff] }
 0x4ff   :  { %10844 = vst [vmem:[#allocation72_spill] sm:$0xff] %v8432_v18  ;;  %2778 = vmatpush.msrb.mxu1 %v8447_v11  ;;  %v8450_v18 = vld [vmem:[#allocation4 + $0xd0] sm:$0xff] }
 0x500   :  { %10845 = vst [vmem:[#allocation73_spill] sm:$0xff] %v8435_v28  ;;  %2798 = vmatpush.msrb.mxu2 %v8450_v18  ;;  %v8453_v28 = vld [vmem:[#allocation4 + $0xd8] sm:$0xff] }
 0x501   :  { %10846 = vst [vmem:[#allocation74_spill] sm:$0xff] %v8438_v15  ;;  %2818 = vmatpush.msrb.mxu3 %v8453_v28  ;;  %v8456_v15 = vld [vmem:[#allocation4 + $0xa0] sm:$0xff] }
 0x502   :  { %10847 = vst [vmem:[#allocation76_spill] sm:$0xff] %v8441_v60  ;;  %2759 = vmatpush.msrb.mxu0 %v8456_v15  ;;  %v8459_v60 = vld [vmem:[#allocation4 + $0xa8] sm:$0xff] }
 0x503   :  { %10848 = vst [vmem:[#allocation77_spill] sm:$0xff] %v8444_v25  ;;  %2779 = vmatpush.msrb.mxu1 %v8459_v60  ;;  %v8462_v25 = vld [vmem:[#allocation4 + $0xb0] sm:$0xff] }
 0x504   :  { %10849 = vst [vmem:[#allocation78_spill] sm:$0xff] %v8447_v11  ;;  %2799 = vmatpush.msrb.mxu2 %v8462_v25  ;;  %v8465_v11 = vld [vmem:[#allocation4 + $0xb8] sm:$0xff] }
 0x505   :  { %10850 = vst [vmem:[#allocation80_spill] sm:$0xff] %v8450_v18  ;;  %2819 = vmatpush.msrb.mxu3 %v8465_v11  ;;  %v8468_v18 = vld [vmem:[#allocation4 + $0x80] sm:$0xff] }
 0x506   :  { %10851 = vst [vmem:[#allocation81_spill] sm:$0xff] %v8453_v28  ;;  %2760 = vmatpush.msrb.mxu0 %v8468_v18  ;;  %v8471_v28 = vld [vmem:[#allocation4 + $0x88] sm:$0xff] }
 0x507   :  { %10852 = vst [vmem:[#allocation82_spill] sm:$0xff] %v8456_v15  ;;  %2780 = vmatpush.msrb.mxu1 %v8471_v28  ;;  %v8474_v15 = vld [vmem:[#allocation4 + $0x90] sm:$0xff] }
 0x508   :  { %10853 = vst [vmem:[#allocation84_spill] sm:$0xff] %v8459_v60  ;;  %2800 = vmatpush.msrb.mxu2 %v8474_v15  ;;  %v8477_v60 = vld [vmem:[#allocation4 + $0x98] sm:$0xff] }
 0x509   :  { %10854 = vst [vmem:[#allocation85_spill] sm:$0xff] %v8462_v25  ;;  %2820 = vmatpush.msrb.mxu3 %v8477_v60  ;;  %v8480_v25 = vld [vmem:[#allocation4 + $0x60] sm:$0xff] }
 0x50a   :  { %10855 = vst [vmem:[#allocation86_spill] sm:$0xff] %v8465_v11  ;;  %2761 = vmatpush.msrb.mxu0 %v8480_v25  ;;  %v8483_v11 = vld [vmem:[#allocation4 + $0x68] sm:$0xff] }
 0x50b   :  { %10856 = vst [vmem:[#allocation88_spill] sm:$0xff] %v8468_v18  ;;  %2781 = vmatpush.msrb.mxu1 %v8483_v11  ;;  %v8486_v18 = vld [vmem:[#allocation4 + $0x70] sm:$0xff] }
 0x50c   :  { %10857 = vst [vmem:[#allocation89_spill] sm:$0xff] %v8471_v28  ;;  %2801 = vmatpush.msrb.mxu2 %v8486_v18  ;;  %v8489_v28 = vld [vmem:[#allocation4 + $0x78] sm:$0xff] }
 0x50d   :  { %10858 = vst [vmem:[#allocation97_spill] sm:$0xff] %v8474_v15  ;;  %2821 = vmatpush.msrb.mxu3 %v8489_v28  ;;  %v8492_v15 = vld [vmem:[#allocation4 + $0x40] sm:$0xff] }
 0x50e   :  { %10859 = vst [vmem:[#allocation90_spill] sm:$0xff] %v8477_v60  ;;  %2762 = vmatpush.msrb.mxu0 %v8492_v15  ;;  %v8495_v60 = vld [vmem:[#allocation4 + $0x48] sm:$0xff] }
 0x50f   :  { %10860 = vst [vmem:[#allocation91_spill] sm:$0xff] %v8480_v25  ;;  %2782 = vmatpush.msrb.mxu1 %v8495_v60  ;;  %v8498_v25 = vld [vmem:[#allocation4 + $0x50] sm:$0xff] }
 0x510   :  { %10861 = vst [vmem:[#allocation92_spill] sm:$0xff] %v8483_v11  ;;  %2802 = vmatpush.msrb.mxu2 %v8498_v25  ;;  %v8501_v11 = vld [vmem:[#allocation4 + $0x58] sm:$0xff] }
 0x511   :  { %10862 = vst [vmem:[#allocation98_spill] sm:$0xff] %v8486_v18  ;;  %2822 = vmatpush.msrb.mxu3 %v8501_v11  ;;  %v8504_v18 = vld [vmem:[#allocation4 + $0x20] sm:$0xff] }
 0x512   :  { %10863 = vst [vmem:[#allocation93_spill] sm:$0xff] %v8489_v28  ;;  %2763 = vmatpush.msrb.mxu0 %v8504_v18  ;;  %v8507_v28 = vld [vmem:[#allocation4 + $0x28] sm:$0xff] }
 0x513   :  { %10864 = vst [vmem:[#allocation94_spill] sm:$0xff] %v8492_v15  ;;  %2783 = vmatpush.msrb.mxu1 %v8507_v28  ;;  %v8510_v15 = vld [vmem:[#allocation4 + $0x30] sm:$0xff] }
 0x514   :  { %10865 = vst [vmem:[#allocation95_spill] sm:$0xff] %v8495_v60  ;;  %2803 = vmatpush.msrb.mxu2 %v8510_v15  ;;  %v8513_v60 = vld [vmem:[#allocation4 + $0x38] sm:$0xff] }
 0x515   :  { %10866 = vst [vmem:[#allocation99_spill] sm:$0xff] %v8498_v25  ;;  %2823 = vmatpush.msrb.mxu3 %v8513_v60  ;;  %v8516_v25 = vld [vmem:[#allocation4] sm:$0xff] }
 0x516   :  { %10867 = vst [vmem:[#allocation96_spill] sm:$0xff] %v8501_v11  ;;  %2764 = vmatpush.msrb.mxu0 %v8516_v25  ;;  %v8519_v11 = vld [vmem:[#allocation4 + $0x8] sm:$0xff] }
 0x517   :  { %10868 = vst [vmem:[#allocation100_spill] sm:$0xff] %v8504_v18  ;;  %2784 = vmatpush.msrb.mxu1 %v8519_v11  ;;  %v8522_v18 = vld [vmem:[#allocation4 + $0x10] sm:$0xff] }
 0x518   :  { %10869 = vst [vmem:[#allocation101_spill] sm:$0xff] %v8507_v28  ;;  %2804 = vmatpush.msrb.mxu2 %v8522_v18  ;;  %v8525_v28 = vld [vmem:[#allocation4 + $0x18] sm:$0xff] }
 0x519   :  { %10870 = vst [vmem:[#allocation102_spill] sm:$0xff] %v8510_v15  ;;  %2824 = vmatpush.msrb.mxu3 %v8525_v28  ;;  %v8528_v15 = vld [vmem:[#allocation2 + $0x1e0] sm:$0xff] }
 0x51a   :  { %10871 = vst [vmem:[#allocation103_spill] sm:$0xff] %v8513_v60  ;;  %2829 = vmatpush.msra.mxu0 %v8528_v15  ;;  %v8531_v60 = vld [vmem:[#allocation2 + $0x1e8] sm:$0xff] }
 0x51b   :  { %10872 = vst [vmem:[#allocation104_spill] sm:$0xff] %v8516_v25  ;;  %2849 = vmatpush.msra.mxu1 %v8531_v60  ;;  %v8534_v25 = vld [vmem:[#allocation2 + $0x1f0] sm:$0xff] }
 0x51c   :  { %10873 = vst [vmem:[#allocation105_spill] sm:$0xff] %v8519_v11  ;;  %2869 = vmatpush.msra.mxu2 %v8534_v25  ;;  %v8537_v11 = vld [vmem:[#allocation2 + $0x1f8] sm:$0xff] }
 0x51d   :  { %10874 = vst [vmem:[#allocation106_spill] sm:$0xff] %v8522_v18  ;;  %2889 = vmatpush.msra.mxu3 %v8537_v11  ;;  %v8540_v18 = vld [vmem:[#allocation2 + $0x1c0] sm:$0xff] }
 0x51e   :  { %10875 = vst [vmem:[#allocation107_spill] sm:$0xff] %v8525_v28  ;;  %2830 = vmatpush.msra.mxu0 %v8540_v18  ;;  %v8543_v28 = vld [vmem:[#allocation2 + $0x1c8] sm:$0xff] }
 0x51f   :  { %10876 = vst [vmem:[#allocation108_spill] sm:$0xff] %v8528_v15  ;;  %2850 = vmatpush.msra.mxu1 %v8543_v28  ;;  %v8546_v15 = vld [vmem:[#allocation2 + $0x1d0] sm:$0xff] }
 0x520   :  { %10877 = vst [vmem:[#allocation109_spill] sm:$0xff] %v8531_v60  ;;  %2870 = vmatpush.msra.mxu2 %v8546_v15  ;;  %v8549_v60 = vld [vmem:[#allocation2 + $0x1d8] sm:$0xff] }
 0x521   :  { %10878 = vst [vmem:[#allocation110_spill] sm:$0xff] %v8534_v25  ;;  %2890 = vmatpush.msra.mxu3 %v8549_v60  ;;  %v8552_v25 = vld [vmem:[#allocation2 + $0x1a0] sm:$0xff] }
 0x522   :  { %10879 = vst [vmem:[#allocation111_spill] sm:$0xff] %v8537_v11  ;;  %2831 = vmatpush.msra.mxu0 %v8552_v25  ;;  %v8555_v11 = vld [vmem:[#allocation2 + $0x1a8] sm:$0xff] }
 0x523   :  { %10880 = vst [vmem:[#allocation112_spill] sm:$0xff] %v8540_v18  ;;  %2851 = vmatpush.msra.mxu1 %v8555_v11  ;;  %v8558_v18 = vld [vmem:[#allocation2 + $0x1b0] sm:$0xff] }
 0x524   :  { %10881 = vst [vmem:[#allocation113_spill] sm:$0xff] %v8543_v28  ;;  %2871 = vmatpush.msra.mxu2 %v8558_v18  ;;  %v8561_v28 = vld [vmem:[#allocation2 + $0x1b8] sm:$0xff] }
 0x525   :  { %10882 = vst [vmem:[#allocation114_spill] sm:$0xff] %v8546_v15  ;;  %2891 = vmatpush.msra.mxu3 %v8561_v28  ;;  %v8564_v15 = vld [vmem:[#allocation2 + $0x180] sm:$0xff] }
 0x526   :  { %10883 = vst [vmem:[#allocation115_spill] sm:$0xff] %v8549_v60  ;;  %2832 = vmatpush.msra.mxu0 %v8564_v15  ;;  %v8567_v60 = vld [vmem:[#allocation2 + $0x188] sm:$0xff] }
 0x527   :  { %10884 = vst [vmem:[#allocation116_spill] sm:$0xff] %v8552_v25  ;;  %2852 = vmatpush.msra.mxu1 %v8567_v60  ;;  %v8570_v25 = vld [vmem:[#allocation2 + $0x190] sm:$0xff] }
 0x528   :  { %10885 = vst [vmem:[#allocation117_spill] sm:$0xff] %v8555_v11  ;;  %2872 = vmatpush.msra.mxu2 %v8570_v25  ;;  %v8573_v11 = vld [vmem:[#allocation2 + $0x198] sm:$0xff] }
 0x529   :  { %10886 = vst [vmem:[#allocation118_spill] sm:$0xff] %v8558_v18  ;;  %2892 = vmatpush.msra.mxu3 %v8573_v11  ;;  %v8576_v18 = vld [vmem:[#allocation2 + $0x160] sm:$0xff] }
 0x52a   :  { %10887 = vst [vmem:[#allocation119_spill] sm:$0xff] %v8561_v28  ;;  %2833 = vmatpush.msra.mxu0 %v8576_v18  ;;  %v8579_v28 = vld [vmem:[#allocation2 + $0x168] sm:$0xff] }
 0x52b   :  { %10888 = vst [vmem:[#allocation120_spill] sm:$0xff] %v8564_v15  ;;  %2853 = vmatpush.msra.mxu1 %v8579_v28  ;;  %v8582_v15 = vld [vmem:[#allocation2 + $0x170] sm:$0xff] }
 0x52c   :  { %10889 = vst [vmem:[#allocation121_spill] sm:$0xff] %v8567_v60  ;;  %2873 = vmatpush.msra.mxu2 %v8582_v15  ;;  %v8585_v60 = vld [vmem:[#allocation2 + $0x178] sm:$0xff] }
 0x52d   :  { %10890 = vst [vmem:[#allocation122_spill] sm:$0xff] %v8570_v25  ;;  %2893 = vmatpush.msra.mxu3 %v8585_v60  ;;  %v8588_v25 = vld [vmem:[#allocation2 + $0x140] sm:$0xff] }
 0x52e   :  { %10891 = vst [vmem:[#allocation123_spill] sm:$0xff] %v8573_v11  ;;  %2834 = vmatpush.msra.mxu0 %v8588_v25  ;;  %v8591_v11 = vld [vmem:[#allocation2 + $0x148] sm:$0xff] }
 0x52f   :  { %10892 = vst [vmem:[#allocation124_spill] sm:$0xff] %v8576_v18  ;;  %2854 = vmatpush.msra.mxu1 %v8591_v11  ;;  %v8594_v18 = vld [vmem:[#allocation2 + $0x150] sm:$0xff] }
 0x530   :  { %10893 = vst [vmem:[#allocation125_spill] sm:$0xff] %v8579_v28  ;;  %2874 = vmatpush.msra.mxu2 %v8594_v18  ;;  %v8597_v28 = vld [vmem:[#allocation2 + $0x158] sm:$0xff] }
 0x531   :  { %10894 = vst [vmem:[#allocation126_spill] sm:$0xff] %v8582_v15  ;;  %2894 = vmatpush.msra.mxu3 %v8597_v28  ;;  %v8600_v15 = vld [vmem:[#allocation2 + $0x120] sm:$0xff] }
 0x532   :  { %10895 = vst [vmem:[#allocation127_spill] sm:$0xff] %v8585_v60  ;;  %2835 = vmatpush.msra.mxu0 %v8600_v15  ;;  %v8603_v60 = vld [vmem:[#allocation2 + $0x128] sm:$0xff] }
 0x533   :  { %10896 = vst [vmem:[#allocation128_spill] sm:$0xff] %v8588_v25  ;;  %2855 = vmatpush.msra.mxu1 %v8603_v60  ;;  %v8606_v25 = vld [vmem:[#allocation2 + $0x130] sm:$0xff] }
 0x534   :  { %10897 = vst [vmem:[#allocation129_spill] sm:$0xff] %v8591_v11  ;;  %2875 = vmatpush.msra.mxu2 %v8606_v25  ;;  %v8609_v11 = vld [vmem:[#allocation2 + $0x138] sm:$0xff] }
 0x535   :  { %10898 = vst [vmem:[#allocation130_spill] sm:$0xff] %v8594_v18  ;;  %2895 = vmatpush.msra.mxu3 %v8609_v11  ;;  %v8612_v18 = vld [vmem:[#allocation2 + $0x100] sm:$0xff]  ;;  %v2400_v26 = vpop.f32.mrf.mxu1 }
 0x536   :  { %10899 = vst [vmem:[#allocation131_spill] sm:$0xff] %v8597_v28  ;;  %2836 = vmatpush.msra.mxu0 %v8612_v18  ;;  %v8615_v28 = vld [vmem:[#allocation2 + $0x108] sm:$0xff] }
 0x537   :  { %10900 = vst [vmem:[#allocation132_spill] sm:$0xff] %v8600_v15  ;;  %2856 = vmatpush.msra.mxu1 %v8615_v28  ;;  %v8618_v15 = vld [vmem:[#allocation2 + $0x110] sm:$0xff] }
 0x538   :  { %10901 = vst [vmem:[#allocation133_spill] sm:$0xff] %v8603_v60  ;;  %2876 = vmatpush.msra.mxu2 %v8618_v15  ;;  %v8621_v60 = vld [vmem:[#allocation2 + $0x118] sm:$0xff] }
 0x539   :  { %10902 = vst [vmem:[#allocation134_spill] sm:$0xff] %v8606_v25  ;;  %2896 = vmatpush.msra.mxu3 %v8621_v60  ;;  %v8624_v25 = vld [vmem:[#allocation2 + $0xe0] sm:$0xff] }
 0x53a   :  { %10903 = vst [vmem:[#allocation135_spill] sm:$0xff] %v8609_v11  ;;  %2837 = vmatpush.msra.mxu0 %v8624_v25  ;;  %v8627_v11 = vld [vmem:[#allocation2 + $0xe8] sm:$0xff] }
 0x53b   :  { %10904 = vst [vmem:[#allocation136_spill] sm:$0xff] %v8612_v18  ;;  %2857 = vmatpush.msra.mxu1 %v8627_v11  ;;  %v8630_v18 = vld [vmem:[#allocation2 + $0xf0] sm:$0xff] }
 0x53c   :  { %10905 = vst [vmem:[#allocation137_spill] sm:$0xff] %v8615_v28  ;;  %2877 = vmatpush.msra.mxu2 %v8630_v18  ;;  %v8633_v28 = vld [vmem:[#allocation2 + $0xf8] sm:$0xff]  ;;  %v2440_v14 = vpop.f32.mrf.mxu3 }
 0x53d   :  { %10906 = vst [vmem:[#allocation138_spill] sm:$0xff] %v8618_v15  ;;  %2897 = vmatpush.msra.mxu3 %v8633_v28  ;;  %v8636_v15 = vld [vmem:[#allocation2 + $0xc0] sm:$0xff] }
 0x53e   :  { %10907 = vst [vmem:[#allocation139_spill] sm:$0xff] %v8621_v60  ;;  %2838 = vmatpush.msra.mxu0 %v8636_v15  ;;  %v8639_v60 = vld [vmem:[#allocation2 + $0xc8] sm:$0xff] }
 0x53f   :  { %10908 = vst [vmem:[#allocation140_spill] sm:$0xff] %v8624_v25  ;;  %2858 = vmatpush.msra.mxu1 %v8639_v60  ;;  %v8642_v25 = vld [vmem:[#allocation2 + $0xd0] sm:$0xff] }
 0x540   :  { %10909 = vst [vmem:[#allocation141_spill] sm:$0xff] %v8627_v11  ;;  %2878 = vmatpush.msra.mxu2 %v8642_v25  ;;  %v8645_v11 = vld [vmem:[#allocation2 + $0xd8] sm:$0xff]  ;;  %v2480_v5 = vpop.f32.mrf.mxu1 }
 0x541   :  { %10910 = vst [vmem:[#allocation142_spill] sm:$0xff] %v8630_v18  ;;  %2898 = vmatpush.msra.mxu3 %v8645_v11  ;;  %v8648_v18 = vld [vmem:[#allocation2 + $0xa0] sm:$0xff]  ;;  %v2481_v12 = vadd.f32 %v2480_v5, %v2400_v26 }
 0x542   :  { %10911 = vst [vmem:[#allocation143_spill] sm:$0xff] %v8633_v28  ;;  %2839 = vmatpush.msra.mxu0 %v8648_v18  ;;  %v8651_v28 = vld [vmem:[#allocation2 + $0xa8] sm:$0xff] }
 0x543   :  { %10912 = vst [vmem:[#allocation144_spill] sm:$0xff] %v8636_v15  ;;  %2859 = vmatpush.msra.mxu1 %v8651_v28  ;;  %v8654_v15 = vld [vmem:[#allocation2 + $0xb0] sm:$0xff]  ;;  %v2524_v33 = vadd.f32 %v2481_v12, %v10773_v44 }
 0x544   :  { %10913 = vst [vmem:[#allocation145_spill] sm:$0xff] %v8639_v60  ;;  %2879 = vmatpush.msra.mxu2 %v8654_v15  ;;  %v8657_v60 = vld [vmem:[#allocation2 + $0xb8] sm:$0xff] }
 0x545   :  { %10914 = vst [vmem:[#allocation146_spill] sm:$0xff] %v8642_v25  ;;  %2899 = vmatpush.msra.mxu3 %v8657_v60  ;;  %v8660_v25 = vld [vmem:[#allocation2 + $0x80] sm:$0xff]  ;;  %v3555_v30 = vmul.f32 -1.442695, %v2524_v33 }
 0x546   :  { %10915 = vst [vmem:[#allocation147_spill] sm:$0xff] %v8645_v11  ;;  %2840 = vmatpush.msra.mxu0 %v8660_v25  ;;  %v8663_v11 = vld [vmem:[#allocation2 + $0x88] sm:$0xff] }
 0x547   :  { %10916 = vst [vmem:[#allocation148_spill] sm:$0xff] %v8648_v18  ;;  %2860 = vmatpush.msra.mxu1 %v8663_v11  ;;  %v8666_v18 = vld [vmem:[#allocation2 + $0x90] sm:$0xff] }
 0x548   :  { %10917 = vst [vmem:[#allocation149_spill] sm:$0xff] %v8651_v28  ;;  %2880 = vmatpush.msra.mxu2 %v8666_v18  ;;  %v8669_v28 = vld [vmem:[#allocation2 + $0x98] sm:$0xff] }
 0x549   :  { %10918 = vst [vmem:[#allocation150_spill] sm:$0xff] %v8654_v15  ;;  %2900 = vmatpush.msra.mxu3 %v8669_v28  ;;  %v8672_v15 = vld [vmem:[#allocation2 + $0x60] sm:$0xff] }
 0x54a   :  { %10919 = vst [vmem:[#allocation151_spill] sm:$0xff] %v8657_v60  ;;  %2841 = vmatpush.msra.mxu0 %v8672_v15  ;;  %v8675_v60 = vld [vmem:[#allocation2 + $0x68] sm:$0xff] }
 0x54b   :  { %10920 = vst [vmem:[#allocation152_spill] sm:$0xff] %v8660_v25  ;;  %2861 = vmatpush.msra.mxu1 %v8675_v60  ;;  %v8678_v25 = vld [vmem:[#allocation2 + $0x70] sm:$0xff] }
 0x54c   :  { %10921 = vst [vmem:[#allocation153_spill] sm:$0xff] %v8663_v11  ;;  %2881 = vmatpush.msra.mxu2 %v8678_v25  ;;  %v8681_v11 = vld [vmem:[#allocation2 + $0x78] sm:$0xff] }
 0x54d   :  { %10922 = vst [vmem:[#allocation154_spill] sm:$0xff] %v8666_v18  ;;  %2901 = vmatpush.msra.mxu3 %v8681_v11  ;;  %v8684_v18 = vld [vmem:[#allocation2 + $0x40] sm:$0xff] }
 0x54e   :  { %10923 = vst [vmem:[#allocation155_spill] sm:$0xff] %v8669_v28  ;;  %2842 = vmatpush.msra.mxu0 %v8684_v18  ;;  %v8687_v28 = vld [vmem:[#allocation2 + $0x48] sm:$0xff] }
 0x54f   :  { %10924 = vst [vmem:[#allocation156_spill] sm:$0xff] %v8672_v15  ;;  %2862 = vmatpush.msra.mxu1 %v8687_v28  ;;  %v8690_v15 = vld [vmem:[#allocation2 + $0x50] sm:$0xff] }
 0x550   :  { %10925 = vst [vmem:[#allocation157_spill] sm:$0xff] %v8675_v60  ;;  %2882 = vmatpush.msra.mxu2 %v8690_v15  ;;  %v8693_v60 = vld [vmem:[#allocation2 + $0x58] sm:$0xff] }
 0x551   :  { %10926 = vst [vmem:[#allocation158_spill] sm:$0xff] %v8678_v25  ;;  %2902 = vmatpush.msra.mxu3 %v8693_v60  ;;  %v8696_v25 = vld [vmem:[#allocation2 + $0x20] sm:$0xff] }
 0x552   :  { %10927 = vst [vmem:[#allocation159_spill] sm:$0xff] %v8681_v11  ;;  %2843 = vmatpush.msra.mxu0 %v8696_v25  ;;  %v8699_v11 = vld [vmem:[#allocation2 + $0x28] sm:$0xff] }
 0x553   :  { %10928 = vst [vmem:[#allocation160_spill] sm:$0xff] %v8684_v18  ;;  %2863 = vmatpush.msra.mxu1 %v8699_v11  ;;  %v8702_v18 = vld [vmem:[#allocation2 + $0x30] sm:$0xff] }
 0x554   :  { %10929 = vst [vmem:[#allocation161_spill] sm:$0xff] %v8687_v28  ;;  %2883 = vmatpush.msra.mxu2 %v8702_v18  ;;  %v8705_v28 = vld [vmem:[#allocation2 + $0x38] sm:$0xff] }
 0x555   :  { %10930 = vst [vmem:[#allocation162_spill] sm:$0xff] %v8690_v15  ;;  %2903 = vmatpush.msra.mxu3 %v8705_v28  ;;  %v8708_v15 = vld [vmem:[#allocation2] sm:$0xff] }
 0x556   :  { %10931 = vst [vmem:[#allocation163_spill] sm:$0xff] %v8693_v60  ;;  %2844 = vmatpush.msra.mxu0 %v8708_v15  ;;  %v8711_v60 = vld [vmem:[#allocation2 + $0x8] sm:$0xff] }
 0x557   :  { %10932 = vst [vmem:[#allocation164_spill] sm:$0xff] %v8696_v25  ;;  %2864 = vmatpush.msra.mxu1 %v8711_v60  ;;  %v8714_v25 = vld [vmem:[#allocation2 + $0x10] sm:$0xff] }
 0x558   :  { %10933 = vst [vmem:[#allocation165_spill] sm:$0xff] %v8699_v11  ;;  %2884 = vmatpush.msra.mxu2 %v8714_v25  ;;  %v8717_v11 = vld [vmem:[#allocation2 + $0x18] sm:$0xff] }
 0x559   :  { %10934 = vst [vmem:[#allocation166_spill] sm:$0xff] %v8702_v18  ;;  %2904 = vmatpush.msra.mxu3 %v8717_v11  ;;  %v2380_v18 = vpop.f32.mrf.mxu0 }
 0x55a   :  { %10935 = vst [vmem:[#allocation167_spill] sm:$0xff] %v8705_v28 }
 0x55b   :  { %10936 = vst [vmem:[#allocation168_spill] sm:$0xff] %v8708_v15 }
 0x55c   :  { %10937 = vst [vmem:[#allocation169_spill] sm:$0xff] %v8711_v60  ;;  %v2420_v60 = vpop.f32.mrf.mxu2 }
 0x55d   :  { %10938 = vst [vmem:[#allocation170_spill] sm:$0xff] %v8714_v25  ;;  %v2520_v25 = vpop.f32.mrf.mxu3 }
 0x55e   :  { %10939 = vst [vmem:[#allocation171_spill] sm:$0xff] %v8717_v11  ;;  %v2521_v22 = vadd.f32 %v2520_v25, %v2440_v14 }
 0x560   :  { %v2526_v11 = vadd.f32 %v2521_v22, %v10774_v32 }
 0x561   :  { %v2460_v28 = vpop.f32.mrf.mxu0 }
 0x562   :  { %v2461_v8 = vadd.f32 %v2460_v28, %v2380_v18  ;;  %v3556_v51 = vmul.f32 -1.442695, %v2526_v11 }
 0x564   :  { %v2523_v15 = vadd.f32 %v2461_v8, %v10772_v7  ;;  %v2500_v45 = vpop.f32.mrf.mxu2 }
 0x565   :  { %v2501_v8 = vadd.f32 %v2500_v45, %v2420_v60 }
 0x566   :  { %v3554_v59 = vmul.f32 -1.442695, %v2523_v15  ;;  %v2639_v15 = vpop.f32.mrf.mxu1 }
 0x567   :  { %v2525_v5 = vadd.f32 %v2501_v8, %v10775_v47 }
 0x568   :  { %3767 = vpow2.f32 %v3554_v59 }
 0x569   :  { %3769 = vpow2.f32 %v3555_v30 }
 0x56a   :  { %3771 = vpow2.f32 %v3556_v51  ;;  %v2619_v51 = vpop.f32.mrf.mxu0 }
 0x56e   :  { %v3768_v46 = vpop.eup %3767 }
 0x56f   :  { %v3770_v38 = vpop.eup %3769  ;;  %v2530_v57 = vadd.f32 1.0, %v3768_v46  ;;  %v3557_v46 = vld [vmem:[%s9212_s0 + $0xc0] sm:$0xff] }
 0x570   :  { %v2549_v28 = vadd.f32 1.0, %v3770_v38  ;;  %v3772_v12 = vpop.eup %3771  ;;  %v3558_v38 = vld [vmem:[%s9212_s0 + $0xc8] sm:$0xff]  ;;  %v2682_v60 = vadd.f32 %v3557_v46, %v2619_v51  ;;  %v3560_v46 = vld [vmem:[%s9212_s0 + $0xd8] sm:$0xff] }
 0x571   :  { %3773 = vrcp.f32 %v2530_v57  ;;  %v8724_v33 = vadd.f32 1.0, %v3772_v12  ;;  %v2540_v18 = vand.u32 2147483647, %v2530_v57  ;;  %v2542_v26 = vand.u32 2147483648, %v2530_v57 }
 0x572   :  { %3775 = vrcp.f32 %v2549_v28  ;;  %v2561_v25 = vand.u32 2147483648, %v2549_v28  ;;  %v2683_v12 = vadd.f32 %v3558_v38, %v2639_v15  ;;  %v2559_v32 = vand.u32 2147483647, %v2549_v28 }
 0x573   :  { %3777 = vrcp.f32 %v8724_v33  ;;  %v3561_v44 = vmul.f32 -1.442695, %v2682_v60  ;;  %vm2555_vm1 = vweird.f32 %v2549_v28  ;;  %vm2536_vm2 = vweird.f32 %v2530_v57 }
 0x574   :  { %3779 = vtanh.f32 %v2525_v5  ;;  %v2543_v5 = vor.u32 1.1754944e-38, %v2542_v26  ;;  %vm2541_vm5 = vcmp.eq.f32.partialorder %v2540_v18, 8.507059e+37  ;;  %vm2560_vm6 = vcmp.eq.f32.partialorder %v2559_v32, 8.507059e+37  ;;  %v2659_v18 = vpop.f32.mrf.mxu2 }
 0x575   :  { %3781 = vpow2.f32 %v3561_v44  ;;  %v2581_v32 = vand.u32 2147483648, %v8724_v33  ;;  %vm2575_vm8 = vweird.f32 %v8724_v33 }
 0x577   :  { %v3774_v59 = vpop.eup %3773 }
 0x578   :  { %v3776_v30 = vpop.eup %3775  ;;  %v2532_v14 = vmul.f32 %v3774_v59, %v2530_v57  ;;  %vm2537_vm15 = vweird.f32 %v3774_v59 }
 0x579   :  { %v2551_v22 = vmul.f32 %v3776_v30, %v2549_v28  ;;  %vm2556_vm0 = vweird.f32 %v3776_v30  ;;  %v3778_v7 = vpop.eup %3777  ;;  %vm2538_vm3 = vmor %vm2536_vm2, %vm2537_vm15 }
 0x57a   :  { %v2533_v45 = vsub.f32 1.0, %v2532_v14  ;;  %v3562_v14 = vmul.f32 -1.442695, %v2683_v12  ;;  %v3780_v38 = vpop.eup %3779  ;;  %vm2557_vm4 = vmor %vm2555_vm1, %vm2556_vm0  ;;  %vm2576_vm7 = vweird.f32 %v3778_v7 }
 0x57b   :  { %v2552_v11 = vsub.f32 1.0, %v2551_v22  ;;  %v2571_v22 = vmul.f32 %v3778_v7, %v8724_v33  ;;  %v3782_v31 = vpop.eup %3781  ;;  %vm2577_vm9 = vmor %vm2575_vm8, %vm2576_vm7 }
 0x57c   :  { %v2534_v8 = vmul.f32 %v3774_v59, %v2533_v45  ;;  %v2562_v45 = vor.u32 1.1754944e-38, %v2561_v25  ;;  %3783 = vpow2.f32 %v3562_v14  ;;  %v2594_v14 = vpop.permute.xlu2 %2593 }
 0x57d   :  { %v2553_v47 = vmul.f32 %v3776_v30, %v2552_v11  ;;  %v2572_v15 = vsub.f32 1.0, %v2571_v22  ;;  %v2679_v11 = vpop.f32.mrf.mxu3  ;;  %vm2595_vm11 = vcmp.eq.s32.totalorder %v2594_v14, 1  ;;  %v10959_v14 = vld [vmem:[#allocation43_spill] sm:$0xff] }
 0x57e   :  { %v2535_v62 = vadd.f32 %v3774_v59, %v2534_v8  ;;  %v2685_v60 = vadd.f32 %v3560_v46, %v2679_v11 }
 0x57f   :  { %v2554_v19 = vadd.f32 %v3776_v30, %v2553_v47  ;;  %v2573_v8 = vmul.f32 %v3778_v7, %v2572_v15 }
 0x580   :  { %v2539_v51 = vsel %vm2538_vm3, %v3774_v59, %v2535_v62  ;;  %v3563_v12 = vmul.f32 -1.442695, %v2685_v60  ;;  %v8741_v62 = vadd.f32 1.0, %v3782_v31  ;;  %v3559_v31 = vld [vmem:[%s9212_s0 + $0xd0] sm:$0xff] }
 0x581   :  { %v2544_v28 = vsel %vm2541_vm5, %v2543_v5, %v2539_v51  ;;  %v2558_v57 = vsel %vm2557_vm4, %v3776_v30, %v2554_v19  ;;  %v2574_v25 = vadd.f32 %v3778_v7, %v2573_v8  ;;  %v2582_v30 = vor.u32 1.1754944e-38, %v2581_v32 }
 0x582   :  { %v2563_v47 = vsel %vm2560_vm6, %v2562_v45, %v2558_v57  ;;  %v2586_v26 = vmul.f32 %v3780_v38, %v2544_v28  ;;  %v3784_v54 = vpop.eup %3783  ;;  %3785 = vpow2.f32 %v3563_v12  ;;  %v2684_v38 = vadd.f32 %v3559_v31, %v2659_v18  ;;  %v10957_v31 = vld [vmem:[#allocation25_spill] sm:$0xff]  ;;  %v10958_v18 = vld [vmem:[#allocation26_spill] sm:$0xff] }
 0x583   :  { %v2585_v44 = vmul.f32 %v2563_v47, %v7891_v21  ;;  %v8745_v19 = vadd.f32 1.0, %v3784_v54  ;;  %v2579_v21 = vand.u32 2147483647, %v8724_v33  ;;  %v2578_v59 = vsel %vm2577_vm9, %v3778_v7, %v2574_v25 }
 0x584   :  { %v2701_v47 = vand.u32 2147483648, %v8741_v62  ;;  %vm2695_vm14 = vweird.f32 %v8741_v62 }
 0x585   :  { %v8739_v3 = vadd.f32 %v2586_v26, %v2585_v44  ;;  %vm2580_vm10 = vcmp.eq.f32.partialorder %v2579_v21, 8.507059e+37  ;;  %v2720_v26 = vand.u32 2147483648, %v8745_v19  ;;  %v2699_v44 = vand.u32 2147483647, %v8741_v62  ;;  %v10954_v21 = vld [vmem:[#allocation22_spill] sm:$0xff] }
 0x586   :  { %v2583_v46 = vsel %vm2580_vm10, %v2582_v30, %v2578_v59  ;;  %v2718_v8 = vand.u32 2147483647, %v8745_v19  ;;  %vm2714_vm15 = vweird.f32 %v8745_v19  ;;  %v10955_v59 = vld [vmem:[#allocation39_spill] sm:$0xff] }
 0x587   :  { %3787 = vtanh.f32 %v8739_v3  ;;  %vm2700_vm2 = vcmp.eq.f32.partialorder %v2699_v44, 8.507059e+37  ;;  %v10956_v30 = vld [vmem:[#allocation23_spill] sm:$0xff]  ;;  %v10973_v44 = vld [vmem:[#allocation40_spill] sm:$0xff] }
 0x588   :  { %3789 = vrcp.f32 %v8741_v62  ;;  %v3786_v5 = vpop.eup %3785  ;;  %vm2719_vm3 = vcmp.eq.f32.partialorder %v2718_v8, 8.507059e+37  ;;  %v10975_v8 = vld [vmem:[#allocation42_spill] sm:$0xff] }
 0x589   :  { %3791 = vrcp.f32 %v8745_v19  ;;  %v8754_v22 = vadd.f32 1.0, %v3786_v5  ;;  %v10960_v5 = vld [vmem:[#allocation27_spill] sm:$0xff] }
 0x58b   :  { %3793 = vrcp.f32 %v8754_v22  ;;  %vm2734_vm5 = vweird.f32 %v8754_v22 }
 0x58c   :  { %3795 = vtanh.f32 %v2684_v38  ;;  %v10965_v38 = vld [vmem:[#allocation33_spill] sm:$0xff] }
 0x58d   :  { %v3788_v54 = vpop.eup %3787 }
 0x58e   :  { %v3790_v33 = vpop.eup %3789  ;;  %v2589_v45 = vmul.f32 %v3788_v54, %v2583_v46  ;;  %v10961_v54 = vld [vmem:[#allocation29_spill] sm:$0xff]  ;;  %v10963_v46 = vld [vmem:[#allocation47_spill] sm:$0xff] }
 0x58f   :  { %v3792_v51 = vpop.eup %3791  ;;  %v2691_v7 = vmul.f32 %v3790_v33, %v8741_v62  ;;  %vm2696_vm12 = vweird.f32 %v3790_v33 }
 0x590   :  { %v2710_v28 = vmul.f32 %v3792_v51, %v8745_v19  ;;  %2765 = vmatmul.f32.vlgmr.msrb.gmra.mxu0 %v2589_v45  ;;  %2785 = vmatmul.f32.vlgmr.msrb.gmra.mxu1 %v2589_v45  ;;  %v8760_v15 = vsel %vm2595_vm11, %v2589_v45, %v7923_v2  ;;  %vm2715_vm13 = vweird.f32 %v3792_v51  ;;  %vm2697_vm0 = vmor %vm2695_vm14, %vm2696_vm12  ;;  %v10953_v19 = vld [vmem:[#allocation21_spill] sm:$0xff] }
 0x591   :  { %v2692_v57 = vsub.f32 1.0, %v2691_v7  ;;  %2805 = vmatmul.f32.vlgmr.msrb.gmra.mxu2 %v2589_v45  ;;  %2825 = vmatmul.f32.vlgmr.msrb.gmra.mxu3 %v2589_v45  ;;  %vm2716_vm1 = vmor %vm2714_vm15, %vm2715_vm13  ;;  %v8846_v45 = vld [vmem:[%s9217_s5] sm:$0xff]  ;;  %v10967_v7 = vld [vmem:[#allocation51_spill] sm:$0xff] }
 0x592   :  { %v2711_v11 = vsub.f32 1.0, %v2710_v28  ;;  %2988 = vmatpush.msrb.mxu0 %v7932_v61  ;;  %3008 = vmatpush.msrb.mxu1 %v7938_v0  ;;  %v8772_v61 = vpop.eup %3793  ;;  %vm2976_vm8 = vcmp.eq.s32.totalorder %v8846_v45, 7  ;;  %v10968_v28 = vld [vmem:[#allocation36_spill] sm:$0xff] }
 0x593   :  { %v2693_v60 = vmul.f32 %v3790_v33, %v2692_v57  ;;  %3028 = vmatpush.msrb.mxu2 %v7946_v6  ;;  %3048 = vmatpush.msrb.mxu3 %v7952_v4  ;;  %v2702_v6 = vor.u32 1.1754944e-38, %v2701_v47  ;;  %vm2735_vm4 = vweird.f32 %v8772_v61  ;;  %v10969_v57 = vld [vmem:[#allocation37_spill] sm:$0xff]  ;;  %v10971_v47 = vld [vmem:[#allocation55_spill] sm:$0xff] }
 0x594   :  { %v2712_v2 = vmul.f32 %v3792_v51, %v2711_v11  ;;  %2989 = vmatpush.msrb.mxu0 %v7964_v16  ;;  %3009 = vmatpush.msrb.mxu1 %v7970_v20  ;;  %v2730_v16 = vmul.f32 %v8772_v61, %v8754_v22  ;;  %v2721_v20 = vor.u32 1.1754944e-38, %v2720_v26  ;;  %vm2736_vm6 = vmor %vm2734_vm5, %vm2735_vm4  ;;  %v10970_v11 = vld [vmem:[#allocation38_spill] sm:$0xff]  ;;  %v10972_v26 = vmov 0  }
 0x595   :  { %v2694_v0 = vadd.f32 %v3790_v33, %v2693_v60  ;;  %3029 = vmatpush.msrb.mxu2 %v7979_v48  ;;  %3049 = vmatpush.msrb.mxu3 %v7985_v23  ;;  %v3796_v48 = vpop.eup %3795  ;;  %v2977_v60 = vsel %vm2976_vm8, 1, %v10972_v26 }
 0x596   :  { %v2713_v4 = vadd.f32 %v3792_v51, %v2712_v2  ;;  %2990 = vmatpush.msrb.mxu0 %v7991_v35  ;;  %3010 = vmatpush.msrb.mxu1 %v7997_v13  ;;  %v2731_v62 = vsub.f32 1.0, %v2730_v16  ;;  %v10974_v2 = vld [vmem:[#allocation41_spill] sm:$0xff]  ;;  %v10980_v16 = vld [vmem:[#allocation63_spill] sm:$0xff] }
 0x597   :  { %v2698_v12 = vsel %vm2697_vm0, %v3790_v33, %v2694_v0  ;;  %3030 = vmatpush.msrb.mxu2 %v8003_v39  ;;  %3050 = vmatpush.msrb.mxu3 %v8009_v63  ;;  %v10964_v33 = vld [vmem:[#allocation31_spill] sm:$0xff]  ;;  %v10977_v0 = vld [vmem:[#allocation44_spill] sm:$0xff] }
 0x598   :  { %v2703_v23 = vsel %vm2700_vm2, %v2702_v6, %v2698_v12  ;;  %v2717_v25 = vsel %vm2716_vm1, %v3792_v51, %v2713_v4  ;;  %2991 = vmatpush.msrb.mxu0 %v8015_v36  ;;  %3011 = vmatpush.msrb.mxu1 %v8021_v29  ;;  %v2732_v39 = vmul.f32 %v8772_v61, %v2731_v62  ;;  %v2738_v29 = vand.u32 2147483647, %v8754_v22  ;;  %v10966_v51 = vld [vmem:[#allocation34_spill] sm:$0xff]  ;;  %v10978_v6 = vld [vmem:[#allocation45_spill] sm:$0xff] }
 0x599   :  { %v2722_v35 = vsel %vm2719_vm3, %v2721_v20, %v2717_v25  ;;  %v2745_v13 = vmul.f32 %v3796_v48, %v2703_v23  ;;  %3031 = vmatpush.msrb.mxu2 %v8029_v10  ;;  %3051 = vmatpush.msrb.mxu3 %v8035_v43  ;;  %v10979_v4 = vld [vmem:[#allocation46_spill] sm:$0xff]  ;;  %v10981_v20 = vld [vmem:[#allocation48_spill] sm:$0xff]  ;;  %v10982_v12 = vld [vmem:[#allocation49_spill] sm:$0xff]  ;;  %vm3362_vm1 = vcmp.eq.s32.totalorder %v8846_v45, 8 }
 0x59a   :  { %v2744_v32 = vmul.f32 %v2722_v35, %v7919_v1  ;;  %2992 = vmatpush.msrb.mxu0 %v8041_v52  ;;  %3012 = vmatpush.msrb.mxu1 %v8047_v55  ;;  %v2733_v36 = vadd.f32 %v8772_v61, %v2732_v39  ;;  %v2740_v1 = vand.u32 2147483648, %v8754_v22  ;;  %v10940_v52 = vld [vmem:[#allocation11_spill] sm:$0xff]  ;;  %v10941_v55 = vld [vmem:[#allocation12_spill] sm:$0xff]  ;;  %vm2739_vm7 = vcmp.eq.f32.partialorder %v2738_v29, 8.507059e+37  ;;  %v10962_v22 = vld [vmem:[#allocation30_spill] sm:$0xff] }
 0x59b   :  { %3032 = vmatpush.msrb.mxu2 %v8057_v17  ;;  %3052 = vmatpush.msrb.mxu3 %v8063_v41  ;;  %v10942_v17 = vld [vmem:[#allocation13_spill] sm:$0xff]  ;;  %v10943_v41 = vld [vmem:[#allocation28_spill] sm:$0xff]  ;;  %v10983_v48 = vld [vmem:[#allocation50_spill] sm:$0xff] }
 0x59c   :  { %v8796_v63 = vadd.f32 %v2745_v13, %v2744_v32  ;;  %2993 = vmatpush.msrb.mxu0 %v8069_v58  ;;  %3013 = vmatpush.msrb.mxu1 %v8075_v34  ;;  %v2737_v10 = vsel %vm2736_vm6, %v8772_v61, %v2733_v36  ;;  %v2741_v43 = vor.u32 1.1754944e-38, %v2740_v1  ;;  %v10976_v61 = vld [vmem:[#allocation59_spill] sm:$0xff]  ;;  %v10985_v25 = vld [vmem:[#allocation52_spill] sm:$0xff]  ;;  %v10986_v62 = vld [vmem:[#allocation53_spill] sm:$0xff] }
 0x59d   :  { %3033 = vmatpush.msrb.mxu2 %v8081_v9  ;;  %3053 = vmatpush.msrb.mxu3 %v8087_v56  ;;  %v10944_v9 = vld [vmem:[#allocation14_spill] sm:$0xff]  ;;  %v10945_v56 = vld [vmem:[#allocation15_spill] sm:$0xff]  ;;  %v10989_v32 = vld [vmem:[#allocation56_spill] sm:$0xff] }
 0x59e   :  { %3797 = vtanh.f32 %v8796_v63  ;;  %2994 = vmatpush.msrb.mxu0 %v8093_v27  ;;  %3014 = vmatpush.msrb.mxu1 %v8099_v49  ;;  %v2742_v34 = vsel %vm2739_vm7, %v2741_v43, %v2737_v10  ;;  %v10946_v49 = vld [vmem:[#allocation16_spill] sm:$0xff]  ;;  %v10984_v23 = vld [vmem:[#allocation67_spill] sm:$0xff]  ;;  %v10987_v35 = vld [vmem:[#allocation54_spill] sm:$0xff] }
 0x59f   :  { %3034 = vmatpush.msrb.mxu2 %v8105_v53  ;;  %3054 = vmatpush.msrb.mxu3 %v8111_v50  ;;  %v10947_v53 = vld [vmem:[#allocation32_spill] sm:$0xff]  ;;  %v10948_v50 = vld [vmem:[#allocation17_spill] sm:$0xff]  ;;  %v10988_v13 = vld [vmem:[#allocation71_spill] sm:$0xff] }
 0x5a0   :  { %2995 = vmatpush.msrb.mxu0 %v8117_v40  ;;  %3015 = vmatpush.msrb.mxu1 %v8123_v24  ;;  %v10949_v40 = vld [vmem:[#allocation18_spill] sm:$0xff]  ;;  %v10950_v24 = vld [vmem:[#allocation19_spill] sm:$0xff]  ;;  %v10990_v39 = vld [vmem:[#allocation57_spill] sm:$0xff] }
 0x5a1   :  { %3035 = vmatpush.msrb.mxu2 %v8129_v42  ;;  %3055 = vmatpush.msrb.mxu3 %v8135_v37  ;;  %v10951_v42 = vld [vmem:[#allocation35_spill] sm:$0xff]  ;;  %v10952_v37 = vld [vmem:[#allocation20_spill] sm:$0xff]  ;;  %v10991_v36 = vld [vmem:[#allocation58_spill] sm:$0xff] }
 0x5a2   :  { %2996 = vmatpush.msrb.mxu0 %v10940_v52  ;;  %3016 = vmatpush.msrb.mxu1 %v10941_v55  ;;  %v10992_v1 = vld [vmem:[#allocation75_spill] sm:$0xff]  ;;  %v10993_v29 = vld [vmem:[#allocation60_spill] sm:$0xff]  ;;  %v10994_v10 = vld [vmem:[#allocation61_spill] sm:$0xff] }
 0x5a3   :  { %3036 = vmatpush.msrb.mxu2 %v10942_v17  ;;  %3056 = vmatpush.msrb.mxu3 %v10943_v41  ;;  %v10995_v43 = vld [vmem:[#allocation62_spill] sm:$0xff]  ;;  %v10996_v52 = vld [vmem:[#allocation79_spill] sm:$0xff]  ;;  %v10997_v55 = vld [vmem:[#allocation64_spill] sm:$0xff] }
 0x5a4   :  { %v3798_v58 = vpop.eup %3797  ;;  %2997 = vmatpush.msrb.mxu0 %v10944_v9  ;;  %3017 = vmatpush.msrb.mxu1 %v10945_v56  ;;  %v10998_v17 = vld [vmem:[#allocation65_spill] sm:$0xff]  ;;  %v10999_v41 = vld [vmem:[#allocation66_spill] sm:$0xff] }
 0x5a5   :  { %v2748_v27 = vmul.f32 %v3798_v58, %v2742_v34  ;;  %3037 = vmatpush.msrb.mxu2 %v10946_v49  ;;  %3057 = vmatpush.msrb.mxu3 %v10947_v53  ;;  %v11000_v58 = vld [vmem:[#allocation83_spill] sm:$0xff]  ;;  %v11001_v34 = vld [vmem:[#allocation68_spill] sm:$0xff]  ;;  %v11002_v9 = vld [vmem:[#allocation69_spill] sm:$0xff] }
 0x5a6   :  { %2998 = vmatpush.msrb.mxu0 %v10948_v50  ;;  %3018 = vmatpush.msrb.mxu1 %v10949_v40  ;;  %v11003_v56 = vld [vmem:[#allocation70_spill] sm:$0xff]  ;;  %v11005_v49 = vld [vmem:[#allocation72_spill] sm:$0xff]  ;;  %v11006_v53 = vld [vmem:[#allocation73_spill] sm:$0xff] }
 0x5a7   :  { %3038 = vmatpush.msrb.mxu2 %v10950_v24  ;;  %3058 = vmatpush.msrb.mxu3 %v10951_v42  ;;  %v11007_v50 = vld [vmem:[#allocation74_spill] sm:$0xff]  ;;  %v11008_v40 = vld [vmem:[#allocation76_spill] sm:$0xff]  ;;  %v11009_v24 = vld [vmem:[#allocation77_spill] sm:$0xff] }
 0x5a8   :  { %2845 = vmatmul.f32.vlgmr.msra.gmra.mxu0 %v2748_v27  ;;  %2865 = vmatmul.f32.vlgmr.msra.gmra.mxu1 %v2748_v27  ;;  %v11010_v42 = vld [vmem:[#allocation78_spill] sm:$0xff] }
 0x5a9   :  { %2885 = vmatmul.f32.vlgmr.msra.gmra.mxu2 %v2748_v27  ;;  %2905 = vmatmul.f32.vlgmr.msra.gmra.mxu3 %v2748_v27 }
 0x5aa   :  { %2999 = vmatpush.msrb.mxu0 %v10952_v37  ;;  %3019 = vmatpush.msrb.mxu1 %v10953_v19  ;;  %v11011_v37 = vld [vmem:[#allocation80_spill] sm:$0xff]  ;;  %v11012_v19 = vld [vmem:[#allocation81_spill] sm:$0xff] }
 0x5ab   :  { %3039 = vmatpush.msrb.mxu2 %v10954_v21  ;;  %3059 = vmatpush.msrb.mxu3 %v10955_v59  ;;  %v11013_v21 = vld [vmem:[#allocation82_spill] sm:$0xff]  ;;  %v11014_v59 = vld [vmem:[#allocation84_spill] sm:$0xff] }
 0x5ac   :  { %3000 = vmatpush.msrb.mxu0 %v10956_v30  ;;  %3020 = vmatpush.msrb.mxu1 %v10957_v31  ;;  %v11015_v30 = vld [vmem:[#allocation85_spill] sm:$0xff]  ;;  %v11016_v31 = vld [vmem:[#allocation86_spill] sm:$0xff] }
 0x5ad   :  { %3040 = vmatpush.msrb.mxu2 %v10958_v18  ;;  %3060 = vmatpush.msrb.mxu3 %v10959_v14  ;;  %v11017_v18 = vld [vmem:[#allocation88_spill] sm:$0xff]  ;;  %v11018_v14 = vld [vmem:[#allocation89_spill] sm:$0xff] }
 0x5ae   :  { %3001 = vmatpush.msrb.mxu0 %v10960_v5  ;;  %3021 = vmatpush.msrb.mxu1 %v10961_v54  ;;  %v11019_v5 = vld [vmem:[#allocation97_spill] sm:$0xff]  ;;  %v11020_v54 = vld [vmem:[#allocation90_spill] sm:$0xff] }
 0x5af   :  { %3041 = vmatpush.msrb.mxu2 %v10962_v22  ;;  %3061 = vmatpush.msrb.mxu3 %v10963_v46  ;;  %v11021_v22 = vld [vmem:[#allocation91_spill] sm:$0xff]  ;;  %v11022_v46 = vld [vmem:[#allocation92_spill] sm:$0xff] }
 0x5b0   :  { %3002 = vmatpush.msrb.mxu0 %v10964_v33  ;;  %3022 = vmatpush.msrb.mxu1 %v10965_v38  ;;  %v11023_v33 = vld [vmem:[#allocation98_spill] sm:$0xff]  ;;  %v11024_v38 = vld [vmem:[#allocation93_spill] sm:$0xff] }
 0x5b1   :  { %3042 = vmatpush.msrb.mxu2 %v10966_v51  ;;  %3062 = vmatpush.msrb.mxu3 %v10967_v7  ;;  %v11025_v51 = vld [vmem:[#allocation94_spill] sm:$0xff]  ;;  %v11026_v7 = vld [vmem:[#allocation95_spill] sm:$0xff] }
 0x5b2   :  { %3003 = vmatpush.msrb.mxu0 %v10968_v28  ;;  %3023 = vmatpush.msrb.mxu1 %v10969_v57  ;;  %v11027_v28 = vld [vmem:[#allocation99_spill] sm:$0xff]  ;;  %v11028_v57 = vld [vmem:[#allocation96_spill] sm:$0xff] }
 0x5b3   :  { %3043 = vmatpush.msrb.mxu2 %v10970_v11  ;;  %3063 = vmatpush.msrb.mxu3 %v10971_v47  ;;  %v11029_v11 = vld [vmem:[#allocation100_spill] sm:$0xff]  ;;  %v11030_v47 = vld [vmem:[#allocation101_spill] sm:$0xff] }
 0x5b4   :  { %3004 = vmatmul.f32.vlgmr.msrb.gmra.mxu0 %v2748_v27  ;;  %3024 = vmatmul.f32.vlgmr.msrb.gmra.mxu1 %v2748_v27 }
 0x5b5   :  { %3044 = vmatmul.f32.vlgmr.msrb.gmra.mxu2 %v2748_v27  ;;  %3064 = vmatmul.f32.vlgmr.msrb.gmra.mxu3 %v2748_v27  ;;  %v11004_v27 = vld [vmem:[#allocation87_spill] sm:$0xff] }
 0x5b6   :  { %2979 = vperm.xlu0 %3583, %v2977_v60   ;;  %3135 = vmatpush.msra.mxu0 %v10973_v44  ;;  %v11031_v60 = vld [vmem:[#allocation102_spill] sm:$0xff]  ;;  %v11032_v44 = vld [vmem:[#allocation103_spill] sm:$0xff] }
 0x5b7   :  { %3155 = vmatpush.msra.mxu1 %v10974_v2  ;;  %3175 = vmatpush.msra.mxu2 %v10975_v8  ;;  %v11033_v2 = vld [vmem:[#allocation104_spill] sm:$0xff]  ;;  %v11034_v8 = vld [vmem:[#allocation105_spill] sm:$0xff] }
 0x5b8   :  { %3195 = vmatpush.msra.mxu3 %v10976_v61  ;;  %3136 = vmatpush.msra.mxu0 %v10977_v0  ;;  %v11035_v61 = vld [vmem:[#allocation106_spill] sm:$0xff]  ;;  %v11036_v0 = vld [vmem:[#allocation107_spill] sm:$0xff] }
 0x5b9   :  { %3156 = vmatpush.msra.mxu1 %v10978_v6  ;;  %3176 = vmatpush.msra.mxu2 %v10979_v4  ;;  %v11037_v6 = vld [vmem:[#allocation108_spill] sm:$0xff]  ;;  %v11038_v4 = vld [vmem:[#allocation109_spill] sm:$0xff] }
 0x5ba   :  { %3196 = vmatpush.msra.mxu3 %v10980_v16  ;;  %3137 = vmatpush.msra.mxu0 %v10981_v20  ;;  %v11039_v16 = vld [vmem:[#allocation110_spill] sm:$0xff]  ;;  %v11040_v20 = vld [vmem:[#allocation111_spill] sm:$0xff] }
 0x5bb   :  { %3157 = vmatpush.msra.mxu1 %v10982_v12  ;;  %3177 = vmatpush.msra.mxu2 %v10983_v48  ;;  %v11041_v12 = vld [vmem:[#allocation112_spill] sm:$0xff]  ;;  %v11042_v48 = vld [vmem:[#allocation113_spill] sm:$0xff] }
 0x5bc   :  { %3197 = vmatpush.msra.mxu3 %v10984_v23  ;;  %3138 = vmatpush.msra.mxu0 %v10985_v25  ;;  %v11043_v23 = vld [vmem:[#allocation114_spill] sm:$0xff]  ;;  %v11044_v25 = vld [vmem:[#allocation115_spill] sm:$0xff] }
 0x5bd   :  { %3158 = vmatpush.msra.mxu1 %v10986_v62  ;;  %3178 = vmatpush.msra.mxu2 %v10987_v35  ;;  %v11045_v62 = vld [vmem:[#allocation116_spill] sm:$0xff]  ;;  %v11046_v35 = vld [vmem:[#allocation117_spill] sm:$0xff] }
 0x5be   :  { %3198 = vmatpush.msra.mxu3 %v10988_v13  ;;  %3139 = vmatpush.msra.mxu0 %v10989_v32  ;;  %v11047_v13 = vld [vmem:[#allocation118_spill] sm:$0xff]  ;;  %v11048_v32 = vld [vmem:[#allocation119_spill] sm:$0xff] }
 0x5bf   :  { %3159 = vmatpush.msra.mxu1 %v10990_v39  ;;  %3179 = vmatpush.msra.mxu2 %v10991_v36  ;;  %v11049_v39 = vld [vmem:[#allocation120_spill] sm:$0xff]  ;;  %v11050_v36 = vld [vmem:[#allocation121_spill] sm:$0xff] }
 0x5c0   :  { %3199 = vmatpush.msra.mxu3 %v10992_v1  ;;  %3140 = vmatpush.msra.mxu0 %v10993_v29  ;;  %v11051_v1 = vld [vmem:[#allocation122_spill] sm:$0xff]  ;;  %v11052_v29 = vld [vmem:[#allocation123_spill] sm:$0xff] }
 0x5c1   :  { %3160 = vmatpush.msra.mxu1 %v10994_v10  ;;  %3180 = vmatpush.msra.mxu2 %v10995_v43  ;;  %v11053_v10 = vld [vmem:[#allocation124_spill] sm:$0xff]  ;;  %v11054_v43 = vld [vmem:[#allocation125_spill] sm:$0xff] }
 0x5c2   :  { %3200 = vmatpush.msra.mxu3 %v10996_v52  ;;  %3141 = vmatpush.msra.mxu0 %v10997_v55  ;;  %v11055_v52 = vld [vmem:[#allocation126_spill] sm:$0xff]  ;;  %v11056_v55 = vld [vmem:[#allocation127_spill] sm:$0xff] }
 0x5c3   :  { %3161 = vmatpush.msra.mxu1 %v10998_v17  ;;  %3181 = vmatpush.msra.mxu2 %v10999_v41  ;;  %v11057_v17 = vld [vmem:[#allocation128_spill] sm:$0xff]  ;;  %v11058_v41 = vld [vmem:[#allocation129_spill] sm:$0xff] }
 0x5c4   :  { %3201 = vmatpush.msra.mxu3 %v11000_v58  ;;  %3142 = vmatpush.msra.mxu0 %v11001_v34  ;;  %v11059_v58 = vld [vmem:[#allocation130_spill] sm:$0xff]  ;;  %v11060_v34 = vld [vmem:[#allocation131_spill] sm:$0xff] }
 0x5c5   :  { %3162 = vmatpush.msra.mxu1 %v11002_v9  ;;  %3182 = vmatpush.msra.mxu2 %v11003_v56  ;;  %v11061_v9 = vld [vmem:[#allocation132_spill] sm:$0xff]  ;;  %v11062_v56 = vld [vmem:[#allocation133_spill] sm:$0xff] }
 0x5c6   :  { %3202 = vmatpush.msra.mxu3 %v11004_v27  ;;  %3143 = vmatpush.msra.mxu0 %v11005_v49  ;;  %v11063_v27 = vld [vmem:[#allocation134_spill] sm:$0xff]  ;;  %v11064_v49 = vld [vmem:[#allocation135_spill] sm:$0xff] }
 0x5c7   :  { %3163 = vmatpush.msra.mxu1 %v11006_v53  ;;  %3183 = vmatpush.msra.mxu2 %v11007_v50  ;;  %v11065_v53 = vld [vmem:[#allocation136_spill] sm:$0xff]  ;;  %v11066_v50 = vld [vmem:[#allocation137_spill] sm:$0xff] }
 0x5c8   :  { %3203 = vmatpush.msra.mxu3 %v11008_v40  ;;  %3144 = vmatpush.msra.mxu0 %v11009_v24  ;;  %v11067_v40 = vld [vmem:[#allocation138_spill] sm:$0xff]  ;;  %v11068_v24 = vld [vmem:[#allocation139_spill] sm:$0xff] }
 0x5c9   :  { %3164 = vmatpush.msra.mxu1 %v11010_v42  ;;  %3184 = vmatpush.msra.mxu2 %v11011_v37  ;;  %v11069_v42 = vld [vmem:[#allocation140_spill] sm:$0xff]  ;;  %v11070_v37 = vld [vmem:[#allocation141_spill] sm:$0xff] }
 0x5ca   :  { %3204 = vmatpush.msra.mxu3 %v11012_v19  ;;  %3145 = vmatpush.msra.mxu0 %v11013_v21  ;;  %v11071_v19 = vld [vmem:[#allocation142_spill] sm:$0xff]  ;;  %v11072_v21 = vld [vmem:[#allocation143_spill] sm:$0xff] }
 0x5cb   :  { %3165 = vmatpush.msra.mxu1 %v11014_v59  ;;  %3185 = vmatpush.msra.mxu2 %v11015_v30  ;;  %v11073_v59 = vld [vmem:[#allocation144_spill] sm:$0xff]  ;;  %v11074_v30 = vld [vmem:[#allocation145_spill] sm:$0xff] }
 0x5cc   :  { %3205 = vmatpush.msra.mxu3 %v11016_v31  ;;  %3146 = vmatpush.msra.mxu0 %v11017_v18  ;;  %v11075_v31 = vld [vmem:[#allocation146_spill] sm:$0xff]  ;;  %v11076_v18 = vld [vmem:[#allocation147_spill] sm:$0xff] }
 0x5cd   :  { %3166 = vmatpush.msra.mxu1 %v11018_v14  ;;  %3186 = vmatpush.msra.mxu2 %v11019_v5  ;;  %v11077_v14 = vld [vmem:[#allocation148_spill] sm:$0xff]  ;;  %v11078_v5 = vld [vmem:[#allocation149_spill] sm:$0xff] }
 0x5ce   :  { %3206 = vmatpush.msra.mxu3 %v11020_v54  ;;  %3147 = vmatpush.msra.mxu0 %v11021_v22  ;;  %v11079_v54 = vld [vmem:[#allocation150_spill] sm:$0xff]  ;;  %v11080_v22 = vld [vmem:[#allocation151_spill] sm:$0xff] }
 0x5cf   :  { %3167 = vmatpush.msra.mxu1 %v11022_v46  ;;  %3187 = vmatpush.msra.mxu2 %v11023_v33  ;;  %v11081_v46 = vld [vmem:[#allocation152_spill] sm:$0xff]  ;;  %v11082_v33 = vld [vmem:[#allocation153_spill] sm:$0xff] }
 0x5d0   :  { %3207 = vmatpush.msra.mxu3 %v11024_v38  ;;  %3148 = vmatpush.msra.mxu0 %v11025_v51  ;;  %v11083_v38 = vld [vmem:[#allocation154_spill] sm:$0xff]  ;;  %v11084_v51 = vld [vmem:[#allocation155_spill] sm:$0xff] }
 0x5d1   :  { %3168 = vmatpush.msra.mxu1 %v11026_v7  ;;  %3188 = vmatpush.msra.mxu2 %v11027_v28  ;;  %v11085_v7 = vld [vmem:[#allocation156_spill] sm:$0xff]  ;;  %v11086_v28 = vld [vmem:[#allocation157_spill] sm:$0xff] }
 0x5d2   :  { %3208 = vmatpush.msra.mxu3 %v11028_v57  ;;  %3149 = vmatpush.msra.mxu0 %v11029_v11  ;;  %v11087_v57 = vld [vmem:[#allocation158_spill] sm:$0xff]  ;;  %v11088_v11 = vld [vmem:[#allocation159_spill] sm:$0xff] }
 0x5d3   :  { %3169 = vmatpush.msra.mxu1 %v11030_v47  ;;  %3189 = vmatpush.msra.mxu2 %v11031_v60  ;;  %v11089_v47 = vld [vmem:[#allocation160_spill] sm:$0xff]  ;;  %v11090_v60 = vld [vmem:[#allocation161_spill] sm:$0xff] }
 0x5d4   :  { %3209 = vmatpush.msra.mxu3 %v11032_v44  ;;  %3150 = vmatpush.msra.mxu0 %v11033_v2  ;;  %v11091_v44 = vld [vmem:[#allocation162_spill] sm:$0xff]  ;;  %v11092_v2 = vld [vmem:[#allocation163_spill] sm:$0xff] }
 0x5d5   :  { %3170 = vmatpush.msra.mxu1 %v11034_v8  ;;  %3190 = vmatpush.msra.mxu2 %v11035_v61  ;;  %v11093_v8 = vld [vmem:[#allocation164_spill] sm:$0xff]  ;;  %v11094_v61 = vld [vmem:[#allocation165_spill] sm:$0xff] }
 0x5d6   :  { %3210 = vmatpush.msra.mxu3 %v11036_v0  ;;  %3215 = vmatpush.msrb.mxu0 %v11037_v6  ;;  %v11095_v0 = vld [vmem:[#allocation166_spill] sm:$0xff]  ;;  %v11096_v6 = vld [vmem:[#allocation167_spill] sm:$0xff] }
 0x5d7   :  { %3235 = vmatpush.msrb.mxu1 %v11038_v4  ;;  %3255 = vmatpush.msrb.mxu2 %v11039_v16  ;;  %v11097_v4 = vld [vmem:[#allocation168_spill] sm:$0xff]  ;;  %v11098_v16 = vld [vmem:[#allocation169_spill] sm:$0xff] }
 0x5d8   :  { %3275 = vmatpush.msrb.mxu3 %v11040_v20  ;;  %3216 = vmatpush.msrb.mxu0 %v11041_v12  ;;  %v11099_v20 = vld [vmem:[#allocation170_spill] sm:$0xff]  ;;  %v11100_v12 = vld [vmem:[#allocation171_spill] sm:$0xff] }
 0x5d9   :  { %3236 = vmatpush.msrb.mxu1 %v11042_v48  ;;  %3256 = vmatpush.msrb.mxu2 %v11043_v23 }
 0x5da   :  { %3276 = vmatpush.msrb.mxu3 %v11044_v25  ;;  %3217 = vmatpush.msrb.mxu0 %v11045_v62 }
 0x5db   :  { %3237 = vmatpush.msrb.mxu1 %v11046_v35  ;;  %3257 = vmatpush.msrb.mxu2 %v11047_v13 }
 0x5dc   :  { %3277 = vmatpush.msrb.mxu3 %v11048_v32  ;;  %3218 = vmatpush.msrb.mxu0 %v11049_v39  ;;  %v11101_v39 = vld [vmem:[#allocation8_spill] sm:$0xff] }
 0x5dd   :  { %3238 = vmatpush.msrb.mxu1 %v11050_v36  ;;  %3258 = vmatpush.msrb.mxu2 %v11051_v1  ;;  %v11102_v1 = vld [vmem:[#allocation9_spill] sm:$0xff] }
 0x5de   :  { %3278 = vmatpush.msrb.mxu3 %v11052_v29  ;;  %3219 = vmatpush.msrb.mxu0 %v11053_v10 }
 0x5df   :  { %3239 = vmatpush.msrb.mxu1 %v11054_v43  ;;  %3259 = vmatpush.msrb.mxu2 %v11055_v52 }
 0x5e0   :  { %3279 = vmatpush.msrb.mxu3 %v11056_v55  ;;  %3220 = vmatpush.msrb.mxu0 %v11057_v17 }
 0x5e1   :  { %3240 = vmatpush.msrb.mxu1 %v11058_v41  ;;  %3260 = vmatpush.msrb.mxu2 %v11059_v58  ;;  %v11103_v41 = vld [vmem:[#allocation10_spill] sm:$0xff] }
 0x5e2   :  { %3280 = vmatpush.msrb.mxu3 %v11060_v34  ;;  %3221 = vmatpush.msrb.mxu0 %v11061_v9  ;;  %v3567_v34 = vld [vmem:[%s9212_s0 + $0xe0] sm:$0xff]  ;;  %v3568_v9 = vld [vmem:[%s9212_s0 + $0xe8] sm:$0xff] }
 0x5e3   :  { %3241 = vmatpush.msrb.mxu1 %v11062_v56  ;;  %3261 = vmatpush.msrb.mxu2 %v11063_v27 }
 0x5e4   :  { %3281 = vmatpush.msrb.mxu3 %v11064_v49  ;;  %3222 = vmatpush.msrb.mxu0 %v11065_v53 }
 0x5e5   :  { %3242 = vmatpush.msrb.mxu1 %v11066_v50  ;;  %3262 = vmatpush.msrb.mxu2 %v11067_v40 }
 0x5e6   :  { %3282 = vmatpush.msrb.mxu3 %v11068_v24  ;;  %3223 = vmatpush.msrb.mxu0 %v11069_v42 }
 0x5e7   :  { %3243 = vmatpush.msrb.mxu1 %v11070_v37  ;;  %3263 = vmatpush.msrb.mxu2 %v11071_v19 }
 0x5e8   :  { %3283 = vmatpush.msrb.mxu3 %v11072_v21  ;;  %3224 = vmatpush.msrb.mxu0 %v11073_v59 }
 0x5e9   :  { %3244 = vmatpush.msrb.mxu1 %v11074_v30  ;;  %3264 = vmatpush.msrb.mxu2 %v11075_v31  ;;  %v3570_v31 = vld [vmem:[%s9212_s0 + $0xf8] sm:$0xff] }
 0x5ea   :  { %3284 = vmatpush.msrb.mxu3 %v11076_v18  ;;  %3225 = vmatpush.msrb.mxu0 %v11077_v14 }
 0x5eb   :  { %3245 = vmatpush.msrb.mxu1 %v11078_v5  ;;  %3265 = vmatpush.msrb.mxu2 %v11079_v54  ;;  %v11104_v5 = vld [vmem:[#allocation24_spill] sm:$0xff] }
 0x5ec   :  { %3285 = vmatpush.msrb.mxu3 %v11080_v22  ;;  %3226 = vmatpush.msrb.mxu0 %v11081_v46 }
 0x5ed   :  { %3246 = vmatpush.msrb.mxu1 %v11082_v33  ;;  %3266 = vmatpush.msrb.mxu2 %v11083_v38 }
 0x5ee   :  { %3286 = vmatpush.msrb.mxu3 %v11084_v51  ;;  %3227 = vmatpush.msrb.mxu0 %v11085_v7 }
 0x5ef   :  { %3247 = vmatpush.msrb.mxu1 %v11086_v28  ;;  %3267 = vmatpush.msrb.mxu2 %v11087_v57 }
 0x5f0   :  { %3287 = vmatpush.msrb.mxu3 %v11088_v11  ;;  %3228 = vmatpush.msrb.mxu0 %v11089_v47 }
 0x5f1   :  { %3248 = vmatpush.msrb.mxu1 %v11090_v60  ;;  %3268 = vmatpush.msrb.mxu2 %v11091_v44 }
 0x5f2   :  { %3288 = vmatpush.msrb.mxu3 %v11092_v2  ;;  %3229 = vmatpush.msrb.mxu0 %v11093_v8 }
 0x5f3   :  { %3249 = vmatpush.msrb.mxu1 %v11094_v61  ;;  %3269 = vmatpush.msrb.mxu2 %v11095_v0 }
 0x5f4   :  { %3289 = vmatpush.msrb.mxu3 %v11096_v6  ;;  %3230 = vmatpush.msrb.mxu0 %v11097_v4 }
 0x5f5   :  { %3250 = vmatpush.msrb.mxu1 %v11098_v16  ;;  %3270 = vmatpush.msrb.mxu2 %v11099_v20  ;;  %v3569_v16 = vld [vmem:[%s9212_s0 + $0xf0] sm:$0xff] }
 0x5f6   :  { %3290 = vmatpush.msrb.mxu3 %v11100_v12 }
 0x60d   :  { %v2766_v48 = vpop.f32.mrf.mxu0  ;;  %v2786_v23 = vpop.f32.mrf.mxu1 }
 0x614   :  { %v2826_v25 = vpop.f32.mrf.mxu3  ;;  %v2806_v10 = vpop.f32.mrf.mxu2 }
 0x625   :  { %v2846_v62 = vpop.f32.mrf.mxu0  ;;  %v2866_v35 = vpop.f32.mrf.mxu1 }
 0x626   :  { %v2847_v13 = vadd.f32 %v2846_v62, %v2766_v48  ;;  %v2867_v32 = vadd.f32 %v2866_v35, %v2786_v23 }
 0x628   :  { %v2909_v36 = vadd.f32 %v2847_v13, %v11101_v39  ;;  %v2910_v29 = vadd.f32 %v2867_v32, %v11102_v1 }
 0x62a   :  { %v3564_v43 = vmul.f32 -1.442695, %v2909_v36  ;;  %v3565_v52 = vmul.f32 -1.442695, %v2910_v29 }
 0x62c   :  { %3799 = vpow2.f32 %v3564_v43  ;;  %v2906_v55 = vpop.f32.mrf.mxu3  ;;  %v2886_v50 = vpop.f32.mrf.mxu2 }
 0x62d   :  { %3801 = vpow2.f32 %v3565_v52  ;;  %v2907_v17 = vadd.f32 %v2906_v55, %v2826_v25  ;;  %v2887_v30 = vadd.f32 %v2886_v50, %v2806_v10 }
 0x62f   :  { %v2912_v58 = vadd.f32 %v2907_v17, %v11103_v41  ;;  %v2911_v54 = vadd.f32 %v2887_v30, %v11104_v5 }
 0x631   :  { %v3566_v56 = vmul.f32 -1.442695, %v2912_v58  ;;  %v3005_v27 = vpop.f32.mrf.mxu0  ;;  %v3025_v49 = vpop.f32.mrf.mxu1 }
 0x632   :  { %v3800_v53 = vpop.eup %3799  ;;  %v3068_v40 = vadd.f32 %v3567_v34, %v3005_v27  ;;  %v3069_v24 = vadd.f32 %v3568_v9, %v3025_v49 }
 0x633   :  { %v3802_v42 = vpop.eup %3801  ;;  %v2916_v37 = vadd.f32 1.0, %v3800_v53  ;;  %3803 = vpow2.f32 %v3566_v56  ;;  %v3363_v56 = vsel %vm3362_vm1, 1, %v10972_v26 }
 0x634   :  { %v2935_v19 = vadd.f32 1.0, %v3802_v42  ;;  %v3571_v21 = vmul.f32 -1.442695, %v3068_v40  ;;  %v3572_v59 = vmul.f32 -1.442695, %v3069_v24  ;;  %3365 = vperm.xlu1 %3584, %v3363_v56   ;;  %v3413_v56 = vld [vmem:[%s9222_s10 + $0x60] sm:$0xff] }
 0x635   :  { %3805 = vrcp.f32 %v2916_v37  ;;  %v2926_v60 = vand.u32 2147483647, %v2916_v37  ;;  %v2928_v61 = vand.u32 2147483648, %v2916_v37  ;;  %vm2922_vm12 = vweird.f32 %v2916_v37 }
 0x636   :  { %3807 = vrcp.f32 %v2935_v19  ;;  %v2947_v8 = vand.u32 2147483648, %v2935_v19  ;;  %v2945_v4 = vand.u32 2147483647, %v2935_v19  ;;  %vm2941_vm11 = vweird.f32 %v2935_v19 }
 0x637   :  { %3809 = vpow2.f32 %v3571_v21  ;;  %vm2927_vm13 = vcmp.eq.f32.partialorder %v2926_v60, 8.507059e+37  ;;  %v2929_v62 = vor.u32 1.1754944e-38, %v2928_v61  ;;  %v2980_v21 = vpop.permute.xlu0 %2979 }
 0x638   :  { %3811 = vpow2.f32 %v3572_v59  ;;  %v3065_v18 = vpop.f32.mrf.mxu3  ;;  %v3045_v20 = vpop.f32.mrf.mxu2  ;;  %v2948_v29 = vor.u32 1.1754944e-38, %v2947_v8  ;;  %vm2946_vm0 = vcmp.eq.f32.partialorder %v2945_v4, 8.507059e+37  ;;  %vm2981_vm8 = vcmp.eq.s32.totalorder %v2980_v21, 1  ;;  %v3409_v21 = vld [vmem:[%s9222_s10 + $0x40] sm:$0xff] }
 0x639   :  { %v3804_v14 = vpop.eup %3803  ;;  %v3071_v22 = vadd.f32 %v3570_v31, %v3065_v18  ;;  %v3070_v32 = vadd.f32 %v3569_v16, %v3045_v20 }
 0x63a   :  { %v8997_v46 = vadd.f32 1.0, %v3804_v14 }
 0x63b   :  { %v3806_v33 = vpop.eup %3805  ;;  %v3573_v38 = vmul.f32 -1.442695, %v3071_v22 }
 0x63c   :  { %v3808_v51 = vpop.eup %3807  ;;  %v2918_v7 = vmul.f32 %v3806_v33, %v2916_v37  ;;  %3813 = vrcp.f32 %v8997_v46  ;;  %vm2923_vm9 = vweird.f32 %v3806_v33  ;;  %vm2961_vm2 = vweird.f32 %v8997_v46 }
 0x63d   :  { %v3810_v28 = vpop.eup %3809  ;;  %v2937_v57 = vmul.f32 %v3808_v51, %v2935_v19  ;;  %3815 = vtanh.f32 %v2911_v54  ;;  %vm2942_vm10 = vweird.f32 %v3808_v51  ;;  %vm2924_vm14 = vmor %vm2922_vm12, %vm2923_vm9  ;;  %v2967_v24 = vand.u32 2147483648, %v8997_v46 }
 0x63e   :  { %v3812_v11 = vpop.eup %3811  ;;  %v2919_v47 = vsub.f32 1.0, %v2918_v7  ;;  %v9000_v44 = vadd.f32 1.0, %v3810_v28  ;;  %3817 = vpow2.f32 %v3573_v38  ;;  %vm2943_vm15 = vmor %vm2941_vm11, %vm2942_vm10  ;;  %v2965_v31 = vand.u32 2147483647, %v8997_v46 }
 0x63f   :  { %v2938_v2 = vsub.f32 1.0, %v2937_v57  ;;  %v9002_v0 = vadd.f32 1.0, %v3812_v11 }
 0x640   :  { %v2920_v6 = vmul.f32 %v3806_v33, %v2919_v47  ;;  %3819 = vrcp.f32 %v9000_v44  ;;  %v3085_v42 = vand.u32 2147483647, %v9000_v44  ;;  %v3087_v19 = vand.u32 2147483648, %v9000_v44 }
 0x641   :  { %v2939_v12 = vmul.f32 %v3808_v51, %v2938_v2  ;;  %3821 = vrcp.f32 %v9002_v0  ;;  %v3106_v59 = vand.u32 2147483648, %v9002_v0  ;;  %v3104_v14 = vand.u32 2147483647, %v9002_v0 }
 0x642   :  { %v9009_v48 = vpop.eup %3813  ;;  %v2921_v23 = vadd.f32 %v3806_v33, %v2920_v6  ;;  %3823 = vtanh.f32 %v3070_v32  ;;  %vm3081_vm7 = vweird.f32 %v9000_v44  ;;  %vm3100_vm9 = vweird.f32 %v9002_v0 }
 0x643   :  { %v3816_v25 = vpop.eup %3815  ;;  %v2940_v35 = vadd.f32 %v3808_v51, %v2939_v12  ;;  %v2957_v13 = vmul.f32 %v9009_v48, %v8997_v46  ;;  %vm2962_vm3 = vweird.f32 %v9009_v48  ;;  %v3088_v7 = vor.u32 1.1754944e-38, %v3087_v19 }
 0x644   :  { %v3818_v36 = vpop.eup %3817  ;;  %v2925_v10 = vsel %vm2924_vm14, %v3806_v33, %v2921_v23  ;;  %vm9036_vm6 = vmor %vm2961_vm2, %vm2962_vm3  ;;  %v2968_v33 = vor.u32 1.1754944e-38, %v2967_v24  ;;  %v3107_v46 = vor.u32 1.1754944e-38, %v3106_v59  ;;  %vm3086_vm12 = vcmp.eq.f32.partialorder %v3085_v42, 8.507059e+37 }
 0x645   :  { %v2930_v43 = vsel %vm2927_vm13, %v2929_v62, %v2925_v10  ;;  %v2944_v52 = vsel %vm2943_vm15, %v3808_v51, %v2940_v35  ;;  %v2958_v55 = vsub.f32 1.0, %v2957_v13  ;;  %v9014_v17 = vadd.f32 1.0, %v3818_v36  ;;  %v3416_v10 = vld [vmem:[%s9222_s10 + $0x78] sm:$0xff] }
 0x646   :  { %v3820_v58 = vpop.eup %3819  ;;  %v2949_v34 = vsel %vm2946_vm0, %v2948_v29, %v2944_v52  ;;  %v2972_v9 = vmul.f32 %v3816_v25, %v2930_v43  ;;  %vm2966_vm13 = vcmp.eq.f32.partialorder %v2965_v31, 8.507059e+37  ;;  %vm3105_vm14 = vcmp.eq.f32.partialorder %v3104_v14, 8.507059e+37  ;;  %v3415_v52 = vld [vmem:[%s9222_s10 + $0x70] sm:$0xff] }
 0x647   :  { %v3822_v27 = vpop.eup %3821  ;;  %v2971_v49 = vmul.f32 %v2949_v34, %v8739_v3  ;;  %v2959_v53 = vmul.f32 %v9009_v48, %v2958_v55  ;;  %v3077_v50 = vmul.f32 %v3820_v58, %v9000_v44  ;;  %3825 = vrcp.f32 %v9014_v17 }
 0x648   :  { %v3096_v45 = vmul.f32 %v3822_v27, %v9002_v0  ;;  %vm3082_vm4 = vweird.f32 %v3820_v58  ;;  %vm3101_vm5 = vweird.f32 %v3822_v27  ;;  %v3824_v54 = vpop.eup %3823  ;;  %v3126_v25 = vand.u32 2147483648, %v9014_v17 }
 0x649   :  { %v9023_v40 = vadd.f32 %v2972_v9, %v2971_v49  ;;  %v3078_v26 = vsub.f32 1.0, %v3077_v50  ;;  %v2960_v3 = vadd.f32 %v9009_v48, %v2959_v53  ;;  %vm3083_vm10 = vmor %vm3081_vm7, %vm3082_vm4  ;;  %vm3120_vm0 = vweird.f32 %v9014_v17  ;;  %v3412_v53 = vld [vmem:[%s9222_s10 + $0x58] sm:$0xff] }
 0x64a   :  { %v3097_v37 = vsub.f32 1.0, %v3096_v45  ;;  %vm3102_vm11 = vmor %vm3100_vm9, %vm3101_vm5  ;;  %v3127_v35 = vor.u32 1.1754944e-38, %v3126_v25 }
 0x64b   :  { %3827 = vtanh.f32 %v9023_v40  ;;  %v3079_v30 = vmul.f32 %v3820_v58, %v3078_v26  ;;  %v2964_v57 = vsel %vm9036_vm6, %v9009_v48, %v2960_v3  ;;  %v3369_v26 = vld [vmem:[%s9221_s9] sm:$0x1]  ;;  %v3410_v3 = vld [vmem:[%s9222_s10 + $0x48] sm:$0xff] }
 0x64c   :  { %v3098_v18 = vmul.f32 %v3822_v27, %v3097_v37  ;;  %v2969_v6 = vsel %vm2966_vm13, %v2968_v33, %v2964_v57  ;;  %v9080_v37 = vadd.f32 1e-05, %v3369_v26  ;;  %v3406_v33 = vld [vmem:[%s9222_s10 + $0x28] sm:$0xff]  ;;  %v3404_v57 = vld [vmem:[%s9222_s10 + $0x18] sm:$0xff]  ;;  %v3451_v26 = vld [vmem:[%s9224_s12 + $0x50] sm:$0xff] }
 0x64d   :  { %v3080_v38 = vadd.f32 %v3820_v58, %v3079_v30  ;;  %v3826_v51 = vpop.eup %3825  ;;  %v3408_v30 = vld [vmem:[%s9222_s10 + $0x38] sm:$0xff] }
 0x64e   :  { %v3099_v28 = vadd.f32 %v3822_v27, %v3098_v18  ;;  %v3116_v47 = vmul.f32 %v3826_v51, %v9014_v17  ;;  %vm3121_vm15 = vweird.f32 %v3826_v51 }
 0x64f   :  { %v3084_v11 = vsel %vm3083_vm10, %v3820_v58, %v3080_v38  ;;  %vm3122_vm1 = vmor %vm3120_vm0, %vm3121_vm15  ;;  %v3414_v58 = vld [vmem:[%s9222_s10 + $0x68] sm:$0xff] }
 0x650   :  { %v3089_v60 = vsel %vm3086_vm12, %v3088_v7, %v3084_v11  ;;  %v3103_v44 = vsel %vm3102_vm11, %v3822_v27, %v3099_v28  ;;  %v3117_v0 = vsub.f32 1.0, %v3116_v47  ;;  %vm3377_vm11 = vweird.f32 %v9080_v37 }
 0x651   :  { %v3828_v2 = vpop.eup %3827  ;;  %v3108_v8 = vsel %vm3105_vm14, %v3107_v46, %v3103_v44  ;;  %v3131_v61 = vmul.f32 %v3824_v54, %v3089_v60  ;;  %v3403_v44 = vld [vmem:[%s9222_s10 + $0x10] sm:$0xff] }
 0x652   :  { %v3130_v4 = vmul.f32 %v3108_v8, %v8796_v63  ;;  %v2975_v16 = vmul.f32 %v3828_v2, %v2969_v6  ;;  %v3118_v20 = vmul.f32 %v3826_v51, %v3117_v0  ;;  %v3124_v63 = vand.u32 2147483647, %v9014_v17  ;;  %v3402_v0 = vld [vmem:[%s9222_s10 + $0x8] sm:$0xff]  ;;  %v3401_v6 = vld [vmem:[%s9222_s10] sm:$0xff] }
 0x654   :  { %v3132_v12 = vadd.f32 %v3131_v61, %v3130_v4  ;;  %v9049_v48 = vsel %vm2981_vm8, %v2975_v16, %v8760_v15  ;;  %3151 = vmatmul.f32.vlgmr.msra.gmra.mxu0 %v2975_v16  ;;  %3171 = vmatmul.f32.vlgmr.msra.gmra.mxu1 %v2975_v16  ;;  %v3119_v23 = vadd.f32 %v3826_v51, %v3118_v20  ;;  %vm3125_vm2 = vcmp.eq.f32.partialorder %v3124_v63, 8.507059e+37 }
 0x655   :  { %3191 = vmatmul.f32.vlgmr.msra.gmra.mxu2 %v2975_v16  ;;  %3211 = vmatmul.f32.vlgmr.msra.gmra.mxu3 %v2975_v16 }
 0x656   :  { %3829 = vtanh.f32 %v3132_v12  ;;  %v3123_v62 = vsel %vm3122_vm1, %v3826_v51, %v3119_v23  ;;  %3421 = vmatpush.msra.mxu0 %v3416_v10  ;;  %v3405_v51 = vld [vmem:[%s9222_s10 + $0x20] sm:$0xff]  ;;  %v3456_v12 = vld [vmem:[%s9224_s12 + $0x78] sm:$0xff]  ;;  %v3455_v23 = vld [vmem:[%s9224_s12 + $0x70] sm:$0xff] }
 0x657   :  { %v3128_v15 = vsel %vm3125_vm2, %v3127_v35, %v3123_v62  ;;  %3461 = vmatpush.msra.mxu1 %v3456_v12  ;;  %v3590_v12 = vld [vmem:[%s9225_s13] ss:$0 sm:$0xff] }
 0x658   :  { %3422 = vmatpush.msra.mxu0 %v3415_v52  ;;  %v3453_v52 = vld [vmem:[%s9224_s12 + $0x60] sm:$0xff] }
 0x659   :  { %3462 = vmatpush.msra.mxu1 %v3455_v23 }
 0x65a   :  { %3423 = vmatpush.msra.mxu0 %v3414_v58 }
 0x65c   :  { %v3830_v13 = vpop.eup %3829  ;;  %3424 = vmatpush.msra.mxu0 %v3413_v56 }
 0x65d   :  { %v3134_v32 = vmul.f32 %v3830_v13, %v3128_v15  ;;  %v3454_v15 = vld [vmem:[%s9224_s12 + $0x68] sm:$0xff] }
 0x65e   :  { %3425 = vmatpush.msra.mxu0 %v3412_v53  ;;  %3463 = vmatpush.msra.mxu1 %v3454_v15 }
 0x65f   :  { %3231 = vmatmul.f32.vlgmr.msrb.gmra.mxu0 %v3134_v32  ;;  %3251 = vmatmul.f32.vlgmr.msrb.gmra.mxu1 %v3134_v32 }
 0x660   :  { %3271 = vmatmul.f32.vlgmr.msrb.gmra.mxu2 %v3134_v32  ;;  %3291 = vmatmul.f32.vlgmr.msrb.gmra.mxu3 %v3134_v32 }
 0x661   :  { %3464 = vmatpush.msra.mxu1 %v3453_v52 }
 0x6d1   :  { %v3152_v36 = vpop.f32.mrf.mxu0  ;;  %v3172_v29 = vpop.f32.mrf.mxu1 }
 0x6d8   :  { %v3212_v43 = vpop.f32.mrf.mxu3  ;;  %v3192_v50 = vpop.f32.mrf.mxu2 }
 0x6dc   :  { %v3232_v55 = vpop.f32.mrf.mxu0  ;;  %v3252_v17 = vpop.f32.mrf.mxu1 }
 0x6dd   :  { %v3233_v34 = vadd.f32 %v3232_v55, %v3152_v36  ;;  %v3253_v9 = vadd.f32 %v3252_v17, %v3172_v29 }
 0x6df   :  { %v3295_v27 = vadd.f32 %v3233_v34, %v11101_v39  ;;  %v3296_v49 = vadd.f32 %v3253_v9, %v11102_v1  ;;  %v3411_v39 = vld [vmem:[%s9222_s10 + $0x50] sm:$0xff] }
 0x6e0   :  { %3426 = vmatpush.msra.mxu0 %v3411_v39 }
 0x6e1   :  { %v3574_v45 = vmul.f32 -1.442695, %v3295_v27  ;;  %v3575_v24 = vmul.f32 -1.442695, %v3296_v49  ;;  %v3452_v49 = vld [vmem:[%s9224_s12 + $0x58] sm:$0xff] }
 0x6e2   :  { %3427 = vmatpush.msra.mxu0 %v3410_v3  ;;  %3465 = vmatpush.msra.mxu1 %v3452_v49 }
 0x6e3   :  { %3831 = vpow2.f32 %v3574_v45  ;;  %v3292_v42 = vpop.f32.mrf.mxu3  ;;  %v3272_v22 = vpop.f32.mrf.mxu2 }
 0x6e4   :  { %3833 = vpow2.f32 %v3575_v24  ;;  %v3293_v1 = vadd.f32 %v3292_v42, %v3212_v43  ;;  %3428 = vmatpush.msra.mxu0 %v3409_v21  ;;  %v3273_v38 = vadd.f32 %v3272_v22, %v3192_v50  ;;  %3466 = vmatpush.msra.mxu1 %v3451_v26 }
 0x6e5   :  { %3835 = vrsqrt.f32 %v9080_v37 }
 0x6e6   :  { %v3298_v19 = vadd.f32 %v3293_v1, %v11103_v41  ;;  %3429 = vmatpush.msra.mxu0 %v3408_v30  ;;  %v3407_v41 = vld [vmem:[%s9222_s10 + $0x30] sm:$0xff]  ;;  %v3297_v47 = vadd.f32 %v3273_v38, %v11104_v5  ;;  %v3450_v1 = vld [vmem:[%s9224_s12 + $0x48] sm:$0xff]  ;;  %v3448_v30 = vld [vmem:[%s9224_s12 + $0x38] sm:$0xff] }
 0x6e7   :  { %3467 = vmatpush.msra.mxu1 %v3450_v1 }
 0x6e8   :  { %v3576_v59 = vmul.f32 -1.442695, %v3298_v19  ;;  %3430 = vmatpush.msra.mxu0 %v3407_v41  ;;  %v3449_v19 = vld [vmem:[%s9224_s12 + $0x40] sm:$0xff] }
 0x6e9   :  { %v3832_v31 = vpop.eup %3831  ;;  %3468 = vmatpush.msra.mxu1 %v3449_v19 }
 0x6ea   :  { %v3834_v18 = vpop.eup %3833  ;;  %v3302_v14 = vadd.f32 1.0, %v3832_v31  ;;  %3837 = vpow2.f32 %v3576_v59  ;;  %3431 = vmatpush.msra.mxu0 %v3406_v33  ;;  %v3586_v33 = vld [vmem:[%s9220_s8] ss:$0 sm:$0xff] }
 0x6eb   :  { %v9093_v54 = vadd.f32 1.0, %v3834_v18  ;;  %v9102_v7 = vpop.eup %3835  ;;  %3469 = vmatpush.msra.mxu1 %v3448_v30 }
 0x6ec   :  { %3839 = vrcp.f32 %v3302_v14  ;;  %3432 = vmatpush.msra.mxu0 %v3405_v51  ;;  %v3372_v60 = vmul.f32 %v9102_v7, %v9080_v37  ;;  %v3314_v16 = vand.u32 2147483648, %v3302_v14  ;;  %v3312_v62 = vand.u32 2147483647, %v3302_v14  ;;  %v3446_v51 = vld [vmem:[%s9224_s12 + $0x28] sm:$0xff] }
 0x6ed   :  { %3841 = vrcp.f32 %v9093_v54  ;;  %v3333_v25 = vand.u32 2147483648, %v9093_v54  ;;  %v3331_v13 = vand.u32 2147483647, %v9093_v54  ;;  %vm3308_vm5 = vweird.f32 %v3302_v14 }
 0x6ee   :  { %3433 = vmatpush.msra.mxu0 %v3404_v57  ;;  %v3373_v20 = vmul.f32 %v9102_v7, %v3372_v60  ;;  %vm3327_vm6 = vweird.f32 %v9093_v54  ;;  %v3315_v29 = vor.u32 1.1754944e-38, %v3314_v16  ;;  %vm3313_vm9 = vcmp.eq.f32.partialorder %v3312_v62, 8.507059e+37  ;;  %v3444_v60 = vld [vmem:[%s9224_s12 + $0x18] sm:$0xff] }
 0x6ef   :  { %v3334_v55 = vor.u32 1.1754944e-38, %v3333_v25  ;;  %vm3332_vm10 = vcmp.eq.f32.partialorder %v3331_v13, 8.507059e+37  ;;  %vm3378_vm12 = vweird.f32 %v9102_v7 }
 0x6f0   :  { %v3838_v28 = vpop.eup %3837  ;;  %3434 = vmatpush.msra.mxu0 %v3403_v44  ;;  %v3374_v58 = vmul.f32 0.5, %v3373_v20  ;;  %vm9157_vm14 = vmor %vm3377_vm11, %vm3378_vm12  ;;  %v3588_v44 = vld [vmem:[%s9219_s7] ss:$0 sm:$0xff] }
 0x6f1   :  { %v9107_v46 = vadd.f32 1.0, %v3838_v28 }
 0x6f2   :  { %v3840_v11 = vpop.eup %3839  ;;  %3435 = vmatpush.msra.mxu0 %v3402_v0  ;;  %v3375_v42 = vsub.f32 1.5, %v3374_v58 }
 0x6f3   :  { %v3842_v2 = vpop.eup %3841  ;;  %v3304_v8 = vmul.f32 %v3840_v11, %v3302_v14  ;;  %3843 = vrcp.f32 %v9107_v46  ;;  %vm3309_vm3 = vweird.f32 %v3840_v11  ;;  %vm3347_vm15 = vweird.f32 %v9107_v46  ;;  %v3447_v14 = vld [vmem:[%s9224_s12 + $0x30] sm:$0xff] }
 0x6f4   :  { %v3323_v61 = vmul.f32 %v3842_v2, %v9093_v54  ;;  %3845 = vtanh.f32 %v3297_v47  ;;  %vm3328_vm4 = vweird.f32 %v3842_v2  ;;  %3436 = vmatpush.msra.mxu0 %v3401_v6  ;;  %vm3310_vm7 = vmor %vm3308_vm5, %vm3309_vm3  ;;  %v3376_v21 = vmul.f32 %v9102_v7, %v3375_v42  ;;  %v3366_v54 = vpop.permute.xlu1 %3365  ;;  %3470 = vmatpush.msra.mxu1 %v3447_v14  ;;  %v3441_v6 = vld [vmem:[%s9224_s12] sm:$0xff] }
 0x6f5   :  { %v3305_v5 = vsub.f32 1.0, %v3304_v8  ;;  %vm3329_vm8 = vmor %vm3327_vm6, %vm3328_vm4  ;;  %v3351_v59 = vand.u32 2147483647, %v9107_v46  ;;  %vm3367_vm2 = vcmp.eq.s32.totalorder %v3366_v54, 1  ;;  %vm3481_vm3 = vcmask 15360  }
 0x6f6   :  { %v3324_v4 = vsub.f32 1.0, %v3323_v61  ;;  %v3380_v41 = vsel %vm9157_vm14, %v9102_v7, %v3376_v21  ;;  %v3445_v7 = vld [vmem:[%s9224_s12 + $0x20] sm:$0xff]  ;;  %3471 = vmatpush.msra.mxu1 %v3446_v51 }
 0x6f7   :  { %v3306_v63 = vmul.f32 %v3840_v11, %v3305_v5  ;;  %vm3352_vm1 = vcmp.eq.f32.partialorder %v3351_v59, 8.507059e+37  ;;  %v3387_v57 = vperm.slane %v3380_v41, 0  ;;  %v3442_v5 = vld [vmem:[%s9224_s12 + $0x8] sm:$0xff] }
 0x6f8   :  { %v3325_v35 = vmul.f32 %v3842_v2, %v3324_v4  ;;  %3472 = vmatpush.msra.mxu1 %v3445_v7  ;;  %v3589_v4 = vld [vmem:[%s9223_s11] ss:$0 sm:$0xff] }
 0x6f9   :  { %v3844_v32 = vpop.eup %3843  ;;  %v3307_v36 = vadd.f32 %v3840_v11, %v3306_v63 }
 0x6fa   :  { %v3326_v10 = vadd.f32 %v3842_v2, %v3325_v35  ;;  %v3343_v43 = vmul.f32 %v3844_v32, %v9107_v46  ;;  %v3846_v34 = vpop.eup %3845  ;;  %vm3348_vm13 = vweird.f32 %v3844_v32  ;;  %3473 = vmatpush.msra.mxu1 %v3444_v60 }
 0x6fb   :  { %v3311_v17 = vsel %vm3310_vm7, %v3840_v11, %v3307_v36  ;;  %vm3349_vm0 = vmor %vm3347_vm15, %vm3348_vm13  ;;  %v3587_v11 = vld [vmem:[%s9218_s6] ss:$0 sm:$0xff] }
 0x6fc   :  { %v3316_v9 = vsel %vm3313_vm9, %v3315_v29, %v3311_v17  ;;  %v3330_v56 = vsel %vm3329_vm8, %v3842_v2, %v3326_v10  ;;  %v3344_v27 = vsub.f32 1.0, %v3343_v43 }
 0x6fd   :  { %v3335_v53 = vsel %vm3332_vm10, %v3334_v55, %v3330_v56  ;;  %v3358_v50 = vmul.f32 %v3846_v34, %v3316_v9 }
 0x6fe   :  { %v3357_v45 = vmul.f32 %v3335_v53, %v9023_v40  ;;  %v3345_v24 = vmul.f32 %v3844_v32, %v3344_v27  ;;  %v3353_v40 = vand.u32 2147483648, %v9107_v46 }
 0x700   :  { %v3359_v39 = vadd.f32 %v3358_v50, %v3357_v45  ;;  %v3346_v3 = vadd.f32 %v3844_v32, %v3345_v24  ;;  %v3354_v18 = vor.u32 1.1754944e-38, %v3353_v40 }
 0x702   :  { %3847 = vtanh.f32 %v3359_v39  ;;  %v3350_v31 = vsel %vm3349_vm0, %v3844_v32, %v3346_v3 }
 0x703   :  { %v3355_v38 = vsel %vm3352_vm1, %v3354_v18, %v3350_v31 }
 0x708   :  { %v3848_v22 = vpop.eup %3847 }
 0x709   :  { %v3361_v28 = vmul.f32 %v3848_v22, %v3355_v38 }
 0x70b   :  { %v3368_v46 = vsel %vm3367_vm2, %v3361_v28, %v9049_v48  ;;  %v3443_v48 = vld [vmem:[%s9224_s12 + $0x10] sm:$0xff] }
 0x70c   :  { %v3385_v47 = vsub.f32 %v3368_v46, %v3586_v33  ;;  %3474 = vmatpush.msra.mxu1 %v3443_v48 }
 0x70e   :  { %v3389_v2 = vmul.f32 %v3387_v57, %v3385_v47  ;;  %3475 = vmatpush.msra.mxu1 %v3442_v5 }
 0x710   :  { %v3394_v8 = vmul.f32 %v3587_v11, %v3389_v2  ;;  %3476 = vmatpush.msra.mxu1 %v3441_v6 }
 0x712   :  { %v3399_v61 = vadd.f32 %v3588_v44, %v3394_v8 }
 0x714   :  { %v3400_v0 = vmax.f32 %v3399_v61, 0.0 }
 0x716   :  { %3437 = vmatmul.f32.vlgmr.msra.gmra.mxu0 %v3400_v0 }
 0x793   :  { %v3438_v16 = vpop.f32.mrf.mxu0 }
 0x794   :  { %v3439_v20 = vadd.f32 %v3589_v4, %v3438_v16 }
 0x796   :  { %3477 = vmatmul.f32.vlgmr.msra.gmra.mxu1 %v3439_v20 }
 0x813   :  { %v3478_v23 = vpop.f32.mrf.mxu1 }
 0x814   :  { %v3479_v25 = vadd.f32 %v3590_v12, %v3478_v23 }
 0x816   :  { %v3482_v63 = vsel %vm3481_vm3, %v3479_v25, -inf }
 0x817   :  { %3483 = vmax.xlane.f32.xlu2 %v3482_v63 }
 0x88a   :  { %v3484_v62 = vpop.xlane.xlu2 %3483 }
 0x88b   :  { %v3485_v35 = vsub.f32 %v3479_v25, %v3484_v62 }
 0x88d   :  { %v3486_v13 = vmul.f32 1.442695, %v3485_v35 }
 0x88f   :  { %3849 = vpow2.f32 %v3486_v13 }
 0x895   :  { %v3850_v15 = vpop.eup %3849 }
 0x896   :  { %v3488_v32 = vsel %vm3481_vm3, %v3850_v15, 0.0 }
 0x897   :  { %3489 = vadd.xlane.f32.xlu0 %v3488_v32 }
 0x90a   :  { %v3490_v36 = vpop.xlane.xlu0 %3489 }
 0x90b   :  { %3851 = vlog2.f32 %v3490_v36 }
 0x911   :  { %v3852_v29 = vpop.eup %3851 }
 0x912   :  { %v3492_v10 = vmul.f32 0.6931472, %v3852_v29 }
 0x914   :  { %v3493_v43 = vsub.f32 %v3485_v35, %v3492_v10 }
 0x916   :  { %3494 = vst.msk [vmem:[%s9226_s14] sm:$0xff] %vm3481_vm3, %v3493_v43 }
 0x917   :  { %3499 = vsyncpa [#allocation3], 1 }
 0x918   :  { %3500 = vsyncpa [#allocation5], 1 }

</bundles_post_ra>
